<compile_context>
chip_gen: v5e
topology: v5e:2x2
jax: 0.10.0
libtpu: 0.0.40
codegen_flags: <defaults>
</compile_context>

<pallas_src>
import math

import jax
import jax.numpy as jnp
from jax.experimental import pallas as pl
from jax.experimental.pallas import tpu as pltpu


LANE = 128        # lane width -> hidden / feature padding target
ROW_PAD = 16      # batch padding: bf16 packs 2 rows per sublane -> 16-row tiles


def _round_up(x, m):
    return (x + m - 1) // m * m


def _pick_time_chunk(T, target=64):
    """Largest divisor of T that is <= target (time-blocking of the projection)."""
    ct = min(T, target)
    while T % ct:
        ct -= 1
    return ct


# ----------------------------------------------------------------------------
# Fused bidirectional LSTM layer: grid = (direction, time-chunk)
# ----------------------------------------------------------------------------
def bilstm_layer(x2d, w_ih, b, w_hh, seq_len, batch_p, hidden_p):
    """One bidirectional LSTM layer over the full sequence.

    x2d  : (T*Bp, Din)    bf16, time-major flattened (row r = t*Bp + b)
    w_ih : (2, Din, 4Hp)  bf16, dir 0 = forward, dir 1 = backward; gates i,f,o,g
    b    : (2, 1, 4Hp)    f32,  b_ih + b_hh per direction
    w_hh : (2, Hp, 4Hp)   bf16
    out  : (T*Bp, 2Hp)    bf16, [:, :Hp] forward hidden, [:, Hp:] backward hidden
    """
    T, Bp, Hp = seq_len, batch_p, hidden_p
    TB, Din = x2d.shape
    G = 4 * Hp
    CT = _pick_time_chunk(T)      # timesteps per chunk
    NC = T // CT                  # number of chunks
    CR = CT * Bp                  # rows per chunk

    def chunk_ix(d, c):
        # forward (d=0) walks chunks 0..NC-1, backward (d=1) walks NC-1..0
        return c + d * (NC - 1 - 2 * c)

    def kernel(x_ref, wih_ref, b_ref, whh_ref, out_ref, pre_ref, h_ref, c_ref):
        d = pl.program_id(0)      # direction
        ci = pl.program_id(1)     # chunk step (time order depends on d)

        @pl.when(ci == 0)
        def _():
            h_ref[...] = jnp.zeros_like(h_ref)
            c_ref[...] = jnp.zeros_like(c_ref)

        # Hoisted, time-parallel input projection for this chunk: one MXU
        # matmul with f32 accumulation, stored bf16 to halve the live scratch.
        pre_ref[...] = (
            jnp.dot(x_ref[...], wih_ref[...], preferred_element_type=jnp.float32)
            + b_ref[...]
        ).astype(jnp.bfloat16)

        whh = whh_ref[...]        # weight-stationary recurrent matrix (bf16)

        def step(s, carry):
            h, c = carry
            # forward: local time s ; backward: local time CT-1-s
            t_local = s + d * (CT - 1 - 2 * s)
            row = pl.multiple_of(t_local * Bp, Bp)
            gates = pre_ref[pl.ds(row, Bp), :] + jnp.dot(
                h.astype(jnp.bfloat16), whh, preferred_element_type=jnp.float32)
            act = jax.nn.sigmoid(gates[:, : 3 * Hp])   # i | f | o, one EUP slab
            g_g = jnp.tanh(gates[:, 3 * Hp:])
            i_g = act[:, 0:Hp]
            f_g = act[:, Hp:2 * Hp]
            o_g = act[:, 2 * Hp:3 * Hp]
            c_new = f_g * c + i_g * g_g
            h_new = o_g * jnp.tanh(c_new)
            out_ref[pl.ds(row, Bp), :] = h_new.astype(out_ref.dtype)
            return h_new, c_new

        h_fin, c_fin = jax.lax.fori_loop(
            0, CT, step, (h_ref[...], c_ref[...]), unroll=min(CT, 8))
        h_ref[...] = h_fin
        c_ref[...] = c_fin

    # Conservative VMEM budget: double-buffered blocks + weights + scratch.
    est = (2 * (CR * Din * 2 + CR * Hp * 2 + Din * G * 2 + Hp * G * 2 + G * 4)
           + CR * G * 2 + 2 * Bp * Hp * 4 + (4 << 20))
    vmem_bytes = int(min(max(est, 8 << 20), 100 << 20))

    return pl.pallas_call(
        kernel,
        out_shape=jax.ShapeDtypeStruct((TB, 2 * Hp), jnp.bfloat16),
        grid=(2, NC),
        in_specs=[
            pl.BlockSpec((CR, Din), lambda d, c: (chunk_ix(d, c), 0)),
            pl.BlockSpec((None, Din, G), lambda d, c: (d, 0, 0)),
            pl.BlockSpec((None, 1, G), lambda d, c: (d, 0, 0)),
            pl.BlockSpec((None, Hp, G), lambda d, c: (d, 0, 0)),
        ],
        out_specs=pl.BlockSpec((CR, Hp), lambda d, c: (chunk_ix(d, c), d)),
        scratch_shapes=[
            pltpu.VMEM((CR, G), jnp.bfloat16),   # pre-activations for one chunk
            pltpu.VMEM((Bp, Hp), jnp.float32),   # h carry across chunks
            pltpu.VMEM((Bp, Hp), jnp.float32),   # c carry across chunks
        ],
        compiler_params=pltpu.CompilerParams(
            dimension_semantics=("parallel", "arbitrary"),
            vmem_limit_bytes=vmem_bytes,
        ),
    )(x2d, w_ih, b, w_hh)


# ----------------------------------------------------------------------------
# Linear(2Hp -> P) + softmax, row-tiled
# ----------------------------------------------------------------------------
def fc_softmax(x2d, w, b):
    rows, feat = x2d.shape
    P = w.shape[1]
    row_block = min(rows, 256)
    grid = (pl.cdiv(rows, row_block),)

    def kernel(x_ref, w_ref, b_ref, out_ref):
        logits = jnp.dot(x_ref[...], w_ref[...],
                         preferred_element_type=jnp.float32) + b_ref[...]
        m = jnp.max(logits, axis=-1, keepdims=True)
        e = jnp.exp(logits - m)
        out_ref[...] = (e / jnp.sum(e, axis=-1, keepdims=True)).astype(out_ref.dtype)

    return pl.pallas_call(
        kernel,
        out_shape=jax.ShapeDtypeStruct((rows, P), jnp.float32),
        grid=grid,
        in_specs=[
            pl.BlockSpec((row_block, feat), lambda i: (i, 0)),
            pl.BlockSpec((feat, P), lambda i: (0, 0)),
            pl.BlockSpec((1, P), lambda i: (0, 0)),
        ],
        out_specs=pl.BlockSpec((row_block, P), lambda i: (i, 0)),
        compiler_params=pltpu.CompilerParams(dimension_semantics=("parallel",)),
    )(x2d, w, b)


# ----------------------------------------------------------------------------
# Full forward pass
# ----------------------------------------------------------------------------
def bilstm_forward(x_ids, params):
    """x_ids: (B, T) int32 token ids -> (B, T, pos_size) softmax probabilities."""
    B, T = x_ids.shape
    Bp = _round_up(B, ROW_PAD)
    Hp = params["lstm"][0]["w_hh"].shape[1]

    # Embedding gather kept as XLA glue.
    # TODO(synk): fuse into the first layer via scalar-prefetched ids + a
    # pl.Element row-gather BlockSpec if the gather ever dominates.
    emb = jnp.take(params["embedding"], x_ids, axis=0)            # (B, T, Ep) bf16
    emb = jnp.pad(emb, ((0, Bp - B), (0, 0), (0, 0)))             # batch row padding
    x = jnp.transpose(emb, (1, 0, 2)).reshape(T * Bp, -1)         # (T*Bp, Ep) time-major

    # TODO(synk): packed/padded-sequence masking (PyTorch packed sequences) is
    # not reproduced; fixed-length sequences are assumed.
    for p in params["lstm"]:
        x = bilstm_layer(x, p["w_ih"], p["b"], p["w_hh"], T, Bp, Hp)  # (T*Bp, 2Hp) bf16

    probs = fc_softmax(x, params["fc_w"], params["fc_b"])         # (T*Bp, P) f32
    P = probs.shape[-1]
    return jnp.transpose(probs.reshape(T, Bp, P), (1, 0, 2))[:B]  # (B, T, P)


# ----------------------------------------------------------------------------
# Deterministic parameter init in the padded, direction/gate-fused layout
# (logical shapes / init ranges mirror the PyTorch module; padded channels
#  carry zero weights & biases so they stay exactly zero everywhere)
# ----------------------------------------------------------------------------
def init_params(key, n_layers, word_embedding_dim, hidden_dim, vocab_size, pos_size):
    H, E = hidden_dim, word_embedding_dim
    Hp, Ep = _round_up(H, LANE), _round_up(E, LANE)

    k_emb, k_lstm, k_fc = jax.random.split(key, 3)

    emb = jnp.zeros((vocab_size, Ep), jnp.float32).at[:, :E].set(
        jax.random.normal(k_emb, (vocab_size, E), jnp.float32))
    params = {"embedding": emb.astype(jnp.bfloat16)}

    lim = 1.0 / math.sqrt(H)

    def uni(k, shape, l=lim):
        return jax.random.uniform(k, shape, jnp.float32, -l, l)

    def embed_rows(blk, rows_pad, top_rows):
        """Place logical input-feature rows into the padded row layout."""
        out = jnp.zeros((rows_pad, blk.shape[1]), jnp.float32)
        if top_rows:                       # input features occupy the top rows
            out = out.at[:blk.shape[0], :].set(blk)
        else:                              # input = [fwd hidden | bwd hidden]
            Hl = blk.shape[0] // 2
            out = out.at[:Hl, :].set(blk[:Hl])
            out = out.at[Hp:Hp + Hl, :].set(blk[Hl:])
        return out

    def pack_cols(blocks):
        """4 gate blocks (rows, H) in order i,f,o,g -> (rows, 4Hp), lane-padded."""
        rp = blocks[0].shape[0]
        out = jnp.zeros((rp, 4 * Hp), jnp.float32)
        for g, blk in enumerate(blocks):
            out = out.at[:, g * Hp:g * Hp + H].set(blk)
        return out

    layers = []
    for layer in range(n_layers):
        d_in, d_in_p = (E, Ep) if layer == 0 else (2 * H, 2 * Hp)
        w_ih_dirs, w_hh_dirs, b_dirs = [], [], []
        for _d in range(2):
            k_lstm, sub = jax.random.split(k_lstm)
            kk = jax.random.split(sub, 16)
            w_ih_g = [uni(kk[g], (d_in, H)) for g in range(4)]
            w_hh_g = [uni(kk[4 + g], (H, H)) for g in range(4)]
            b_g = [uni(kk[8 + g], (1, H)) + uni(kk[12 + g], (1, H)) for g in range(4)]
            w_ih_dirs.append(pack_cols(
                [embed_rows(w_ih_g[g], d_in_p, layer == 0) for g in range(4)]))
            w_hh_dirs.append(pack_cols(
                [embed_rows(w_hh_g[g], Hp, True) for g in range(4)]))
            b_dirs.append(pack_cols(b_g))
        layers.append(dict(
            w_ih=jnp.stack(w_ih_dirs).astype(jnp.bfloat16),   # (2, Dp,  4Hp)
            w_hh=jnp.stack(w_hh_dirs).astype(jnp.bfloat16),   # (2, Hp,  4Hp)
            b=jnp.stack(b_dirs),                              # (2, 1,   4Hp) f32
        ))
    params["lstm"] = layers

    lim_fc = 1.0 / math.sqrt(2 * H)
    kw, kb = jax.random.split(k_fc)
    fc_w = jax.random.uniform(kw, (2 * H, pos_size), jnp.float32, -lim_fc, lim_fc)
    params["fc_w"] = embed_rows(fc_w, 2 * Hp, False).astype(jnp.bfloat16)
    params["fc_b"] = jax.random.uniform(kb, (1, pos_size), jnp.float32, -lim_fc, lim_fc)
    return params


# ----------------------------------------------------------------------------
if __name__ == "__main__":
    n_layers = 2
    word_embedding_dim = 32
    hidden_dim = 32
    vocab_size = 50
    pos_size = 16
    batch = 2
    seq_len = 8

    key = jax.random.PRNGKey(0)
    k_params, k_ids = jax.random.split(key)
    params = init_params(
        k_params, n_layers, word_embedding_dim, hidden_dim, vocab_size, pos_size
    )
    x_ids = jax.random.randint(k_ids, (batch, seq_len), 0, vocab_size, jnp.int32)

    fwd = jax.jit(bilstm_forward)
    out = jax.block_until_ready(fwd(x_ids, params))

    assert out.shape == (batch, seq_len, pos_size)
    # softmax rows should sum to 1
    assert bool(jnp.allclose(jnp.sum(out, axis=-1), 1.0, atol=1e-5))
    print("KERNEL_OK")
</pallas_src>

<mosaic_0001>
module attributes {stable_mosaic.version = 11 : i64} {
  func.func @kernel(%arg0: i32, %arg1: i32, %arg2: memref<128x256xbf16, #tpu.memory_space<vmem>>, %arg3: memref<1x256x512xbf16, #tpu.memory_space<vmem>>, %arg4: memref<1x1x512xf32, #tpu.memory_space<vmem>>, %arg5: memref<1x128x512xbf16, #tpu.memory_space<vmem>>, %arg6: memref<128x128xbf16, #tpu.memory_space<vmem>>, %arg7: memref<128x512xbf16, #tpu.memory_space<vmem>>, %arg8: memref<16x128xf32, #tpu.memory_space<vmem>>, %arg9: memref<16x128xf32, #tpu.memory_space<vmem>>) attributes {dimension_semantics = [#tpu.dimension_semantics<parallel>, #tpu.dimension_semantics<arbitrary>], iteration_bounds = array<i64: 2, 1>, scalar_prefetch = 0 : i64, scratch_operands = 3 : i64, tpu.core_type = #tpu.core_type<tc>, window_params = [{transform_indices = @transform_0, window_bounds = array<i64: 128, 256>}, {transform_indices = @transform_1, window_bounds = array<i64: 1, 256, 512>}, {transform_indices = @transform_2, window_bounds = array<i64: 1, 1, 512>}, {transform_indices = @transform_3, window_bounds = array<i64: 1, 128, 512>}, {transform_indices = @transform_4, window_bounds = array<i64: 128, 128>}]} {
    %c0_i32 = arith.constant 0 : i32
    %0 = arith.cmpi eq, %arg1, %c0_i32 : i32
    %1 = arith.extui %0 : i1 to i32
    %c0_i32_0 = arith.constant 0 : i32
    %2 = arith.cmpi ne, %1, %c0_i32_0 : i32
    scf.if %2 {
      %cst_77 = arith.constant 0.000000e+00 : f32
      %267 = vector.broadcast %cst_77 : f32 to vector<16x128xf32>
      %c0_78 = arith.constant 0 : index
      %c0_79 = arith.constant 0 : index
      %268 = vector.load %arg8[%c0_78, %c0_79] : memref<16x128xf32, #tpu.memory_space<vmem>>, vector<16x128xf32>
      tpu.vector_store %arg8[%c0_78, %c0_79], %267 {strides = array<i32>} : memref<16x128xf32, #tpu.memory_space<vmem>>, vector<16x128xf32>,
      %cst_80 = arith.constant 0.000000e+00 : f32
      %269 = vector.broadcast %cst_80 : f32 to vector<16x128xf32>
      %c0_81 = arith.constant 0 : index
      %c0_82 = arith.constant 0 : index
      %270 = vector.load %arg9[%c0_81, %c0_82] : memref<16x128xf32, #tpu.memory_space<vmem>>, vector<16x128xf32>
      tpu.vector_store %arg9[%c0_81, %c0_82], %269 {strides = array<i32>} : memref<16x128xf32, #tpu.memory_space<vmem>>, vector<16x128xf32>,
    } else {
    }
    %c0 = arith.constant 0 : index
    %c0_1 = arith.constant 0 : index
    %3 = vector.load %arg2[%c0, %c0_1] : memref<128x256xbf16, #tpu.memory_space<vmem>>, vector<128x256xbf16>
    %c0_2 = arith.constant 0 : index
    %c0_3 = arith.constant 0 : index
    %c0_4 = arith.constant 0 : index
    %4 = vector.load %arg3[%c0_2, %c0_3, %c0_4] : memref<1x256x512xbf16, #tpu.memory_space<vmem>>, vector<1x256x512xbf16>
    %5 = vector.shape_cast %4 : vector<1x256x512xbf16> to vector<256x512xbf16>
    %cst = arith.constant dense<0.000000e+00> : vector<128x512xf32>
    %6 = tpu.matmul %3, %5, %cst {dimension_numbers = #tpu.dot_dimension_numbers<[1], [0], [0], [1], [0, 0, 1, 1], [], []>} : vector<128x256xbf16>, vector<256x512xbf16>, vector<128x512xf32> -> vector<128x512xf32>
    %c0_5 = arith.constant 0 : index
    %c0_6 = arith.constant 0 : index
    %c0_7 = arith.constant 0 : index
    %7 = vector.load %arg4[%c0_5, %c0_6, %c0_7] : memref<1x1x512xf32, #tpu.memory_space<vmem>>, vector<1x1x512xf32>
    %8 = vector.shape_cast %7 : vector<1x1x512xf32> to vector<1x512xf32>
    %9 = vector.broadcast %8 : vector<1x512xf32> to vector<128x512xf32>
    %10 = arith.addf %6, %9 : vector<128x512xf32>
    %11 = arith.truncf %10 : vector<128x512xf32> to vector<128x512xbf16>
    %c0_8 = arith.constant 0 : index
    %c0_9 = arith.constant 0 : index
    %12 = vector.load %arg7[%c0_8, %c0_9] : memref<128x512xbf16, #tpu.memory_space<vmem>>, vector<128x512xbf16>
    tpu.vector_store %arg7[%c0_8, %c0_9], %11 {strides = array<i32>} : memref<128x512xbf16, #tpu.memory_space<vmem>>, vector<128x512xbf16>,
    %c0_10 = arith.constant 0 : index
    %c0_11 = arith.constant 0 : index
    %c0_12 = arith.constant 0 : index
    %13 = vector.load %arg5[%c0_10, %c0_11, %c0_12] : memref<1x128x512xbf16, #tpu.memory_space<vmem>>, vector<1x128x512xbf16>
    %14 = vector.shape_cast %13 : vector<1x128x512xbf16> to vector<128x512xbf16>
    %c0_13 = arith.constant 0 : index
    %c0_14 = arith.constant 0 : index
    %15 = vector.load %arg8[%c0_13, %c0_14] : memref<16x128xf32, #tpu.memory_space<vmem>>, vector<16x128xf32>
    %c0_15 = arith.constant 0 : index
    %c0_16 = arith.constant 0 : index
    %16 = vector.load %arg9[%c0_15, %c0_16] : memref<16x128xf32, #tpu.memory_space<vmem>>, vector<16x128xf32>
    %c0_i32_17 = arith.constant 0 : i32
    %c2_i32 = arith.constant 2 : i32
    %17 = arith.muli %c2_i32, %c0_i32_17 : i32
    %c7_i32 = arith.constant 7 : i32
    %18 = arith.subi %c7_i32, %17 : i32
    %19 = arith.muli %arg0, %18 : i32
    %20 = arith.addi %c0_i32_17, %19 : i32
    %c16_i32 = arith.constant 16 : i32
    %21 = arith.muli %20, %c16_i32 : i32
    %22 = tpu.assume_multiple %21, 16 : i32
    %23 = arith.index_cast %22 : i32 to index
    %c0_18 = arith.constant 0 : index
    %24 = vector.load %arg7[%23, %c0_18] : memref<128x512xbf16, #tpu.memory_space<vmem>>, vector<16x512xbf16>
    %25 = arith.truncf %15 : vector<16x128xf32> to vector<16x128xbf16>
    %cst_19 = arith.constant dense<0.000000e+00> : vector<16x512xf32>
    %26 = tpu.matmul %25, %14, %cst_19 {dimension_numbers = #tpu.dot_dimension_numbers<[1], [0], [0], [1], [0, 0, 1, 1], [], []>} : vector<16x128xbf16>, vector<128x512xbf16>, vector<16x512xf32> -> vector<16x512xf32>
    %27 = arith.extf %24 : vector<16x512xbf16> to vector<16x512xf32>
    %28 = arith.addf %27, %26 : vector<16x512xf32>
    %29 = vector.extract_strided_slice %28 {offsets = [0, 0], sizes = [16, 384], strides = [1, 1]} : vector<16x512xf32> to vector<16x384xf32>
    %30 = arith.negf %29 : vector<16x384xf32>
    %31 = math.exp %30 : vector<16x384xf32>
    %cst_20 = arith.constant 1.000000e+00 : f32
    %32 = vector.broadcast %cst_20 : f32 to vector<16x384xf32>
    %33 = arith.addf %32, %31 : vector<16x384xf32>
    %34 = arith.divf %32, %33 : vector<16x384xf32>
    %35 = vector.extract_strided_slice %28 {offsets = [0, 384], sizes = [16, 128], strides = [1, 1]} : vector<16x512xf32> to vector<16x128xf32>
    %36 = math.tanh %35 : vector<16x128xf32>
    %37 = vector.extract_strided_slice %34 {offsets = [0, 0], sizes = [16, 128], strides = [1, 1]} : vector<16x384xf32> to vector<16x128xf32>
    %38 = vector.extract_strided_slice %34 {offsets = [0, 128], sizes = [16, 128], strides = [1, 1]} : vector<16x384xf32> to vector<16x128xf32>
    %39 = vector.extract_strided_slice %34 {offsets = [0, 256], sizes = [16, 128], strides = [1, 1]} : vector<16x384xf32> to vector<16x128xf32>
    %40 = arith.mulf %38, %16 : vector<16x128xf32>
    %41 = arith.mulf %37, %36 : vector<16x128xf32>
    %42 = arith.addf %40, %41 : vector<16x128xf32>
    %43 = math.tanh %42 : vector<16x128xf32>
    %44 = arith.mulf %39, %43 : vector<16x128xf32>
    %45 = arith.truncf %44 : vector<16x128xf32> to vector<16x128xbf16>
    %46 = arith.index_cast %22 : i32 to index
    %c0_21 = arith.constant 0 : index
    %47 = vector.load %arg6[%46, %c0_21] : memref<128x128xbf16, #tpu.memory_space<vmem>>, vector<16x128xbf16>
    tpu.vector_store %arg6[%46, %c0_21], %45 {strides = array<i32>} : memref<128x128xbf16, #tpu.memory_space<vmem>>, vector<16x128xbf16>,
    %c1_i32 = arith.constant 1 : i32
    %c2_i32_22 = arith.constant 2 : i32
    %48 = arith.muli %c2_i32_22, %c1_i32 : i32
    %c7_i32_23 = arith.constant 7 : i32
    %49 = arith.subi %c7_i32_23, %48 : i32
    %50 = arith.muli %arg0, %49 : i32
    %51 = arith.addi %c1_i32, %50 : i32
    %c16_i32_24 = arith.constant 16 : i32
    %52 = arith.muli %51, %c16_i32_24 : i32
    %53 = tpu.assume_multiple %52, 16 : i32
    %54 = arith.index_cast %53 : i32 to index
    %c0_25 = arith.constant 0 : index
    %55 = vector.load %arg7[%54, %c0_25] : memref<128x512xbf16, #tpu.memory_space<vmem>>, vector<16x512xbf16>
    %56 = arith.truncf %44 : vector<16x128xf32> to vector<16x128xbf16>
    %cst_26 = arith.constant dense<0.000000e+00> : vector<16x512xf32>
    %57 = tpu.matmul %56, %14, %cst_26 {dimension_numbers = #tpu.dot_dimension_numbers<[1], [0], [0], [1], [0, 0, 1, 1], [], []>} : vector<16x128xbf16>, vector<128x512xbf16>, vector<16x512xf32> -> vector<16x512xf32>
    %58 = arith.extf %55 : vector<16x512xbf16> to vector<16x512xf32>
    %59 = arith.addf %58, %57 : vector<16x512xf32>
    %60 = vector.extract_strided_slice %59 {offsets = [0, 0], sizes = [16, 384], strides = [1, 1]} : vector<16x512xf32> to vector<16x384xf32>
    %61 = arith.negf %60 : vector<16x384xf32>
    %62 = math.exp %61 : vector<16x384xf32>
    %cst_27 = arith.constant 1.000000e+00 : f32
    %63 = vector.broadcast %cst_27 : f32 to vector<16x384xf32>
    %64 = arith.addf %63, %62 : vector<16x384xf32>
    %65 = arith.divf %63, %64 : vector<16x384xf32>
    %66 = vector.extract_strided_slice %59 {offsets = [0, 384], sizes = [16, 128], strides = [1, 1]} : vector<16x512xf32> to vector<16x128xf32>
    %67 = math.tanh %66 : vector<16x128xf32>
    %68 = vector.extract_strided_slice %65 {offsets = [0, 0], sizes = [16, 128], strides = [1, 1]} : vector<16x384xf32> to vector<16x128xf32>
    %69 = vector.extract_strided_slice %65 {offsets = [0, 128], sizes = [16, 128], strides = [1, 1]} : vector<16x384xf32> to vector<16x128xf32>
    %70 = vector.extract_strided_slice %65 {offsets = [0, 256], sizes = [16, 128], strides = [1, 1]} : vector<16x384xf32> to vector<16x128xf32>
    %71 = arith.mulf %69, %42 : vector<16x128xf32>
    %72 = arith.mulf %68, %67 : vector<16x128xf32>
    %73 = arith.addf %71, %72 : vector<16x128xf32>
    %74 = math.tanh %73 : vector<16x128xf32>
    %75 = arith.mulf %70, %74 : vector<16x128xf32>
    %76 = arith.truncf %75 : vector<16x128xf32> to vector<16x128xbf16>
    %77 = arith.index_cast %53 : i32 to index
    %c0_28 = arith.constant 0 : index
    %78 = vector.load %arg6[%77, %c0_28] : memref<128x128xbf16, #tpu.memory_space<vmem>>, vector<16x128xbf16>
    tpu.vector_store %arg6[%77, %c0_28], %76 {strides = array<i32>} : memref<128x128xbf16, #tpu.memory_space<vmem>>, vector<16x128xbf16>,
    %c2_i32_29 = arith.constant 2 : i32
    %c2_i32_30 = arith.constant 2 : i32
    %79 = arith.muli %c2_i32_30, %c2_i32_29 : i32
    %c7_i32_31 = arith.constant 7 : i32
    %80 = arith.subi %c7_i32_31, %79 : i32
    %81 = arith.muli %arg0, %80 : i32
    %82 = arith.addi %c2_i32_29, %81 : i32
    %c16_i32_32 = arith.constant 16 : i32
    %83 = arith.muli %82, %c16_i32_32 : i32
    %84 = tpu.assume_multiple %83, 16 : i32
    %85 = arith.index_cast %84 : i32 to index
    %c0_33 = arith.constant 0 : index
    %86 = vector.load %arg7[%85, %c0_33] : memref<128x512xbf16, #tpu.memory_space<vmem>>, vector<16x512xbf16>
    %87 = arith.truncf %75 : vector<16x128xf32> to vector<16x128xbf16>
    %cst_34 = arith.constant dense<0.000000e+00> : vector<16x512xf32>
    %88 = tpu.matmul %87, %14, %cst_34 {dimension_numbers = #tpu.dot_dimension_numbers<[1], [0], [0], [1], [0, 0, 1, 1], [], []>} : vector<16x128xbf16>, vector<128x512xbf16>, vector<16x512xf32> -> vector<16x512xf32>
    %89 = arith.extf %86 : vector<16x512xbf16> to vector<16x512xf32>
    %90 = arith.addf %89, %88 : vector<16x512xf32>
    %91 = vector.extract_strided_slice %90 {offsets = [0, 0], sizes = [16, 384], strides = [1, 1]} : vector<16x512xf32> to vector<16x384xf32>
    %92 = arith.negf %91 : vector<16x384xf32>
    %93 = math.exp %92 : vector<16x384xf32>
    %cst_35 = arith.constant 1.000000e+00 : f32
    %94 = vector.broadcast %cst_35 : f32 to vector<16x384xf32>
    %95 = arith.addf %94, %93 : vector<16x384xf32>
    %96 = arith.divf %94, %95 : vector<16x384xf32>
    %97 = vector.extract_strided_slice %90 {offsets = [0, 384], sizes = [16, 128], strides = [1, 1]} : vector<16x512xf32> to vector<16x128xf32>
    %98 = math.tanh %97 : vector<16x128xf32>
    %99 = vector.extract_strided_slice %96 {offsets = [0, 0], sizes = [16, 128], strides = [1, 1]} : vector<16x384xf32> to vector<16x128xf32>
    %100 = vector.extract_strided_slice %96 {offsets = [0, 128], sizes = [16, 128], strides = [1, 1]} : vector<16x384xf32> to vector<16x128xf32>
    %101 = vector.extract_strided_slice %96 {offsets = [0, 256], sizes = [16, 128], strides = [1, 1]} : vector<16x384xf32> to vector<16x128xf32>
    %102 = arith.mulf %100, %73 : vector<16x128xf32>
    %103 = arith.mulf %99, %98 : vector<16x128xf32>
    %104 = arith.addf %102, %103 : vector<16x128xf32>
    %105 = math.tanh %104 : vector<16x128xf32>
    %106 = arith.mulf %101, %105 : vector<16x128xf32>
    %107 = arith.truncf %106 : vector<16x128xf32> to vector<16x128xbf16>
    %108 = arith.index_cast %84 : i32 to index
    %c0_36 = arith.constant 0 : index
    %109 = vector.load %arg6[%108, %c0_36] : memref<128x128xbf16, #tpu.memory_space<vmem>>, vector<16x128xbf16>
    tpu.vector_store %arg6[%108, %c0_36], %107 {strides = array<i32>} : memref<128x128xbf16, #tpu.memory_space<vmem>>, vector<16x128xbf16>,
    %c3_i32 = arith.constant 3 : i32
    %c2_i32_37 = arith.constant 2 : i32
    %110 = arith.muli %c2_i32_37, %c3_i32 : i32
    %c7_i32_38 = arith.constant 7 : i32
    %111 = arith.subi %c7_i32_38, %110 : i32
    %112 = arith.muli %arg0, %111 : i32
    %113 = arith.addi %c3_i32, %112 : i32
    %c16_i32_39 = arith.constant 16 : i32
    %114 = arith.muli %113, %c16_i32_39 : i32
    %115 = tpu.assume_multiple %114, 16 : i32
    %116 = arith.index_cast %115 : i32 to index
    %c0_40 = arith.constant 0 : index
    %117 = vector.load %arg7[%116, %c0_40] : memref<128x512xbf16, #tpu.memory_space<vmem>>, vector<16x512xbf16>
    %118 = arith.truncf %106 : vector<16x128xf32> to vector<16x128xbf16>
    %cst_41 = arith.constant dense<0.000000e+00> : vector<16x512xf32>
    %119 = tpu.matmul %118, %14, %cst_41 {dimension_numbers = #tpu.dot_dimension_numbers<[1], [0], [0], [1], [0, 0, 1, 1], [], []>} : vector<16x128xbf16>, vector<128x512xbf16>, vector<16x512xf32> -> vector<16x512xf32>
    %120 = arith.extf %117 : vector<16x512xbf16> to vector<16x512xf32>
    %121 = arith.addf %120, %119 : vector<16x512xf32>
    %122 = vector.extract_strided_slice %121 {offsets = [0, 0], sizes = [16, 384], strides = [1, 1]} : vector<16x512xf32> to vector<16x384xf32>
    %123 = arith.negf %122 : vector<16x384xf32>
    %124 = math.exp %123 : vector<16x384xf32>
    %cst_42 = arith.constant 1.000000e+00 : f32
    %125 = vector.broadcast %cst_42 : f32 to vector<16x384xf32>
    %126 = arith.addf %125, %124 : vector<16x384xf32>
    %127 = arith.divf %125, %126 : vector<16x384xf32>
    %128 = vector.extract_strided_slice %121 {offsets = [0, 384], sizes = [16, 128], strides = [1, 1]} : vector<16x512xf32> to vector<16x128xf32>
    %129 = math.tanh %128 : vector<16x128xf32>
    %130 = vector.extract_strided_slice %127 {offsets = [0, 0], sizes = [16, 128], strides = [1, 1]} : vector<16x384xf32> to vector<16x128xf32>
    %131 = vector.extract_strided_slice %127 {offsets = [0, 128], sizes = [16, 128], strides = [1, 1]} : vector<16x384xf32> to vector<16x128xf32>
    %132 = vector.extract_strided_slice %127 {offsets = [0, 256], sizes = [16, 128], strides = [1, 1]} : vector<16x384xf32> to vector<16x128xf32>
    %133 = arith.mulf %131, %104 : vector<16x128xf32>
    %134 = arith.mulf %130, %129 : vector<16x128xf32>
    %135 = arith.addf %133, %134 : vector<16x128xf32>
    %136 = math.tanh %135 : vector<16x128xf32>
    %137 = arith.mulf %132, %136 : vector<16x128xf32>
    %138 = arith.truncf %137 : vector<16x128xf32> to vector<16x128xbf16>
    %139 = arith.index_cast %115 : i32 to index
    %c0_43 = arith.constant 0 : index
    %140 = vector.load %arg6[%139, %c0_43] : memref<128x128xbf16, #tpu.memory_space<vmem>>, vector<16x128xbf16>
    tpu.vector_store %arg6[%139, %c0_43], %138 {strides = array<i32>} : memref<128x128xbf16, #tpu.memory_space<vmem>>, vector<16x128xbf16>,
    %c4_i32 = arith.constant 4 : i32
    %c2_i32_44 = arith.constant 2 : i32
    %141 = arith.muli %c2_i32_44, %c4_i32 : i32
    %c7_i32_45 = arith.constant 7 : i32
    %142 = arith.subi %c7_i32_45, %141 : i32
    %143 = arith.muli %arg0, %142 : i32
    %144 = arith.addi %c4_i32, %143 : i32
    %c16_i32_46 = arith.constant 16 : i32
    %145 = arith.muli %144, %c16_i32_46 : i32
    %146 = tpu.assume_multiple %145, 16 : i32
    %147 = arith.index_cast %146 : i32 to index
    %c0_47 = arith.constant 0 : index
    %148 = vector.load %arg7[%147, %c0_47] : memref<128x512xbf16, #tpu.memory_space<vmem>>, vector<16x512xbf16>
    %149 = arith.truncf %137 : vector<16x128xf32> to vector<16x128xbf16>
    %cst_48 = arith.constant dense<0.000000e+00> : vector<16x512xf32>
    %150 = tpu.matmul %149, %14, %cst_48 {dimension_numbers = #tpu.dot_dimension_numbers<[1], [0], [0], [1], [0, 0, 1, 1], [], []>} : vector<16x128xbf16>, vector<128x512xbf16>, vector<16x512xf32> -> vector<16x512xf32>
    %151 = arith.extf %148 : vector<16x512xbf16> to vector<16x512xf32>
    %152 = arith.addf %151, %150 : vector<16x512xf32>
    %153 = vector.extract_strided_slice %152 {offsets = [0, 0], sizes = [16, 384], strides = [1, 1]} : vector<16x512xf32> to vector<16x384xf32>
    %154 = arith.negf %153 : vector<16x384xf32>
    %155 = math.exp %154 : vector<16x384xf32>
    %cst_49 = arith.constant 1.000000e+00 : f32
    %156 = vector.broadcast %cst_49 : f32 to vector<16x384xf32>
    %157 = arith.addf %156, %155 : vector<16x384xf32>
    %158 = arith.divf %156, %157 : vector<16x384xf32>
    %159 = vector.extract_strided_slice %152 {offsets = [0, 384], sizes = [16, 128], strides = [1, 1]} : vector<16x512xf32> to vector<16x128xf32>
    %160 = math.tanh %159 : vector<16x128xf32>
    %161 = vector.extract_strided_slice %158 {offsets = [0, 0], sizes = [16, 128], strides = [1, 1]} : vector<16x384xf32> to vector<16x128xf32>
    %162 = vector.extract_strided_slice %158 {offsets = [0, 128], sizes = [16, 128], strides = [1, 1]} : vector<16x384xf32> to vector<16x128xf32>
    %163 = vector.extract_strided_slice %158 {offsets = [0, 256], sizes = [16, 128], strides = [1, 1]} : vector<16x384xf32> to vector<16x128xf32>
    %164 = arith.mulf %162, %135 : vector<16x128xf32>
    %165 = arith.mulf %161, %160 : vector<16x128xf32>
    %166 = arith.addf %164, %165 : vector<16x128xf32>
    %167 = math.tanh %166 : vector<16x128xf32>
    %168 = arith.mulf %163, %167 : vector<16x128xf32>
    %169 = arith.truncf %168 : vector<16x128xf32> to vector<16x128xbf16>
    %170 = arith.index_cast %146 : i32 to index
    %c0_50 = arith.constant 0 : index
    %171 = vector.load %arg6[%170, %c0_50] : memref<128x128xbf16, #tpu.memory_space<vmem>>, vector<16x128xbf16>
    tpu.vector_store %arg6[%170, %c0_50], %169 {strides = array<i32>} : memref<128x128xbf16, #tpu.memory_space<vmem>>, vector<16x128xbf16>,
    %c5_i32 = arith.constant 5 : i32
    %c2_i32_51 = arith.constant 2 : i32
    %172 = arith.muli %c2_i32_51, %c5_i32 : i32
    %c7_i32_52 = arith.constant 7 : i32
    %173 = arith.subi %c7_i32_52, %172 : i32
    %174 = arith.muli %arg0, %173 : i32
    %175 = arith.addi %c5_i32, %174 : i32
    %c16_i32_53 = arith.constant 16 : i32
    %176 = arith.muli %175, %c16_i32_53 : i32
    %177 = tpu.assume_multiple %176, 16 : i32
    %178 = arith.index_cast %177 : i32 to index
    %c0_54 = arith.constant 0 : index
    %179 = vector.load %arg7[%178, %c0_54] : memref<128x512xbf16, #tpu.memory_space<vmem>>, vector<16x512xbf16>
    %180 = arith.truncf %168 : vector<16x128xf32> to vector<16x128xbf16>
    %cst_55 = arith.constant dense<0.000000e+00> : vector<16x512xf32>
    %181 = tpu.matmul %180, %14, %cst_55 {dimension_numbers = #tpu.dot_dimension_numbers<[1], [0], [0], [1], [0, 0, 1, 1], [], []>} : vector<16x128xbf16>, vector<128x512xbf16>, vector<16x512xf32> -> vector<16x512xf32>
    %182 = arith.extf %179 : vector<16x512xbf16> to vector<16x512xf32>
    %183 = arith.addf %182, %181 : vector<16x512xf32>
    %184 = vector.extract_strided_slice %183 {offsets = [0, 0], sizes = [16, 384], strides = [1, 1]} : vector<16x512xf32> to vector<16x384xf32>
    %185 = arith.negf %184 : vector<16x384xf32>
    %186 = math.exp %185 : vector<16x384xf32>
    %cst_56 = arith.constant 1.000000e+00 : f32
    %187 = vector.broadcast %cst_56 : f32 to vector<16x384xf32>
    %188 = arith.addf %187, %186 : vector<16x384xf32>
    %189 = arith.divf %187, %188 : vector<16x384xf32>
    %190 = vector.extract_strided_slice %183 {offsets = [0, 384], sizes = [16, 128], strides = [1, 1]} : vector<16x512xf32> to vector<16x128xf32>
    %191 = math.tanh %190 : vector<16x128xf32>
    %192 = vector.extract_strided_slice %189 {offsets = [0, 0], sizes = [16, 128], strides = [1, 1]} : vector<16x384xf32> to vector<16x128xf32>
    %193 = vector.extract_strided_slice %189 {offsets = [0, 128], sizes = [16, 128], strides = [1, 1]} : vector<16x384xf32> to vector<16x128xf32>
    %194 = vector.extract_strided_slice %189 {offsets = [0, 256], sizes = [16, 128], strides = [1, 1]} : vector<16x384xf32> to vector<16x128xf32>
    %195 = arith.mulf %193, %166 : vector<16x128xf32>
    %196 = arith.mulf %192, %191 : vector<16x128xf32>
    %197 = arith.addf %195, %196 : vector<16x128xf32>
    %198 = math.tanh %197 : vector<16x128xf32>
    %199 = arith.mulf %194, %198 : vector<16x128xf32>
    %200 = arith.truncf %199 : vector<16x128xf32> to vector<16x128xbf16>
    %201 = arith.index_cast %177 : i32 to index
    %c0_57 = arith.constant 0 : index
    %202 = vector.load %arg6[%201, %c0_57] : memref<128x128xbf16, #tpu.memory_space<vmem>>, vector<16x128xbf16>
    tpu.vector_store %arg6[%201, %c0_57], %200 {strides = array<i32>} : memref<128x128xbf16, #tpu.memory_space<vmem>>, vector<16x128xbf16>,
    %c6_i32 = arith.constant 6 : i32
    %c2_i32_58 = arith.constant 2 : i32
    %203 = arith.muli %c2_i32_58, %c6_i32 : i32
    %c7_i32_59 = arith.constant 7 : i32
    %204 = arith.subi %c7_i32_59, %203 : i32
    %205 = arith.muli %arg0, %204 : i32
    %206 = arith.addi %c6_i32, %205 : i32
    %c16_i32_60 = arith.constant 16 : i32
    %207 = arith.muli %206, %c16_i32_60 : i32
    %208 = tpu.assume_multiple %207, 16 : i32
    %209 = arith.index_cast %208 : i32 to index
    %c0_61 = arith.constant 0 : index
    %210 = vector.load %arg7[%209, %c0_61] : memref<128x512xbf16, #tpu.memory_space<vmem>>, vector<16x512xbf16>
    %211 = arith.truncf %199 : vector<16x128xf32> to vector<16x128xbf16>
    %cst_62 = arith.constant dense<0.000000e+00> : vector<16x512xf32>
    %212 = tpu.matmul %211, %14, %cst_62 {dimension_numbers = #tpu.dot_dimension_numbers<[1], [0], [0], [1], [0, 0, 1, 1], [], []>} : vector<16x128xbf16>, vector<128x512xbf16>, vector<16x512xf32> -> vector<16x512xf32>
    %213 = arith.extf %210 : vector<16x512xbf16> to vector<16x512xf32>
    %214 = arith.addf %213, %212 : vector<16x512xf32>
    %215 = vector.extract_strided_slice %214 {offsets = [0, 0], sizes = [16, 384], strides = [1, 1]} : vector<16x512xf32> to vector<16x384xf32>
    %216 = arith.negf %215 : vector<16x384xf32>
    %217 = math.exp %216 : vector<16x384xf32>
    %cst_63 = arith.constant 1.000000e+00 : f32
    %218 = vector.broadcast %cst_63 : f32 to vector<16x384xf32>
    %219 = arith.addf %218, %217 : vector<16x384xf32>
    %220 = arith.divf %218, %219 : vector<16x384xf32>
    %221 = vector.extract_strided_slice %214 {offsets = [0, 384], sizes = [16, 128], strides = [1, 1]} : vector<16x512xf32> to vector<16x128xf32>
    %222 = math.tanh %221 : vector<16x128xf32>
    %223 = vector.extract_strided_slice %220 {offsets = [0, 0], sizes = [16, 128], strides = [1, 1]} : vector<16x384xf32> to vector<16x128xf32>
    %224 = vector.extract_strided_slice %220 {offsets = [0, 128], sizes = [16, 128], strides = [1, 1]} : vector<16x384xf32> to vector<16x128xf32>
    %225 = vector.extract_strided_slice %220 {offsets = [0, 256], sizes = [16, 128], strides = [1, 1]} : vector<16x384xf32> to vector<16x128xf32>
    %226 = arith.mulf %224, %197 : vector<16x128xf32>
    %227 = arith.mulf %223, %222 : vector<16x128xf32>
    %228 = arith.addf %226, %227 : vector<16x128xf32>
    %229 = math.tanh %228 : vector<16x128xf32>
    %230 = arith.mulf %225, %229 : vector<16x128xf32>
    %231 = arith.truncf %230 : vector<16x128xf32> to vector<16x128xbf16>
    %232 = arith.index_cast %208 : i32 to index
    %c0_64 = arith.constant 0 : index
    %233 = vector.load %arg6[%232, %c0_64] : memref<128x128xbf16, #tpu.memory_space<vmem>>, vector<16x128xbf16>
    tpu.vector_store %arg6[%232, %c0_64], %231 {strides = array<i32>} : memref<128x128xbf16, #tpu.memory_space<vmem>>, vector<16x128xbf16>,
    %c7_i32_65 = arith.constant 7 : i32
    %c2_i32_66 = arith.constant 2 : i32
    %234 = arith.muli %c2_i32_66, %c7_i32_65 : i32
    %c7_i32_67 = arith.constant 7 : i32
    %235 = arith.subi %c7_i32_67, %234 : i32
    %236 = arith.muli %arg0, %235 : i32
    %237 = arith.addi %c7_i32_65, %236 : i32
    %c16_i32_68 = arith.constant 16 : i32
    %238 = arith.muli %237, %c16_i32_68 : i32
    %239 = tpu.assume_multiple %238, 16 : i32
    %240 = arith.index_cast %239 : i32 to index
    %c0_69 = arith.constant 0 : index
    %241 = vector.load %arg7[%240, %c0_69] : memref<128x512xbf16, #tpu.memory_space<vmem>>, vector<16x512xbf16>
    %242 = arith.truncf %230 : vector<16x128xf32> to vector<16x128xbf16>
    %cst_70 = arith.constant dense<0.000000e+00> : vector<16x512xf32>
    %243 = tpu.matmul %242, %14, %cst_70 {dimension_numbers = #tpu.dot_dimension_numbers<[1], [0], [0], [1], [0, 0, 1, 1], [], []>} : vector<16x128xbf16>, vector<128x512xbf16>, vector<16x512xf32> -> vector<16x512xf32>
    %244 = arith.extf %241 : vector<16x512xbf16> to vector<16x512xf32>
    %245 = arith.addf %244, %243 : vector<16x512xf32>
    %246 = vector.extract_strided_slice %245 {offsets = [0, 0], sizes = [16, 384], strides = [1, 1]} : vector<16x512xf32> to vector<16x384xf32>
    %247 = arith.negf %246 : vector<16x384xf32>
    %248 = math.exp %247 : vector<16x384xf32>
    %cst_71 = arith.constant 1.000000e+00 : f32
    %249 = vector.broadcast %cst_71 : f32 to vector<16x384xf32>
    %250 = arith.addf %249, %248 : vector<16x384xf32>
    %251 = arith.divf %249, %250 : vector<16x384xf32>
    %252 = vector.extract_strided_slice %245 {offsets = [0, 384], sizes = [16, 128], strides = [1, 1]} : vector<16x512xf32> to vector<16x128xf32>
    %253 = math.tanh %252 : vector<16x128xf32>
    %254 = vector.extract_strided_slice %251 {offsets = [0, 0], sizes = [16, 128], strides = [1, 1]} : vector<16x384xf32> to vector<16x128xf32>
    %255 = vector.extract_strided_slice %251 {offsets = [0, 128], sizes = [16, 128], strides = [1, 1]} : vector<16x384xf32> to vector<16x128xf32>
    %256 = vector.extract_strided_slice %251 {offsets = [0, 256], sizes = [16, 128], strides = [1, 1]} : vector<16x384xf32> to vector<16x128xf32>
    %257 = arith.mulf %255, %228 : vector<16x128xf32>
    %258 = arith.mulf %254, %253 : vector<16x128xf32>
    %259 = arith.addf %257, %258 : vector<16x128xf32>
    %260 = math.tanh %259 : vector<16x128xf32>
    %261 = arith.mulf %256, %260 : vector<16x128xf32>
    %262 = arith.truncf %261 : vector<16x128xf32> to vector<16x128xbf16>
    %263 = arith.index_cast %239 : i32 to index
    %c0_72 = arith.constant 0 : index
    %264 = vector.load %arg6[%263, %c0_72] : memref<128x128xbf16, #tpu.memory_space<vmem>>, vector<16x128xbf16>
    tpu.vector_store %arg6[%263, %c0_72], %262 {strides = array<i32>} : memref<128x128xbf16, #tpu.memory_space<vmem>>, vector<16x128xbf16>,
    %c8_i32 = arith.constant 8 : i32
    %c0_73 = arith.constant 0 : index
    %c0_74 = arith.constant 0 : index
    %265 = vector.load %arg8[%c0_73, %c0_74] : memref<16x128xf32, #tpu.memory_space<vmem>>, vector<16x128xf32>
    tpu.vector_store %arg8[%c0_73, %c0_74], %261 {strides = array<i32>} : memref<16x128xf32, #tpu.memory_space<vmem>>, vector<16x128xf32>,
    %c0_75 = arith.constant 0 : index
    %c0_76 = arith.constant 0 : index
    %266 = vector.load %arg9[%c0_75, %c0_76] : memref<16x128xf32, #tpu.memory_space<vmem>>, vector<16x128xf32>
    tpu.vector_store %arg9[%c0_75, %c0_76], %259 {strides = array<i32>} : memref<16x128xf32, #tpu.memory_space<vmem>>, vector<16x128xf32>,
    return
  }
  func.func @transform_0(%arg0: i32, %arg1: i32) -> (i32, i32) {
    %c2_i32 = arith.constant 2 : i32
    %0 = arith.muli %c2_i32, %arg1 : i32
    %c0_i32 = arith.constant 0 : i32
    %1 = arith.subi %c0_i32, %0 : i32
    %2 = arith.muli %arg0, %1 : i32
    %3 = arith.addi %arg1, %2 : i32
    %c0_i32_0 = arith.constant 0 : i32
    %c0_i32_1 = arith.constant 0 : i32
    return %3, %c0_i32_0 : i32, i32
  }
  func.func @transform_1(%arg0: i32, %arg1: i32) -> (i32, i32, i32) {
    %c0_i32 = arith.constant 0 : i32
    %c0_i32_0 = arith.constant 0 : i32
    %c0_i32_1 = arith.constant 0 : i32
    return %arg0, %c0_i32, %c0_i32_0 : i32, i32, i32
  }
  func.func @transform_2(%arg0: i32, %arg1: i32) -> (i32, i32, i32) {
    %c0_i32 = arith.constant 0 : i32
    %c0_i32_0 = arith.constant 0 : i32
    %c0_i32_1 = arith.constant 0 : i32
    return %arg0, %c0_i32, %c0_i32_0 : i32, i32, i32
  }
  func.func @transform_3(%arg0: i32, %arg1: i32) -> (i32, i32, i32) {
    %c0_i32 = arith.constant 0 : i32
    %c0_i32_0 = arith.constant 0 : i32
    %c0_i32_1 = arith.constant 0 : i32
    return %arg0, %c0_i32, %c0_i32_0 : i32, i32, i32
  }
  func.func @transform_4(%arg0: i32, %arg1: i32) -> (i32, i32) {
    %c2_i32 = arith.constant 2 : i32
    %0 = arith.muli %c2_i32, %arg1 : i32
    %c0_i32 = arith.constant 0 : i32
    %1 = arith.subi %c0_i32, %0 : i32
    %2 = arith.muli %arg0, %1 : i32
    %3 = arith.addi %arg1, %2 : i32
    %c0_i32_0 = arith.constant 0 : i32
    return %3, %arg0 : i32, i32
  }
}

module attributes {stable_mosaic.version = 11 : i64} {
  func.func @kernel(%arg0: i32, %arg1: i32, %arg2: memref<128x128xbf16, #tpu.memory_space<vmem>>, %arg3: memref<1x128x512xbf16, #tpu.memory_space<vmem>>, %arg4: memref<1x1x512xf32, #tpu.memory_space<vmem>>, %arg5: memref<1x128x512xbf16, #tpu.memory_space<vmem>>, %arg6: memref<128x128xbf16, #tpu.memory_space<vmem>>, %arg7: memref<128x512xbf16, #tpu.memory_space<vmem>>, %arg8: memref<16x128xf32, #tpu.memory_space<vmem>>, %arg9: memref<16x128xf32, #tpu.memory_space<vmem>>) attributes {dimension_semantics = [#tpu.dimension_semantics<parallel>, #tpu.dimension_semantics<arbitrary>], iteration_bounds = array<i64: 2, 1>, scalar_prefetch = 0 : i64, scratch_operands = 3 : i64, tpu.core_type = #tpu.core_type<tc>, window_params = [{transform_indices = @transform_0, window_bounds = array<i64: 128, 128>}, {transform_indices = @transform_1, window_bounds = array<i64: 1, 128, 512>}, {transform_indices = @transform_2, window_bounds = array<i64: 1, 1, 512>}, {transform_indices = @transform_3, window_bounds = array<i64: 1, 128, 512>}, {transform_indices = @transform_4, window_bounds = array<i64: 128, 128>}]} {
    %c0_i32 = arith.constant 0 : i32
    %0 = arith.cmpi eq, %arg1, %c0_i32 : i32
    %1 = arith.extui %0 : i1 to i32
    %c0_i32_0 = arith.constant 0 : i32
    %2 = arith.cmpi ne, %1, %c0_i32_0 : i32
    scf.if %2 {
      %cst_77 = arith.constant 0.000000e+00 : f32
      %267 = vector.broadcast %cst_77 : f32 to vector<16x128xf32>
      %c0_78 = arith.constant 0 : index
      %c0_79 = arith.constant 0 : index
      %268 = vector.load %arg8[%c0_78, %c0_79] : memref<16x128xf32, #tpu.memory_space<vmem>>, vector<16x128xf32>
      tpu.vector_store %arg8[%c0_78, %c0_79], %267 {strides = array<i32>} : memref<16x128xf32, #tpu.memory_space<vmem>>, vector<16x128xf32>,
      %cst_80 = arith.constant 0.000000e+00 : f32
      %269 = vector.broadcast %cst_80 : f32 to vector<16x128xf32>
      %c0_81 = arith.constant 0 : index
      %c0_82 = arith.constant 0 : index
      %270 = vector.load %arg9[%c0_81, %c0_82] : memref<16x128xf32, #tpu.memory_space<vmem>>, vector<16x128xf32>
      tpu.vector_store %arg9[%c0_81, %c0_82], %269 {strides = array<i32>} : memref<16x128xf32, #tpu.memory_space<vmem>>, vector<16x128xf32>,
    } else {
    }
    %c0 = arith.constant 0 : index
    %c0_1 = arith.constant 0 : index
    %3 = vector.load %arg2[%c0, %c0_1] : memref<128x128xbf16, #tpu.memory_space<vmem>>, vector<128x128xbf16>
    %c0_2 = arith.constant 0 : index
    %c0_3 = arith.constant 0 : index
    %c0_4 = arith.constant 0 : index
    %4 = vector.load %arg3[%c0_2, %c0_3, %c0_4] : memref<1x128x512xbf16, #tpu.memory_space<vmem>>, vector<1x128x512xbf16>
    %5 = vector.shape_cast %4 : vector<1x128x512xbf16> to vector<128x512xbf16>
    %cst = arith.constant dense<0.000000e+00> : vector<128x512xf32>
    %6 = tpu.matmul %3, %5, %cst {dimension_numbers = #tpu.dot_dimension_numbers<[1], [0], [0], [1], [0, 0, 1, 1], [], []>} : vector<128x128xbf16>, vector<128x512xbf16>, vector<128x512xf32> -> vector<128x512xf32>
    %c0_5 = arith.constant 0 : index
    %c0_6 = arith.constant 0 : index
    %c0_7 = arith.constant 0 : index
    %7 = vector.load %arg4[%c0_5, %c0_6, %c0_7] : memref<1x1x512xf32, #tpu.memory_space<vmem>>, vector<1x1x512xf32>
    %8 = vector.shape_cast %7 : vector<1x1x512xf32> to vector<1x512xf32>
    %9 = vector.broadcast %8 : vector<1x512xf32> to vector<128x512xf32>
    %10 = arith.addf %6, %9 : vector<128x512xf32>
    %11 = arith.truncf %10 : vector<128x512xf32> to vector<128x512xbf16>
    %c0_8 = arith.constant 0 : index
    %c0_9 = arith.constant 0 : index
    %12 = vector.load %arg7[%c0_8, %c0_9] : memref<128x512xbf16, #tpu.memory_space<vmem>>, vector<128x512xbf16>
    tpu.vector_store %arg7[%c0_8, %c0_9], %11 {strides = array<i32>} : memref<128x512xbf16, #tpu.memory_space<vmem>>, vector<128x512xbf16>,
    %c0_10 = arith.constant 0 : index
    %c0_11 = arith.constant 0 : index
    %c0_12 = arith.constant 0 : index
    %13 = vector.load %arg5[%c0_10, %c0_11, %c0_12] : memref<1x128x512xbf16, #tpu.memory_space<vmem>>, vector<1x128x512xbf16>
    %14 = vector.shape_cast %13 : vector<1x128x512xbf16> to vector<128x512xbf16>
    %c0_13 = arith.constant 0 : index
    %c0_14 = arith.constant 0 : index
    %15 = vector.load %arg8[%c0_13, %c0_14] : memref<16x128xf32, #tpu.memory_space<vmem>>, vector<16x128xf32>
    %c0_15 = arith.constant 0 : index
    %c0_16 = arith.constant 0 : index
    %16 = vector.load %arg9[%c0_15, %c0_16] : memref<16x128xf32, #tpu.memory_space<vmem>>, vector<16x128xf32>
    %c0_i32_17 = arith.constant 0 : i32
    %c2_i32 = arith.constant 2 : i32
    %17 = arith.muli %c2_i32, %c0_i32_17 : i32
    %c7_i32 = arith.constant 7 : i32
    %18 = arith.subi %c7_i32, %17 : i32
    %19 = arith.muli %arg0, %18 : i32
    %20 = arith.addi %c0_i32_17, %19 : i32
    %c16_i32 = arith.constant 16 : i32
    %21 = arith.muli %20, %c16_i32 : i32
    %22 = tpu.assume_multiple %21, 16 : i32
    %23 = arith.index_cast %22 : i32 to index
    %c0_18 = arith.constant 0 : index
    %24 = vector.load %arg7[%23, %c0_18] : memref<128x512xbf16, #tpu.memory_space<vmem>>, vector<16x512xbf16>
    %25 = arith.truncf %15 : vector<16x128xf32> to vector<16x128xbf16>
    %cst_19 = arith.constant dense<0.000000e+00> : vector<16x512xf32>
    %26 = tpu.matmul %25, %14, %cst_19 {dimension_numbers = #tpu.dot_dimension_numbers<[1], [0], [0], [1], [0, 0, 1, 1], [], []>} : vector<16x128xbf16>, vector<128x512xbf16>, vector<16x512xf32> -> vector<16x512xf32>
    %27 = arith.extf %24 : vector<16x512xbf16> to vector<16x512xf32>
    %28 = arith.addf %27, %26 : vector<16x512xf32>
    %29 = vector.extract_strided_slice %28 {offsets = [0, 0], sizes = [16, 384], strides = [1, 1]} : vector<16x512xf32> to vector<16x384xf32>
    %30 = arith.negf %29 : vector<16x384xf32>
    %31 = math.exp %30 : vector<16x384xf32>
    %cst_20 = arith.constant 1.000000e+00 : f32
    %32 = vector.broadcast %cst_20 : f32 to vector<16x384xf32>
    %33 = arith.addf %32, %31 : vector<16x384xf32>
    %34 = arith.divf %32, %33 : vector<16x384xf32>
    %35 = vector.extract_strided_slice %28 {offsets = [0, 384], sizes = [16, 128], strides = [1, 1]} : vector<16x512xf32> to vector<16x128xf32>
    %36 = math.tanh %35 : vector<16x128xf32>
    %37 = vector.extract_strided_slice %34 {offsets = [0, 0], sizes = [16, 128], strides = [1, 1]} : vector<16x384xf32> to vector<16x128xf32>
    %38 = vector.extract_strided_slice %34 {offsets = [0, 128], sizes = [16, 128], strides = [1, 1]} : vector<16x384xf32> to vector<16x128xf32>
    %39 = vector.extract_strided_slice %34 {offsets = [0, 256], sizes = [16, 128], strides = [1, 1]} : vector<16x384xf32> to vector<16x128xf32>
    %40 = arith.mulf %38, %16 : vector<16x128xf32>
    %41 = arith.mulf %37, %36 : vector<16x128xf32>
    %42 = arith.addf %40, %41 : vector<16x128xf32>
    %43 = math.tanh %42 : vector<16x128xf32>
    %44 = arith.mulf %39, %43 : vector<16x128xf32>
    %45 = arith.truncf %44 : vector<16x128xf32> to vector<16x128xbf16>
    %46 = arith.index_cast %22 : i32 to index
    %c0_21 = arith.constant 0 : index
    %47 = vector.load %arg6[%46, %c0_21] : memref<128x128xbf16, #tpu.memory_space<vmem>>, vector<16x128xbf16>
    tpu.vector_store %arg6[%46, %c0_21], %45 {strides = array<i32>} : memref<128x128xbf16, #tpu.memory_space<vmem>>, vector<16x128xbf16>,
    %c1_i32 = arith.constant 1 : i32
    %c2_i32_22 = arith.constant 2 : i32
    %48 = arith.muli %c2_i32_22, %c1_i32 : i32
    %c7_i32_23 = arith.constant 7 : i32
    %49 = arith.subi %c7_i32_23, %48 : i32
    %50 = arith.muli %arg0, %49 : i32
    %51 = arith.addi %c1_i32, %50 : i32
    %c16_i32_24 = arith.constant 16 : i32
    %52 = arith.muli %51, %c16_i32_24 : i32
    %53 = tpu.assume_multiple %52, 16 : i32
    %54 = arith.index_cast %53 : i32 to index
    %c0_25 = arith.constant 0 : index
    %55 = vector.load %arg7[%54, %c0_25] : memref<128x512xbf16, #tpu.memory_space<vmem>>, vector<16x512xbf16>
    %56 = arith.truncf %44 : vector<16x128xf32> to vector<16x128xbf16>
    %cst_26 = arith.constant dense<0.000000e+00> : vector<16x512xf32>
    %57 = tpu.matmul %56, %14, %cst_26 {dimension_numbers = #tpu.dot_dimension_numbers<[1], [0], [0], [1], [0, 0, 1, 1], [], []>} : vector<16x128xbf16>, vector<128x512xbf16>, vector<16x512xf32> -> vector<16x512xf32>
    %58 = arith.extf %55 : vector<16x512xbf16> to vector<16x512xf32>
    %59 = arith.addf %58, %57 : vector<16x512xf32>
    %60 = vector.extract_strided_slice %59 {offsets = [0, 0], sizes = [16, 384], strides = [1, 1]} : vector<16x512xf32> to vector<16x384xf32>
    %61 = arith.negf %60 : vector<16x384xf32>
    %62 = math.exp %61 : vector<16x384xf32>
    %cst_27 = arith.constant 1.000000e+00 : f32
    %63 = vector.broadcast %cst_27 : f32 to vector<16x384xf32>
    %64 = arith.addf %63, %62 : vector<16x384xf32>
    %65 = arith.divf %63, %64 : vector<16x384xf32>
    %66 = vector.extract_strided_slice %59 {offsets = [0, 384], sizes = [16, 128], strides = [1, 1]} : vector<16x512xf32> to vector<16x128xf32>
    %67 = math.tanh %66 : vector<16x128xf32>
    %68 = vector.extract_strided_slice %65 {offsets = [0, 0], sizes = [16, 128], strides = [1, 1]} : vector<16x384xf32> to vector<16x128xf32>
    %69 = vector.extract_strided_slice %65 {offsets = [0, 128], sizes = [16, 128], strides = [1, 1]} : vector<16x384xf32> to vector<16x128xf32>
    %70 = vector.extract_strided_slice %65 {offsets = [0, 256], sizes = [16, 128], strides = [1, 1]} : vector<16x384xf32> to vector<16x128xf32>
    %71 = arith.mulf %69, %42 : vector<16x128xf32>
    %72 = arith.mulf %68, %67 : vector<16x128xf32>
    %73 = arith.addf %71, %72 : vector<16x128xf32>
    %74 = math.tanh %73 : vector<16x128xf32>
    %75 = arith.mulf %70, %74 : vector<16x128xf32>
    %76 = arith.truncf %75 : vector<16x128xf32> to vector<16x128xbf16>
    %77 = arith.index_cast %53 : i32 to index
    %c0_28 = arith.constant 0 : index
    %78 = vector.load %arg6[%77, %c0_28] : memref<128x128xbf16, #tpu.memory_space<vmem>>, vector<16x128xbf16>
    tpu.vector_store %arg6[%77, %c0_28], %76 {strides = array<i32>} : memref<128x128xbf16, #tpu.memory_space<vmem>>, vector<16x128xbf16>,
    %c2_i32_29 = arith.constant 2 : i32
    %c2_i32_30 = arith.constant 2 : i32
    %79 = arith.muli %c2_i32_30, %c2_i32_29 : i32
    %c7_i32_31 = arith.constant 7 : i32
    %80 = arith.subi %c7_i32_31, %79 : i32
    %81 = arith.muli %arg0, %80 : i32
    %82 = arith.addi %c2_i32_29, %81 : i32
    %c16_i32_32 = arith.constant 16 : i32
    %83 = arith.muli %82, %c16_i32_32 : i32
    %84 = tpu.assume_multiple %83, 16 : i32
    %85 = arith.index_cast %84 : i32 to index
    %c0_33 = arith.constant 0 : index
    %86 = vector.load %arg7[%85, %c0_33] : memref<128x512xbf16, #tpu.memory_space<vmem>>, vector<16x512xbf16>
    %87 = arith.truncf %75 : vector<16x128xf32> to vector<16x128xbf16>
    %cst_34 = arith.constant dense<0.000000e+00> : vector<16x512xf32>
    %88 = tpu.matmul %87, %14, %cst_34 {dimension_numbers = #tpu.dot_dimension_numbers<[1], [0], [0], [1], [0, 0, 1, 1], [], []>} : vector<16x128xbf16>, vector<128x512xbf16>, vector<16x512xf32> -> vector<16x512xf32>
    %89 = arith.extf %86 : vector<16x512xbf16> to vector<16x512xf32>
    %90 = arith.addf %89, %88 : vector<16x512xf32>
    %91 = vector.extract_strided_slice %90 {offsets = [0, 0], sizes = [16, 384], strides = [1, 1]} : vector<16x512xf32> to vector<16x384xf32>
    %92 = arith.negf %91 : vector<16x384xf32>
    %93 = math.exp %92 : vector<16x384xf32>
    %cst_35 = arith.constant 1.000000e+00 : f32
    %94 = vector.broadcast %cst_35 : f32 to vector<16x384xf32>
    %95 = arith.addf %94, %93 : vector<16x384xf32>
    %96 = arith.divf %94, %95 : vector<16x384xf32>
    %97 = vector.extract_strided_slice %90 {offsets = [0, 384], sizes = [16, 128], strides = [1, 1]} : vector<16x512xf32> to vector<16x128xf32>
    %98 = math.tanh %97 : vector<16x128xf32>
    %99 = vector.extract_strided_slice %96 {offsets = [0, 0], sizes = [16, 128], strides = [1, 1]} : vector<16x384xf32> to vector<16x128xf32>
    %100 = vector.extract_strided_slice %96 {offsets = [0, 128], sizes = [16, 128], strides = [1, 1]} : vector<16x384xf32> to vector<16x128xf32>
    %101 = vector.extract_strided_slice %96 {offsets = [0, 256], sizes = [16, 128], strides = [1, 1]} : vector<16x384xf32> to vector<16x128xf32>
    %102 = arith.mulf %100, %73 : vector<16x128xf32>
    %103 = arith.mulf %99, %98 : vector<16x128xf32>
    %104 = arith.addf %102, %103 : vector<16x128xf32>
    %105 = math.tanh %104 : vector<16x128xf32>
    %106 = arith.mulf %101, %105 : vector<16x128xf32>
    %107 = arith.truncf %106 : vector<16x128xf32> to vector<16x128xbf16>
    %108 = arith.index_cast %84 : i32 to index
    %c0_36 = arith.constant 0 : index
    %109 = vector.load %arg6[%108, %c0_36] : memref<128x128xbf16, #tpu.memory_space<vmem>>, vector<16x128xbf16>
    tpu.vector_store %arg6[%108, %c0_36], %107 {strides = array<i32>} : memref<128x128xbf16, #tpu.memory_space<vmem>>, vector<16x128xbf16>,
    %c3_i32 = arith.constant 3 : i32
    %c2_i32_37 = arith.constant 2 : i32
    %110 = arith.muli %c2_i32_37, %c3_i32 : i32
    %c7_i32_38 = arith.constant 7 : i32
    %111 = arith.subi %c7_i32_38, %110 : i32
    %112 = arith.muli %arg0, %111 : i32
    %113 = arith.addi %c3_i32, %112 : i32
    %c16_i32_39 = arith.constant 16 : i32
    %114 = arith.muli %113, %c16_i32_39 : i32
    %115 = tpu.assume_multiple %114, 16 : i32
    %116 = arith.index_cast %115 : i32 to index
    %c0_40 = arith.constant 0 : index
    %117 = vector.load %arg7[%116, %c0_40] : memref<128x512xbf16, #tpu.memory_space<vmem>>, vector<16x512xbf16>
    %118 = arith.truncf %106 : vector<16x128xf32> to vector<16x128xbf16>
    %cst_41 = arith.constant dense<0.000000e+00> : vector<16x512xf32>
    %119 = tpu.matmul %118, %14, %cst_41 {dimension_numbers = #tpu.dot_dimension_numbers<[1], [0], [0], [1], [0, 0, 1, 1], [], []>} : vector<16x128xbf16>, vector<128x512xbf16>, vector<16x512xf32> -> vector<16x512xf32>
    %120 = arith.extf %117 : vector<16x512xbf16> to vector<16x512xf32>
    %121 = arith.addf %120, %119 : vector<16x512xf32>
    %122 = vector.extract_strided_slice %121 {offsets = [0, 0], sizes = [16, 384], strides = [1, 1]} : vector<16x512xf32> to vector<16x384xf32>
    %123 = arith.negf %122 : vector<16x384xf32>
    %124 = math.exp %123 : vector<16x384xf32>
    %cst_42 = arith.constant 1.000000e+00 : f32
    %125 = vector.broadcast %cst_42 : f32 to vector<16x384xf32>
    %126 = arith.addf %125, %124 : vector<16x384xf32>
    %127 = arith.divf %125, %126 : vector<16x384xf32>
    %128 = vector.extract_strided_slice %121 {offsets = [0, 384], sizes = [16, 128], strides = [1, 1]} : vector<16x512xf32> to vector<16x128xf32>
    %129 = math.tanh %128 : vector<16x128xf32>
    %130 = vector.extract_strided_slice %127 {offsets = [0, 0], sizes = [16, 128], strides = [1, 1]} : vector<16x384xf32> to vector<16x128xf32>
    %131 = vector.extract_strided_slice %127 {offsets = [0, 128], sizes = [16, 128], strides = [1, 1]} : vector<16x384xf32> to vector<16x128xf32>
    %132 = vector.extract_strided_slice %127 {offsets = [0, 256], sizes = [16, 128], strides = [1, 1]} : vector<16x384xf32> to vector<16x128xf32>
    %133 = arith.mulf %131, %104 : vector<16x128xf32>
    %134 = arith.mulf %130, %129 : vector<16x128xf32>
    %135 = arith.addf %133, %134 : vector<16x128xf32>
    %136 = math.tanh %135 : vector<16x128xf32>
    %137 = arith.mulf %132, %136 : vector<16x128xf32>
    %138 = arith.truncf %137 : vector<16x128xf32> to vector<16x128xbf16>
    %139 = arith.index_cast %115 : i32 to index
    %c0_43 = arith.constant 0 : index
    %140 = vector.load %arg6[%139, %c0_43] : memref<128x128xbf16, #tpu.memory_space<vmem>>, vector<16x128xbf16>
    tpu.vector_store %arg6[%139, %c0_43], %138 {strides = array<i32>} : memref<128x128xbf16, #tpu.memory_space<vmem>>, vector<16x128xbf16>,
    %c4_i32 = arith.constant 4 : i32
    %c2_i32_44 = arith.constant 2 : i32
    %141 = arith.muli %c2_i32_44, %c4_i32 : i32
    %c7_i32_45 = arith.constant 7 : i32
    %142 = arith.subi %c7_i32_45, %141 : i32
    %143 = arith.muli %arg0, %142 : i32
    %144 = arith.addi %c4_i32, %143 : i32
    %c16_i32_46 = arith.constant 16 : i32
    %145 = arith.muli %144, %c16_i32_46 : i32
    %146 = tpu.assume_multiple %145, 16 : i32
    %147 = arith.index_cast %146 : i32 to index
    %c0_47 = arith.constant 0 : index
    %148 = vector.load %arg7[%147, %c0_47] : memref<128x512xbf16, #tpu.memory_space<vmem>>, vector<16x512xbf16>
    %149 = arith.truncf %137 : vector<16x128xf32> to vector<16x128xbf16>
    %cst_48 = arith.constant dense<0.000000e+00> : vector<16x512xf32>
    %150 = tpu.matmul %149, %14, %cst_48 {dimension_numbers = #tpu.dot_dimension_numbers<[1], [0], [0], [1], [0, 0, 1, 1], [], []>} : vector<16x128xbf16>, vector<128x512xbf16>, vector<16x512xf32> -> vector<16x512xf32>
    %151 = arith.extf %148 : vector<16x512xbf16> to vector<16x512xf32>
    %152 = arith.addf %151, %150 : vector<16x512xf32>
    %153 = vector.extract_strided_slice %152 {offsets = [0, 0], sizes = [16, 384], strides = [1, 1]} : vector<16x512xf32> to vector<16x384xf32>
    %154 = arith.negf %153 : vector<16x384xf32>
    %155 = math.exp %154 : vector<16x384xf32>
    %cst_49 = arith.constant 1.000000e+00 : f32
    %156 = vector.broadcast %cst_49 : f32 to vector<16x384xf32>
    %157 = arith.addf %156, %155 : vector<16x384xf32>
    %158 = arith.divf %156, %157 : vector<16x384xf32>
    %159 = vector.extract_strided_slice %152 {offsets = [0, 384], sizes = [16, 128], strides = [1, 1]} : vector<16x512xf32> to vector<16x128xf32>
    %160 = math.tanh %159 : vector<16x128xf32>
    %161 = vector.extract_strided_slice %158 {offsets = [0, 0], sizes = [16, 128], strides = [1, 1]} : vector<16x384xf32> to vector<16x128xf32>
    %162 = vector.extract_strided_slice %158 {offsets = [0, 128], sizes = [16, 128], strides = [1, 1]} : vector<16x384xf32> to vector<16x128xf32>
    %163 = vector.extract_strided_slice %158 {offsets = [0, 256], sizes = [16, 128], strides = [1, 1]} : vector<16x384xf32> to vector<16x128xf32>
    %164 = arith.mulf %162, %135 : vector<16x128xf32>
    %165 = arith.mulf %161, %160 : vector<16x128xf32>
    %166 = arith.addf %164, %165 : vector<16x128xf32>
    %167 = math.tanh %166 : vector<16x128xf32>
    %168 = arith.mulf %163, %167 : vector<16x128xf32>
    %169 = arith.truncf %168 : vector<16x128xf32> to vector<16x128xbf16>
    %170 = arith.index_cast %146 : i32 to index
    %c0_50 = arith.constant 0 : index
    %171 = vector.load %arg6[%170, %c0_50] : memref<128x128xbf16, #tpu.memory_space<vmem>>, vector<16x128xbf16>
    tpu.vector_store %arg6[%170, %c0_50], %169 {strides = array<i32>} : memref<128x128xbf16, #tpu.memory_space<vmem>>, vector<16x128xbf16>,
    %c5_i32 = arith.constant 5 : i32
    %c2_i32_51 = arith.constant 2 : i32
    %172 = arith.muli %c2_i32_51, %c5_i32 : i32
    %c7_i32_52 = arith.constant 7 : i32
    %173 = arith.subi %c7_i32_52, %172 : i32
    %174 = arith.muli %arg0, %173 : i32
    %175 = arith.addi %c5_i32, %174 : i32
    %c16_i32_53 = arith.constant 16 : i32
    %176 = arith.muli %175, %c16_i32_53 : i32
    %177 = tpu.assume_multiple %176, 16 : i32
    %178 = arith.index_cast %177 : i32 to index
    %c0_54 = arith.constant 0 : index
    %179 = vector.load %arg7[%178, %c0_54] : memref<128x512xbf16, #tpu.memory_space<vmem>>, vector<16x512xbf16>
    %180 = arith.truncf %168 : vector<16x128xf32> to vector<16x128xbf16>
    %cst_55 = arith.constant dense<0.000000e+00> : vector<16x512xf32>
    %181 = tpu.matmul %180, %14, %cst_55 {dimension_numbers = #tpu.dot_dimension_numbers<[1], [0], [0], [1], [0, 0, 1, 1], [], []>} : vector<16x128xbf16>, vector<128x512xbf16>, vector<16x512xf32> -> vector<16x512xf32>
    %182 = arith.extf %179 : vector<16x512xbf16> to vector<16x512xf32>
    %183 = arith.addf %182, %181 : vector<16x512xf32>
    %184 = vector.extract_strided_slice %183 {offsets = [0, 0], sizes = [16, 384], strides = [1, 1]} : vector<16x512xf32> to vector<16x384xf32>
    %185 = arith.negf %184 : vector<16x384xf32>
    %186 = math.exp %185 : vector<16x384xf32>
    %cst_56 = arith.constant 1.000000e+00 : f32
    %187 = vector.broadcast %cst_56 : f32 to vector<16x384xf32>
    %188 = arith.addf %187, %186 : vector<16x384xf32>
    %189 = arith.divf %187, %188 : vector<16x384xf32>
    %190 = vector.extract_strided_slice %183 {offsets = [0, 384], sizes = [16, 128], strides = [1, 1]} : vector<16x512xf32> to vector<16x128xf32>
    %191 = math.tanh %190 : vector<16x128xf32>
    %192 = vector.extract_strided_slice %189 {offsets = [0, 0], sizes = [16, 128], strides = [1, 1]} : vector<16x384xf32> to vector<16x128xf32>
    %193 = vector.extract_strided_slice %189 {offsets = [0, 128], sizes = [16, 128], strides = [1, 1]} : vector<16x384xf32> to vector<16x128xf32>
    %194 = vector.extract_strided_slice %189 {offsets = [0, 256], sizes = [16, 128], strides = [1, 1]} : vector<16x384xf32> to vector<16x128xf32>
    %195 = arith.mulf %193, %166 : vector<16x128xf32>
    %196 = arith.mulf %192, %191 : vector<16x128xf32>
    %197 = arith.addf %195, %196 : vector<16x128xf32>
    %198 = math.tanh %197 : vector<16x128xf32>
    %199 = arith.mulf %194, %198 : vector<16x128xf32>
    %200 = arith.truncf %199 : vector<16x128xf32> to vector<16x128xbf16>
    %201 = arith.index_cast %177 : i32 to index
    %c0_57 = arith.constant 0 : index
    %202 = vector.load %arg6[%201, %c0_57] : memref<128x128xbf16, #tpu.memory_space<vmem>>, vector<16x128xbf16>
    tpu.vector_store %arg6[%201, %c0_57], %200 {strides = array<i32>} : memref<128x128xbf16, #tpu.memory_space<vmem>>, vector<16x128xbf16>,
    %c6_i32 = arith.constant 6 : i32
    %c2_i32_58 = arith.constant 2 : i32
    %203 = arith.muli %c2_i32_58, %c6_i32 : i32
    %c7_i32_59 = arith.constant 7 : i32
    %204 = arith.subi %c7_i32_59, %203 : i32
    %205 = arith.muli %arg0, %204 : i32
    %206 = arith.addi %c6_i32, %205 : i32
    %c16_i32_60 = arith.constant 16 : i32
    %207 = arith.muli %206, %c16_i32_60 : i32
    %208 = tpu.assume_multiple %207, 16 : i32
    %209 = arith.index_cast %208 : i32 to index
    %c0_61 = arith.constant 0 : index
    %210 = vector.load %arg7[%209, %c0_61] : memref<128x512xbf16, #tpu.memory_space<vmem>>, vector<16x512xbf16>
    %211 = arith.truncf %199 : vector<16x128xf32> to vector<16x128xbf16>
    %cst_62 = arith.constant dense<0.000000e+00> : vector<16x512xf32>
    %212 = tpu.matmul %211, %14, %cst_62 {dimension_numbers = #tpu.dot_dimension_numbers<[1], [0], [0], [1], [0, 0, 1, 1], [], []>} : vector<16x128xbf16>, vector<128x512xbf16>, vector<16x512xf32> -> vector<16x512xf32>
    %213 = arith.extf %210 : vector<16x512xbf16> to vector<16x512xf32>
    %214 = arith.addf %213, %212 : vector<16x512xf32>
    %215 = vector.extract_strided_slice %214 {offsets = [0, 0], sizes = [16, 384], strides = [1, 1]} : vector<16x512xf32> to vector<16x384xf32>
    %216 = arith.negf %215 : vector<16x384xf32>
    %217 = math.exp %216 : vector<16x384xf32>
    %cst_63 = arith.constant 1.000000e+00 : f32
    %218 = vector.broadcast %cst_63 : f32 to vector<16x384xf32>
    %219 = arith.addf %218, %217 : vector<16x384xf32>
    %220 = arith.divf %218, %219 : vector<16x384xf32>
    %221 = vector.extract_strided_slice %214 {offsets = [0, 384], sizes = [16, 128], strides = [1, 1]} : vector<16x512xf32> to vector<16x128xf32>
    %222 = math.tanh %221 : vector<16x128xf32>
    %223 = vector.extract_strided_slice %220 {offsets = [0, 0], sizes = [16, 128], strides = [1, 1]} : vector<16x384xf32> to vector<16x128xf32>
    %224 = vector.extract_strided_slice %220 {offsets = [0, 128], sizes = [16, 128], strides = [1, 1]} : vector<16x384xf32> to vector<16x128xf32>
    %225 = vector.extract_strided_slice %220 {offsets = [0, 256], sizes = [16, 128], strides = [1, 1]} : vector<16x384xf32> to vector<16x128xf32>
    %226 = arith.mulf %224, %197 : vector<16x128xf32>
    %227 = arith.mulf %223, %222 : vector<16x128xf32>
    %228 = arith.addf %226, %227 : vector<16x128xf32>
    %229 = math.tanh %228 : vector<16x128xf32>
    %230 = arith.mulf %225, %229 : vector<16x128xf32>
    %231 = arith.truncf %230 : vector<16x128xf32> to vector<16x128xbf16>
    %232 = arith.index_cast %208 : i32 to index
    %c0_64 = arith.constant 0 : index
    %233 = vector.load %arg6[%232, %c0_64] : memref<128x128xbf16, #tpu.memory_space<vmem>>, vector<16x128xbf16>
    tpu.vector_store %arg6[%232, %c0_64], %231 {strides = array<i32>} : memref<128x128xbf16, #tpu.memory_space<vmem>>, vector<16x128xbf16>,
    %c7_i32_65 = arith.constant 7 : i32
    %c2_i32_66 = arith.constant 2 : i32
    %234 = arith.muli %c2_i32_66, %c7_i32_65 : i32
    %c7_i32_67 = arith.constant 7 : i32
    %235 = arith.subi %c7_i32_67, %234 : i32
    %236 = arith.muli %arg0, %235 : i32
    %237 = arith.addi %c7_i32_65, %236 : i32
    %c16_i32_68 = arith.constant 16 : i32
    %238 = arith.muli %237, %c16_i32_68 : i32
    %239 = tpu.assume_multiple %238, 16 : i32
    %240 = arith.index_cast %239 : i32 to index
    %c0_69 = arith.constant 0 : index
    %241 = vector.load %arg7[%240, %c0_69] : memref<128x512xbf16, #tpu.memory_space<vmem>>, vector<16x512xbf16>
    %242 = arith.truncf %230 : vector<16x128xf32> to vector<16x128xbf16>
    %cst_70 = arith.constant dense<0.000000e+00> : vector<16x512xf32>
    %243 = tpu.matmul %242, %14, %cst_70 {dimension_numbers = #tpu.dot_dimension_numbers<[1], [0], [0], [1], [0, 0, 1, 1], [], []>} : vector<16x128xbf16>, vector<128x512xbf16>, vector<16x512xf32> -> vector<16x512xf32>
    %244 = arith.extf %241 : vector<16x512xbf16> to vector<16x512xf32>
    %245 = arith.addf %244, %243 : vector<16x512xf32>
    %246 = vector.extract_strided_slice %245 {offsets = [0, 0], sizes = [16, 384], strides = [1, 1]} : vector<16x512xf32> to vector<16x384xf32>
    %247 = arith.negf %246 : vector<16x384xf32>
    %248 = math.exp %247 : vector<16x384xf32>
    %cst_71 = arith.constant 1.000000e+00 : f32
    %249 = vector.broadcast %cst_71 : f32 to vector<16x384xf32>
    %250 = arith.addf %249, %248 : vector<16x384xf32>
    %251 = arith.divf %249, %250 : vector<16x384xf32>
    %252 = vector.extract_strided_slice %245 {offsets = [0, 384], sizes = [16, 128], strides = [1, 1]} : vector<16x512xf32> to vector<16x128xf32>
    %253 = math.tanh %252 : vector<16x128xf32>
    %254 = vector.extract_strided_slice %251 {offsets = [0, 0], sizes = [16, 128], strides = [1, 1]} : vector<16x384xf32> to vector<16x128xf32>
    %255 = vector.extract_strided_slice %251 {offsets = [0, 128], sizes = [16, 128], strides = [1, 1]} : vector<16x384xf32> to vector<16x128xf32>
    %256 = vector.extract_strided_slice %251 {offsets = [0, 256], sizes = [16, 128], strides = [1, 1]} : vector<16x384xf32> to vector<16x128xf32>
    %257 = arith.mulf %255, %228 : vector<16x128xf32>
    %258 = arith.mulf %254, %253 : vector<16x128xf32>
    %259 = arith.addf %257, %258 : vector<16x128xf32>
    %260 = math.tanh %259 : vector<16x128xf32>
    %261 = arith.mulf %256, %260 : vector<16x128xf32>
    %262 = arith.truncf %261 : vector<16x128xf32> to vector<16x128xbf16>
    %263 = arith.index_cast %239 : i32 to index
    %c0_72 = arith.constant 0 : index
    %264 = vector.load %arg6[%263, %c0_72] : memref<128x128xbf16, #tpu.memory_space<vmem>>, vector<16x128xbf16>
    tpu.vector_store %arg6[%263, %c0_72], %262 {strides = array<i32>} : memref<128x128xbf16, #tpu.memory_space<vmem>>, vector<16x128xbf16>,
    %c8_i32 = arith.constant 8 : i32
    %c0_73 = arith.constant 0 : index
    %c0_74 = arith.constant 0 : index
    %265 = vector.load %arg8[%c0_73, %c0_74] : memref<16x128xf32, #tpu.memory_space<vmem>>, vector<16x128xf32>
    tpu.vector_store %arg8[%c0_73, %c0_74], %261 {strides = array<i32>} : memref<16x128xf32, #tpu.memory_space<vmem>>, vector<16x128xf32>,
    %c0_75 = arith.constant 0 : index
    %c0_76 = arith.constant 0 : index
    %266 = vector.load %arg9[%c0_75, %c0_76] : memref<16x128xf32, #tpu.memory_space<vmem>>, vector<16x128xf32>
    tpu.vector_store %arg9[%c0_75, %c0_76], %259 {strides = array<i32>} : memref<16x128xf32, #tpu.memory_space<vmem>>, vector<16x128xf32>,
    return
  }
  func.func @transform_0(%arg0: i32, %arg1: i32) -> (i32, i32) {
    %c2_i32 = arith.constant 2 : i32
    %0 = arith.muli %c2_i32, %arg1 : i32
    %c0_i32 = arith.constant 0 : i32
    %1 = arith.subi %c0_i32, %0 : i32
    %2 = arith.muli %arg0, %1 : i32
    %3 = arith.addi %arg1, %2 : i32
    %c0_i32_0 = arith.constant 0 : i32
    %c0_i32_1 = arith.constant 0 : i32
    return %3, %c0_i32_0 : i32, i32
  }
  func.func @transform_1(%arg0: i32, %arg1: i32) -> (i32, i32, i32) {
    %c0_i32 = arith.constant 0 : i32
    %c0_i32_0 = arith.constant 0 : i32
    %c0_i32_1 = arith.constant 0 : i32
    return %arg0, %c0_i32, %c0_i32_0 : i32, i32, i32
  }
  func.func @transform_2(%arg0: i32, %arg1: i32) -> (i32, i32, i32) {
    %c0_i32 = arith.constant 0 : i32
    %c0_i32_0 = arith.constant 0 : i32
    %c0_i32_1 = arith.constant 0 : i32
    return %arg0, %c0_i32, %c0_i32_0 : i32, i32, i32
  }
  func.func @transform_3(%arg0: i32, %arg1: i32) -> (i32, i32, i32) {
    %c0_i32 = arith.constant 0 : i32
    %c0_i32_0 = arith.constant 0 : i32
    %c0_i32_1 = arith.constant 0 : i32
    return %arg0, %c0_i32, %c0_i32_0 : i32, i32, i32
  }
  func.func @transform_4(%arg0: i32, %arg1: i32) -> (i32, i32) {
    %c2_i32 = arith.constant 2 : i32
    %0 = arith.muli %c2_i32, %arg1 : i32
    %c0_i32 = arith.constant 0 : i32
    %1 = arith.subi %c0_i32, %0 : i32
    %2 = arith.muli %arg0, %1 : i32
    %3 = arith.addi %arg1, %2 : i32
    %c0_i32_0 = arith.constant 0 : i32
    return %3, %arg0 : i32, i32
  }
}

module attributes {stable_mosaic.version = 11 : i64} {
  func.func @kernel(%arg0: i32, %arg1: memref<128x256xbf16, #tpu.memory_space<vmem>>, %arg2: memref<256x16xbf16, #tpu.memory_space<vmem>>, %arg3: memref<1x16xf32, #tpu.memory_space<vmem>>, %arg4: memref<128x16xf32, #tpu.memory_space<vmem>>) attributes {dimension_semantics = [#tpu.dimension_semantics<parallel>], iteration_bounds = array<i64: 1>, scalar_prefetch = 0 : i64, scratch_operands = 0 : i64, tpu.core_type = #tpu.core_type<tc>, window_params = [{transform_indices = @transform_0, window_bounds = array<i64: 128, 256>}, {pipeline_mode = #tpu.pipeline_mode<synchronous>, transform_indices = @transform_1, window_bounds = array<i64: 256, 16>}, {pipeline_mode = #tpu.pipeline_mode<synchronous>, transform_indices = @transform_2, window_bounds = array<i64: 1, 16>}, {transform_indices = @transform_3, window_bounds = array<i64: 128, 16>}]} {
    %c0 = arith.constant 0 : index
    %c0_0 = arith.constant 0 : index
    %0 = vector.load %arg1[%c0, %c0_0] : memref<128x256xbf16, #tpu.memory_space<vmem>>, vector<128x256xbf16>
    %c0_1 = arith.constant 0 : index
    %c0_2 = arith.constant 0 : index
    %1 = vector.load %arg2[%c0_1, %c0_2] : memref<256x16xbf16, #tpu.memory_space<vmem>>, vector<256x16xbf16>
    %cst = arith.constant dense<0.000000e+00> : vector<128x16xf32>
    %2 = tpu.matmul %0, %1, %cst {dimension_numbers = #tpu.dot_dimension_numbers<[1], [0], [0], [1], [0, 0, 1, 1], [], []>} : vector<128x256xbf16>, vector<256x16xbf16>, vector<128x16xf32> -> vector<128x16xf32>
    %c0_3 = arith.constant 0 : index
    %c0_4 = arith.constant 0 : index
    %3 = vector.load %arg3[%c0_3, %c0_4] : memref<1x16xf32, #tpu.memory_space<vmem>>, vector<1x16xf32>
    %4 = vector.broadcast %3 : vector<1x16xf32> to vector<128x16xf32>
    %5 = arith.addf %2, %4 : vector<128x16xf32>
    %cst_5 = arith.constant dense<0xFF800000> : vector<128xf32>
    %6 = vector.multi_reduction <maximumf>, %5, %cst_5 [1] : vector<128x16xf32> to vector<128xf32>
    %7 = vector.shape_cast %6 : vector<128xf32> to vector<128x1xf32>
    %8 = vector.broadcast %7 : vector<128x1xf32> to vector<128x16xf32>
    %9 = arith.subf %5, %8 : vector<128x16xf32>
    %10 = math.exp %9 : vector<128x16xf32>
    %cst_6 = arith.constant dense<0.000000e+00> : vector<128xf32>
    %11 = vector.multi_reduction <add>, %10, %cst_6 [1] : vector<128x16xf32> to vector<128xf32>
    %12 = vector.shape_cast %11 : vector<128xf32> to vector<128x1xf32>
    %13 = vector.broadcast %12 : vector<128x1xf32> to vector<128x16xf32>
    %14 = arith.divf %10, %13 : vector<128x16xf32>
    %c0_7 = arith.constant 0 : index
    %c0_8 = arith.constant 0 : index
    %15 = vector.load %arg4[%c0_7, %c0_8] : memref<128x16xf32, #tpu.memory_space<vmem>>, vector<128x16xf32>
    tpu.vector_store %arg4[%c0_7, %c0_8], %14 {strides = array<i32>} : memref<128x16xf32, #tpu.memory_space<vmem>>, vector<128x16xf32>,
    return
  }
  func.func @transform_0(%arg0: i32) -> (i32, i32) {
    %c0_i32 = arith.constant 0 : i32
    %c0_i32_0 = arith.constant 0 : i32
    return %arg0, %c0_i32 : i32, i32
  }
  func.func @transform_1(%arg0: i32) -> (i32, i32) {
    %c0_i32 = arith.constant 0 : i32
    %c0_i32_0 = arith.constant 0 : i32
    %c0_i32_1 = arith.constant 0 : i32
    return %c0_i32, %c0_i32_0 : i32, i32
  }
  func.func @transform_2(%arg0: i32) -> (i32, i32) {
    %c0_i32 = arith.constant 0 : i32
    %c0_i32_0 = arith.constant 0 : i32
    %c0_i32_1 = arith.constant 0 : i32
    return %c0_i32, %c0_i32_0 : i32, i32
  }
  func.func @transform_3(%arg0: i32) -> (i32, i32) {
    %c0_i32 = arith.constant 0 : i32
    %c0_i32_0 = arith.constant 0 : i32
    return %arg0, %c0_i32 : i32, i32
  }
}

</mosaic_0001>

<bundles_post_ra>
// kernel: bilstm_forward.5
= control target key start
LH: loop header
LB: loop body
LE: loop exit
PB: predicated region body
PF: predicated region fallthrough
CT: control target
= control target key end

     0   :  { %vm340_vm0 = vcmask 130048   ;;  %s1460_s1 = inlined_call_operand.vmem [shape: bf16[256,16], index: 1, kind: input, shape index: {}]   ;;  %s1461_s2 = inlined_call_operand.vmem [shape: f32[1,16], index: 2, kind: input, shape index: {}]   ;;  %s1462_s0 = inlined_call_operand.vmem [shape: bf16[128,256], index: 0, kind: input, shape index: {}]   ;;  %s1463_s3 = inlined_call_operand.vmem [shape: f32[128,16], index: 3, kind: output, shape index: {}]  }
   0x1   :  { %v896_v0 = vld [vmem:[%s1460_s1 + $0x38] sm:$0xff]  ;;  %v895_v2 = vld [vmem:[%s1460_s1 + $0x30] sm:$0xff]  ;;  %v894_v4 = vld [vmem:[%s1460_s1 + $0x28] sm:$0xff] }
   0x2   :  { %v904_v1 = vld [vmem:[%s1460_s1 + $0x78] sm:$0xff]  ;;  %242 = vmatpush.bf16.msra.mxu0 %v896_v0  ;;  %905 = vmatpush.bf16.msra.mxu2 %v896_v0  ;;  %v903_v3 = vld [vmem:[%s1460_s1 + $0x70] sm:$0xff]  ;;  %v902_v5 = vld [vmem:[%s1460_s1 + $0x68] sm:$0xff] }
   0x3   :  { %291 = vmatpush.bf16.msra.mxu1 %v904_v1  ;;  %913 = vmatpush.bf16.msra.mxu3 %v904_v1  ;;  %v893_v6 = vld [vmem:[%s1460_s1 + $0x20] sm:$0xff]  ;;  %v892_v8 = vld [vmem:[%s1460_s1 + $0x18] sm:$0xff]  ;;  %v891_v10 = vld [vmem:[%s1460_s1 + $0x10] sm:$0xff] }
   0x4   :  { %v901_v7 = vld [vmem:[%s1460_s1 + $0x60] sm:$0xff]  ;;  %v900_v9 = vld [vmem:[%s1460_s1 + $0x58] sm:$0xff]  ;;  %v899_v11 = vld [vmem:[%s1460_s1 + $0x50] sm:$0xff] }
   0x5   :  { %v890_v12 = vld [vmem:[%s1460_s1 + $0x8] sm:$0xff]  ;;  %v889_v14 = vld [vmem:[%s1460_s1] sm:$0xff]  ;;  %v755_v28 = vld [vmem:[%s1462_s0 + $0x10] sm:$0xf] }
   0x6   :  { %243 = vmatpush.bf16.msra.mxu0 %v895_v2  ;;  %906 = vmatpush.bf16.msra.mxu2 %v895_v2  ;;  %v898_v13 = vld [vmem:[%s1460_s1 + $0x48] sm:$0xff]  ;;  %v897_v15 = vld [vmem:[%s1460_s1 + $0x40] sm:$0xff]  ;;  %v876_v29 = vld [vmem:[%s1462_s0 + $0x14] sm:$0xf0] }
   0x7   :  { %292 = vmatpush.bf16.msra.mxu1 %v903_v3  ;;  %914 = vmatpush.bf16.msra.mxu3 %v903_v3  ;;  %v747_v16 = vld [vmem:[%s1462_s0] sm:$0xf]  ;;  %v874_v17 = vld [vmem:[%s1462_s0 + $0x4] sm:$0xf0]  ;;  %v873_v20 = vld [vmem:[%s1462_s0 + $0x4] sm:$0xf]  ;;  %v756_v36 = vor.u32 %v876_v29, %v755_v28 }
   0x8   :  { %v779_v18 = vld [vmem:[%s1462_s0 + $0x40] sm:$0xf]  ;;  %v882_v19 = vld [vmem:[%s1462_s0 + $0x44] sm:$0xf0]  ;;  %v749_v21 = vld [vmem:[%s1462_s0 + $0x8] sm:$0xf0]  ;;  %v748_v24 = vor.u32 %v874_v17, %v747_v16 }
   0x9   :  { %v881_v22 = vld [vmem:[%s1462_s0 + $0x44] sm:$0xf]  ;;  %v781_v23 = vld [vmem:[%s1462_s0 + $0x48] sm:$0xf0]  ;;  %v780_v25 = vor.u32 %v882_v19, %v779_v18  ;;  %v752_v26 = vor.u32 %v873_v20, %v749_v21  ;;  %v787_v30 = vld [vmem:[%s1462_s0 + $0x50] sm:$0xf] }
   0xa   :  { %244 = vmatpush.bf16.msra.mxu0 %v894_v4  ;;  %907 = vmatpush.bf16.msra.mxu2 %v894_v4  ;;  %v784_v27 = vor.u32 %v881_v22, %v781_v23  ;;  %v884_v31 = vld [vmem:[%s1462_s0 + $0x54] sm:$0xf0]  ;;  %v875_v32 = vld [vmem:[%s1462_s0 + $0x14] sm:$0xf]  ;;  %v757_v33 = vld [vmem:[%s1462_s0 + $0x18] sm:$0xf0] }
   0xb   :  { %293 = vmatpush.bf16.msra.mxu1 %v902_v5  ;;  %915 = vmatpush.bf16.msra.mxu3 %v902_v5  ;;  %v883_v34 = vld [vmem:[%s1462_s0 + $0x54] sm:$0xf]  ;;  %v789_v35 = vld [vmem:[%s1462_s0 + $0x58] sm:$0xf0]  ;;  %v788_v37 = vor.u32 %v884_v31, %v787_v30  ;;  %v760_v38 = vor.u32 %v875_v32, %v757_v33  ;;  %v763_v40 = vld [vmem:[%s1462_s0 + $0x20] sm:$0xf] }
   0xc   :  { %v792_v39 = vor.u32 %v883_v34, %v789_v35  ;;  %v878_v41 = vld [vmem:[%s1462_s0 + $0x24] sm:$0xf0]  ;;  %v795_v42 = vld [vmem:[%s1462_s0 + $0x60] sm:$0xf]  ;;  %v877_v44 = vld [vmem:[%s1462_s0 + $0x24] sm:$0xf] }
   0xd   :  { %v886_v43 = vld [vmem:[%s1462_s0 + $0x64] sm:$0xf0]  ;;  %v765_v45 = vld [vmem:[%s1462_s0 + $0x28] sm:$0xf0]  ;;  %v885_v46 = vld [vmem:[%s1462_s0 + $0x64] sm:$0xf]  ;;  %v764_v48 = vor.u32 %v878_v41, %v763_v40 }
   0xe   :  { %245 = vmatpush.bf16.msra.mxu0 %v893_v6  ;;  %908 = vmatpush.bf16.msra.mxu2 %v893_v6  ;;  %v797_v47 = vld [vmem:[%s1462_s0 + $0x68] sm:$0xf0]  ;;  %v796_v49 = vor.u32 %v886_v43, %v795_v42  ;;  %v768_v50 = vor.u32 %v877_v44, %v765_v45  ;;  %v771_v52 = vld [vmem:[%s1462_s0 + $0x30] sm:$0xf]  ;;  %v880_v53 = vld [vmem:[%s1462_s0 + $0x34] sm:$0xf0] }
   0xf   :  { %294 = vmatpush.bf16.msra.mxu1 %v901_v7  ;;  %916 = vmatpush.bf16.msra.mxu3 %v901_v7  ;;  %v800_v51 = vor.u32 %v885_v46, %v797_v47  ;;  %v803_v54 = vld [vmem:[%s1462_s0 + $0x70] sm:$0xf]  ;;  %v888_v55 = vld [vmem:[%s1462_s0 + $0x74] sm:$0xf0]  ;;  %v879_v56 = vld [vmem:[%s1462_s0 + $0x34] sm:$0xf]  ;;  %v772_v60 = vor.u32 %v880_v53, %v771_v52 }
  0x10   :  { %v773_v57 = vld [vmem:[%s1462_s0 + $0x38] sm:$0xf0]  ;;  %v887_v58 = vld [vmem:[%s1462_s0 + $0x74] sm:$0xf]  ;;  %v804_v61 = vor.u32 %v888_v55, %v803_v54  ;;  %v1153_v0 = vld [vmem:[%s1461_s2] ss:$0 sm:$0xff] }
  0x11   :  { %v805_v59 = vld [vmem:[%s1462_s0 + $0x78] sm:$0xf0]  ;;  %v776_v62 = vor.u32 %v879_v56, %v773_v57 }
  0x12   :  { %246 = vmatpush.bf16.msra.mxu0 %v892_v8  ;;  %909 = vmatpush.bf16.msra.mxu2 %v892_v8  ;;  %v808_v63 = vor.u32 %v887_v58, %v805_v59 }
  0x13   :  { %295 = vmatpush.bf16.msra.mxu1 %v900_v9  ;;  %917 = vmatpush.bf16.msra.mxu3 %v900_v9 }
  0x16   :  { %247 = vmatpush.bf16.msra.mxu0 %v891_v10  ;;  %910 = vmatpush.bf16.msra.mxu2 %v891_v10 }
  0x17   :  { %296 = vmatpush.bf16.msra.mxu1 %v899_v11  ;;  %918 = vmatpush.bf16.msra.mxu3 %v899_v11 }
  0x1a   :  { %248 = vmatpush.bf16.msra.mxu0 %v890_v12  ;;  %911 = vmatpush.bf16.msra.mxu2 %v890_v12 }
  0x1b   :  { %297 = vmatpush.bf16.msra.mxu1 %v898_v13  ;;  %919 = vmatpush.bf16.msra.mxu3 %v898_v13 }
  0x1e   :  { %249 = vmatpush.bf16.msra.mxu0 %v889_v14  ;;  %912 = vmatpush.bf16.msra.mxu2 %v889_v14 }
  0x1f   :  { %298 = vmatpush.bf16.msra.mxu1 %v897_v15  ;;  %920 = vmatpush.bf16.msra.mxu3 %v897_v15 }
  0x21   :  { %250 = vmatmul.bf16.vlgmr.msra.gmra.mxu0 %v748_v24  ;;  %270 = vmatmul.bf16.vlgmr.msra.gmra.mxu2 %v780_v25 }
  0x22   :  { %299 = vmatmul.bf16.vlgmr.msra.gmra.mxu1 %v752_v26  ;;  %319 = vmatmul.bf16.vlgmr.msra.gmra.mxu3 %v784_v27 }
  0x31   :  { %255 = vmatmul.bf16.gmra.mxu0 %v756_v36  ;;  %275 = vmatmul.bf16.gmra.mxu2 %v788_v37 }
  0x32   :  { %304 = vmatmul.bf16.gmra.mxu1 %v760_v38  ;;  %324 = vmatmul.bf16.gmra.mxu3 %v792_v39 }
  0x41   :  { %260 = vmatmul.bf16.gmra.mxu0 %v764_v48  ;;  %280 = vmatmul.bf16.gmra.mxu2 %v796_v49 }
  0x42   :  { %309 = vmatmul.bf16.gmra.mxu1 %v768_v50  ;;  %329 = vmatmul.bf16.gmra.mxu3 %v800_v51 }
  0x51   :  { %265 = vmatmul.bf16.gmra.mxu0 %v772_v60  ;;  %285 = vmatmul.bf16.gmra.mxu2 %v804_v61 }
  0x52   :  { %314 = vmatmul.bf16.gmra.mxu1 %v776_v62  ;;  %334 = vmatmul.bf16.gmra.mxu3 %v808_v63 }
  0x9e   :  { %v251_v1 = vpop.f32.mrf.mxu0 }
  0x9f   :  { %v252_v2 = vadd.f32 %v1153_v0, %v251_v1  ;;  %v300_v3 = vpop.f32.mrf.mxu1 }
  0xa1   :  { %v1156_v4 = vadd.f32 %v300_v3, %v252_v2 }
  0xa3   :  { %v341_v5 = vsel %vm340_vm0, %v1156_v4, -inf }
  0xa4   :  { %v271_v6 = vpop.f32.mrf.mxu2  ;;  %342 = vmax.xlane.f32.xlu0 %v341_v5 }
  0xa5   :  { %v272_v7 = vadd.f32 %v1153_v0, %v271_v6  ;;  %v320_v8 = vpop.f32.mrf.mxu3 }
  0xa6   :  { %v253_v9 = vpop.f32.mrf.mxu0 }
  0xa7   :  { %v1161_v10 = vadd.f32 %v320_v8, %v272_v7  ;;  %v254_v11 = vadd.f32 %v1153_v0, %v253_v9  ;;  %v302_v12 = vpop.f32.mrf.mxu1 }
  0xa9   :  { %v1164_v13 = vadd.f32 %v302_v12, %v254_v11  ;;  %v365_v14 = vsel %vm340_vm0, %v1161_v10, -inf }
  0xaa   :  { %366 = vmax.xlane.f32.xlu2 %v365_v14 }
  0xab   :  { %v344_v15 = vsel %vm340_vm0, %v1164_v13, -inf }
  0xac   :  { %v273_v16 = vpop.f32.mrf.mxu2  ;;  %345 = vmax.xlane.f32.xlu0 %v344_v15 }
  0xad   :  { %v274_v17 = vadd.f32 %v1153_v0, %v273_v16  ;;  %v322_v18 = vpop.f32.mrf.mxu3 }
  0xae   :  { %v256_v19 = vpop.f32.mrf.mxu0 }
  0xaf   :  { %v1171_v20 = vadd.f32 %v322_v18, %v274_v17  ;;  %v257_v21 = vadd.f32 %v1153_v0, %v256_v19  ;;  %v305_v22 = vpop.f32.mrf.mxu1 }
  0xb1   :  { %v1174_v23 = vadd.f32 %v305_v22, %v257_v21  ;;  %v368_v25 = vsel %vm340_vm0, %v1171_v20, -inf }
  0xb3   :  { %v347_v24 = vsel %vm340_vm0, %v1174_v23, -inf }
  0xb4   :  { %v276_v26 = vpop.f32.mrf.mxu2  ;;  %348 = vmax.xlane.f32.xlu1 %v347_v24  ;;  %369 = vmax.xlane.f32.xlu0 %v368_v25 }
  0xb5   :  { %v277_v27 = vadd.f32 %v1153_v0, %v276_v26  ;;  %v325_v28 = vpop.f32.mrf.mxu3 }
  0xb6   :  { %v258_v29 = vpop.f32.mrf.mxu0 }
  0xb7   :  { %v1181_v30 = vadd.f32 %v325_v28, %v277_v27  ;;  %v307_v31 = vpop.f32.mrf.mxu1  ;;  %v259_v33 = vadd.f32 %v1153_v0, %v258_v29 }
  0xb9   :  { %v371_v32 = vsel %vm340_vm0, %v1181_v30, -inf  ;;  %v1187_v38 = vadd.f32 %v307_v31, %v259_v33 }
  0xbb   :  { %v350_v43 = vsel %vm340_vm0, %v1187_v38, -inf }
  0xbc   :  { %v278_v34 = vpop.f32.mrf.mxu2  ;;  %372 = vmax.xlane.f32.xlu1 %v371_v32 }
  0xbd   :  { %v279_v35 = vadd.f32 %v1153_v0, %v278_v34  ;;  %v327_v36 = vpop.f32.mrf.mxu3 }
  0xbe   :  { %v261_v37 = vpop.f32.mrf.mxu0 }
  0xbf   :  { %v1189_v39 = vadd.f32 %v327_v36, %v279_v35  ;;  %v310_v40 = vpop.f32.mrf.mxu1  ;;  %v262_v41 = vadd.f32 %v1153_v0, %v261_v37 }
  0xc1   :  { %v374_v42 = vsel %vm340_vm0, %v1189_v39, -inf  ;;  %v1196_v45 = vadd.f32 %v310_v40, %v262_v41 }
  0xc2   :  { %375 = vmax.xlane.f32.xlu2 %v374_v42 }
  0xc3   :  { %v353_v52 = vsel %vm340_vm0, %v1196_v45, -inf }
  0xc4   :  { %v281_v44 = vpop.f32.mrf.mxu2  ;;  %351 = vmax.xlane.f32.xlu1 %v350_v43 }
  0xc5   :  { %v282_v46 = vadd.f32 %v1153_v0, %v281_v44  ;;  %v330_v47 = vpop.f32.mrf.mxu3 }
  0xc6   :  { %v263_v48 = vpop.f32.mrf.mxu0 }
  0xc7   :  { %v1199_v49 = vadd.f32 %v330_v47, %v282_v46  ;;  %v312_v50 = vpop.f32.mrf.mxu1  ;;  %v264_v51 = vadd.f32 %v1153_v0, %v263_v48 }
  0xc9   :  { %v377_v53 = vsel %vm340_vm0, %v1199_v49, -inf  ;;  %v1206_v55 = vadd.f32 %v312_v50, %v264_v51 }
  0xca   :  { %354 = vmax.xlane.f32.xlu2 %v353_v52  ;;  %378 = vmax.xlane.f32.xlu0 %v377_v53 }
  0xcb   :  { %v356_v61 = vsel %vm340_vm0, %v1206_v55, -inf }
  0xcc   :  { %v283_v54 = vpop.f32.mrf.mxu2 }
  0xcd   :  { %v332_v56 = vpop.f32.mrf.mxu3  ;;  %v284_v11 = vadd.f32 %v1153_v0, %v283_v54 }
  0xce   :  { %v266_v57 = vpop.f32.mrf.mxu0 }
  0xcf   :  { %v267_v58 = vadd.f32 %v1153_v0, %v266_v57  ;;  %v315_v59 = vpop.f32.mrf.mxu1  ;;  %v1227_v17 = vadd.f32 %v332_v56, %v284_v11 }
  0xd1   :  { %v1209_v60 = vadd.f32 %v315_v59, %v267_v58  ;;  %v380_v21 = vsel %vm340_vm0, %v1227_v17, -inf }
  0xd2   :  { %357 = vmax.xlane.f32.xlu2 %v356_v61 }
  0xd3   :  { %v359_v62 = vsel %vm340_vm0, %v1209_v60, -inf }
  0xd4   :  { %v286_v63 = vpop.f32.mrf.mxu2  ;;  %360 = vmax.xlane.f32.xlu0 %v359_v62 }
  0xd5   :  { %v287_v1 = vadd.f32 %v1153_v0, %v286_v63  ;;  %v335_v2 = vpop.f32.mrf.mxu3 }
  0xd6   :  { %v268_v3 = vpop.f32.mrf.mxu0 }
  0xd7   :  { %v1216_v5 = vadd.f32 %v335_v2, %v287_v1  ;;  %v269_v6 = vadd.f32 %v1153_v0, %v268_v3  ;;  %v317_v7 = vpop.f32.mrf.mxu1 }
  0xd9   :  { %v1219_v8 = vadd.f32 %v317_v7, %v269_v6  ;;  %v383_v9 = vsel %vm340_vm0, %v1216_v5, -inf }
  0xda   :  { %384 = vmax.xlane.f32.xlu2 %v383_v9 }
  0xdb   :  { %v362_v12 = vsel %vm340_vm0, %v1219_v8, -inf }
  0xdc   :  { %v288_v14 = vpop.f32.mrf.mxu2  ;;  %363 = vmax.xlane.f32.xlu1 %v362_v12 }
  0xdd   :  { %v289_v15 = vadd.f32 %v1153_v0, %v288_v14  ;;  %v337_v16 = vpop.f32.mrf.mxu3 }
  0xdf   :  { %v1229_v18 = vadd.f32 %v337_v16, %v289_v15 }
  0xe1   :  { %v386_v19 = vsel %vm340_vm0, %v1229_v18, -inf }
  0xe2   :  { %387 = vmax.xlane.f32.xlu0 %v386_v19 }
  0xe4   :  { %381 = vmax.xlane.f32.xlu1 %v380_v21 }
 0x117   :  { %v343_v22 = vpop.xlane.xlu0 %342 }
 0x118   :  { %v389_v24 = vsub.f32 %v1156_v4, %v343_v22 }
 0x11a   :  { %v405_v25 = vmul.f32 1.442695, %v389_v24 }
 0x11c   :  { %922 = vpow2.f32 %v405_v25 }
 0x11d   :  { %v367_v26 = vpop.xlane.xlu2 %366 }
 0x11e   :  { %v397_v0 = vsub.f32 %v1161_v10, %v367_v26 }
 0x11f   :  { %v346_v27 = vpop.xlane.xlu0 %345 }
 0x120   :  { %v421_v28 = vmul.f32 1.442695, %v397_v0  ;;  %v390_v29 = vsub.f32 %v1164_v13, %v346_v27 }
 0x122   :  { %v1238_v31 = vpop.eup %922  ;;  %924 = vpow2.f32 %v421_v28  ;;  %v407_v32 = vmul.f32 1.442695, %v390_v29 }
 0x123   :  { %v437_v33 = vsel %vm340_vm0, %v1238_v31, 0.0 }
 0x124   :  { %926 = vpow2.f32 %v407_v32  ;;  %438 = vadd.xlane.f32.xlu1 %v437_v33 }
 0x127   :  { %v349_v34 = vpop.xlane.xlu1 %348  ;;  %v370_v4 = vpop.xlane.xlu0 %369 }
 0x128   :  { %v1242_v35 = vpop.eup %924  ;;  %v391_v36 = vsub.f32 %v1174_v23, %v349_v34  ;;  %v398_v10 = vsub.f32 %v1171_v20, %v370_v4 }
 0x129   :  { %v461_v13 = vsel %vm340_vm0, %v1242_v35, 0.0 }
 0x12a   :  { %v1248_v37 = vpop.eup %926  ;;  %v409_v40 = vmul.f32 1.442695, %v391_v36  ;;  %v423_v41 = vmul.f32 1.442695, %v398_v10  ;;  %462 = vadd.xlane.f32.xlu0 %v461_v13 }
 0x12b   :  { %v440_v42 = vsel %vm340_vm0, %v1248_v37, 0.0 }
 0x12c   :  { %928 = vpow2.f32 %v409_v40  ;;  %441 = vadd.xlane.f32.xlu2 %v440_v42 }
 0x12d   :  { %930 = vpow2.f32 %v423_v41 }
 0x12f   :  { %v373_v43 = vpop.xlane.xlu1 %372 }
 0x130   :  { %v399_v44 = vsub.f32 %v1181_v30, %v373_v43 }
 0x132   :  { %v1253_v23 = vpop.eup %928  ;;  %v425_v20 = vmul.f32 1.442695, %v399_v44 }
 0x133   :  { %v1255_v46 = vpop.eup %930  ;;  %v443_v47 = vsel %vm340_vm0, %v1253_v23, 0.0 }
 0x134   :  { %932 = vpow2.f32 %v425_v20  ;;  %444 = vadd.xlane.f32.xlu0 %v443_v47  ;;  %v464_v48 = vsel %vm340_vm0, %v1255_v46, 0.0 }
 0x135   :  { %465 = vadd.xlane.f32.xlu1 %v464_v48  ;;  %v376_v50 = vpop.xlane.xlu2 %375 }
 0x136   :  { %v400_v51 = vsub.f32 %v1189_v39, %v376_v50 }
 0x137   :  { %v352_v52 = vpop.xlane.xlu1 %351 }
 0x138   :  { %v427_v53 = vmul.f32 1.442695, %v400_v51  ;;  %v392_v30 = vsub.f32 %v1187_v38, %v352_v52 }
 0x13a   :  { %v1263_v54 = vpop.eup %932  ;;  %934 = vpow2.f32 %v427_v53  ;;  %v411_v56 = vmul.f32 1.442695, %v392_v30 }
 0x13b   :  { %v467_v57 = vsel %vm340_vm0, %v1263_v54, 0.0 }
 0x13c   :  { %936 = vpow2.f32 %v411_v56  ;;  %468 = vadd.xlane.f32.xlu2 %v467_v57 }
 0x13d   :  { %v355_v58 = vpop.xlane.xlu2 %354  ;;  %v379_v59 = vpop.xlane.xlu0 %378 }
 0x13e   :  { %v393_v61 = vsub.f32 %v1196_v45, %v355_v58  ;;  %v401_v62 = vsub.f32 %v1199_v49, %v379_v59 }
 0x140   :  { %v1269_v39 = vpop.eup %934  ;;  %v413_v63 = vmul.f32 1.442695, %v393_v61  ;;  %v429_v1 = vmul.f32 1.442695, %v401_v62 }
 0x141   :  { %v470_v38 = vsel %vm340_vm0, %v1269_v39, 0.0 }
 0x142   :  { %v1273_v2 = vpop.eup %936  ;;  %938 = vpow2.f32 %v413_v63  ;;  %471 = vadd.xlane.f32.xlu0 %v470_v38 }
 0x143   :  { %940 = vpow2.f32 %v429_v1  ;;  %v446_v3 = vsel %vm340_vm0, %v1273_v2, 0.0 }
 0x144   :  { %447 = vadd.xlane.f32.xlu1 %v446_v3 }
 0x145   :  { %v358_v6 = vpop.xlane.xlu2 %357 }
 0x146   :  { %v394_v45 = vsub.f32 %v1206_v55, %v358_v6 }
 0x147   :  { %v361_v49 = vpop.xlane.xlu0 %360 }
 0x148   :  { %v1278_v7 = vpop.eup %938  ;;  %v415_v9 = vmul.f32 1.442695, %v394_v45  ;;  %v395_v11 = vsub.f32 %v1209_v60, %v361_v49 }
 0x149   :  { %v1281_v12 = vpop.eup %940  ;;  %v449_v14 = vsel %vm340_vm0, %v1278_v7, 0.0 }
 0x14a   :  { %942 = vpow2.f32 %v415_v9  ;;  %v417_v15 = vmul.f32 1.442695, %v395_v11  ;;  %450 = vadd.xlane.f32.xlu2 %v449_v14  ;;  %v473_v16 = vsel %vm340_vm0, %v1281_v12, 0.0 }
 0x14c   :  { %944 = vpow2.f32 %v417_v15  ;;  %474 = vadd.xlane.f32.xlu1 %v473_v16 }
 0x14d   :  { %v385_v55 = vpop.xlane.xlu2 %384 }
 0x14e   :  { %v403_v19 = vsub.f32 %v1216_v5, %v385_v55 }
 0x14f   :  { %v364_v21 = vpop.xlane.xlu1 %363 }
 0x150   :  { %v1288_v22 = vpop.eup %942  ;;  %v433_v60 = vmul.f32 1.442695, %v403_v19  ;;  %v396_v24 = vsub.f32 %v1219_v8, %v364_v21 }
 0x151   :  { %v452_v25 = vsel %vm340_vm0, %v1288_v22, 0.0 }
 0x152   :  { %v1293_v26 = vpop.eup %944  ;;  %946 = vpow2.f32 %v433_v60  ;;  %v419_v0 = vmul.f32 1.442695, %v396_v24  ;;  %453 = vadd.xlane.f32.xlu0 %v452_v25 }
 0x153   :  { %v455_v27 = vsel %vm340_vm0, %v1293_v26, 0.0 }
 0x154   :  { %948 = vpow2.f32 %v419_v0  ;;  %456 = vadd.xlane.f32.xlu1 %v455_v27 }
 0x155   :  { %v388_v5 = vpop.xlane.xlu0 %387 }
 0x156   :  { %v404_v28 = vsub.f32 %v1229_v18, %v388_v5 }
 0x157   :  { %v382_v29 = vpop.xlane.xlu1 %381 }
 0x158   :  { %v1298_v32 = vpop.eup %946  ;;  %v435_v8 = vmul.f32 1.442695, %v404_v28  ;;  %v402_v33 = vsub.f32 %v1227_v17, %v382_v29 }
 0x159   :  { %v479_v34 = vsel %vm340_vm0, %v1298_v32, 0.0 }
 0x15a   :  { %v1303_v4 = vpop.eup %948  ;;  %950 = vpow2.f32 %v435_v8  ;;  %v431_v36 = vmul.f32 1.442695, %v402_v33  ;;  %480 = vadd.xlane.f32.xlu0 %v479_v34 }
 0x15b   :  { %v458_v10 = vsel %vm340_vm0, %v1303_v4, 0.0 }
 0x15c   :  { %952 = vpow2.f32 %v431_v36  ;;  %459 = vadd.xlane.f32.xlu2 %v458_v10 }
 0x160   :  { %v1307_v18 = vpop.eup %950 }
 0x161   :  { %v482_v13 = vsel %vm340_vm0, %v1307_v18, 0.0 }
 0x162   :  { %v1311_v40 = vpop.eup %952  ;;  %483 = vadd.xlane.f32.xlu1 %v482_v13 }
 0x163   :  { %v476_v17 = vsel %vm340_vm0, %v1311_v40, 0.0 }
 0x164   :  { %477 = vadd.xlane.f32.xlu2 %v476_v17 }
 0x197   :  { %v439_v41 = vpop.xlane.xlu1 %438 }
 0x198   :  { %954 = vrcp.f32 %v439_v41  ;;  %v494_v48 = vand.u32 2147483647, %v439_v41  ;;  %v496_v50 = vand.u32 2147483648, %v439_v41  ;;  %vm490_vm2 = vweird.f32 %v439_v41 }
 0x19a   :  { %vm495_vm4 = vcmp.eq.f32.partialorder %v494_v48, 8.507059e+37  ;;  %v497_v57 = vor.u32 1.1754944e-38, %v496_v50 }
 0x19d   :  { %v463_v42 = vpop.xlane.xlu0 %462 }
 0x19e   :  { %v955_v43 = vpop.eup %954  ;;  %956 = vrcp.f32 %v463_v42  ;;  %v614_v61 = vand.u32 2147483647, %v463_v42  ;;  %v616_v38 = vand.u32 2147483648, %v463_v42  ;;  %vm610_vm6 = vweird.f32 %v463_v42 }
 0x19f   :  { %v486_v44 = vmul.f32 %v955_v43, %v439_v41  ;;  %v442_v20 = vpop.xlane.xlu2 %441  ;;  %vm491_vm1 = vweird.f32 %v955_v43 }
 0x1a0   :  { %958 = vrcp.f32 %v442_v20  ;;  %vm492_vm3 = vmor %vm490_vm2, %vm491_vm1  ;;  %v511_v9 = vand.u32 2147483648, %v442_v20  ;;  %v509_v15 = vand.u32 2147483647, %v442_v20  ;;  %v617_v16 = vor.u32 1.1754944e-38, %v616_v38 }
 0x1a1   :  { %v487_v47 = vsub.f32 1.0, %v486_v44  ;;  %vm615_vm9 = vcmp.eq.f32.partialorder %v614_v61, 8.507059e+37  ;;  %vm505_vm10 = vweird.f32 %v442_v20 }
 0x1a2   :  { %v512_v60 = vor.u32 1.1754944e-38, %v511_v9  ;;  %vm510_vm12 = vcmp.eq.f32.partialorder %v509_v15, 8.507059e+37 }
 0x1a3   :  { %v488_v51 = vmul.f32 %v955_v43, %v487_v47 }
 0x1a4   :  { %v957_v52 = vpop.eup %956 }
 0x1a5   :  { %v489_v53 = vadd.f32 %v955_v43, %v488_v51  ;;  %v606_v30 = vmul.f32 %v957_v52, %v463_v42  ;;  %vm611_vm5 = vweird.f32 %v957_v52 }
 0x1a6   :  { %v959_v56 = vpop.eup %958  ;;  %vm612_vm8 = vmor %vm610_vm6, %vm611_vm5 }
 0x1a7   :  { %v493_v58 = vsel %vm492_vm3, %v955_v43, %v489_v53  ;;  %v607_v59 = vsub.f32 1.0, %v606_v30  ;;  %v501_v62 = vmul.f32 %v959_v56, %v442_v20  ;;  %v1315_v63 = vpop.xlane.xlu0 %444  ;;  %vm506_vm7 = vweird.f32 %v959_v56 }
 0x1a8   :  { %v498_v1 = vsel %vm495_vm4, %v497_v57, %v493_v58  ;;  %v466_v3 = vpop.xlane.xlu1 %465  ;;  %960 = vrcp.f32 %v1315_v63  ;;  %vm507_vm11 = vmor %vm505_vm10, %vm506_vm7  ;;  %v526_v36 = vand.u32 2147483648, %v1315_v63  ;;  %v524_v13 = vand.u32 2147483647, %v1315_v63 }
 0x1a9   :  { %v499_v6 = vmul.f32 %v1238_v31, %v498_v1  ;;  %v608_v45 = vmul.f32 %v957_v52, %v607_v59  ;;  %v502_v49 = vsub.f32 1.0, %v501_v62  ;;  %962 = vrcp.f32 %v466_v3 }
 0x1aa   :  { %v629_v41 = vand.u32 2147483647, %v466_v3  ;;  %vm520_vm15 = vweird.f32 %v1315_v63  ;;  %vm625_vm1 = vweird.f32 %v466_v3  ;;  %v527_v20 = vor.u32 1.1754944e-38, %v526_v36 }
 0x1ab   :  { %725 = vst.msk [vmem:[%s1463_s3] sm:$0xff] %vm340_vm0, %v499_v6  ;;  %v609_v11 = vadd.f32 %v957_v52, %v608_v45  ;;  %v503_v14 = vmul.f32 %v959_v56, %v502_v49  ;;  %vm525_vm4 = vcmp.eq.f32.partialorder %v524_v13, 8.507059e+37 }
 0x1ac   :  { %vm630_vm5 = vcmp.eq.f32.partialorder %v629_v41, 8.507059e+37 }
 0x1ad   :  { %v613_v55 = vsel %vm612_vm8, %v957_v52, %v609_v11  ;;  %v504_v31 = vadd.f32 %v959_v56, %v503_v14 }
 0x1ae   :  { %v961_v19 = vpop.eup %960  ;;  %v618_v21 = vsel %vm615_vm9, %v617_v16, %v613_v55 }
 0x1af   :  { %v963_v24 = vpop.eup %962  ;;  %v619_v25 = vmul.f32 %v1242_v35, %v618_v21  ;;  %v508_v0 = vsel %vm507_vm11, %v959_v56, %v504_v31  ;;  %v516_v27 = vmul.f32 %v961_v19, %v1315_v63  ;;  %v469_v5 = vpop.xlane.xlu2 %468  ;;  %v631_v35 = vand.u32 2147483648, %v466_v3 }
 0x1b0   :  { %v513_v28 = vsel %vm510_vm12, %v512_v60, %v508_v0  ;;  %v621_v29 = vmul.f32 %v963_v24, %v466_v3  ;;  %964 = vrcp.f32 %v469_v5  ;;  %vm521_vm13 = vweird.f32 %v961_v19 }
 0x1b1   :  { %733 = vst.msk [vmem:[%s1463_s3 + $0x40] sm:$0xff] %vm340_vm0, %v619_v25  ;;  %v514_v8 = vmul.f32 %v1248_v37, %v513_v28  ;;  %v517_v33 = vsub.f32 1.0, %v516_v27  ;;  %vm626_vm14 = vweird.f32 %v963_v24  ;;  %vm522_vm2 = vmor %vm520_vm15, %vm521_vm13  ;;  %v632_v47 = vor.u32 1.1754944e-38, %v631_v35 }
 0x1b2   :  { %v622_v34 = vsub.f32 1.0, %v621_v29  ;;  %vm627_vm3 = vmor %vm625_vm1, %vm626_vm14  ;;  %v646_v59 = vand.u32 2147483648, %v469_v5  ;;  %v644_v62 = vand.u32 2147483647, %v469_v5  ;;  %vm640_vm7 = vweird.f32 %v469_v5 }
 0x1b3   :  { %726 = vst.msk [vmem:[%s1463_s3 + $0x8] sm:$0xff] %vm340_vm0, %v514_v8  ;;  %v518_v10 = vmul.f32 %v961_v19, %v517_v33 }
 0x1b4   :  { %v623_v17 = vmul.f32 %v963_v24, %v622_v34  ;;  %v647_v3 = vor.u32 1.1754944e-38, %v646_v59  ;;  %vm645_vm9 = vcmp.eq.f32.partialorder %v644_v62, 8.507059e+37 }
 0x1b5   :  { %v519_v42 = vadd.f32 %v961_v19, %v518_v10  ;;  %v472_v37 = vpop.xlane.xlu0 %471 }
 0x1b6   :  { %v965_v43 = vpop.eup %964  ;;  %v624_v44 = vadd.f32 %v963_v24, %v623_v17  ;;  %966 = vrcp.f32 %v472_v37  ;;  %v659_v14 = vand.u32 2147483647, %v472_v37  ;;  %v661_v15 = vand.u32 2147483648, %v472_v37 }
 0x1b7   :  { %v523_v48 = vsel %vm522_vm2, %v961_v19, %v519_v42  ;;  %v636_v50 = vmul.f32 %v965_v43, %v469_v5  ;;  %v448_v51 = vpop.xlane.xlu1 %447  ;;  %vm641_vm6 = vweird.f32 %v965_v43  ;;  %vm655_vm11 = vweird.f32 %v472_v37 }
 0x1b8   :  { %v628_v52 = vsel %vm627_vm3, %v963_v24, %v624_v44  ;;  %v528_v53 = vsel %vm525_vm4, %v527_v20, %v523_v48  ;;  %968 = vrcp.f32 %v448_v51  ;;  %vm642_vm8 = vmor %vm640_vm7, %vm641_vm6  ;;  %v539_v19 = vand.u32 2147483647, %v448_v51 }
 0x1b9   :  { %v633_v30 = vsel %vm630_vm5, %v632_v47, %v628_v52  ;;  %v529_v56 = vmul.f32 %v1253_v23, %v528_v53  ;;  %v637_v57 = vsub.f32 1.0, %v636_v50  ;;  %v541_v21 = vand.u32 2147483648, %v448_v51 }
 0x1ba   :  { %v634_v58 = vmul.f32 %v1255_v46, %v633_v30  ;;  %vm660_vm14 = vcmp.eq.f32.partialorder %v659_v14, 8.507059e+37  ;;  %v662_v0 = vor.u32 1.1754944e-38, %v661_v15  ;;  %vm535_vm15 = vweird.f32 %v448_v51 }
 0x1bb   :  { %727 = vst.msk [vmem:[%s1463_s3 + $0x10] sm:$0xff] %vm340_vm0, %v529_v56  ;;  %v638_v61 = vmul.f32 %v965_v43, %v637_v57  ;;  %vm540_vm2 = vcmp.eq.f32.partialorder %v539_v19, 8.507059e+37  ;;  %v542_v33 = vor.u32 1.1754944e-38, %v541_v21 }
 0x1bc   :  { %v967_v63 = vpop.eup %966  ;;  %734 = vst.msk [vmem:[%s1463_s3 + $0x48] sm:$0xff] %vm340_vm0, %v634_v58 }
 0x1bd   :  { %v639_v1 = vadd.f32 %v965_v43, %v638_v61  ;;  %v651_v23 = vmul.f32 %v967_v63, %v472_v37  ;;  %v1348_v38 = vpop.xlane.xlu2 %450  ;;  %vm656_vm10 = vweird.f32 %v967_v63 }
 0x1be   :  { %v969_v46 = vpop.eup %968  ;;  %970 = vrcp.f32 %v1348_v38  ;;  %vm657_vm13 = vmor %vm655_vm11, %vm656_vm10  ;;  %v554_v41 = vand.u32 2147483647, %v1348_v38  ;;  %v556_v42 = vand.u32 2147483648, %v1348_v38  ;;  %vm550_vm4 = vweird.f32 %v1348_v38 }
 0x1bf   :  { %v643_v6 = vsel %vm642_vm8, %v965_v43, %v639_v1  ;;  %v652_v45 = vsub.f32 1.0, %v651_v23  ;;  %v531_v49 = vmul.f32 %v969_v46, %v448_v51  ;;  %v1351_v9 = vpop.xlane.xlu1 %474  ;;  %vm536_vm12 = vweird.f32 %v969_v46 }
 0x1c0   :  { %v648_v11 = vsel %vm645_vm9, %v647_v3, %v643_v6  ;;  %972 = vrcp.f32 %v1351_v9  ;;  %vm537_vm1 = vmor %vm535_vm15, %vm536_vm12  ;;  %v676_v44 = vand.u32 2147483648, %v1351_v9  ;;  %v674_v48 = vand.u32 2147483647, %v1351_v9 }
 0x1c1   :  { %v649_v16 = vmul.f32 %v1263_v54, %v648_v11  ;;  %v653_v55 = vmul.f32 %v967_v63, %v652_v45  ;;  %v532_v31 = vsub.f32 1.0, %v531_v49  ;;  %vm555_vm7 = vcmp.eq.f32.partialorder %v554_v41, 8.507059e+37 }
 0x1c2   :  { %vm670_vm8 = vweird.f32 %v1351_v9  ;;  %v677_v57 = vor.u32 1.1754944e-38, %v676_v44  ;;  %vm675_vm10 = vcmp.eq.f32.partialorder %v674_v48, 8.507059e+37 }
 0x1c3   :  { %735 = vst.msk [vmem:[%s1463_s3 + $0x50] sm:$0xff] %vm340_vm0, %v649_v16  ;;  %v654_v60 = vadd.f32 %v967_v63, %v653_v55  ;;  %v533_v24 = vmul.f32 %v969_v46, %v532_v31 }
 0x1c4   :  { %v971_v25 = vpop.eup %970 }
 0x1c5   :  { %v658_v27 = vsel %vm657_vm13, %v967_v63, %v654_v60  ;;  %v534_v54 = vadd.f32 %v969_v46, %v533_v24  ;;  %v546_v5 = vmul.f32 %v971_v25, %v1348_v38  ;;  %v1360_v28 = vpop.xlane.xlu0 %453  ;;  %vm551_vm3 = vweird.f32 %v971_v25 }
 0x1c6   :  { %v973_v29 = vpop.eup %972  ;;  %v663_v8 = vsel %vm660_vm14, %v662_v0, %v658_v27  ;;  %974 = vrcp.f32 %v1360_v28  ;;  %vm552_vm6 = vmor %vm550_vm4, %vm551_vm3  ;;  %v569_v23 = vand.u32 2147483647, %v1360_v28  ;;  %v571_v38 = vand.u32 2147483648, %v1360_v28 }
 0x1c7   :  { %v664_v34 = vmul.f32 %v1269_v39, %v663_v8  ;;  %v538_v36 = vsel %vm537_vm1, %v969_v46, %v534_v54  ;;  %v547_v35 = vsub.f32 1.0, %v546_v5  ;;  %v666_v10 = vmul.f32 %v973_v29, %v1351_v9  ;;  %v1365_v13 = vpop.xlane.xlu1 %456 }
 0x1c8   :  { %v543_v17 = vsel %vm540_vm2, %v542_v33, %v538_v36  ;;  %976 = vrcp.f32 %v1365_v13  ;;  %vm671_vm5 = vweird.f32 %v973_v29  ;;  %vm565_vm12 = vweird.f32 %v1360_v28 }
 0x1c9   :  { %736 = vst.msk [vmem:[%s1463_s3 + $0x58] sm:$0xff] %vm340_vm0, %v664_v34  ;;  %v544_v37 = vmul.f32 %v1273_v2, %v543_v17  ;;  %v548_v39 = vmul.f32 %v971_v25, %v547_v35  ;;  %v667_v43 = vsub.f32 1.0, %v666_v10  ;;  %v557_v2 = vor.u32 1.1754944e-38, %v556_v42  ;;  %vm672_vm9 = vmor %vm670_vm8, %vm671_vm5 }
 0x1ca   :  { %v584_v49 = vand.u32 2147483647, %v1365_v13  ;;  %v586_v9 = vand.u32 2147483648, %v1365_v13  ;;  %vm570_vm15 = vcmp.eq.f32.partialorder %v569_v23, 8.507059e+37  ;;  %vm580_vm1 = vweird.f32 %v1365_v13 }
 0x1cb   :  { %728 = vst.msk [vmem:[%s1463_s3 + $0x18] sm:$0xff] %vm340_vm0, %v544_v37  ;;  %v549_v20 = vadd.f32 %v971_v25, %v548_v39  ;;  %v668_v47 = vmul.f32 %v973_v29, %v667_v43 }
 0x1cc   :  { %v975_v50 = vpop.eup %974  ;;  %vm585_vm3 = vcmp.eq.f32.partialorder %v584_v49, 8.507059e+37  ;;  %v587_v24 = vor.u32 1.1754944e-38, %v586_v9 }
 0x1cd   :  { %v553_v51 = vsel %vm552_vm6, %v971_v25, %v549_v20  ;;  %v669_v52 = vadd.f32 %v973_v29, %v668_v47  ;;  %v561_v53 = vmul.f32 %v975_v50, %v1360_v28  ;;  %v1385_v30 = vpop.xlane.xlu0 %480  ;;  %vm566_vm11 = vweird.f32 %v975_v50 }
 0x1ce   :  { %v558_v56 = vsel %vm555_vm7, %v557_v2, %v553_v51  ;;  %978 = vrcp.f32 %v1385_v30  ;;  %v977_v58 = vpop.eup %976  ;;  %vm567_vm13 = vmor %vm565_vm12, %vm566_vm11  ;;  %v706_v54 = vand.u32 2147483648, %v1385_v30  ;;  %vm700_vm5 = vweird.f32 %v1385_v30 }
 0x1cf   :  { %v559_v59 = vmul.f32 %v1278_v7, %v558_v56  ;;  %v673_v61 = vsel %vm672_vm9, %v973_v29, %v669_v52  ;;  %v562_v62 = vsub.f32 1.0, %v561_v53  ;;  %v1389_v63 = vpop.xlane.xlu2 %459  ;;  %v576_v46 = vmul.f32 %v977_v58, %v1365_v13 }
 0x1d0   :  { %v678_v1 = vsel %vm675_vm10, %v677_v57, %v673_v61  ;;  %980 = vrcp.f32 %v1389_v63  ;;  %vm581_vm14 = vweird.f32 %v977_v58  ;;  %v704_v29 = vand.u32 2147483647, %v1385_v30 }
 0x1d1   :  { %729 = vst.msk [vmem:[%s1463_s3 + $0x20] sm:$0xff] %vm340_vm0, %v559_v59  ;;  %v679_v3 = vmul.f32 %v1281_v12, %v678_v1  ;;  %v563_v7 = vmul.f32 %v975_v50, %v562_v62  ;;  %v577_v6 = vsub.f32 1.0, %v576_v46  ;;  %v572_v12 = vor.u32 1.1754944e-38, %v571_v38  ;;  %vm582_vm2 = vmor %vm580_vm1, %vm581_vm14 }
 0x1d2   :  { %v601_v36 = vand.u32 2147483648, %v1389_v63  ;;  %v707_v10 = vor.u32 1.1754944e-38, %v706_v54  ;;  %v599_v17 = vand.u32 2147483647, %v1389_v63  ;;  %vm705_vm8 = vcmp.eq.f32.partialorder %v704_v29, 8.507059e+37 }
 0x1d3   :  { %737 = vst.msk [vmem:[%s1463_s3 + $0x60] sm:$0xff] %vm340_vm0, %v679_v3  ;;  %v564_v45 = vadd.f32 %v975_v50, %v563_v7  ;;  %v578_v14 = vmul.f32 %v977_v58, %v577_v6  ;;  %vm595_vm9 = vweird.f32 %v1389_v63 }
 0x1d4   :  { %v979_v11 = vpop.eup %978  ;;  %v602_v44 = vor.u32 1.1754944e-38, %v601_v36  ;;  %vm600_vm11 = vcmp.eq.f32.partialorder %v599_v17, 8.507059e+37 }
 0x1d5   :  { %v568_v15 = vsel %vm567_vm13, %v975_v50, %v564_v45  ;;  %v696_v16 = vmul.f32 %v979_v11, %v1385_v30  ;;  %v1408_v55 = vpop.xlane.xlu1 %483  ;;  %v579_v19 = vadd.f32 %v977_v58, %v578_v14  ;;  %vm701_vm4 = vweird.f32 %v979_v11 }
 0x1d6   :  { %v573_v31 = vsel %vm570_vm15, %v572_v12, %v568_v15  ;;  %982 = vrcp.f32 %v1408_v55  ;;  %v981_v21 = vpop.eup %980  ;;  %vm702_vm6 = vmor %vm700_vm5, %vm701_vm4  ;;  %v719_v50 = vand.u32 2147483647, %v1408_v55  ;;  %v721_v2 = vand.u32 2147483648, %v1408_v55 }
 0x1d7   :  { %v574_v60 = vmul.f32 %v1288_v22, %v573_v31  ;;  %v697_v25 = vsub.f32 1.0, %v696_v16  ;;  %v1413_v0 = vpop.xlane.xlu2 %477  ;;  %v583_v27 = vsel %vm582_vm2, %v977_v58, %v579_v19  ;;  %v591_v5 = vmul.f32 %v981_v21, %v1389_v63 }
 0x1d8   :  { %984 = vrcp.f32 %v1413_v0  ;;  %v588_v28 = vsel %vm585_vm3, %v587_v24, %v583_v27  ;;  %vm596_vm7 = vweird.f32 %v981_v21  ;;  %vm715_vm13 = vweird.f32 %v1408_v55 }
 0x1d9   :  { %730 = vst.msk [vmem:[%s1463_s3 + $0x28] sm:$0xff] %vm340_vm0, %v574_v60  ;;  %v698_v22 = vmul.f32 %v979_v11, %v697_v25  ;;  %v589_v8 = vmul.f32 %v1293_v26, %v588_v28  ;;  %v592_v33 = vsub.f32 1.0, %v591_v5  ;;  %vm597_vm10 = vmor %vm595_vm9, %vm596_vm7  ;;  %v691_v30 = vand.u32 2147483648, %v1413_v0 }
 0x1da   :  { %v689_v58 = vand.u32 2147483647, %v1413_v0  ;;  %v722_v59 = vor.u32 1.1754944e-38, %v721_v2  ;;  %vm720_vm1 = vcmp.eq.f32.partialorder %v719_v50, 8.507059e+37  ;;  %vm685_vm2 = vweird.f32 %v1413_v0 }
 0x1db   :  { %v699_v34 = vadd.f32 %v979_v11, %v698_v22  ;;  %731 = vst.msk [vmem:[%s1463_s3 + $0x30] sm:$0xff] %vm340_vm0, %v589_v8  ;;  %v593_v13 = vmul.f32 %v981_v21, %v592_v33  ;;  %v692_v63 = vor.u32 1.1754944e-38, %v691_v30 }
 0x1dc   :  { %v983_v35 = vpop.eup %982  ;;  %vm690_vm4 = vcmp.eq.f32.partialorder %v689_v58, 8.507059e+37 }
 0x1dd   :  { %v703_v41 = vsel %vm702_vm6, %v979_v11, %v699_v34  ;;  %v711_v26 = vmul.f32 %v983_v35, %v1408_v55  ;;  %v594_v39 = vadd.f32 %v981_v21, %v593_v13  ;;  %vm716_vm12 = vweird.f32 %v983_v35 }
 0x1de   :  { %v985_v42 = vpop.eup %984  ;;  %v708_v37 = vsel %vm705_vm8, %v707_v10, %v703_v41  ;;  %vm717_vm15 = vmor %vm715_vm13, %vm716_vm12 }
 0x1df   :  { %v709_v43 = vmul.f32 %v1298_v32, %v708_v37  ;;  %v712_v20 = vsub.f32 1.0, %v711_v26  ;;  %v681_v47 = vmul.f32 %v985_v42, %v1413_v0  ;;  %v598_v48 = vsel %vm597_vm10, %v981_v21, %v594_v39 }
 0x1e0   :  { %v603_v51 = vsel %vm600_vm11, %v602_v44, %v598_v48  ;;  %vm686_vm14 = vweird.f32 %v985_v42 }
 0x1e1   :  { %739 = vst.msk [vmem:[%s1463_s3 + $0x70] sm:$0xff] %vm340_vm0, %v709_v43  ;;  %v713_v52 = vmul.f32 %v983_v35, %v712_v20  ;;  %v682_v32 = vsub.f32 1.0, %v681_v47  ;;  %v604_v53 = vmul.f32 %v1303_v4, %v603_v51  ;;  %vm687_vm3 = vmor %vm685_vm2, %vm686_vm14 }
 0x1e3   :  { %v714_v56 = vadd.f32 %v983_v35, %v713_v52  ;;  %v683_v57 = vmul.f32 %v985_v42, %v682_v32  ;;  %732 = vst.msk [vmem:[%s1463_s3 + $0x38] sm:$0xff] %vm340_vm0, %v604_v53 }
 0x1e5   :  { %v718_v61 = vsel %vm717_vm15, %v983_v35, %v714_v56  ;;  %v684_v62 = vadd.f32 %v985_v42, %v683_v57 }
 0x1e6   :  { %v723_v4 = vsel %vm720_vm1, %v722_v59, %v718_v61 }
 0x1e7   :  { %v724_v1 = vmul.f32 %v1307_v18, %v723_v4  ;;  %v688_v23 = vsel %vm687_vm3, %v985_v42, %v684_v62 }
 0x1e8   :  { %v693_v38 = vsel %vm690_vm4, %v692_v63, %v688_v23 }
 0x1e9   :  { %740 = vst.msk [vmem:[%s1463_s3 + $0x78] sm:$0xff] %vm340_vm0, %v724_v1  ;;  %v694_v46 = vmul.f32 %v1311_v40, %v693_v38 }
 0x1eb   :  { %738 = vst.msk [vmem:[%s1463_s3 + $0x68] sm:$0xff] %vm340_vm0, %v694_v46 }

// kernel: bilstm_forward.3
= control target key start
LH: loop header
LB: loop body
LE: loop exit
PB: predicated region body
PF: predicated region fallthrough
CT: control target
= control target key end

     0   :  { %9 = vsyncpa [#allocation6], 0  ;;  %s5276_s0 = inlined_call_operand.vmem [shape: bf16[128,128], index: 0, kind: input, shape index: {}]   ;;  %s5277_s1 = inlined_call_operand.hbm [shape: bf16[2,128,512], index: 1, kind: input, shape index: {}]   ;;  %s5278_s2 = inlined_call_operand.vmem [shape: f32[2,1,512], index: 2, kind: input, shape index: {}]   ;;  %s5279_s3 = inlined_call_operand.hbm [shape: bf16[2,128,512], index: 3, kind: input, shape index: {}]   ;;  %s5280_s4 = inlined_call_operand.vmem [shape: bf16[128,256], index: 4, kind: output, shape index: {}]  }
   0x1   :  { %11 = vsyncpa [#allocation6 + $0x1], 0 }
   0x2   :  { %12 = vsyncpa [#allocation8], 0 }
   0x3   :  { %14 = vsyncpa [#allocation8 + $0x1], 0  ;;  %s4109_s15 = smov 0   ;;  %s4111_s16 = smov 0  }
   0x4   :  { %s4113_s17 = smov 0   ;;  %s4115_s18 = smov 0  }
   0x5   :  { %s4117_s19 = smov 0   ;;  %s4119_s20 = smov 0  }
   0x6 LB: > { %s3120_s21 = sadd.s32 4294967295, %s4079_s20   ;;  %s32_s22 = sadd.s32 1, %s4075_s19  ;;  %s4079_s20 = sphi %s4119_s20, %s20_s20   ;;  %s4075_s19 = sphi %s4117_s19, %s5317_s19   ;;  %s4071_s18 = sphi %s4115_s18, %s5316_s18   ;;  %s4067_s17 = sphi %s4113_s17, %s5315_s17   ;;  %s4063_s16 = sphi %s4111_s16, %s5314_s16   ;;  %s4059_s15 = sphi %s4109_s15, %s5313_s15  }
   0x7   : > { %p34_p0 = scmp.ge.s32.totalorder %s32_s22, 2  ;;  %s73_s23 = sadd.s32 1, %s4067_s17 }
   0x8   : > { %p80_p1 = scmp.ne.s32.totalorder %s4067_s17, %s4063_s16  ;;  %p81_p2 = scmp.eq.s32.totalorder %s4079_s20, 0 }
   0x9   : > { %s5319_s22 = smov (%p34_p0, %s32_s22), 0  ;;  %p86_p4 = scmp.ne.s32.totalorder %s4063_s16, %s4059_s15 }
   0xa   : > { %p4145_p3 = por %p81_p2, %p80_p1  ;;  %s70_s25 = ssub.s32 %s4075_s19, %s5319_s22 }
   0xb   : > { %p87_p5 = scmp.eq.s32.totalorder %s3120_s21, 0  ;;  %p71_p6 = scmp.eq.s32.totalorder %s70_s25, 0 }
   0xc   : > { %p172_p7 = scmp.eq.s32.totalorder %s3120_s21, 1  ;;  %p3657_p10 = scmp.lt.s32.totalorder %s4079_s20, 2 }
   0xd   : > { %p4152_p8 = por %p87_p5, %p86_p4  ;;  %s4165_s29 = sand.u32 1, %s4067_s17  }
   0xe   : > { %s4157_s27 = scalar_select %p71_p6, %s4067_s17, %s73_s23  }
   0xf   : > { %p4159_p9 = por %p172_p7, %p80_p1  ;;  %s3507_s30 = sshll.u32 %s4075_s19, 8 }
  0x10   : > { %s3125_s5 = sshll.u32 %s4165_s29, 8  ;;  %s224_s8 = scalar_lea.hbm %s5277_s1, %s3507_s30 }
  0x11   : > { %s225_s9 = sshll.u32 %s224_s8, 4  ;;  %s219_s10 = scalar_lea.vmem [#allocation5], %s3125_s5  ;;  %s226_s9 = int_to_ptr.hbm [resolvable:$true] %s225_s9 }
  0x12   : > { %s227_s11 = sshll.u32 %s219_s10, 4  ;;  %p4174_p11 = pnand %p3657_p10, %p4145_p3  ;;  %s228_s11 = int_to_ptr.vmem [resolvable:$true] %s227_s11 }
  0x13   : > { %p3131_p12 = scmp.ge.s32.totalorder %s4079_s20, 1  ;;  %p264_p13 = scmp.lt.s32.totalorder %s4079_s20, 3 }
  0x14   : > { %s216_s13 = scalar_lea.sflag [#allocation6], %s4165_s29  ;;  %s4081_s14 = smov 256  }
  0x15   : > { %s4082_s15 = smov 16   ;;  %p265_p0 = pnand %p3131_p12, %p264_p13 }
  0x16   : > { %3653 = dma.hbm_to_vmem [thread:$0]  (!%p4174_p11), %s226_s9, 4096, %s228_s11, %s216_s13, %s4081_s14, %s4081_s14, %s4082_s15  }
  0x17   : > { %s253_s25 = scalar_lea.hbm %s5279_s3, %s3507_s30  ;;  %s248_s24 = scalar_lea.vmem [#allocation7], %s3125_s5 }
  0x18   : > { %s254_s6 = sshll.u32 %s253_s25, 4  ;;  %s256_s7 = sshll.u32 %s248_s24, 4  ;;  %s255_s6 = int_to_ptr.hbm [resolvable:$true] %s254_s6  ;;  %s257_s7 = int_to_ptr.vmem [resolvable:$true] %s256_s7 }
  0x19   : > { %s245_s8 = scalar_lea.sflag [#allocation8], %s4165_s29  ;;  %268 = sbr.rel (%p265_p0) target bundleno = 1715 (0x6b3), region = 36 }
  0x1a   : > { %3656 = dma.hbm_to_vmem [thread:$0]  (!%p4174_p11), %s255_s6, 4096, %s257_s7, %s245_s8, %s4081_s14, %s4081_s14, %s4082_s15  }
  0x1e   : > { %s4190_s10 = sand.u32 1, %s4063_s16  }
  0x1f   : > { %s3132_s9 = sshll.u32 %s4190_s10, 8  ;;  %s271_s11 = scalar_lea.sflag [#allocation6], %s4190_s10 }
  0x20   : > { %s4194_s13 = scalar_lea.vmem [#allocation5], %s3132_s9 }
  0x21   : > { %4050 = dma.done.wait (%p4152_p8), %s271_s11, 4096  }
  0x22   : > { %4052 = vsyncadd (%p4152_p8), %s271_s11, 4294963200  ;;  %s281_s29 = scalar_lea.sflag [#allocation8], %s4190_s10  ;;  %s4201_s30 = scalar_lea.vmem [#allocation7], %s3132_s9 }
  0x23   : > { %4054 = dma.done.wait (%p4152_p8), %s281_s29, 4096  }
  0x24   : > { %4056 = vsyncadd (%p4152_p8), %s281_s29, 4294963200  ;;  %v3282_v0 = vld [vmem:[%s4194_s13 + $0xe0] sm:$0xf]  ;;  %v3547_v1 = vld [vmem:[%s4194_s13 + $0xec] sm:$0xf0]  ;;  %p341_p1 = scmp.lt.s32.totalorder %s4071_s18, 1 }
  0x25   : > { %v3545_v2 = vld [vmem:[%s4194_s13 + $0xe4] sm:$0xf]  ;;  %v3283_v3 = vor.u32 %v3547_v1, %v3282_v0  ;;  %v3284_v4 = vld [vmem:[%s4194_s13 + $0xf0] sm:$0xf0]  ;;  %v3290_v5 = vld [vmem:[%s4194_s13 + $0xe8] sm:$0xf] }
  0x26   : > { %v3548_v6 = vld [vmem:[%s4194_s13 + $0xf4] sm:$0xf0]  ;;  %v3287_v7 = vor.u32 %v3545_v2, %v3284_v4  ;;  %v3546_v9 = vld [vmem:[%s4194_s13 + $0xec] sm:$0xf]  ;;  %v3292_v10 = vld [vmem:[%s4194_s13 + $0xf8] sm:$0xf0] }
  0x27   : > { %v3291_v8 = vor.u32 %v3548_v6, %v3290_v5  ;;  %v3266_v11 = vld [vmem:[%s4194_s13 + $0xc0] sm:$0xf]  ;;  %624 = vmatpush.bf16.msra.mxu0 %v3283_v3  ;;  %v3295_v12 = vor.u32 %v3546_v9, %v3292_v10  ;;  %v3543_v13 = vld [vmem:[%s4194_s13 + $0xcc] sm:$0xf0]  ;;  %v3541_v14 = vld [vmem:[%s4194_s13 + $0xc4] sm:$0xf] }
  0x28   : > { %v3268_v15 = vld [vmem:[%s4194_s13 + $0xd0] sm:$0xf0]  ;;  %673 = vmatpush.bf16.msra.mxu1 %v3287_v7  ;;  %v3267_v16 = vor.u32 %v3543_v13, %v3266_v11  ;;  %v3274_v18 = vld [vmem:[%s4194_s13 + $0xc8] sm:$0xf]  ;;  %v3544_v19 = vld [vmem:[%s4194_s13 + $0xd4] sm:$0xf0] }
  0x29   : > { %722 = vmatpush.bf16.msra.mxu2 %v3291_v8  ;;  %v3271_v17 = vor.u32 %v3541_v14, %v3268_v15  ;;  %v3542_v20 = vld [vmem:[%s4194_s13 + $0xcc] sm:$0xf]  ;;  %771 = vmatpush.bf16.msra.mxu3 %v3295_v12  ;;  %v3275_v21 = vor.u32 %v3544_v19, %v3274_v18  ;;  %v3276_v22 = vld [vmem:[%s4194_s13 + $0xd8] sm:$0xf0]  ;;  %v3250_v23 = vld [vmem:[%s4194_s13 + $0xa0] sm:$0xf] }
  0x2a   : > { %v3539_v24 = vld [vmem:[%s4194_s13 + $0xac] sm:$0xf0]  ;;  %v3279_v25 = vor.u32 %v3542_v20, %v3276_v22  ;;  %v3537_v26 = vld [vmem:[%s4194_s13 + $0xa4] sm:$0xf]  ;;  %v3252_v27 = vld [vmem:[%s4194_s13 + $0xb0] sm:$0xf0] }
  0x2b   : > { %v3258_v28 = vld [vmem:[%s4194_s13 + $0xa8] sm:$0xf]  ;;  %625 = vmatpush.bf16.msra.mxu0 %v3267_v16  ;;  %v3251_v29 = vor.u32 %v3539_v24, %v3250_v23  ;;  %v3540_v30 = vld [vmem:[%s4194_s13 + $0xb4] sm:$0xf0]  ;;  %v3538_v31 = vld [vmem:[%s4194_s13 + $0xac] sm:$0xf]  ;;  %v3255_v33 = vor.u32 %v3537_v26, %v3252_v27 }
  0x2c   : > { %v3260_v32 = vld [vmem:[%s4194_s13 + $0xb8] sm:$0xf0]  ;;  %674 = vmatpush.bf16.msra.mxu1 %v3271_v17  ;;  %v3259_v34 = vor.u32 %v3540_v30, %v3258_v28  ;;  %v3234_v35 = vld [vmem:[%s4194_s13 + $0x80] sm:$0xf]  ;;  %v3535_v36 = vld [vmem:[%s4194_s13 + $0x8c] sm:$0xf0] }
  0x2d   : > { %723 = vmatpush.bf16.msra.mxu2 %v3275_v21  ;;  %v3533_v37 = vld [vmem:[%s4194_s13 + $0x84] sm:$0xf]  ;;  %772 = vmatpush.bf16.msra.mxu3 %v3279_v25  ;;  %v3263_v38 = vor.u32 %v3538_v31, %v3260_v32  ;;  %v3236_v39 = vld [vmem:[%s4194_s13 + $0x90] sm:$0xf0]  ;;  %v3242_v40 = vld [vmem:[%s4194_s13 + $0x88] sm:$0xf]  ;;  %v3235_v44 = vor.u32 %v3535_v36, %v3234_v35 }
  0x2e   : > { %v3536_v41 = vld [vmem:[%s4194_s13 + $0x94] sm:$0xf0]  ;;  %v3534_v42 = vld [vmem:[%s4194_s13 + $0x8c] sm:$0xf]  ;;  %v3244_v43 = vld [vmem:[%s4194_s13 + $0x98] sm:$0xf0]  ;;  %v3239_v45 = vor.u32 %v3533_v37, %v3236_v39 }
  0x2f   : > { %626 = vmatpush.bf16.msra.mxu0 %v3251_v29  ;;  %v3243_v46 = vor.u32 %v3536_v41, %v3242_v40  ;;  %v3218_v47 = vld [vmem:[%s4194_s13 + $0x60] sm:$0xf]  ;;  %v3531_v48 = vld [vmem:[%s4194_s13 + $0x6c] sm:$0xf0]  ;;  %v3529_v49 = vld [vmem:[%s4194_s13 + $0x64] sm:$0xf]  ;;  %v3247_v50 = vor.u32 %v3534_v42, %v3244_v43 }
  0x30   : > { %675 = vmatpush.bf16.msra.mxu1 %v3255_v33  ;;  %v3220_v51 = vld [vmem:[%s4194_s13 + $0x70] sm:$0xf0]  ;;  %v3226_v52 = vld [vmem:[%s4194_s13 + $0x68] sm:$0xf]  ;;  %v3532_v53 = vld [vmem:[%s4194_s13 + $0x74] sm:$0xf0]  ;;  %v3219_v56 = vor.u32 %v3531_v48, %v3218_v47 }
  0x31   : > { %724 = vmatpush.bf16.msra.mxu2 %v3259_v34  ;;  %773 = vmatpush.bf16.msra.mxu3 %v3263_v38  ;;  %v3530_v54 = vld [vmem:[%s4194_s13 + $0x6c] sm:$0xf]  ;;  %v3228_v55 = vld [vmem:[%s4194_s13 + $0x78] sm:$0xf0]  ;;  %v3223_v57 = vor.u32 %v3529_v49, %v3220_v51  ;;  %v3227_v58 = vor.u32 %v3532_v53, %v3226_v52  ;;  %v3202_v59 = vld [vmem:[%s4194_s13 + $0x40] sm:$0xf] }
  0x32   : > { %v3527_v60 = vld [vmem:[%s4194_s13 + $0x4c] sm:$0xf0]  ;;  %v3525_v61 = vld [vmem:[%s4194_s13 + $0x44] sm:$0xf]  ;;  %v3231_v62 = vor.u32 %v3530_v54, %v3228_v55  ;;  %v3204_v63 = vld [vmem:[%s4194_s13 + $0x50] sm:$0xf0] }
  0x33   : > { %627 = vmatpush.bf16.msra.mxu0 %v3235_v44  ;;  %v3210_v0 = vld [vmem:[%s4194_s13 + $0x48] sm:$0xf]  ;;  %v3528_v1 = vld [vmem:[%s4194_s13 + $0x54] sm:$0xf0]  ;;  %v3526_v2 = vld [vmem:[%s4194_s13 + $0x4c] sm:$0xf]  ;;  %v3203_v4 = vor.u32 %v3527_v60, %v3202_v59  ;;  %v3207_v5 = vor.u32 %v3525_v61, %v3204_v63 }
  0x34   : > { %676 = vmatpush.bf16.msra.mxu1 %v3239_v45  ;;  %v3212_v3 = vld [vmem:[%s4194_s13 + $0x58] sm:$0xf0]  ;;  %v3211_v6 = vor.u32 %v3528_v1, %v3210_v0  ;;  %v3186_v7 = vld [vmem:[%s4194_s13 + $0x20] sm:$0xf]  ;;  %v3523_v8 = vld [vmem:[%s4194_s13 + $0x2c] sm:$0xf0] }
  0x35   : > { %725 = vmatpush.bf16.msra.mxu2 %v3243_v46  ;;  %774 = vmatpush.bf16.msra.mxu3 %v3247_v50  ;;  %v3521_v9 = vld [vmem:[%s4194_s13 + $0x24] sm:$0xf]  ;;  %v3215_v10 = vor.u32 %v3526_v2, %v3212_v3  ;;  %v3188_v11 = vld [vmem:[%s4194_s13 + $0x30] sm:$0xf0]  ;;  %v3194_v12 = vld [vmem:[%s4194_s13 + $0x28] sm:$0xf]  ;;  %v3187_v16 = vor.u32 %v3523_v8, %v3186_v7 }
  0x36   : > { %v3524_v13 = vld [vmem:[%s4194_s13 + $0x34] sm:$0xf0]  ;;  %v3522_v14 = vld [vmem:[%s4194_s13 + $0x2c] sm:$0xf]  ;;  %v3196_v15 = vld [vmem:[%s4194_s13 + $0x38] sm:$0xf0]  ;;  %v3191_v18 = vor.u32 %v3521_v9, %v3188_v11 }
  0x37   : > { %628 = vmatpush.bf16.msra.mxu0 %v3219_v56  ;;  %v3170_v17 = vld [vmem:[%s4194_s13] sm:$0xf]  ;;  %v3195_v19 = vor.u32 %v3524_v13, %v3194_v12  ;;  %v3519_v20 = vld [vmem:[%s4194_s13 + $0xc] sm:$0xf0]  ;;  %v3517_v21 = vld [vmem:[%s4194_s13 + $0x4] sm:$0xf]  ;;  %v3199_v23 = vor.u32 %v3522_v14, %v3196_v15 }
  0x38   : > { %677 = vmatpush.bf16.msra.mxu1 %v3223_v57  ;;  %v3172_v22 = vld [vmem:[%s4194_s13 + $0x10] sm:$0xf0]  ;;  %v3178_v24 = vld [vmem:[%s4194_s13 + $0x8] sm:$0xf]  ;;  %v3520_v25 = vld [vmem:[%s4194_s13 + $0x14] sm:$0xf0]  ;;  %v3171_v30 = vor.u32 %v3519_v20, %v3170_v17 }
  0x39   : > { %726 = vmatpush.bf16.msra.mxu2 %v3227_v58  ;;  %775 = vmatpush.bf16.msra.mxu3 %v3231_v62  ;;  %v3518_v26 = vld [vmem:[%s4194_s13 + $0xc] sm:$0xf]  ;;  %v3180_v27 = vld [vmem:[%s4194_s13 + $0x18] sm:$0xf0]  ;;  %v3412_v28 = vld [vmem:[%s4201_s30 + $0xe0] sm:$0xf]  ;;  %v3175_v33 = vor.u32 %v3517_v21, %v3172_v22  ;;  %v3179_v34 = vor.u32 %v3520_v25, %v3178_v24 }
  0x3a   : > { %v3579_v29 = vld [vmem:[%s4201_s30 + $0xec] sm:$0xf0]  ;;  %v3577_v31 = vld [vmem:[%s4201_s30 + $0xe4] sm:$0xf]  ;;  %v3414_v32 = vld [vmem:[%s4201_s30 + $0xf0] sm:$0xf0]  ;;  %v3183_v36 = vor.u32 %v3518_v26, %v3180_v27 }
  0x3b   : > { %629 = vmatpush.bf16.msra.mxu0 %v3203_v4  ;;  %v3509_v35 = vld [vmem:[%s5276_s0] sm:$0xff]  ;;  %v4278_v37 = vor.u32 %v3579_v29, %v3412_v28  ;;  %v3420_v38 = vld [vmem:[%s4201_s30 + $0xe8] sm:$0xf]  ;;  %v3580_v39 = vld [vmem:[%s4201_s30 + $0xf4] sm:$0xf0]  ;;  %v4283_v41 = vor.u32 %v3577_v31, %v3414_v32  ;;  %s920_s15 = smul.u32 112, %s4071_s18 }
  0x3c   : > { %678 = vmatpush.bf16.msra.mxu1 %v3207_v5  ;;  %v3578_v40 = vld [vmem:[%s4201_s30 + $0xec] sm:$0xf]  ;;  %v3422_v42 = vld [vmem:[%s4201_s30 + $0xf8] sm:$0xf0]  ;;  %v3396_v43 = vld [vmem:[%s4201_s30 + $0xc0] sm:$0xf]  ;;  %v4290_v47 = vor.u32 %v3580_v39, %v3420_v38 }
  0x3d   : > { %727 = vmatpush.bf16.msra.mxu2 %v3211_v6  ;;  %776 = vmatpush.bf16.msra.mxu3 %v3215_v10  ;;  %v3575_v44 = vld [vmem:[%s4201_s30 + $0xcc] sm:$0xf0]  ;;  %v3573_v45 = vld [vmem:[%s4201_s30 + $0xc4] sm:$0xf]  ;;  %v3398_v46 = vld [vmem:[%s4201_s30 + $0xd0] sm:$0xf0]  ;;  %v4293_v48 = vor.u32 %v3578_v40, %v3422_v42 }
  0x3e   : > { %v4295_v49 = vor.u32 %v3575_v44, %v3396_v43  ;;  %v3404_v50 = vld [vmem:[%s4201_s30 + $0xc8] sm:$0xf]  ;;  %v3576_v51 = vld [vmem:[%s4201_s30 + $0xd4] sm:$0xf0]  ;;  %v4300_v52 = vor.u32 %v3573_v45, %v3398_v46  ;;  %v3574_v54 = vld [vmem:[%s4201_s30 + $0xcc] sm:$0xf] }
  0x3f   : > { %630 = vmatpush.bf16.msra.mxu0 %v3187_v16  ;;  %v4303_v53 = vor.u32 %v3576_v51, %v3404_v50  ;;  %v3406_v55 = vld [vmem:[%s4201_s30 + $0xd8] sm:$0xf0]  ;;  %v3380_v56 = vld [vmem:[%s4201_s30 + $0xa0] sm:$0xf]  ;;  %v3571_v58 = vld [vmem:[%s4201_s30 + $0xac] sm:$0xf0] }
  0x40   : > { %679 = vmatpush.bf16.msra.mxu1 %v3191_v18  ;;  %v4310_v57 = vor.u32 %v3574_v54, %v3406_v55  ;;  %v3569_v59 = vld [vmem:[%s4201_s30 + $0xa4] sm:$0xf]  ;;  %v3382_v60 = vld [vmem:[%s4201_s30 + $0xb0] sm:$0xf0]  ;;  %v4316_v61 = vor.u32 %v3571_v58, %v3380_v56  ;;  %v3388_v63 = vld [vmem:[%s4201_s30 + $0xa8] sm:$0xf] }
  0x41   : > { %728 = vmatpush.bf16.msra.mxu2 %v3195_v19  ;;  %777 = vmatpush.bf16.msra.mxu3 %v3199_v23  ;;  %v4318_v62 = vor.u32 %v3569_v59, %v3382_v60  ;;  %v3572_v0 = vld [vmem:[%s4201_s30 + $0xb4] sm:$0xf0]  ;;  %v3510_v2 = vld [vmem:[%s5276_s0 + $0x8] sm:$0xff]  ;;  %v3390_v4 = vld [vmem:[%s4201_s30 + $0xb8] sm:$0xf0]  ;;  %s4597_s21 = sshra.s32 %s920_s15, 3 }
  0x42   : > { %v4323_v1 = vor.u32 %v3572_v0, %v3388_v63  ;;  %v3570_v3 = vld [vmem:[%s4201_s30 + $0xac] sm:$0xf]  ;;  %v3364_v5 = vld [vmem:[%s4201_s30 + $0x80] sm:$0xf]  ;;  %v3567_v7 = vld [vmem:[%s4201_s30 + $0x8c] sm:$0xf0] }
  0x43   : > { %631 = vmatpush.bf16.msra.mxu0 %v3171_v30  ;;  %v4335_v6 = vor.u32 %v3570_v3, %v3390_v4  ;;  %v3565_v8 = vld [vmem:[%s4201_s30 + $0x84] sm:$0xf]  ;;  %v3366_v9 = vld [vmem:[%s4201_s30 + $0x90] sm:$0xf0]  ;;  %v4340_v10 = vor.u32 %v3567_v7, %v3364_v5  ;;  %v3372_v12 = vld [vmem:[%s4201_s30 + $0x88] sm:$0xf] }
  0x44   : > { %680 = vmatpush.bf16.msra.mxu1 %v3175_v33  ;;  %v4342_v11 = vor.u32 %v3565_v8, %v3366_v9  ;;  %v3568_v13 = vld [vmem:[%s4201_s30 + $0x94] sm:$0xf0]  ;;  %v3511_v15 = vld [vmem:[%s5276_s0 + $0x10] sm:$0xff]  ;;  %v3566_v16 = vld [vmem:[%s4201_s30 + $0x8c] sm:$0xf]  ;;  %s3581_s23 = sshll.u32 %s4597_s21, 4 }
  0x45   : > { %729 = vmatpush.bf16.msra.mxu2 %v3179_v34  ;;  %778 = vmatpush.bf16.msra.mxu3 %v3183_v36  ;;  %v4347_v14 = vor.u32 %v3568_v13, %v3372_v12  ;;  %v3374_v17 = vld [vmem:[%s4201_s30 + $0x98] sm:$0xf0]  ;;  %v3348_v18 = vld [vmem:[%s4201_s30 + $0x60] sm:$0xf]  ;;  %v3563_v20 = vld [vmem:[%s4201_s30 + $0x6c] sm:$0xf0] }
  0x46   : > { %632 = vmatmul.bf16.vlgmr.msra.gmra.mxu0 %v3509_v35  ;;  %v4358_v19 = vor.u32 %v3566_v16, %v3374_v17  ;;  %v3561_v21 = vld [vmem:[%s4201_s30 + $0x64] sm:$0xf]  ;;  %v3350_v22 = vld [vmem:[%s4201_s30 + $0x70] sm:$0xf0]  ;;  %v4363_v23 = vor.u32 %v3563_v20, %v3348_v18  ;;  %v3356_v25 = vld [vmem:[%s4201_s30 + $0x68] sm:$0xf] }
  0x47   : > { %1091 = vmatpush.bf16.msrb.mxu0 %v4278_v37  ;;  %681 = vmatmul.bf16.vlgmr.msra.gmra.mxu1 %v3509_v35  ;;  %v4365_v24 = vor.u32 %v3561_v21, %v3350_v22  ;;  %v3564_v26 = vld [vmem:[%s4201_s30 + $0x74] sm:$0xf0]  ;;  %v3562_v29 = vld [vmem:[%s4201_s30 + $0x6c] sm:$0xf]  ;;  %v3358_v30 = vld [vmem:[%s4201_s30 + $0x78] sm:$0xf0] }
  0x48   : > { %1105 = vmatpush.bf16.msrb.mxu1 %v4283_v41  ;;  %730 = vmatmul.bf16.vlgmr.msra.gmra.mxu2 %v3509_v35  ;;  %v4370_v27 = vor.u32 %v3564_v26, %v3356_v25  ;;  %v3512_v28 = vld [vmem:[%s5276_s0 + $0x18] sm:$0xff]  ;;  %v3332_v31 = vld [vmem:[%s4201_s30 + $0x40] sm:$0xf]  ;;  %v4381_v32 = vor.u32 %v3562_v29, %v3358_v30  ;;  %v3559_v33 = vld [vmem:[%s4201_s30 + $0x4c] sm:$0xf0]  ;;  %s925_s25 = scalar_lea.vmem [#allocation2], %s3581_s23 }
  0x49   : > { %779 = vmatmul.bf16.vlgmr.msra.gmra.mxu3 %v3509_v35  ;;  %1119 = vmatpush.bf16.msrb.mxu2 %v4290_v47  ;;  %v3557_v34 = vld [vmem:[%s4201_s30 + $0x44] sm:$0xf]  ;;  %v3334_v35 = vld [vmem:[%s4201_s30 + $0x50] sm:$0xf0]  ;;  %v4386_v36 = vor.u32 %v3559_v33, %v3332_v31  ;;  %v3340_v39 = vld [vmem:[%s4201_s30 + $0x48] sm:$0xf] }
  0x4a   : > { %1133 = vmatpush.bf16.msrb.mxu3 %v4293_v48  ;;  %v4388_v38 = vor.u32 %v3557_v34, %v3334_v35  ;;  %v3560_v40 = vld [vmem:[%s4201_s30 + $0x54] sm:$0xf0]  ;;  %v3513_v43 = vld [vmem:[%s5276_s0 + $0x20] sm:$0xff]  ;;  %v3558_v44 = vld [vmem:[%s4201_s30 + $0x4c] sm:$0xf]  ;;  %v4083_v35 = vmov 0.0|0.0  }
  0x4b   : > { %1092 = vmatpush.bf16.msrb.mxu0 %v4295_v49  ;;  %v4393_v42 = vor.u32 %v3560_v40, %v3340_v39  ;;  %v3342_v45 = vld [vmem:[%s4201_s30 + $0x58] sm:$0xf0]  ;;  %v3316_v46 = vld [vmem:[%s4201_s30 + $0x20] sm:$0xf]  ;;  %v3555_v51 = vld [vmem:[%s4201_s30 + $0x2c] sm:$0xf0] }
  0x4c   : > { %1106 = vmatpush.bf16.msrb.mxu1 %v4300_v52  ;;  %v4404_v50 = vor.u32 %v3558_v44, %v3342_v45  ;;  %v3553_v54 = vld [vmem:[%s4201_s30 + $0x24] sm:$0xf]  ;;  %v3318_v55 = vld [vmem:[%s4201_s30 + $0x30] sm:$0xf0]  ;;  %v4409_v56 = vor.u32 %v3555_v51, %v3316_v46  ;;  %v3324_v59 = vld [vmem:[%s4201_s30 + $0x28] sm:$0xf] }
  0x4d   : > { %1120 = vmatpush.bf16.msrb.mxu2 %v4303_v53  ;;  %v4411_v58 = vor.u32 %v3553_v54, %v3318_v55  ;;  %v3556_v60 = vld [vmem:[%s4201_s30 + $0x34] sm:$0xf0]  ;;  %v3514_v0 = vld [vmem:[%s5276_s0 + $0x28] sm:$0xff]  ;;  %v3326_v3 = vld [vmem:[%s4201_s30 + $0x38] sm:$0xf0]  ;;  %s3134_s6 = sshll.u32 %s4190_s10, 6 }
  0x4e   : > { %1134 = vmatpush.bf16.msrb.mxu3 %v4310_v57  ;;  %v4416_v63 = vor.u32 %v3556_v60, %v3324_v59  ;;  %v3300_v4 = vld [vmem:[%s4201_s30] sm:$0xf]  ;;  %v3551_v7 = vld [vmem:[%s4201_s30 + $0xc] sm:$0xf0]  ;;  %v3549_v8 = vld [vmem:[%s4201_s30 + $0x4] sm:$0xf] }
  0x4f   : > { %1093 = vmatpush.bf16.msrb.mxu0 %v4316_v61  ;;  %v3302_v9 = vld [vmem:[%s4201_s30 + $0x10] sm:$0xf0]  ;;  %v4432_v12 = vor.u32 %v3551_v7, %v3300_v4  ;;  %v3552_v16 = vld [vmem:[%s4201_s30 + $0x14] sm:$0xf0]  ;;  %v3550_v20 = vld [vmem:[%s4201_s30 + $0xc] sm:$0xf] }
  0x50   : > { %1107 = vmatpush.bf16.msrb.mxu1 %v4318_v62  ;;  %v4434_v13 = vor.u32 %v3549_v8, %v3302_v9  ;;  %v3515_v18 = vld [vmem:[%s5276_s0 + $0x30] sm:$0xff]  ;;  %v3310_v21 = vld [vmem:[%s4201_s30 + $0x18] sm:$0xf0]  ;;  %s3432_s24 = sshll.u32 %s4597_s21, 2  ;;  %s4669_s7 = scalar_lea.vmem [#allocation9], %s3134_s6 }
  0x51   : > { %1121 = vmatpush.bf16.msrb.mxu2 %v4323_v1  ;;  %5294 = vst [vmem:[#allocation12_spill] sm:$0xff] %v4432_v12  ;;  %v4455_v22 = vor.u32 %v3550_v20, %v3310_v21  ;;  %v3516_v25 = vld [vmem:[%s5276_s0 + $0x38] sm:$0xff]  ;;  %s1292_s8 = scalar_lea.vmem %s4669_s7, %s3432_s24 [#allocation9]  ;;  %s3641_s10 = smul.u32 80, %s4071_s18 }
  0x52   : > { %1135 = vmatpush.bf16.msrb.mxu3 %v4335_v6  ;;  %5295 = vst [vmem:[#allocation13_spill] sm:$0xff] %v4434_v13  ;;  %s3642_s5 = smul.u32 48, %s4071_s18  ;;  %s3588_s6 = sshll.u32 %s4071_s18, 4 }
  0x53   : > { %1094 = vmatpush.bf16.msrb.mxu0 %v4340_v10  ;;  %5297 = vst [vmem:[#allocation15_spill] sm:$0xff] %v4455_v22  ;;  %s4705_s9 = sadd.s32 16, %s3641_s10  ;;  %s4875_s24 = sadd.s32 48, %s3588_s6 }
  0x54   : > { %1108 = vmatpush.bf16.msrb.mxu1 %v4342_v11  ;;  %s1298_s11 = sshra.s32 %s4705_s9, 3  ;;  %s4790_s12 = sadd.s32 32, %s3642_s5 }
  0x55   : > { %1122 = vmatpush.bf16.msrb.mxu2 %v4347_v14  ;;  %s3584_s13 = sshll.u32 %s1298_s11, 4 }
  0x56   : > { %637 = vmatmul.bf16.gmra.mxu0 %v3510_v2  ;;  %1136 = vmatpush.bf16.msrb.mxu3 %v4358_v19  ;;  %s1302_s29 = scalar_lea.vmem [#allocation2], %s3584_s13 }
  0x57   : > { %686 = vmatmul.bf16.gmra.mxu1 %v3510_v2  ;;  %1095 = vmatpush.bf16.msrb.mxu0 %v4363_v23 }
  0x58   : > { %735 = vmatmul.bf16.gmra.mxu2 %v3510_v2  ;;  %1109 = vmatpush.bf16.msrb.mxu1 %v4365_v24 }
  0x59   : > { %784 = vmatmul.bf16.gmra.mxu3 %v3510_v2  ;;  %1123 = vmatpush.bf16.msrb.mxu2 %v4370_v27  ;;  %v3554_v2 = vld [vmem:[%s4201_s30 + $0x2c] sm:$0xf] }
  0x5a   : > { %1137 = vmatpush.bf16.msrb.mxu3 %v4381_v32  ;;  %v4427_v5 = vor.u32 %v3554_v2, %v3326_v3 }
  0x5b   : > { %1096 = vmatpush.bf16.msrb.mxu0 %v4386_v36 }
  0x5c   : > { %1110 = vmatpush.bf16.msrb.mxu1 %v4388_v38 }
  0x5d   : > { %1124 = vmatpush.bf16.msrb.mxu2 %v4393_v42 }
  0x5e   : > { %1138 = vmatpush.bf16.msrb.mxu3 %v4404_v50 }
  0x5f   : > { %1097 = vmatpush.bf16.msrb.mxu0 %v4409_v56 }
  0x60   : > { %1111 = vmatpush.bf16.msrb.mxu1 %v4411_v58 }
  0x61   : > { %1125 = vmatpush.bf16.msrb.mxu2 %v4416_v63 }
  0x62   : > { %1139 = vmatpush.bf16.msrb.mxu3 %v4427_v5 }
  0x63   : > { %1098 = vmatpush.bf16.msrb.mxu0 %v4432_v12 }
  0x64   : > { %1112 = vmatpush.bf16.msrb.mxu1 %v4434_v13 }
  0x66   : > { %642 = vmatmul.bf16.gmra.mxu0 %v3511_v15  ;;  %1140 = vmatpush.bf16.msrb.mxu3 %v4455_v22 }
  0x67   : > { %691 = vmatmul.bf16.gmra.mxu1 %v3511_v15  ;;  %1313 = vmatpush.bf16.msra.mxu0 %v4278_v37 }
  0x68   : > { %740 = vmatmul.bf16.gmra.mxu2 %v3511_v15  ;;  %1327 = vmatpush.bf16.msra.mxu1 %v4283_v41 }
  0x69   : > { %789 = vmatmul.bf16.gmra.mxu3 %v3511_v15  ;;  %v3308_v15 = vld [vmem:[%s4201_s30 + $0x8] sm:$0xf]  ;;  %s342_s30 = scalar_select %p341_p1, %s4071_s18, 1 }
  0x6a   : > { %v4439_v17 = vor.u32 %v3552_v16, %v3308_v15  ;;  %1355 = vmatpush.bf16.msra.mxu3 %v4293_v48 }
  0x6b   : > { %1314 = vmatpush.bf16.msra.mxu0 %v4295_v49  ;;  %s3135_s26 = sshll.u32 %s342_s30, 2  ;;  %s3442_s30 = sshll.u32 %s1298_s11, 2 }
  0x6c   : > { %5296 = vst [vmem:[#allocation14_spill] sm:$0xff] %v4439_v17  ;;  %1126 = vmatpush.bf16.msrb.mxu2 %v4439_v17  ;;  %1328 = vmatpush.bf16.msra.mxu1 %v4300_v52  ;;  %s344_s14 = scalar_lea.vmem %s5278_s2, %s3135_s26  ;;  %s1514_s26 = scalar_lea.vmem %s4669_s7, %s3442_s30 [#allocation9] }
  0x6d   : > { %v406_v26 = vld [vmem:[%s344_s14] sm:$0xf]  ;;  %s1520_s14 = sshra.s32 %s4790_s12, 3 }
  0x6e   : > { %1356 = vmatpush.bf16.msra.mxu3 %v4310_v57  ;;  %v4493_v29 = vperm.slane %v406_v26, 1  ;;  %v4498_v40 = vperm.slane %v406_v26, 2  ;;  %s3587_s15 = sshll.u32 %s1520_s14, 4  ;;  %s3452_s23 = sshll.u32 %s1520_s14, 2 }
  0x6f   : > { %1315 = vmatpush.bf16.msra.mxu0 %v4316_v61  ;;  %s1524_s21 = scalar_lea.vmem [#allocation2], %s3587_s15 }
  0x70   : > { %1341 = vmatpush.bf16.msra.mxu2 %v4290_v47  ;;  %1329 = vmatpush.bf16.msra.mxu1 %v4318_v62 }
  0x72   : > { %1357 = vmatpush.bf16.msra.mxu3 %v4335_v6 }
  0x73   : > { %1316 = vmatpush.bf16.msra.mxu0 %v4340_v10 }
  0x74   : > { %1342 = vmatpush.bf16.msra.mxu2 %v4303_v53  ;;  %1330 = vmatpush.bf16.msra.mxu1 %v4342_v11 }
  0x76   : > { %647 = vmatmul.bf16.gmra.mxu0 %v3512_v28  ;;  %1358 = vmatpush.bf16.msra.mxu3 %v4358_v19 }
  0x77   : > { %696 = vmatmul.bf16.gmra.mxu1 %v3512_v28  ;;  %1317 = vmatpush.bf16.msra.mxu0 %v4363_v23 }
  0x78   : > { %745 = vmatmul.bf16.gmra.mxu2 %v3512_v28  ;;  %1331 = vmatpush.bf16.msra.mxu1 %v4365_v24 }
  0x79   : > { %794 = vmatmul.bf16.gmra.mxu3 %v3512_v28  ;;  %1343 = vmatpush.bf16.msra.mxu2 %v4323_v1  ;;  %v4491_v28 = vperm.slane %v406_v26, 0 }
  0x7a   : > { %1359 = vmatpush.bf16.msra.mxu3 %v4381_v32 }
  0x7b   : > { %1318 = vmatpush.bf16.msra.mxu0 %v4386_v36 }
  0x7c   : > { %1332 = vmatpush.bf16.msra.mxu1 %v4388_v38 }
  0x7d   : > { %1344 = vmatpush.bf16.msra.mxu2 %v4347_v14 }
  0x7e   : > { %1360 = vmatpush.bf16.msra.mxu3 %v4404_v50 }
  0x7f   : > { %1319 = vmatpush.bf16.msra.mxu0 %v4409_v56 }
  0x80   : > { %1333 = vmatpush.bf16.msra.mxu1 %v4411_v58 }
  0x81   : > { %1345 = vmatpush.bf16.msra.mxu2 %v4370_v27 }
  0x82   : > { %1361 = vmatpush.bf16.msra.mxu3 %v4427_v5 }
  0x83   : > { %1320 = vmatpush.bf16.msra.mxu0 %v4432_v12 }
  0x84   : > { %1334 = vmatpush.bf16.msra.mxu1 %v4434_v13 }
  0x85   : > { %1346 = vmatpush.bf16.msra.mxu2 %v4393_v42 }
  0x86   : > { %652 = vmatmul.bf16.gmra.mxu0 %v3513_v43  ;;  %1362 = vmatpush.bf16.msra.mxu3 %v4455_v22 }
  0x87   : > { %701 = vmatmul.bf16.gmra.mxu1 %v3513_v43 }
  0x88   : > { %750 = vmatmul.bf16.gmra.mxu2 %v3513_v43 }
  0x89   : > { %799 = vmatmul.bf16.gmra.mxu3 %v3513_v43  ;;  %1347 = vmatpush.bf16.msra.mxu2 %v4416_v63  ;;  %v4500_v43 = vperm.slane %v406_v26, 3 }
  0x8d   : > { %1348 = vmatpush.bf16.msra.mxu2 %v4439_v17 }
  0x96   : > { %657 = vmatmul.bf16.gmra.mxu0 %v3514_v0 }
  0x97   : > { %706 = vmatmul.bf16.gmra.mxu1 %v3514_v0 }
  0x98   : > { %755 = vmatmul.bf16.gmra.mxu2 %v3514_v0 }
  0x99   : > { %804 = vmatmul.bf16.gmra.mxu3 %v3514_v0 }
  0xa6   : > { %662 = vmatmul.bf16.gmra.mxu0 %v3515_v18 }
  0xa7   : > { %711 = vmatmul.bf16.gmra.mxu1 %v3515_v18 }
  0xa8   : > { %760 = vmatmul.bf16.gmra.mxu2 %v3515_v18 }
  0xa9   : > { %809 = vmatmul.bf16.gmra.mxu3 %v3515_v18 }
  0xb6   : > { %667 = vmatmul.bf16.gmra.mxu0 %v3516_v25 }
  0xb7   : > { %716 = vmatmul.bf16.gmra.mxu1 %v3516_v25 }
  0xb8   : > { %765 = vmatmul.bf16.gmra.mxu2 %v3516_v25 }
  0xb9   : > { %814 = vmatmul.bf16.gmra.mxu3 %v3516_v25 }
  0xc3   : > { %v633_v30 = vpop.f32.mrf.mxu0 }
  0xc4   : > { %v634_v31 = vadd.f32 %v633_v30, %v4491_v28  ;;  %v682_v33 = vpop.f32.mrf.mxu1 }
  0xc5   : > { %v683_v34 = vadd.f32 %v682_v33, %v4493_v29 }
  0xc6   : > { %1099 = vmatmul.bf16.vlgmr.msrb.gmra.mxu0 %v4083_v35 }
  0xc7   : > { %v820_v39 = vpack.c.bf16 %v683_v34, %v634_v31  ;;  %1113 = vmatmul.bf16.vlgmr.msrb.gmra.mxu1 %v4083_v35  ;;  %1535 = vmatpush.bf16.msrb.mxu0 %v4278_v37 }
  0xc8   : > { %1127 = vmatmul.bf16.vlgmr.msrb.gmra.mxu2 %v4083_v35  ;;  %1549 = vmatpush.bf16.msrb.mxu1 %v4283_v41 }
  0xc9   : > { %1141 = vmatmul.bf16.vlgmr.msrb.gmra.mxu3 %v4083_v35  ;;  %852 = vst [vmem:[#allocation2] sm:$0xff] %v820_v39  ;;  %1563 = vmatpush.bf16.msrb.mxu2 %v4290_v47 }
  0xca   : > { %1577 = vmatpush.bf16.msrb.mxu3 %v4293_v48 }
  0xcb   : > { %v731_v44 = vpop.f32.mrf.mxu2  ;;  %v635_v51 = vpop.f32.mrf.mxu0  ;;  %1536 = vmatpush.bf16.msrb.mxu0 %v4295_v49 }
  0xcc   : > { %v732_v45 = vadd.f32 %v731_v44, %v4498_v40  ;;  %v780_v46 = vpop.f32.mrf.mxu3  ;;  %v636_v55 = vadd.f32 %v635_v51, %v4491_v28  ;;  %v684_v59 = vpop.f32.mrf.mxu1  ;;  %1550 = vmatpush.bf16.msrb.mxu1 %v4300_v52 }
  0xcd   : > { %v781_v54 = vadd.f32 %v780_v46, %v4500_v43  ;;  %v685_v60 = vadd.f32 %v684_v59, %v4493_v29  ;;  %1564 = vmatpush.bf16.msrb.mxu2 %v4303_v53 }
  0xce   : > { %1578 = vmatpush.bf16.msrb.mxu3 %v4310_v57 }
  0xcf   : > { %v821_v0 = vpack.c.bf16 %v781_v54, %v732_v45  ;;  %v822_v2 = vpack.c.bf16 %v685_v60, %v636_v55  ;;  %1537 = vmatpush.bf16.msrb.mxu0 %v4316_v61 }
  0xd0   : > { %1551 = vmatpush.bf16.msrb.mxu1 %v4318_v62 }
  0xd1   : > { %853 = vst [vmem:[#allocation2 + $0x8] sm:$0xff] %v821_v0  ;;  %1565 = vmatpush.bf16.msrb.mxu2 %v4323_v1 }
  0xd2   : > { %854 = vst [vmem:[#allocation2 + $0x10] sm:$0xff] %v822_v2  ;;  %1579 = vmatpush.bf16.msrb.mxu3 %v4335_v6 }
  0xd3   : > { %v733_v3 = vpop.f32.mrf.mxu2  ;;  %v638_v8 = vpop.f32.mrf.mxu0  ;;  %1538 = vmatpush.bf16.msrb.mxu0 %v4340_v10 }
  0xd4   : > { %v734_v4 = vadd.f32 %v733_v3, %v4498_v40  ;;  %v782_v7 = vpop.f32.mrf.mxu3  ;;  %v639_v15 = vadd.f32 %v638_v8, %v4491_v28  ;;  %v687_v16 = vpop.f32.mrf.mxu1  ;;  %1552 = vmatpush.bf16.msrb.mxu1 %v4342_v11 }
  0xd5   : > { %v783_v9 = vadd.f32 %v782_v7, %v4500_v43  ;;  %v688_v18 = vadd.f32 %v687_v16, %v4493_v29  ;;  %1566 = vmatpush.bf16.msrb.mxu2 %v4347_v14 }
  0xd6   : > { %1580 = vmatpush.bf16.msrb.mxu3 %v4358_v19 }
  0xd7   : > { %v823_v20 = vpack.c.bf16 %v783_v9, %v734_v4  ;;  %v824_v21 = vpack.c.bf16 %v688_v18, %v639_v15  ;;  %1539 = vmatpush.bf16.msrb.mxu0 %v4363_v23 }
  0xd8   : > { %1553 = vmatpush.bf16.msrb.mxu1 %v4365_v24 }
  0xd9   : > { %855 = vst [vmem:[#allocation2 + $0x18] sm:$0xff] %v823_v20  ;;  %1567 = vmatpush.bf16.msrb.mxu2 %v4370_v27 }
  0xda   : > { %856 = vst [vmem:[#allocation2 + $0x20] sm:$0xff] %v824_v21  ;;  %1581 = vmatpush.bf16.msrb.mxu3 %v4381_v32 }
  0xdb   : > { %v736_v25 = vpop.f32.mrf.mxu2  ;;  %v640_v31 = vpop.f32.mrf.mxu0  ;;  %1540 = vmatpush.bf16.msrb.mxu0 %v4386_v36 }
  0xdc   : > { %v737_v26 = vadd.f32 %v736_v25, %v4498_v40  ;;  %v785_v30 = vpop.f32.mrf.mxu3  ;;  %v641_v34 = vadd.f32 %v640_v31, %v4491_v28  ;;  %v689_v35 = vpop.f32.mrf.mxu1  ;;  %1554 = vmatpush.bf16.msrb.mxu1 %v4388_v38 }
  0xdd   : > { %v786_v33 = vadd.f32 %v785_v30, %v4500_v43  ;;  %v690_v39 = vadd.f32 %v689_v35, %v4493_v29  ;;  %1568 = vmatpush.bf16.msrb.mxu2 %v4393_v42 }
  0xde   : > { %1582 = vmatpush.bf16.msrb.mxu3 %v4404_v50 }
  0xdf   : > { %v825_v44 = vpack.c.bf16 %v786_v33, %v737_v26  ;;  %v826_v45 = vpack.c.bf16 %v690_v39, %v641_v34  ;;  %1541 = vmatpush.bf16.msrb.mxu0 %v4409_v56 }
  0xe0   : > { %1555 = vmatpush.bf16.msrb.mxu1 %v4411_v58 }
  0xe1   : > { %857 = vst [vmem:[#allocation2 + $0x28] sm:$0xff] %v825_v44  ;;  %1569 = vmatpush.bf16.msrb.mxu2 %v4416_v63 }
  0xe2   : > { %858 = vst [vmem:[#allocation2 + $0x30] sm:$0xff] %v826_v45  ;;  %1583 = vmatpush.bf16.msrb.mxu3 %v4427_v5 }
  0xe3   : > { %v738_v46 = vpop.f32.mrf.mxu2  ;;  %v643_v55 = vpop.f32.mrf.mxu0  ;;  %1542 = vmatpush.bf16.msrb.mxu0 %v4432_v12 }
  0xe4   : > { %v739_v51 = vadd.f32 %v738_v46, %v4498_v40  ;;  %v787_v54 = vpop.f32.mrf.mxu3  ;;  %v644_v60 = vadd.f32 %v643_v55, %v4491_v28  ;;  %v692_v0 = vpop.f32.mrf.mxu1  ;;  %1556 = vmatpush.bf16.msrb.mxu1 %v4434_v13 }
  0xe5   : > { %v788_v59 = vadd.f32 %v787_v54, %v4500_v43  ;;  %v693_v2 = vadd.f32 %v692_v0, %v4493_v29  ;;  %1570 = vmatpush.bf16.msrb.mxu2 %v4439_v17 }
  0xe6   : > { %1584 = vmatpush.bf16.msrb.mxu3 %v4455_v22 }
  0xe7   : > { %v827_v3 = vpack.c.bf16 %v788_v59, %v739_v51  ;;  %v828_v4 = vpack.c.bf16 %v693_v2, %v644_v60 }
  0xe9   : > { %859 = vst [vmem:[#allocation2 + $0x38] sm:$0xff] %v827_v3 }
  0xea   : > { %860 = vst [vmem:[#allocation2 + $0x40] sm:$0xff] %v828_v4 }
  0xeb   : > { %v741_v7 = vpop.f32.mrf.mxu2  ;;  %v645_v15 = vpop.f32.mrf.mxu0 }
  0xec   : > { %v742_v8 = vadd.f32 %v741_v7, %v4498_v40  ;;  %v790_v9 = vpop.f32.mrf.mxu3  ;;  %v646_v18 = vadd.f32 %v645_v15, %v4491_v28  ;;  %v694_v20 = vpop.f32.mrf.mxu1 }
  0xed   : > { %v791_v16 = vadd.f32 %v790_v9, %v4500_v43  ;;  %v695_v21 = vadd.f32 %v694_v20, %v4493_v29 }
  0xef   : > { %v829_v25 = vpack.c.bf16 %v791_v16, %v742_v8  ;;  %v830_v26 = vpack.c.bf16 %v695_v21, %v646_v18 }
  0xf1   : > { %861 = vst [vmem:[#allocation2 + $0x48] sm:$0xff] %v829_v25 }
  0xf2   : > { %862 = vst [vmem:[#allocation2 + $0x50] sm:$0xff] %v830_v26 }
  0xf3   : > { %v743_v30 = vpop.f32.mrf.mxu2  ;;  %v648_v34 = vpop.f32.mrf.mxu0 }
  0xf4   : > { %v744_v31 = vadd.f32 %v743_v30, %v4498_v40  ;;  %v792_v33 = vpop.f32.mrf.mxu3  ;;  %v649_v39 = vadd.f32 %v648_v34, %v4491_v28  ;;  %v697_v44 = vpop.f32.mrf.mxu1 }
  0xf5   : > { %v793_v35 = vadd.f32 %v792_v33, %v4500_v43  ;;  %v698_v45 = vadd.f32 %v697_v44, %v4493_v29 }
  0xf7   : > { %v831_v46 = vpack.c.bf16 %v793_v35, %v744_v31  ;;  %v832_v51 = vpack.c.bf16 %v698_v45, %v649_v39 }
  0xf9   : > { %863 = vst [vmem:[#allocation2 + $0x58] sm:$0xff] %v831_v46 }
  0xfa   : > { %864 = vst [vmem:[#allocation2 + $0x60] sm:$0xff] %v832_v51 }
  0xfb   : > { %v746_v54 = vpop.f32.mrf.mxu2  ;;  %v650_v60 = vpop.f32.mrf.mxu0 }
  0xfc   : > { %v747_v55 = vadd.f32 %v746_v54, %v4498_v40  ;;  %v795_v59 = vpop.f32.mrf.mxu3  ;;  %v651_v2 = vadd.f32 %v650_v60, %v4491_v28  ;;  %v699_v3 = vpop.f32.mrf.mxu1 }
  0xfd   : > { %v796_v0 = vadd.f32 %v795_v59, %v4500_v43  ;;  %v700_v4 = vadd.f32 %v699_v3, %v4493_v29 }
  0xff   : > { %v833_v7 = vpack.c.bf16 %v796_v0, %v747_v55  ;;  %v834_v8 = vpack.c.bf16 %v700_v4, %v651_v2 }
 0x101   : > { %865 = vst [vmem:[#allocation2 + $0x68] sm:$0xff] %v833_v7 }
 0x102   : > { %866 = vst [vmem:[#allocation2 + $0x70] sm:$0xff] %v834_v8 }
 0x103   : > { %v748_v9 = vpop.f32.mrf.mxu2  ;;  %v653_v18 = vpop.f32.mrf.mxu0 }
 0x104   : > { %v749_v15 = vadd.f32 %v748_v9, %v4498_v40  ;;  %v797_v16 = vpop.f32.mrf.mxu3  ;;  %v654_v21 = vadd.f32 %v653_v18, %v4491_v28  ;;  %v702_v25 = vpop.f32.mrf.mxu1 }
 0x105   : > { %v798_v20 = vadd.f32 %v797_v16, %v4500_v43  ;;  %v703_v26 = vadd.f32 %v702_v25, %v4493_v29 }
 0x107   : > { %v835_v30 = vpack.c.bf16 %v798_v20, %v749_v15  ;;  %v836_v31 = vpack.c.bf16 %v703_v26, %v654_v21 }
 0x109   : > { %867 = vst [vmem:[#allocation2 + $0x78] sm:$0xff] %v835_v30 }
 0x10a   : > { %868 = vst [vmem:[#allocation2 + $0x80] sm:$0xff] %v836_v31 }
 0x10b   : > { %v751_v33 = vpop.f32.mrf.mxu2  ;;  %v655_v39 = vpop.f32.mrf.mxu0 }
 0x10c   : > { %v752_v34 = vadd.f32 %v751_v33, %v4498_v40  ;;  %v800_v35 = vpop.f32.mrf.mxu3  ;;  %v656_v45 = vadd.f32 %v655_v39, %v4491_v28  ;;  %v704_v46 = vpop.f32.mrf.mxu1 }
 0x10d   : > { %v801_v44 = vadd.f32 %v800_v35, %v4500_v43  ;;  %v705_v51 = vadd.f32 %v704_v46, %v4493_v29 }
 0x10f   : > { %v837_v54 = vpack.c.bf16 %v801_v44, %v752_v34  ;;  %v838_v55 = vpack.c.bf16 %v705_v51, %v656_v45 }
 0x111   : > { %869 = vst [vmem:[#allocation2 + $0x88] sm:$0xff] %v837_v54 }
 0x112   : > { %870 = vst [vmem:[#allocation2 + $0x90] sm:$0xff] %v838_v55 }
 0x113   : > { %v753_v59 = vpop.f32.mrf.mxu2  ;;  %v658_v2 = vpop.f32.mrf.mxu0 }
 0x114   : > { %v754_v60 = vadd.f32 %v753_v59, %v4498_v40  ;;  %v802_v0 = vpop.f32.mrf.mxu3  ;;  %v659_v4 = vadd.f32 %v658_v2, %v4491_v28  ;;  %v707_v7 = vpop.f32.mrf.mxu1 }
 0x115   : > { %v803_v3 = vadd.f32 %v802_v0, %v4500_v43  ;;  %v708_v8 = vadd.f32 %v707_v7, %v4493_v29 }
 0x117   : > { %v839_v9 = vpack.c.bf16 %v803_v3, %v754_v60  ;;  %v840_v15 = vpack.c.bf16 %v708_v8, %v659_v4 }
 0x119   : > { %871 = vst [vmem:[#allocation2 + $0x98] sm:$0xff] %v839_v9 }
 0x11a   : > { %872 = vst [vmem:[#allocation2 + $0xa0] sm:$0xff] %v840_v15 }
 0x11b   : > { %v756_v16 = vpop.f32.mrf.mxu2  ;;  %v660_v21 = vpop.f32.mrf.mxu0 }
 0x11c   : > { %v757_v18 = vadd.f32 %v756_v16, %v4498_v40  ;;  %v805_v20 = vpop.f32.mrf.mxu3  ;;  %v661_v26 = vadd.f32 %v660_v21, %v4491_v28  ;;  %v709_v30 = vpop.f32.mrf.mxu1 }
 0x11d   : > { %v806_v25 = vadd.f32 %v805_v20, %v4500_v43  ;;  %v710_v31 = vadd.f32 %v709_v30, %v4493_v29 }
 0x11f   : > { %v841_v33 = vpack.c.bf16 %v806_v25, %v757_v18  ;;  %v842_v34 = vpack.c.bf16 %v710_v31, %v661_v26 }
 0x121   : > { %873 = vst [vmem:[#allocation2 + $0xa8] sm:$0xff] %v841_v33 }
 0x122   : > { %874 = vst [vmem:[#allocation2 + $0xb0] sm:$0xff] %v842_v34 }
 0x123   : > { %v758_v35 = vpop.f32.mrf.mxu2  ;;  %v663_v45 = vpop.f32.mrf.mxu0 }
 0x124   : > { %v759_v39 = vadd.f32 %v758_v35, %v4498_v40  ;;  %v807_v44 = vpop.f32.mrf.mxu3  ;;  %v664_v51 = vadd.f32 %v663_v45, %v4491_v28  ;;  %v712_v54 = vpop.f32.mrf.mxu1 }
 0x125   : > { %v808_v46 = vadd.f32 %v807_v44, %v4500_v43  ;;  %v713_v55 = vadd.f32 %v712_v54, %v4493_v29 }
 0x127   : > { %v843_v59 = vpack.c.bf16 %v808_v46, %v759_v39  ;;  %v844_v60 = vpack.c.bf16 %v713_v55, %v664_v51 }
 0x129   : > { %875 = vst [vmem:[#allocation2 + $0xb8] sm:$0xff] %v843_v59 }
 0x12a   : > { %876 = vst [vmem:[#allocation2 + $0xc0] sm:$0xff] %v844_v60 }
 0x12b   : > { %v761_v0 = vpop.f32.mrf.mxu2  ;;  %v665_v4 = vpop.f32.mrf.mxu0 }
 0x12c   : > { %v762_v2 = vadd.f32 %v761_v0, %v4498_v40  ;;  %v810_v3 = vpop.f32.mrf.mxu3  ;;  %v666_v8 = vadd.f32 %v665_v4, %v4491_v28  ;;  %v714_v9 = vpop.f32.mrf.mxu1 }
 0x12d   : > { %v811_v7 = vadd.f32 %v810_v3, %v4500_v43  ;;  %v715_v15 = vadd.f32 %v714_v9, %v4493_v29 }
 0x12f   : > { %v845_v16 = vpack.c.bf16 %v811_v7, %v762_v2  ;;  %v846_v18 = vpack.c.bf16 %v715_v15, %v666_v8 }
 0x131   : > { %877 = vst [vmem:[#allocation2 + $0xc8] sm:$0xff] %v845_v16 }
 0x132   : > { %878 = vst [vmem:[#allocation2 + $0xd0] sm:$0xff] %v846_v18 }
 0x133   : > { %v763_v20 = vpop.f32.mrf.mxu2  ;;  %v668_v26 = vpop.f32.mrf.mxu0 }
 0x134   : > { %v764_v21 = vadd.f32 %v763_v20, %v4498_v40  ;;  %v812_v25 = vpop.f32.mrf.mxu3  ;;  %v669_v31 = vadd.f32 %v668_v26, %v4491_v28  ;;  %v717_v33 = vpop.f32.mrf.mxu1 }
 0x135   : > { %v813_v30 = vadd.f32 %v812_v25, %v4500_v43  ;;  %v718_v34 = vadd.f32 %v717_v33, %v4493_v29 }
 0x137   : > { %v847_v35 = vpack.c.bf16 %v813_v30, %v764_v21  ;;  %v848_v39 = vpack.c.bf16 %v718_v34, %v669_v31 }
 0x139   : > { %879 = vst [vmem:[#allocation2 + $0xd8] sm:$0xff] %v847_v35 }
 0x13a   : > { %880 = vst [vmem:[#allocation2 + $0xe0] sm:$0xff] %v848_v39 }
 0x13b   : > { %v766_v44 = vpop.f32.mrf.mxu2  ;;  %v670_v51 = vpop.f32.mrf.mxu0 }
 0x13c   : > { %v767_v45 = vadd.f32 %v766_v44, %v4498_v40  ;;  %v815_v46 = vpop.f32.mrf.mxu3  ;;  %v671_v55 = vadd.f32 %v670_v51, %v4491_v28  ;;  %v719_v59 = vpop.f32.mrf.mxu1 }
 0x13d   : > { %v816_v54 = vadd.f32 %v815_v46, %v4500_v43  ;;  %v720_v60 = vadd.f32 %v719_v59, %v4493_v29 }
 0x13f   : > { %v849_v0 = vpack.c.bf16 %v816_v54, %v767_v45  ;;  %v850_v2 = vpack.c.bf16 %v720_v60, %v671_v55 }
 0x141   : > { %881 = vst [vmem:[#allocation2 + $0xe8] sm:$0xff] %v849_v0 }
 0x142   : > { %882 = vst [vmem:[#allocation2 + $0xf0] sm:$0xff] %v850_v2 }
 0x143   : > { %v768_v3 = vpop.f32.mrf.mxu2  ;;  %v1100_v15 = vpop.f32.mrf.mxu0 }
 0x144   : > { %v769_v4 = vadd.f32 %v768_v3, %v4498_v40  ;;  %v817_v7 = vpop.f32.mrf.mxu3  ;;  %v1114_v28 = vpop.f32.mrf.mxu1 }
 0x145   : > { %v818_v8 = vadd.f32 %v817_v7, %v4500_v43 }
 0x147   : > { %v851_v9 = vpack.c.bf16 %v818_v8, %v769_v4 }
 0x149   : > { %883 = vst [vmem:[#allocation2 + $0xf8] sm:$0xff] %v851_v9 }
 0x14b   : > { %v1128_v29 = vpop.f32.mrf.mxu2  ;;  %v1102_v30 = vpop.f32.mrf.mxu0 }
 0x14c   : > { %v1116_v44 = vpop.f32.mrf.mxu1  ;;  %v1142_v2 = vpop.f32.mrf.mxu3 }
 0x150   : > { %v926_v16 = vld [vmem:[%s925_s25] sm:$0xff]  ;;  %v927_v18 = vld [vmem:[%s925_s25 + $0x8] sm:$0xff]  ;;  %v928_v20 = vld [vmem:[%s925_s25 + $0x10] sm:$0xff] }
 0x151   : > { %v1147_v21 = vunpack.c.l.bf16 %v926_v16  ;;  %v1148_v25 = vunpack.c.h.bf16 %v926_v16  ;;  %v1149_v26 = vunpack.c.l.bf16 %v927_v18  ;;  %v929_v40 = vld [vmem:[%s925_s25 + $0x18] sm:$0xff]  ;;  %v1151_v31 = vunpack.c.l.bf16 %v928_v20  ;;  %s1736_s25 = scalar_lea.vmem %s4669_s7, %s3452_s23 [#allocation9] }
 0x152   : > { %v1152_v43 = vunpack.c.h.bf16 %v928_v20  ;;  %v1153_v33 = vunpack.c.l.bf16 %v929_v40  ;;  %v1150_v7 = vunpack.c.h.bf16 %v927_v18 }
 0x153   : > { %v1155_v34 = vadd.f32 %v1147_v21, %v1100_v15  ;;  %v1156_v35 = vadd.f32 %v1148_v25, %v1114_v28  ;;  %v1157_v39 = vadd.f32 %v1149_v26, %v1128_v29  ;;  %v1130_v45 = vpop.f32.mrf.mxu2  ;;  %v1159_v46 = vadd.f32 %v1151_v31, %v1102_v30 }
 0x154   : > { %v1160_v51 = vadd.f32 %v1152_v43, %v1116_v44  ;;  %v1161_v54 = vadd.f32 %v1153_v33, %v1130_v45  ;;  %v1158_v21 = vadd.f32 %v1150_v7, %v1142_v2  ;;  %v1144_v26 = vpop.f32.mrf.mxu3  ;;  %v1154_v31 = vunpack.c.h.bf16 %v929_v40 }
 0x155   : > { %v3426_v55 = vmul.f32 -1.442695, %v1155_v34  ;;  %v3427_v59 = vmul.f32 -1.442695, %v1156_v35  ;;  %v3428_v60 = vmul.f32 -1.442695, %v1157_v39 }
 0x156   : > { %v3429_v0 = vmul.f32 -1.442695, %v1159_v46  ;;  %v3430_v3 = vmul.f32 -1.442695, %v1160_v51  ;;  %v3431_v4 = vmul.f32 -1.442695, %v1161_v54  ;;  %v1162_v34 = vadd.f32 %v1154_v31, %v1144_v26 }
 0x157   : > { %3709 = vpow2.f32 %v3426_v55 }
 0x158   : > { %3711 = vpow2.f32 %v3427_v59 }
 0x159   : > { %3713 = vpow2.f32 %v3428_v60 }
 0x15a   : > { %3715 = vpow2.f32 %v3429_v0 }
 0x15b   : > { %3717 = vpow2.f32 %v3430_v3 }
 0x15c   : > { %3719 = vpow2.f32 %v3431_v4 }
 0x15d   : > { %v3710_v8 = vpop.eup %3709 }
 0x15e   : > { %v3712_v9 = vpop.eup %3711  ;;  %v1181_v15 = vadd.f32 1.0, %v3710_v8 }
 0x15f   : > { %v3714_v28 = vpop.eup %3713  ;;  %v1182_v29 = vadd.f32 1.0, %v3712_v9 }
 0x160   : > { %v3716_v16 = vpop.eup %3715  ;;  %3721 = vrcp.f32 %v1181_v15  ;;  %v4600_v20 = vadd.f32 1.0, %v3714_v28  ;;  %v1196_v44 = vand.u32 2147483647, %v1181_v15  ;;  %v1198_v51 = vand.u32 2147483648, %v1181_v15 }
 0x161   : > { %v3718_v25 = vpop.eup %3717  ;;  %3723 = vrcp.f32 %v1182_v29  ;;  %v4603_v43 = vadd.f32 1.0, %v3716_v16  ;;  %v1213_v39 = vand.u32 2147483648, %v1182_v29  ;;  %v1211_v54 = vand.u32 2147483647, %v1182_v29 }
 0x162   : > { %v3720_v30 = vpop.eup %3719  ;;  %3725 = vrcp.f32 %v4600_v20  ;;  %v4605_v18 = vadd.f32 1.0, %v3718_v25  ;;  %vm1207_vm0 = vweird.f32 %v1182_v29  ;;  %vm1192_vm1 = vweird.f32 %v1181_v15 }
 0x163   : > { %3727 = vtanh.f32 %v1158_v21  ;;  %v4607_v33 = vadd.f32 1.0, %v3720_v30  ;;  %v1214_v3 = vor.u32 1.1754944e-38, %v1213_v39  ;;  %vm4617_vm2 = vcmp.eq.f32.partialorder %v1196_v44, 8.507059e+37 }
 0x164   : > { %3729 = vrcp.f32 %v4603_v43  ;;  %v1199_v28 = vor.u32 1.1754944e-38, %v1198_v51  ;;  %vm4621_vm4 = vcmp.eq.f32.partialorder %v1211_v54, 8.507059e+37  ;;  %v1258_v44 = vand.u32 2147483648, %v4605_v18 }
 0x165   : > { %3731 = vrcp.f32 %v4605_v18  ;;  %v1256_v4 = vand.u32 2147483647, %v4605_v18  ;;  %vm1237_vm10 = vweird.f32 %v4603_v43  ;;  %vm1252_vm11 = vweird.f32 %v4605_v18 }
 0x166   : > { %v3722_v35 = vpop.eup %3721  ;;  %3733 = vrcp.f32 %v4607_v33 }
 0x167   : > { %v3724_v45 = vpop.eup %3723  ;;  %v1188_v46 = vmul.f32 %v3722_v35, %v1181_v15  ;;  %3735 = vtanh.f32 %v1162_v34  ;;  %vm1193_vm3 = vweird.f32 %v3722_v35 }
 0x168   : > { %v4612_v40 = vpop.eup %3725  ;;  %v1203_v55 = vmul.f32 %v3724_v45, %v1182_v29  ;;  %vm1208_vm5 = vweird.f32 %v3724_v45  ;;  %vm1194_vm6 = vmor %vm1192_vm1, %vm1193_vm3  ;;  %vm1222_vm1 = vweird.f32 %v4600_v20 }
 0x169   : > { %v1189_v59 = vsub.f32 1.0, %v1188_v46  ;;  %v1218_v60 = vmul.f32 %v4612_v40, %v4600_v20  ;;  %v3728_v0 = vpop.eup %3727  ;;  %v1241_v46 = vand.u32 2147483647, %v4603_v43  ;;  %vm1209_vm7 = vmor %vm1207_vm0, %vm1208_vm5  ;;  %vm1223_vm13 = vweird.f32 %v4612_v40 }
 0x16a   : > { %v1204_v2 = vsub.f32 1.0, %v1203_v55  ;;  %v3730_v8 = vpop.eup %3729  ;;  %vm1257_vm0 = vcmp.eq.f32.partialorder %v1256_v4, 8.507059e+37  ;;  %vm1267_vm5 = vweird.f32 %v4607_v33 }
 0x16b   : > { %v1190_v9 = vmul.f32 %v3722_v35, %v1189_v59  ;;  %v3732_v21 = vpop.eup %3731  ;;  %v1219_v26 = vsub.f32 1.0, %v1218_v60  ;;  %v1233_v30 = vmul.f32 %v3730_v8, %v4603_v43  ;;  %v1243_v60 = vand.u32 2147483648, %v4603_v43 }
 0x16c   : > { %v1205_v25 = vmul.f32 %v3724_v45, %v1204_v2  ;;  %v4626_v31 = vpop.eup %3733  ;;  %v1248_v39 = vmul.f32 %v3732_v21, %v4605_v18  ;;  %vm1238_vm8 = vweird.f32 %v3730_v8  ;;  %vm1253_vm9 = vweird.f32 %v3732_v21 }
 0x16d   : > { %v1191_v34 = vadd.f32 %v3722_v35, %v1190_v9  ;;  %v3736_v51 = vpop.eup %3735  ;;  %v1234_v55 = vsub.f32 1.0, %v1233_v30  ;;  %v1263_v59 = vmul.f32 %v4626_v31, %v4607_v33  ;;  %v1220_v22 = vmul.f32 %v4612_v40, %v1219_v26  ;;  %vm1239_vm12 = vmor %vm1237_vm10, %vm1238_vm8 }
 0x16e   : > { %v1206_v54 = vadd.f32 %v3724_v45, %v1205_v25  ;;  %v1249_v9 = vsub.f32 1.0, %v1248_v39  ;;  %v1259_v39 = vor.u32 1.1754944e-38, %v1258_v44  ;;  %v1244_v7 = vor.u32 1.1754944e-38, %v1243_v60  ;;  %vm1254_vm15 = vmor %vm1252_vm11, %vm1253_vm9 }
 0x16f   : > { %v1195_v2 = vsel %vm1194_vm6, %v3722_v35, %v1191_v34  ;;  %v1235_v25 = vmul.f32 %v3730_v8, %v1234_v55  ;;  %v1264_v29 = vsub.f32 1.0, %v1263_v59  ;;  %vm1242_vm14 = vcmp.eq.f32.partialorder %v1241_v46, 8.507059e+37 }
 0x170   : > { %v1200_v15 = vsel %vm4617_vm2, %v1199_v28, %v1195_v2  ;;  %v1210_v17 = vsel %vm1209_vm7, %v3724_v45, %v1206_v54  ;;  %v1250_v12 = vmul.f32 %v3732_v21, %v1249_v9  ;;  %v1221_v16 = vadd.f32 %v4612_v40, %v1220_v22  ;;  %vm1224_vm2 = vmor %vm1222_vm1, %vm1223_vm13 }
 0x171   : > { %v1215_v30 = vsel %vm4621_vm4, %v1214_v3, %v1210_v17  ;;  %v1281_v13 = vmul.f32 %v3728_v0, %v1200_v15  ;;  %v1236_v34 = vadd.f32 %v3730_v8, %v1235_v25  ;;  %v1265_v43 = vmul.f32 %v4626_v31, %v1264_v29 }
 0x172   : > { %v1279_v35 = vmul.f32 0.0, %v1215_v30  ;;  %v1251_v28 = vadd.f32 %v3732_v21, %v1250_v12  ;;  %v1225_v4 = vsel %vm1224_vm2, %v4612_v40, %v1221_v16  ;;  %v5302_v22 = vand.u32 2147483648, %v4600_v20 }
 0x173   : > { %v1240_v17 = vsel %vm1239_vm12, %v3730_v8, %v1236_v34  ;;  %vm1268_vm3 = vweird.f32 %v4626_v31  ;;  %v1266_v44 = vadd.f32 %v4626_v31, %v1265_v43  ;;  %v1273_v46 = vand.u32 2147483648, %v4607_v33  ;;  %v5304_v34 = vld [vmem:[#allocation13_spill] sm:$0xff] }
 0x174   : > { %v4646_v45 = vadd.f32 %v1281_v13, %v1279_v35  ;;  %v1245_v0 = vsel %vm1242_vm14, %v1244_v7, %v1240_v17  ;;  %v1255_v3 = vsel %vm1254_vm15, %v3732_v21, %v1251_v28  ;;  %v1226_v13 = vand.u32 2147483647, %v4600_v20  ;;  %vm1269_vm6 = vmor %vm1267_vm5, %vm1268_vm3  ;;  %v5306_v7 = vld [vmem:[#allocation15_spill] sm:$0xff]  ;;  %v1303_v28 = vld [vmem:[%s1302_s29] sm:$0xff] }
 0x175   : > { %v1260_v18 = vsel %vm1257_vm0, %v1259_v39, %v1255_v3  ;;  %v1282_v26 = vmul.f32 %v3736_v51, %v1245_v0  ;;  %v1229_v21 = vor.u32 1.1754944e-38, %v5302_v22  ;;  %v1271_v55 = vand.u32 2147483647, %v4607_v33  ;;  %v5305_v39 = vld [vmem:[#allocation14_spill] sm:$0xff] }
 0x176   : > { %3737 = vtanh.f32 %v4646_v45  ;;  %v1280_v12 = vmul.f32 0.0, %v1260_v18  ;;  %vm1227_vm4 = vcmp.eq.f32.partialorder %v1226_v13, 8.507059e+37  ;;  %v1270_v40 = vsel %vm1269_vm6, %v4626_v31, %v1266_v44  ;;  %v5303_v31 = vld [vmem:[#allocation12_spill] sm:$0xff]  ;;  %v1304_v13 = vld [vmem:[%s1302_s29 + $0x8] sm:$0xff] }
 0x177   : > { %v1230_v54 = vsel %vm1227_vm4, %v1229_v21, %v1225_v4  ;;  %v1274_v59 = vor.u32 1.1754944e-38, %v1273_v46  ;;  %vm1272_vm7 = vcmp.eq.f32.partialorder %v1271_v55, 8.507059e+37  ;;  %v1369_v17 = vunpack.c.l.bf16 %v1303_v28  ;;  %v1305_v4 = vld [vmem:[%s1302_s29 + $0x10] sm:$0xff] }
 0x178   : > { %v4655_v8 = vadd.f32 %v1282_v26, %v1280_v12  ;;  %v1370_v0 = vunpack.c.h.bf16 %v1303_v28  ;;  %v1371_v22 = vunpack.c.l.bf16 %v1304_v13  ;;  %v1373_v44 = vunpack.c.l.bf16 %v1305_v4 }
 0x179   : > { %v1275_v9 = vsel %vm1272_vm7, %v1274_v59, %v1270_v40  ;;  %v1374_v46 = vunpack.c.h.bf16 %v1305_v4 }
 0x17a   : > { %3739 = vtanh.f32 %v4655_v8 }
 0x17c   : > { %v3738_v51 = vpop.eup %3737 }
 0x17d   : > { %v1287_v20 = vmul.f32 %v3738_v51, %v1230_v54 }
 0x17f   : > { %v1289_v60 = vpack.c.bf16 %v1287_v20, %v1287_v20 }
 0x180   : > { %v3740_v2 = vpop.eup %3739 }
 0x181   : > { %v1288_v15 = vmul.f32 %v3740_v2, %v1275_v9  ;;  %v1309_v35 = vunpack.c.l.b16 %v1289_v60  ;;  %v1306_v9 = vld [vmem:[%s1302_s29 + $0x18] sm:$0xff]  ;;  %s1960_s29 = ssub.s32 4, %s4071_s18 }
 0x182   : > { %s4967_s30 = sshll.u32 %s1960_s29, 4 }
 0x183   : > { %v1290_v25 = vpack.c.bf16 %v1288_v15, %v1288_v15  ;;  %v3604_v30 = vpack.c.bf16 %v1288_v15, %v1287_v20 }
 0x185   : > { %3605 = vst [vmem:[%s1292_s8] sm:$0xff] %v3604_v30   ;;  %v1310_v33 = vunpack.c.l.b16 %v1290_v25  ;;  %s1741_s8 = sshra.s32 %s4875_s24, 3 }
 0x186   : > { %s3590_s10 = sshll.u32 %s1741_s8, 4  ;;  %s3462_s11 = sshll.u32 %s1741_s8, 2 }
 0x187   : > { %v1311_v29 = vpack.c.b16 %v1310_v33, %v1309_v35  ;;  %v1375_v33 = vunpack.c.l.bf16 %v1306_v9  ;;  %s1745_s9 = scalar_lea.vmem [#allocation2], %s3590_s10  ;;  %s1957_s13 = scalar_lea.vmem %s4669_s7, %s3462_s11 [#allocation9] }
 0x189   : > { %1321 = vmatmul.bf16.vlgmr.msra.gmra.mxu0 %v1311_v29  ;;  %1335 = vmatmul.bf16.vlgmr.msra.gmra.mxu1 %v1311_v29 }
 0x18a   : > { %1349 = vmatmul.bf16.vlgmr.msra.gmra.mxu2 %v1311_v29  ;;  %1363 = vmatmul.bf16.vlgmr.msra.gmra.mxu3 %v1311_v29 }
 0x18b   : > { %1756 = vmatpush.bf16.msra.mxu0 %v4278_v37  ;;  %1770 = vmatpush.bf16.msra.mxu1 %v4283_v41 }
 0x18c   : > { %1784 = vmatpush.bf16.msra.mxu2 %v4290_v47  ;;  %1798 = vmatpush.bf16.msra.mxu3 %v4293_v48 }
 0x18f   : > { %1757 = vmatpush.bf16.msra.mxu0 %v4295_v49  ;;  %1771 = vmatpush.bf16.msra.mxu1 %v4300_v52 }
 0x190   : > { %1785 = vmatpush.bf16.msra.mxu2 %v4303_v53  ;;  %1799 = vmatpush.bf16.msra.mxu3 %v4310_v57 }
 0x193   : > { %1758 = vmatpush.bf16.msra.mxu0 %v4316_v61  ;;  %1772 = vmatpush.bf16.msra.mxu1 %v4318_v62 }
 0x194   : > { %1786 = vmatpush.bf16.msra.mxu2 %v4323_v1  ;;  %1800 = vmatpush.bf16.msra.mxu3 %v4335_v6 }
 0x197   : > { %1759 = vmatpush.bf16.msra.mxu0 %v4340_v10  ;;  %1773 = vmatpush.bf16.msra.mxu1 %v4342_v11 }
 0x198   : > { %1787 = vmatpush.bf16.msra.mxu2 %v4347_v14  ;;  %1801 = vmatpush.bf16.msra.mxu3 %v4358_v19 }
 0x19b   : > { %1760 = vmatpush.bf16.msra.mxu0 %v4363_v23  ;;  %1774 = vmatpush.bf16.msra.mxu1 %v4365_v24 }
 0x19c   : > { %1788 = vmatpush.bf16.msra.mxu2 %v4370_v27  ;;  %1802 = vmatpush.bf16.msra.mxu3 %v4381_v32 }
 0x19f   : > { %1761 = vmatpush.bf16.msra.mxu0 %v4386_v36  ;;  %1775 = vmatpush.bf16.msra.mxu1 %v4388_v38 }
 0x1a0   : > { %1789 = vmatpush.bf16.msra.mxu2 %v4393_v42  ;;  %1803 = vmatpush.bf16.msra.mxu3 %v4404_v50 }
 0x1a3   : > { %1762 = vmatpush.bf16.msra.mxu0 %v4409_v56  ;;  %1776 = vmatpush.bf16.msra.mxu1 %v4411_v58 }
 0x1a4   : > { %1790 = vmatpush.bf16.msra.mxu2 %v4416_v63  ;;  %1804 = vmatpush.bf16.msra.mxu3 %v4427_v5 }
 0x1a7   : > { %1763 = vmatpush.bf16.msra.mxu0 %v5303_v31  ;;  %1777 = vmatpush.bf16.msra.mxu1 %v5304_v34 }
 0x1a8   : > { %1791 = vmatpush.bf16.msra.mxu2 %v5305_v39  ;;  %1805 = vmatpush.bf16.msra.mxu3 %v5306_v7 }
 0x206   : > { %v1322_v3 = vpop.f32.mrf.mxu0  ;;  %v1336_v16 = vpop.f32.mrf.mxu1 }
 0x207   : > { %v1377_v43 = vadd.f32 %v1369_v17, %v1322_v3  ;;  %v1378_v18 = vadd.f32 %v1370_v0, %v1336_v16  ;;  %v1372_v3 = vunpack.c.h.bf16 %v1304_v13 }
 0x209   : > { %v3436_v26 = vmul.f32 -1.442695, %v1377_v43  ;;  %v3437_v12 = vmul.f32 -1.442695, %v1378_v18 }
 0x20b   : > { %3741 = vpow2.f32 %v3436_v26 }
 0x20c   : > { %3743 = vpow2.f32 %v3437_v12 }
 0x20d   : > { %v1350_v21 = vpop.f32.mrf.mxu2  ;;  %v1364_v29 = vpop.f32.mrf.mxu3 }
 0x20e   : > { %v1379_v51 = vadd.f32 %v1371_v22, %v1350_v21  ;;  %v1324_v54 = vpop.f32.mrf.mxu0  ;;  %v1338_v55 = vpop.f32.mrf.mxu1  ;;  %v1380_v12 = vadd.f32 %v1372_v3, %v1364_v29 }
 0x20f   : > { %v1381_v20 = vadd.f32 %v1373_v44, %v1324_v54  ;;  %v1382_v40 = vadd.f32 %v1374_v46, %v1338_v55 }
 0x210   : > { %v3438_v59 = vmul.f32 -1.442695, %v1379_v51 }
 0x211   : > { %v3742_v60 = vpop.eup %3741  ;;  %v3439_v2 = vmul.f32 -1.442695, %v1381_v20  ;;  %v3440_v30 = vmul.f32 -1.442695, %v1382_v40 }
 0x212   : > { %v3744_v15 = vpop.eup %3743  ;;  %v1403_v25 = vadd.f32 1.0, %v3742_v60  ;;  %3745 = vpow2.f32 %v3438_v59 }
 0x213   : > { %v1404_v35 = vadd.f32 1.0, %v3744_v15  ;;  %3747 = vpow2.f32 %v3439_v2  ;;  %v1376_v2 = vunpack.c.h.bf16 %v1306_v9 }
 0x214   : > { %3749 = vrcp.f32 %v1403_v25  ;;  %v1418_v54 = vand.u32 2147483647, %v1403_v25  ;;  %v1420_v40 = vand.u32 2147483648, %v1403_v25  ;;  %vm1414_vm10 = vweird.f32 %v1403_v25 }
 0x215   : > { %3751 = vrcp.f32 %v1404_v35  ;;  %v1352_v28 = vpop.f32.mrf.mxu2  ;;  %v1435_v20 = vand.u32 2147483648, %v1404_v35  ;;  %v1366_v60 = vpop.f32.mrf.mxu3  ;;  %vm1429_vm11 = vweird.f32 %v1404_v35 }
 0x216   : > { %3753 = vpow2.f32 %v3440_v30  ;;  %v1383_v17 = vadd.f32 %v1375_v33, %v1352_v28  ;;  %v1433_v33 = vand.u32 2147483647, %v1404_v35  ;;  %vm1419_vm12 = vcmp.eq.f32.partialorder %v1418_v54, 8.507059e+37 }
 0x217   : > { %v1436_v3 = vor.u32 1.1754944e-38, %v1435_v20 }
 0x218   : > { %v3746_v0 = vpop.eup %3745  ;;  %v3441_v16 = vmul.f32 -1.442695, %v1383_v17  ;;  %vm1434_vm15 = vcmp.eq.f32.partialorder %v1433_v33, 8.507059e+37 }
 0x219   : > { %v3748_v43 = vpop.eup %3747  ;;  %v4710_v18 = vadd.f32 1.0, %v3746_v0 }
 0x21a   : > { %v3750_v26 = vpop.eup %3749  ;;  %v4712_v4 = vadd.f32 1.0, %v3748_v43  ;;  %3755 = vpow2.f32 %v3441_v16  ;;  %v1421_v16 = vor.u32 1.1754944e-38, %v1420_v40 }
 0x21b   : > { %v3752_v22 = vpop.eup %3751  ;;  %v1410_v21 = vmul.f32 %v3750_v26, %v1403_v25  ;;  %3757 = vrcp.f32 %v4710_v18  ;;  %vm1415_vm8 = vweird.f32 %v3750_v26 }
 0x21c   : > { %v3754_v44 = vpop.eup %3753  ;;  %v1425_v46 = vmul.f32 %v3752_v22, %v1404_v35  ;;  %3759 = vrcp.f32 %v4712_v4  ;;  %vm1430_vm9 = vweird.f32 %v3752_v22  ;;  %vm1416_vm13 = vmor %vm1414_vm10, %vm1415_vm8  ;;  %v1465_v20 = vand.u32 2147483648, %v4712_v4 }
 0x21d   : > { %v1411_v51 = vsub.f32 1.0, %v1410_v21  ;;  %v4716_v13 = vadd.f32 1.0, %v3754_v44  ;;  %3761 = vtanh.f32 %v1380_v12  ;;  %v1384_v12 = vadd.f32 %v1376_v2, %v1366_v60  ;;  %vm1431_vm14 = vmor %vm1429_vm11, %vm1430_vm9 }
 0x21e   : > { %v1426_v55 = vsub.f32 1.0, %v1425_v46  ;;  %vm1459_vm1 = vweird.f32 %v4712_v4  ;;  %vm1444_vm9 = vweird.f32 %v4710_v18 }
 0x21f   : > { %v1412_v59 = vmul.f32 %v3750_v26, %v1411_v51  ;;  %3763 = vrcp.f32 %v4716_v13  ;;  %v1480_v33 = vand.u32 2147483648, %v4716_v13  ;;  %vm1474_vm5 = vweird.f32 %v4716_v13 }
 0x220   : > { %v3756_v15 = vpop.eup %3755  ;;  %v1427_v30 = vmul.f32 %v3752_v22, %v1426_v55 }
 0x221   : > { %v4719_v29 = vpop.eup %3757  ;;  %v1413_v28 = vadd.f32 %v3750_v26, %v1412_v59  ;;  %v4721_v17 = vadd.f32 1.0, %v3756_v15  ;;  %v1463_v15 = vand.u32 2147483647, %v4712_v4 }
 0x222   : > { %v3760_v0 = vpop.eup %3759  ;;  %v1428_v43 = vadd.f32 %v3752_v22, %v1427_v30  ;;  %v1440_v9 = vmul.f32 %v4719_v29, %v4710_v18  ;;  %vm1445_vm8 = vweird.f32 %v4719_v29 }
 0x223   : > { %v1417_v25 = vsel %vm1416_vm13, %v3750_v26, %v1413_v28  ;;  %v1455_v21 = vmul.f32 %v3760_v0, %v4712_v4  ;;  %3765 = vrcp.f32 %v4721_v17  ;;  %v3762_v35 = vpop.eup %3761  ;;  %vm1460_vm0 = vweird.f32 %v3760_v0  ;;  %vm1446_vm10 = vmor %vm1444_vm9, %vm1445_vm8 }
 0x224   : > { %v1422_v44 = vsel %vm1419_vm12, %v1421_v16, %v1417_v25  ;;  %v1432_v46 = vsel %vm1431_vm14, %v3752_v22, %v1428_v43  ;;  %3767 = vtanh.f32 %v1384_v12  ;;  %v1441_v26 = vsub.f32 1.0, %v1440_v9  ;;  %vm1461_vm3 = vmor %vm1459_vm1, %vm1460_vm0 }
 0x225   : > { %v3764_v51 = vpop.eup %3763  ;;  %v1437_v54 = vsel %vm1434_vm15, %v1436_v3, %v1432_v46  ;;  %v1456_v55 = vsub.f32 1.0, %v1455_v21  ;;  %v1503_v59 = vmul.f32 %v3762_v35, %v1422_v44  ;;  %v1466_v3 = vor.u32 1.1754944e-38, %v1465_v20 }
 0x226   : > { %v1501_v40 = vmul.f32 %v1437_v54, %v4646_v45  ;;  %v1470_v60 = vmul.f32 %v3764_v51, %v4716_v13  ;;  %v1478_v16 = vand.u32 2147483647, %v4716_v13  ;;  %vm1475_vm2 = vweird.f32 %v3764_v51 }
 0x227   : > { %v1457_v2 = vmul.f32 %v3760_v0, %v1456_v55  ;;  %v1442_v9 = vmul.f32 %v4719_v29, %v1441_v26  ;;  %vm1464_vm4 = vcmp.eq.f32.partialorder %v1463_v15, 8.507059e+37  ;;  %vm1476_vm6 = vmor %vm1474_vm5, %vm1475_vm2  ;;  %v1481_v46 = vor.u32 1.1754944e-38, %v1480_v33 }
 0x228   : > { %v1471_v30 = vsub.f32 1.0, %v1470_v60  ;;  %v4735_v45 = vadd.f32 %v1503_v59, %v1501_v40  ;;  %vm1479_vm7 = vcmp.eq.f32.partialorder %v1478_v16, 8.507059e+37  ;;  %v1450_v59 = vand.u32 2147483648, %v4710_v18 }
 0x229   : > { %v3766_v22 = vpop.eup %3765  ;;  %v1458_v28 = vadd.f32 %v3760_v0, %v1457_v2  ;;  %v1448_v60 = vand.u32 2147483647, %v4710_v18  ;;  %v1495_v33 = vand.u32 2147483648, %v4721_v17  ;;  %vm1489_vm12 = vweird.f32 %v4721_v17 }
 0x22a   : > { %v1472_v43 = vmul.f32 %v3764_v51, %v1471_v30  ;;  %v1485_v12 = vmul.f32 %v3766_v22, %v4721_v17  ;;  %v3768_v21 = vpop.eup %3767  ;;  %3769 = vtanh.f32 %v4735_v45  ;;  %vm1490_vm11 = vweird.f32 %v3766_v22 }
 0x22b   : > { %v1462_v25 = vsel %vm1461_vm3, %v3760_v0, %v1458_v28  ;;  %v1443_v0 = vadd.f32 %v4719_v29, %v1442_v9  ;;  %v1451_v30 = vor.u32 1.1754944e-38, %v1450_v59  ;;  %vm1449_vm13 = vcmp.eq.f32.partialorder %v1448_v60, 8.507059e+37  ;;  %vm1491_vm14 = vmor %vm1489_vm12, %vm1490_vm11  ;;  %v1527_v60 = vld [vmem:[%s1524_s21 + $0x10] sm:$0xff] }
 0x22c   : > { %v1486_v4 = vsub.f32 1.0, %v1485_v12  ;;  %v1467_v35 = vsel %vm1464_vm4, %v1466_v3, %v1462_v25  ;;  %v1473_v44 = vadd.f32 %v3764_v51, %v1472_v43  ;;  %v1496_v16 = vor.u32 1.1754944e-38, %v1495_v33 }
 0x22d   : > { %v1504_v55 = vmul.f32 %v3768_v21, %v1467_v35 }
 0x22e   : > { %v1477_v54 = vsel %vm1476_vm6, %v3764_v51, %v1473_v44  ;;  %v1487_v20 = vmul.f32 %v3766_v22, %v1486_v4  ;;  %v1447_v51 = vsel %vm1446_vm10, %v4719_v29, %v1443_v0 }
 0x22f   : > { %v1482_v40 = vsel %vm1479_vm7, %v1481_v46, %v1477_v54  ;;  %v1452_v18 = vsel %vm1449_vm13, %v1451_v30, %v1447_v51  ;;  %v1596_v30 = vunpack.c.h.bf16 %v1527_v60 }
 0x230   : > { %v1502_v13 = vmul.f32 %v1482_v40, %v4655_v8  ;;  %v1488_v2 = vadd.f32 %v3766_v22, %v1487_v20  ;;  %v3770_v15 = vpop.eup %3769  ;;  %v1493_v8 = vand.u32 2147483647, %v4721_v17  ;;  %v1525_v17 = vld [vmem:[%s1524_s21] sm:$0xff] }
 0x231   : > { %v1509_v3 = vmul.f32 %v3770_v15, %v1452_v18  ;;  %v1592_v46 = vunpack.c.h.bf16 %v1525_v17  ;;  %v1595_v15 = vunpack.c.l.bf16 %v1527_v60 }
 0x232   : > { %v4747_v26 = vadd.f32 %v1504_v55, %v1502_v13  ;;  %v1492_v28 = vsel %vm1491_vm14, %v3766_v22, %v1488_v2  ;;  %vm1494_vm15 = vcmp.eq.f32.partialorder %v1493_v8, 8.507059e+37  ;;  %v1591_v22 = vunpack.c.l.bf16 %v1525_v17  ;;  %v1526_v13 = vld [vmem:[%s1524_s21 + $0x8] sm:$0xff] }
 0x233   : > { %v1497_v43 = vsel %vm1494_vm15, %v1496_v16, %v1492_v28  ;;  %v1511_v9 = vpack.c.bf16 %v1509_v3, %v1509_v3  ;;  %v1593_v51 = vunpack.c.l.bf16 %v1526_v13 }
 0x234   : > { %3771 = vtanh.f32 %v4747_v26 }
 0x235   : > { %v1531_v4 = vunpack.c.l.b16 %v1511_v9 }
 0x23a   : > { %v3772_v29 = vpop.eup %3771 }
 0x23b   : > { %v1510_v12 = vmul.f32 %v3772_v29, %v1497_v43 }
 0x23d   : > { %v1512_v25 = vpack.c.bf16 %v1510_v12, %v1510_v12  ;;  %v3609_v21 = vpack.c.bf16 %v1510_v12, %v1509_v3  ;;  %v1528_v12 = vld [vmem:[%s1524_s21 + $0x18] sm:$0xff]  ;;  %s3643_s21 = smul.u32 4294967248, %s4071_s18 }
 0x23f   : > { %3610 = vst [vmem:[%s1514_s26] sm:$0xff] %v3609_v21   ;;  %v1532_v35 = vunpack.c.l.b16 %v1512_v25  ;;  %s1962_s26 = sshra.s32 %s4967_s30, 3  ;;  %s5059_s23 = sadd.s32 80, %s3643_s21 }
 0x240   : > { %s3591_s5 = sshll.u32 %s1962_s26, 4  ;;  %s3472_s14 = sshll.u32 %s1962_s26, 2 }
 0x241   : > { %v1533_v44 = vpack.c.b16 %v1532_v35, %v1531_v4  ;;  %v1597_v35 = vunpack.c.l.bf16 %v1528_v12  ;;  %s1966_s12 = scalar_lea.vmem [#allocation2], %s3591_s5  ;;  %s2178_s15 = scalar_lea.vmem %s4669_s7, %s3472_s14 [#allocation9] }
 0x243   : > { %1543 = vmatmul.bf16.vlgmr.msrb.gmra.mxu0 %v1533_v44  ;;  %1557 = vmatmul.bf16.vlgmr.msrb.gmra.mxu1 %v1533_v44 }
 0x244   : > { %1571 = vmatmul.bf16.vlgmr.msrb.gmra.mxu2 %v1533_v44  ;;  %1585 = vmatmul.bf16.vlgmr.msrb.gmra.mxu3 %v1533_v44 }
 0x245   : > { %1977 = vmatpush.bf16.msrb.mxu0 %v4278_v37  ;;  %1991 = vmatpush.bf16.msrb.mxu1 %v4283_v41 }
 0x246   : > { %2005 = vmatpush.bf16.msrb.mxu2 %v4290_v47  ;;  %2019 = vmatpush.bf16.msrb.mxu3 %v4293_v48 }
 0x249   : > { %1978 = vmatpush.bf16.msrb.mxu0 %v4295_v49  ;;  %1992 = vmatpush.bf16.msrb.mxu1 %v4300_v52 }
 0x24a   : > { %2006 = vmatpush.bf16.msrb.mxu2 %v4303_v53  ;;  %2020 = vmatpush.bf16.msrb.mxu3 %v4310_v57 }
 0x24d   : > { %1979 = vmatpush.bf16.msrb.mxu0 %v4316_v61  ;;  %1993 = vmatpush.bf16.msrb.mxu1 %v4318_v62 }
 0x24e   : > { %2007 = vmatpush.bf16.msrb.mxu2 %v4323_v1  ;;  %2021 = vmatpush.bf16.msrb.mxu3 %v4335_v6 }
 0x251   : > { %1980 = vmatpush.bf16.msrb.mxu0 %v4340_v10  ;;  %1994 = vmatpush.bf16.msrb.mxu1 %v4342_v11 }
 0x252   : > { %2008 = vmatpush.bf16.msrb.mxu2 %v4347_v14  ;;  %2022 = vmatpush.bf16.msrb.mxu3 %v4358_v19 }
 0x255   : > { %1981 = vmatpush.bf16.msrb.mxu0 %v4363_v23  ;;  %1995 = vmatpush.bf16.msrb.mxu1 %v4365_v24 }
 0x256   : > { %2009 = vmatpush.bf16.msrb.mxu2 %v4370_v27  ;;  %2023 = vmatpush.bf16.msrb.mxu3 %v4381_v32 }
 0x259   : > { %1982 = vmatpush.bf16.msrb.mxu0 %v4386_v36  ;;  %1996 = vmatpush.bf16.msrb.mxu1 %v4388_v38 }
 0x25a   : > { %2010 = vmatpush.bf16.msrb.mxu2 %v4393_v42  ;;  %2024 = vmatpush.bf16.msrb.mxu3 %v4404_v50 }
 0x25d   : > { %1983 = vmatpush.bf16.msrb.mxu0 %v4409_v56  ;;  %1997 = vmatpush.bf16.msrb.mxu1 %v4411_v58 }
 0x25e   : > { %2011 = vmatpush.bf16.msrb.mxu2 %v4416_v63  ;;  %2025 = vmatpush.bf16.msrb.mxu3 %v4427_v5 }
 0x261   : > { %1984 = vmatpush.bf16.msrb.mxu0 %v5303_v31  ;;  %1998 = vmatpush.bf16.msrb.mxu1 %v5304_v34 }
 0x262   : > { %2012 = vmatpush.bf16.msrb.mxu2 %v5305_v39  ;;  %2026 = vmatpush.bf16.msrb.mxu3 %v5306_v7 }
 0x2c0   : > { %v1544_v54 = vpop.f32.mrf.mxu0  ;;  %v1558_v55 = vpop.f32.mrf.mxu1 }
 0x2c1   : > { %v1599_v20 = vadd.f32 %v1591_v22, %v1544_v54  ;;  %v1600_v40 = vadd.f32 %v1592_v46, %v1558_v55  ;;  %v1594_v54 = vunpack.c.h.bf16 %v1526_v13 }
 0x2c3   : > { %v3446_v0 = vmul.f32 -1.442695, %v1599_v20  ;;  %v3447_v59 = vmul.f32 -1.442695, %v1600_v40 }
 0x2c5   : > { %3773 = vpow2.f32 %v3446_v0 }
 0x2c6   : > { %3775 = vpow2.f32 %v3447_v59 }
 0x2c7   : > { %v1572_v2 = vpop.f32.mrf.mxu2  ;;  %v1586_v44 = vpop.f32.mrf.mxu3 }
 0x2c8   : > { %v1601_v33 = vadd.f32 %v1593_v51, %v1572_v2  ;;  %v1546_v8 = vpop.f32.mrf.mxu0  ;;  %v1560_v18 = vpop.f32.mrf.mxu1  ;;  %v1602_v59 = vadd.f32 %v1594_v54, %v1586_v44 }
 0x2c9   : > { %v1603_v28 = vadd.f32 %v1595_v15, %v1546_v8  ;;  %v1604_v3 = vadd.f32 %v1596_v30, %v1560_v18 }
 0x2ca   : > { %v3448_v16 = vmul.f32 -1.442695, %v1601_v33 }
 0x2cb   : > { %v3774_v29 = vpop.eup %3773  ;;  %v3449_v43 = vmul.f32 -1.442695, %v1603_v28  ;;  %v3450_v21 = vmul.f32 -1.442695, %v1604_v3 }
 0x2cc   : > { %v3776_v9 = vpop.eup %3775  ;;  %v1625_v25 = vadd.f32 1.0, %v3774_v29  ;;  %3777 = vpow2.f32 %v3448_v16 }
 0x2cd   : > { %v1626_v4 = vadd.f32 1.0, %v3776_v9  ;;  %3779 = vpow2.f32 %v3449_v43  ;;  %v1598_v43 = vunpack.c.h.bf16 %v1528_v12 }
 0x2ce   : > { %3781 = vrcp.f32 %v1625_v25  ;;  %v1640_v8 = vand.u32 2147483647, %v1625_v25  ;;  %v1642_v3 = vand.u32 2147483648, %v1625_v25  ;;  %vm1636_vm2 = vweird.f32 %v1625_v25 }
 0x2cf   : > { %3783 = vrcp.f32 %v1626_v4  ;;  %v1574_v17 = vpop.f32.mrf.mxu2  ;;  %v1657_v28 = vand.u32 2147483648, %v1626_v4  ;;  %v1588_v29 = vpop.f32.mrf.mxu3  ;;  %vm1651_vm3 = vweird.f32 %v1626_v4 }
 0x2d0   : > { %3785 = vpow2.f32 %v3450_v21  ;;  %v1605_v22 = vadd.f32 %v1597_v35, %v1574_v17  ;;  %v1655_v35 = vand.u32 2147483647, %v1626_v4  ;;  %vm1641_vm4 = vcmp.eq.f32.partialorder %v1640_v8, 8.507059e+37 }
 0x2d1   : > { %v1658_v54 = vor.u32 1.1754944e-38, %v1657_v28 }
 0x2d2   : > { %v3778_v46 = vpop.eup %3777  ;;  %v3451_v55 = vmul.f32 -1.442695, %v1605_v22  ;;  %vm1656_vm7 = vcmp.eq.f32.partialorder %v1655_v35, 8.507059e+37 }
 0x2d3   : > { %v3780_v20 = vpop.eup %3779  ;;  %v4795_v40 = vadd.f32 1.0, %v3778_v46 }
 0x2d4   : > { %v3782_v0 = vpop.eup %3781  ;;  %v4797_v60 = vadd.f32 1.0, %v3780_v20  ;;  %3787 = vpow2.f32 %v3451_v55  ;;  %v1643_v55 = vor.u32 1.1754944e-38, %v1642_v3 }
 0x2d5   : > { %v3784_v51 = vpop.eup %3783  ;;  %v1632_v2 = vmul.f32 %v3782_v0, %v1625_v25  ;;  %3789 = vrcp.f32 %v4795_v40  ;;  %vm1637_vm0 = vweird.f32 %v3782_v0 }
 0x2d6   : > { %v3786_v15 = vpop.eup %3785  ;;  %v1647_v30 = vmul.f32 %v3784_v51, %v1626_v4  ;;  %3791 = vrcp.f32 %v4797_v60  ;;  %vm1652_vm1 = vweird.f32 %v3784_v51  ;;  %vm1638_vm5 = vmor %vm1636_vm2, %vm1637_vm0  ;;  %v1687_v28 = vand.u32 2147483648, %v4797_v60 }
 0x2d7   : > { %v1633_v33 = vsub.f32 1.0, %v1632_v2  ;;  %v4801_v13 = vadd.f32 1.0, %v3786_v15  ;;  %3793 = vtanh.f32 %v1602_v59  ;;  %v1606_v59 = vadd.f32 %v1598_v43, %v1588_v29  ;;  %vm1653_vm6 = vmor %vm1651_vm3, %vm1652_vm1 }
 0x2d8   : > { %v1648_v18 = vsub.f32 1.0, %v1647_v30  ;;  %vm1681_vm9 = vweird.f32 %v4797_v60  ;;  %vm1666_vm1 = vweird.f32 %v4795_v40 }
 0x2d9   : > { %v1634_v16 = vmul.f32 %v3782_v0, %v1633_v33  ;;  %3795 = vrcp.f32 %v4801_v13  ;;  %v1702_v35 = vand.u32 2147483648, %v4801_v13  ;;  %vm1696_vm13 = vweird.f32 %v4801_v13 }
 0x2da   : > { %v3788_v9 = vpop.eup %3787  ;;  %v1649_v21 = vmul.f32 %v3784_v51, %v1648_v18 }
 0x2db   : > { %v4804_v44 = vpop.eup %3789  ;;  %v1635_v17 = vadd.f32 %v3782_v0, %v1634_v16  ;;  %v4806_v22 = vadd.f32 1.0, %v3788_v9  ;;  %v1685_v9 = vand.u32 2147483647, %v4797_v60 }
 0x2dc   : > { %v3792_v46 = vpop.eup %3791  ;;  %v1650_v20 = vadd.f32 %v3784_v51, %v1649_v21  ;;  %v1662_v12 = vmul.f32 %v4804_v44, %v4795_v40  ;;  %vm1667_vm0 = vweird.f32 %v4804_v44 }
 0x2dd   : > { %v1639_v25 = vsel %vm1638_vm5, %v3782_v0, %v1635_v17  ;;  %v1677_v2 = vmul.f32 %v3792_v46, %v4797_v60  ;;  %3797 = vrcp.f32 %v4806_v22  ;;  %v3794_v4 = vpop.eup %3793  ;;  %vm1682_vm8 = vweird.f32 %v3792_v46  ;;  %vm1668_vm2 = vmor %vm1666_vm1, %vm1667_vm0 }
 0x2de   : > { %v1644_v15 = vsel %vm1641_vm4, %v1643_v55, %v1639_v25  ;;  %v1654_v30 = vsel %vm1653_vm6, %v3784_v51, %v1650_v20  ;;  %3799 = vtanh.f32 %v1606_v59  ;;  %v1663_v0 = vsub.f32 1.0, %v1662_v12  ;;  %vm1683_vm11 = vmor %vm1681_vm9, %vm1682_vm8 }
 0x2df   : > { %v3796_v33 = vpop.eup %3795  ;;  %v1659_v8 = vsel %vm1656_vm7, %v1658_v54, %v1654_v30  ;;  %v1678_v18 = vsub.f32 1.0, %v1677_v2  ;;  %v1725_v16 = vmul.f32 %v3794_v4, %v1644_v15  ;;  %v1688_v54 = vor.u32 1.1754944e-38, %v1687_v28 }
 0x2e0   : > { %v1723_v3 = vmul.f32 %v1659_v8, %v4735_v45  ;;  %v1692_v29 = vmul.f32 %v3796_v33, %v4801_v13  ;;  %v1700_v55 = vand.u32 2147483647, %v4801_v13  ;;  %vm1697_vm10 = vweird.f32 %v3796_v33 }
 0x2e1   : > { %v1679_v43 = vmul.f32 %v3792_v46, %v1678_v18  ;;  %v1664_v12 = vmul.f32 %v4804_v44, %v1663_v0  ;;  %vm1686_vm12 = vcmp.eq.f32.partialorder %v1685_v9, 8.507059e+37  ;;  %vm1698_vm14 = vmor %vm1696_vm13, %vm1697_vm10  ;;  %v1703_v30 = vor.u32 1.1754944e-38, %v1702_v35 }
 0x2e2   : > { %v1693_v21 = vsub.f32 1.0, %v1692_v29  ;;  %v4820_v45 = vadd.f32 %v1725_v16, %v1723_v3  ;;  %vm1701_vm15 = vcmp.eq.f32.partialorder %v1700_v55, 8.507059e+37  ;;  %v1672_v16 = vand.u32 2147483648, %v4795_v40 }
 0x2e3   : > { %v3798_v51 = vpop.eup %3797  ;;  %v1680_v17 = vadd.f32 %v3792_v46, %v1679_v43  ;;  %v1670_v29 = vand.u32 2147483647, %v4795_v40  ;;  %v1717_v35 = vand.u32 2147483648, %v4806_v22  ;;  %vm1711_vm4 = vweird.f32 %v4806_v22 }
 0x2e4   : > { %v1694_v20 = vmul.f32 %v3796_v33, %v1693_v21  ;;  %v1707_v59 = vmul.f32 %v3798_v51, %v4806_v22  ;;  %v3800_v2 = vpop.eup %3799  ;;  %3801 = vtanh.f32 %v4820_v45  ;;  %vm1712_vm3 = vweird.f32 %v3798_v51 }
 0x2e5   : > { %v1684_v25 = vsel %vm1683_vm11, %v3792_v46, %v1680_v17  ;;  %v1665_v46 = vadd.f32 %v4804_v44, %v1664_v12  ;;  %v1673_v21 = vor.u32 1.1754944e-38, %v1672_v16  ;;  %vm1671_vm5 = vcmp.eq.f32.partialorder %v1670_v29, 8.507059e+37  ;;  %vm1713_vm6 = vmor %vm1711_vm4, %vm1712_vm3  ;;  %v1748_v29 = vld [vmem:[%s1745_s9 + $0x10] sm:$0xff] }
 0x2e6   : > { %v1708_v60 = vsub.f32 1.0, %v1707_v59  ;;  %v1689_v4 = vsel %vm1686_vm12, %v1688_v54, %v1684_v25  ;;  %v1695_v15 = vadd.f32 %v3796_v33, %v1694_v20  ;;  %v1718_v55 = vor.u32 1.1754944e-38, %v1717_v35 }
 0x2e7   : > { %v1726_v18 = vmul.f32 %v3800_v2, %v1689_v4 }
 0x2e8   : > { %v1699_v8 = vsel %vm1698_vm14, %v3796_v33, %v1695_v15  ;;  %v1709_v28 = vmul.f32 %v3798_v51, %v1708_v60  ;;  %v1669_v33 = vsel %vm1668_vm2, %v4804_v44, %v1665_v46 }
 0x2e9   : > { %v1704_v3 = vsel %vm1701_vm15, %v1703_v30, %v1699_v8  ;;  %v1674_v40 = vsel %vm1671_vm5, %v1673_v21, %v1669_v33  ;;  %v1817_v21 = vunpack.c.h.bf16 %v1748_v29 }
 0x2ea   : > { %v1724_v13 = vmul.f32 %v1704_v3, %v4747_v26  ;;  %v1710_v43 = vadd.f32 %v3798_v51, %v1709_v28  ;;  %v3802_v9 = vpop.eup %3801  ;;  %v1715_v26 = vand.u32 2147483647, %v4806_v22  ;;  %v1746_v22 = vld [vmem:[%s1745_s9] sm:$0xff] }
 0x2eb   : > { %v1731_v54 = vmul.f32 %v3802_v9, %v1674_v40  ;;  %v1813_v30 = vunpack.c.h.bf16 %v1746_v22  ;;  %v1816_v9 = vunpack.c.l.bf16 %v1748_v29 }
 0x2ec   : > { %v4832_v0 = vadd.f32 %v1726_v18, %v1724_v13  ;;  %v1714_v17 = vsel %vm1713_vm6, %v3798_v51, %v1710_v43  ;;  %vm1716_vm7 = vcmp.eq.f32.partialorder %v1715_v26, 8.507059e+37  ;;  %v1812_v51 = vunpack.c.l.bf16 %v1746_v22  ;;  %v1747_v13 = vld [vmem:[%s1745_s9 + $0x8] sm:$0xff] }
 0x2ed   : > { %v1719_v20 = vsel %vm1716_vm7, %v1718_v55, %v1714_v17  ;;  %v1733_v12 = vpack.c.bf16 %v1731_v54, %v1731_v54  ;;  %v1814_v33 = vunpack.c.l.bf16 %v1747_v13 }
 0x2ee   : > { %3803 = vtanh.f32 %v4832_v0 }
 0x2ef   : > { %v1752_v60 = vunpack.c.l.b16 %v1733_v12 }
 0x2f4   : > { %v3804_v44 = vpop.eup %3803 }
 0x2f5   : > { %v1732_v59 = vmul.f32 %v3804_v44, %v1719_v20 }
 0x2f7   : > { %v1734_v25 = vpack.c.bf16 %v1732_v59, %v1732_v59  ;;  %v3614_v2 = vpack.c.bf16 %v1732_v59, %v1731_v54  ;;  %v4880_v59 = vld [vmem:[%s1745_s9 + $0x18] sm:$0xff]  ;;  %s3644_s9 = smul.u32 4294967216, %s4071_s18 }
 0x2f9   : > { %3615 = vst [vmem:[%s1736_s25] sm:$0xff] %v3614_v2   ;;  %v1753_v4 = vunpack.c.l.b16 %v1734_v25  ;;  %s2184_s25 = sshra.s32 %s5059_s23, 3  ;;  %s5119_s11 = sadd.s32 96, %s3644_s9 }
 0x2fa   : > { %s3594_s6 = sshll.u32 %s2184_s25, 4  ;;  %s3482_s8 = sshll.u32 %s2184_s25, 2 }
 0x2fb   : > { %v1754_v15 = vpack.c.b16 %v1753_v4, %v1752_v60  ;;  %v1818_v4 = vunpack.c.l.bf16 %v4880_v59  ;;  %s2188_s24 = scalar_lea.vmem [#allocation2], %s3594_s6  ;;  %s2400_s10 = scalar_lea.vmem %s4669_s7, %s3482_s8 [#allocation9] }
 0x2fd   : > { %1764 = vmatmul.bf16.vlgmr.msra.gmra.mxu0 %v1754_v15  ;;  %1778 = vmatmul.bf16.vlgmr.msra.gmra.mxu1 %v1754_v15 }
 0x2fe   : > { %1792 = vmatmul.bf16.vlgmr.msra.gmra.mxu2 %v1754_v15  ;;  %1806 = vmatmul.bf16.vlgmr.msra.gmra.mxu3 %v1754_v15 }
 0x2ff   : > { %2199 = vmatpush.bf16.msra.mxu0 %v4278_v37  ;;  %2213 = vmatpush.bf16.msra.mxu1 %v4283_v41 }
 0x300   : > { %2227 = vmatpush.bf16.msra.mxu2 %v4290_v47  ;;  %2241 = vmatpush.bf16.msra.mxu3 %v4293_v48 }
 0x303   : > { %2200 = vmatpush.bf16.msra.mxu0 %v4295_v49  ;;  %2214 = vmatpush.bf16.msra.mxu1 %v4300_v52 }
 0x304   : > { %2228 = vmatpush.bf16.msra.mxu2 %v4303_v53  ;;  %2242 = vmatpush.bf16.msra.mxu3 %v4310_v57 }
 0x307   : > { %2201 = vmatpush.bf16.msra.mxu0 %v4316_v61  ;;  %2215 = vmatpush.bf16.msra.mxu1 %v4318_v62 }
 0x308   : > { %2229 = vmatpush.bf16.msra.mxu2 %v4323_v1  ;;  %2243 = vmatpush.bf16.msra.mxu3 %v4335_v6 }
 0x30b   : > { %2202 = vmatpush.bf16.msra.mxu0 %v4340_v10  ;;  %2216 = vmatpush.bf16.msra.mxu1 %v4342_v11 }
 0x30c   : > { %2230 = vmatpush.bf16.msra.mxu2 %v4347_v14  ;;  %2244 = vmatpush.bf16.msra.mxu3 %v4358_v19 }
 0x30f   : > { %2203 = vmatpush.bf16.msra.mxu0 %v4363_v23  ;;  %2217 = vmatpush.bf16.msra.mxu1 %v4365_v24 }
 0x310   : > { %2231 = vmatpush.bf16.msra.mxu2 %v4370_v27  ;;  %2245 = vmatpush.bf16.msra.mxu3 %v4381_v32 }
 0x313   : > { %2204 = vmatpush.bf16.msra.mxu0 %v4386_v36  ;;  %2218 = vmatpush.bf16.msra.mxu1 %v4388_v38 }
 0x314   : > { %2232 = vmatpush.bf16.msra.mxu2 %v4393_v42  ;;  %2246 = vmatpush.bf16.msra.mxu3 %v4404_v50 }
 0x317   : > { %2205 = vmatpush.bf16.msra.mxu0 %v4409_v56  ;;  %2219 = vmatpush.bf16.msra.mxu1 %v4411_v58 }
 0x318   : > { %2233 = vmatpush.bf16.msra.mxu2 %v4416_v63  ;;  %2247 = vmatpush.bf16.msra.mxu3 %v4427_v5 }
 0x31b   : > { %2206 = vmatpush.bf16.msra.mxu0 %v5303_v31  ;;  %2220 = vmatpush.bf16.msra.mxu1 %v5304_v34 }
 0x31c   : > { %2234 = vmatpush.bf16.msra.mxu2 %v5305_v39  ;;  %2248 = vmatpush.bf16.msra.mxu3 %v5306_v7 }
 0x37a   : > { %v1765_v8 = vpop.f32.mrf.mxu0  ;;  %v1779_v18 = vpop.f32.mrf.mxu1 }
 0x37b   : > { %v1820_v28 = vadd.f32 %v1812_v51, %v1765_v8  ;;  %v1821_v3 = vadd.f32 %v1813_v30, %v1779_v18  ;;  %v1815_v51 = vunpack.c.h.bf16 %v1747_v13 }
 0x37d   : > { %v3456_v46 = vmul.f32 -1.442695, %v1820_v28  ;;  %v3457_v16 = vmul.f32 -1.442695, %v1821_v3 }
 0x37f   : > { %3805 = vpow2.f32 %v3456_v46 }
 0x380   : > { %3807 = vpow2.f32 %v3457_v16 }
 0x381   : > { %v1793_v43 = vpop.f32.mrf.mxu2  ;;  %v1807_v15 = vpop.f32.mrf.mxu3 }
 0x382   : > { %v1822_v35 = vadd.f32 %v1814_v33, %v1793_v43  ;;  %v1767_v26 = vpop.f32.mrf.mxu0  ;;  %v1781_v40 = vpop.f32.mrf.mxu1  ;;  %v1823_v18 = vadd.f32 %v1815_v51, %v1807_v15 }
 0x383   : > { %v1824_v17 = vadd.f32 %v1816_v9, %v1767_v26  ;;  %v1825_v54 = vadd.f32 %v1817_v21, %v1781_v40 }
 0x384   : > { %v3458_v55 = vmul.f32 -1.442695, %v1822_v35 }
 0x385   : > { %v3806_v44 = vpop.eup %3805  ;;  %v3459_v20 = vmul.f32 -1.442695, %v1824_v17  ;;  %v3460_v2 = vmul.f32 -1.442695, %v1825_v54 }
 0x386   : > { %v3808_v12 = vpop.eup %3807  ;;  %v1846_v25 = vadd.f32 1.0, %v3806_v44  ;;  %3809 = vpow2.f32 %v3458_v55 }
 0x387   : > { %v1847_v60 = vadd.f32 1.0, %v3808_v12  ;;  %3811 = vpow2.f32 %v3459_v20 }
 0x388   : > { %3813 = vrcp.f32 %v1846_v25  ;;  %v1861_v17 = vand.u32 2147483647, %v1846_v25  ;;  %v1863_v54 = vand.u32 2147483648, %v1846_v25  ;;  %vm1857_vm11 = vweird.f32 %v1846_v25 }
 0x389   : > { %3815 = vrcp.f32 %v1847_v60  ;;  %v1795_v22 = vpop.f32.mrf.mxu2  ;;  %v1878_v40 = vand.u32 2147483648, %v1847_v60  ;;  %v1876_v44 = vand.u32 2147483647, %v1847_v60  ;;  %vm1872_vm10 = vweird.f32 %v1847_v60  ;;  %v1809_v51 = vpop.f32.mrf.mxu3 }
 0x38a   : > { %3817 = vpow2.f32 %v3460_v2  ;;  %v1826_v30 = vadd.f32 %v1818_v4, %v1795_v22  ;;  %v1819_v2 = vunpack.c.h.bf16 %v4880_v59  ;;  %vm1862_vm13 = vcmp.eq.f32.partialorder %v1861_v17, 8.507059e+37 }
 0x38b   : > { %vm1877_vm15 = vcmp.eq.f32.partialorder %v1876_v44, 8.507059e+37 }
 0x38c   : > { %v3810_v8 = vpop.eup %3809  ;;  %v3461_v28 = vmul.f32 -1.442695, %v1826_v30 }
 0x38d   : > { %v3812_v3 = vpop.eup %3811  ;;  %v4883_v46 = vadd.f32 1.0, %v3810_v8  ;;  %v1879_v8 = vor.u32 1.1754944e-38, %v1878_v40 }
 0x38e   : > { %v3814_v16 = vpop.eup %3813  ;;  %v4885_v29 = vadd.f32 1.0, %v3812_v3  ;;  %3819 = vpow2.f32 %v3461_v28 }
 0x38f   : > { %v3816_v33 = vpop.eup %3815  ;;  %v1853_v43 = vmul.f32 %v3814_v16, %v1846_v25  ;;  %3821 = vrcp.f32 %v4883_v46  ;;  %vm1858_vm8 = vweird.f32 %v3814_v16 }
 0x390   : > { %v3818_v9 = vpop.eup %3817  ;;  %v1868_v21 = vmul.f32 %v3816_v33, %v1847_v60  ;;  %3823 = vtanh.f32 %v1823_v18  ;;  %vm1873_vm9 = vweird.f32 %v3816_v33  ;;  %vm1859_vm12 = vmor %vm1857_vm11, %vm1858_vm8  ;;  %v1864_v18 = vor.u32 1.1754944e-38, %v1863_v54 }
 0x391   : > { %v1854_v13 = vsub.f32 1.0, %v1853_v43  ;;  %3825 = vrcp.f32 %v4885_v29  ;;  %v4889_v35 = vadd.f32 1.0, %v3818_v9  ;;  %vm1874_vm14 = vmor %vm1872_vm10, %vm1873_vm9  ;;  %vm1902_vm2 = vweird.f32 %v4885_v29 }
 0x392   : > { %v1869_v26 = vsub.f32 1.0, %v1868_v21  ;;  %v1827_v21 = vadd.f32 %v1819_v2, %v1809_v51  ;;  %v1906_v2 = vand.u32 2147483647, %v4885_v29  ;;  %vm1887_vm9 = vweird.f32 %v4883_v46 }
 0x393   : > { %v1855_v55 = vmul.f32 %v3814_v16, %v1854_v13  ;;  %3827 = vrcp.f32 %v4889_v35  ;;  %vm1917_vm3 = vweird.f32 %v4889_v35 }
 0x394   : > { %v3820_v20 = vpop.eup %3819  ;;  %v1870_v12 = vmul.f32 %v3816_v33, %v1869_v26  ;;  %vm1907_vm7 = vcmp.eq.f32.partialorder %v1906_v2, 8.507059e+37 }
 0x395   : > { %v4893_v4 = vpop.eup %3821  ;;  %v1856_v15 = vadd.f32 %v3814_v16, %v1855_v55  ;;  %v4895_v22 = vadd.f32 1.0, %v3820_v20 }
 0x396   : > { %v3824_v30 = vpop.eup %3823  ;;  %v1871_v28 = vadd.f32 %v3816_v33, %v1870_v12  ;;  %v1883_v59 = vmul.f32 %v4893_v4, %v4883_v46  ;;  %vm1888_vm5 = vweird.f32 %v4893_v4 }
 0x397   : > { %v3826_v3 = vpop.eup %3825  ;;  %v1860_v43 = vsel %vm1859_vm12, %v3814_v16, %v1856_v15  ;;  %3829 = vrcp.f32 %v4895_v22  ;;  %v1908_v16 = vand.u32 2147483648, %v4885_v29  ;;  %v1921_v15 = vand.u32 2147483647, %v4889_v35  ;;  %vm1889_vm10 = vmor %vm1887_vm9, %vm1888_vm5 }
 0x398   : > { %v1865_v25 = vsel %vm1862_vm13, %v1864_v18, %v1860_v43  ;;  %v1875_v60 = vsel %vm1874_vm14, %v3816_v33, %v1871_v28  ;;  %v1898_v9 = vmul.f32 %v3826_v3, %v4885_v29  ;;  %v1884_v20 = vsub.f32 1.0, %v1883_v59 }
 0x399   : > { %v3828_v13 = vpop.eup %3827  ;;  %v1880_v26 = vsel %vm1877_vm15, %v1879_v8, %v1875_v60  ;;  %v1946_v17 = vmul.f32 %v3824_v30, %v1865_v25  ;;  %3831 = vtanh.f32 %v1827_v21  ;;  %v1923_v33 = vand.u32 2147483648, %v4889_v35 }
 0x39a   : > { %v1944_v40 = vmul.f32 %v1880_v26, %v4820_v45  ;;  %v1899_v54 = vsub.f32 1.0, %v1898_v9  ;;  %v1913_v55 = vmul.f32 %v3828_v13, %v4889_v35  ;;  %vm1903_vm0 = vweird.f32 %v3826_v3 }
 0x39b   : > { %vm1918_vm1 = vweird.f32 %v3828_v13  ;;  %v1885_v8 = vmul.f32 %v4893_v4, %v1884_v20  ;;  %vm1904_vm4 = vmor %vm1902_vm2, %vm1903_vm0  ;;  %v1909_v59 = vor.u32 1.1754944e-38, %v1908_v16  ;;  %v1924_v25 = vor.u32 1.1754944e-38, %v1923_v33 }
 0x39c   : > { %v1914_v12 = vsub.f32 1.0, %v1913_v55  ;;  %v1900_v7 = vmul.f32 %v3826_v3, %v1899_v54  ;;  %v4909_v51 = vadd.f32 %v1946_v17, %v1944_v40  ;;  %vm1919_vm6 = vmor %vm1917_vm3, %vm1918_vm1  ;;  %vm1922_vm8 = vcmp.eq.f32.partialorder %v1921_v15, 8.507059e+37 }
 0x39d   : > { %v3830_v44 = vpop.eup %3829  ;;  %v1893_v17 = vand.u32 2147483648, %v4883_v46  ;;  %v1938_v33 = vand.u32 2147483648, %v4895_v22  ;;  %vm1932_vm13 = vweird.f32 %v4895_v22 }
 0x39e   : > { %v1915_v45 = vmul.f32 %v3828_v13, %v1914_v12  ;;  %v1928_v30 = vmul.f32 %v3830_v44, %v4895_v22  ;;  %v1901_v18 = vadd.f32 %v3826_v3, %v1900_v7  ;;  %3833 = vtanh.f32 %v4909_v51 }
 0x39f   : > { %v3832_v9 = vpop.eup %3831  ;;  %v1886_v7 = vadd.f32 %v4893_v4, %v1885_v8  ;;  %vm1933_vm11 = vweird.f32 %v3830_v44  ;;  %v1894_v16 = vor.u32 1.1754944e-38, %v1893_v17 }
 0x3a0   : > { %v1929_v28 = vsub.f32 1.0, %v1928_v30  ;;  %v1916_v43 = vadd.f32 %v3828_v13, %v1915_v45  ;;  %v1905_v60 = vsel %vm1904_vm4, %v3826_v3, %v1901_v18  ;;  %v1891_v3 = vand.u32 2147483647, %v4883_v46  ;;  %vm1934_vm14 = vmor %vm1932_vm13, %vm1933_vm11 }
 0x3a1   : > { %v1910_v21 = vsel %vm1907_vm7, %v1909_v59, %v1905_v60 }
 0x3a2   : > { %v1920_v26 = vsel %vm1919_vm6, %v3828_v13, %v1916_v43  ;;  %v1930_v29 = vmul.f32 %v3830_v44, %v1929_v28  ;;  %v1947_v40 = vmul.f32 %v3832_v9, %v1910_v21  ;;  %v1890_v13 = vsel %vm1889_vm10, %v4893_v4, %v1886_v7 }
 0x3a3   : > { %v1925_v35 = vsel %vm1922_vm8, %v1924_v25, %v1920_v26  ;;  %vm1892_vm12 = vcmp.eq.f32.partialorder %v1891_v3, 8.507059e+37  ;;  %v1939_v4 = vor.u32 1.1754944e-38, %v1938_v33  ;;  %v1969_v3 = vld [vmem:[%s1966_s12 + $0x10] sm:$0xff] }
 0x3a4   : > { %v1945_v54 = vmul.f32 %v1925_v35, %v4832_v0  ;;  %v1931_v20 = vadd.f32 %v3830_v44, %v1930_v29  ;;  %v3834_v12 = vpop.eup %3833  ;;  %v1936_v0 = vand.u32 2147483647, %v4895_v22  ;;  %v1895_v46 = vsel %vm1892_vm12, %v1894_v16, %v1890_v13  ;;  %v5307_v22 = vld [vmem:[#allocation15_spill] sm:$0xff] }
 0x3a5   : > { %v1952_v15 = vmul.f32 %v3834_v12, %v1895_v46  ;;  %v2037_v12 = vunpack.c.l.bf16 %v1969_v3  ;;  %v2038_v16 = vunpack.c.h.bf16 %v1969_v3 }
 0x3a6   : > { %v4924_v55 = vadd.f32 %v1947_v40, %v1945_v54  ;;  %v1935_v2 = vsel %vm1934_vm14, %v3830_v44, %v1931_v20  ;;  %vm1937_vm15 = vcmp.eq.f32.partialorder %v1936_v0, 8.507059e+37  ;;  %v1967_v44 = vld [vmem:[%s1966_s12] sm:$0xff]  ;;  %v1968_v54 = vld [vmem:[%s1966_s12 + $0x8] sm:$0xff] }
 0x3a7   : > { %v1940_v30 = vsel %vm1937_vm15, %v1939_v4, %v1935_v2  ;;  %v1954_v18 = vpack.c.bf16 %v1952_v15, %v1952_v15  ;;  %v2033_v9 = vunpack.c.l.bf16 %v1967_v44  ;;  %v2034_v21 = vunpack.c.h.bf16 %v1967_v44 }
 0x3a8   : > { %3835 = vtanh.f32 %v4924_v55  ;;  %v2035_v13 = vunpack.c.l.bf16 %v1968_v54 }
 0x3a9   : > { %v1973_v43 = vunpack.c.l.b16 %v1954_v18 }
 0x3ae   : > { %v3836_v45 = vpop.eup %3835 }
 0x3af   : > { %v1953_v8 = vmul.f32 %v3836_v45, %v1940_v30 }
 0x3b1   : > { %v1955_v28 = vpack.c.bf16 %v1953_v8, %v1953_v8  ;;  %v3619_v59 = vpack.c.bf16 %v1953_v8, %v1952_v15  ;;  %v4972_v8 = vld [vmem:[%s1966_s12 + $0x18] sm:$0xff]  ;;  %s3645_s12 = smul.u32 4294967184, %s4071_s18 }
 0x3b3   : > { %3620 = vst [vmem:[%s1957_s13] sm:$0xff] %v3619_v59   ;;  %v1974_v25 = vunpack.c.l.b16 %v1955_v28  ;;  %s2406_s13 = sshra.s32 %s5119_s11, 3  ;;  %s5179_s14 = sadd.s32 112, %s3645_s12 }
 0x3b4   : > { %s3597_s29 = sshll.u32 %s2406_s13, 4  ;;  %s3492_s26 = sshll.u32 %s2406_s13, 2 }
 0x3b5   : > { %v1975_v60 = vpack.c.b16 %v1974_v25, %v1973_v43  ;;  %v2039_v25 = vunpack.c.l.bf16 %v4972_v8  ;;  %s2410_s30 = scalar_lea.vmem [#allocation2], %s3597_s29  ;;  %s2622_s5 = scalar_lea.vmem %s4669_s7, %s3492_s26 [#allocation9] }
 0x3b7   : > { %1985 = vmatmul.bf16.vlgmr.msrb.gmra.mxu0 %v1975_v60  ;;  %1999 = vmatmul.bf16.vlgmr.msrb.gmra.mxu1 %v1975_v60 }
 0x3b8   : > { %2013 = vmatmul.bf16.vlgmr.msrb.gmra.mxu2 %v1975_v60  ;;  %2027 = vmatmul.bf16.vlgmr.msrb.gmra.mxu3 %v1975_v60 }
 0x3b9   : > { %2421 = vmatpush.bf16.msrb.mxu0 %v4278_v37  ;;  %2435 = vmatpush.bf16.msrb.mxu1 %v4283_v41 }
 0x3ba   : > { %2449 = vmatpush.bf16.msrb.mxu2 %v4290_v47  ;;  %2463 = vmatpush.bf16.msrb.mxu3 %v4293_v48 }
 0x3bd   : > { %2422 = vmatpush.bf16.msrb.mxu0 %v4295_v49  ;;  %2436 = vmatpush.bf16.msrb.mxu1 %v4300_v52 }
 0x3be   : > { %2450 = vmatpush.bf16.msrb.mxu2 %v4303_v53  ;;  %2464 = vmatpush.bf16.msrb.mxu3 %v4310_v57 }
 0x3c1   : > { %2423 = vmatpush.bf16.msrb.mxu0 %v4316_v61  ;;  %2437 = vmatpush.bf16.msrb.mxu1 %v4318_v62 }
 0x3c2   : > { %2451 = vmatpush.bf16.msrb.mxu2 %v4323_v1  ;;  %2465 = vmatpush.bf16.msrb.mxu3 %v4335_v6 }
 0x3c5   : > { %2424 = vmatpush.bf16.msrb.mxu0 %v4340_v10  ;;  %2438 = vmatpush.bf16.msrb.mxu1 %v4342_v11 }
 0x3c6   : > { %2452 = vmatpush.bf16.msrb.mxu2 %v4347_v14  ;;  %2466 = vmatpush.bf16.msrb.mxu3 %v4358_v19 }
 0x3c9   : > { %2425 = vmatpush.bf16.msrb.mxu0 %v4363_v23  ;;  %2439 = vmatpush.bf16.msrb.mxu1 %v4365_v24 }
 0x3ca   : > { %2453 = vmatpush.bf16.msrb.mxu2 %v4370_v27  ;;  %2467 = vmatpush.bf16.msrb.mxu3 %v4381_v32 }
 0x3cd   : > { %2426 = vmatpush.bf16.msrb.mxu0 %v4386_v36  ;;  %2440 = vmatpush.bf16.msrb.mxu1 %v4388_v38 }
 0x3ce   : > { %2454 = vmatpush.bf16.msrb.mxu2 %v4393_v42  ;;  %2468 = vmatpush.bf16.msrb.mxu3 %v4404_v50 }
 0x3d1   : > { %2427 = vmatpush.bf16.msrb.mxu0 %v4409_v56  ;;  %2441 = vmatpush.bf16.msrb.mxu1 %v4411_v58 }
 0x3d2   : > { %2455 = vmatpush.bf16.msrb.mxu2 %v4416_v63  ;;  %2469 = vmatpush.bf16.msrb.mxu3 %v4427_v5 }
 0x3d5   : > { %2428 = vmatpush.bf16.msrb.mxu0 %v5303_v31  ;;  %2442 = vmatpush.bf16.msrb.mxu1 %v5304_v34 }
 0x3d6   : > { %2456 = vmatpush.bf16.msrb.mxu2 %v5305_v39  ;;  %2470 = vmatpush.bf16.msrb.mxu3 %v5307_v22 }
 0x434   : > { %v1986_v26 = vpop.f32.mrf.mxu0  ;;  %v2000_v7 = vpop.f32.mrf.mxu1 }
 0x435   : > { %v2041_v29 = vadd.f32 %v2033_v9, %v1986_v26  ;;  %v2042_v35 = vadd.f32 %v2034_v21, %v2000_v7  ;;  %v2036_v9 = vunpack.c.h.bf16 %v1968_v54 }
 0x437   : > { %v3466_v40 = vmul.f32 -1.442695, %v2041_v29  ;;  %v3467_v17 = vmul.f32 -1.442695, %v2042_v35 }
 0x439   : > { %3837 = vpow2.f32 %v3466_v40 }
 0x43a   : > { %3839 = vpow2.f32 %v3467_v17 }
 0x43b   : > { %v2014_v20 = vpop.f32.mrf.mxu2  ;;  %v2028_v60 = vpop.f32.mrf.mxu3 }
 0x43c   : > { %v2043_v33 = vadd.f32 %v2035_v13, %v2014_v20  ;;  %v1988_v0 = vpop.f32.mrf.mxu0  ;;  %v2002_v46 = vpop.f32.mrf.mxu1  ;;  %v2044_v7 = vadd.f32 %v2036_v9, %v2028_v60 }
 0x43d   : > { %v2045_v2 = vadd.f32 %v2037_v12, %v1988_v0  ;;  %v2046_v15 = vadd.f32 %v2038_v16, %v2002_v46 }
 0x43e   : > { %v3468_v4 = vmul.f32 -1.442695, %v2043_v33 }
 0x43f   : > { %v3838_v45 = vpop.eup %3837  ;;  %v3469_v30 = vmul.f32 -1.442695, %v2045_v2  ;;  %v3470_v59 = vmul.f32 -1.442695, %v2046_v15 }
 0x440   : > { %v3840_v18 = vpop.eup %3839  ;;  %v2067_v28 = vadd.f32 1.0, %v3838_v45  ;;  %3841 = vpow2.f32 %v3468_v4 }
 0x441   : > { %v2068_v43 = vadd.f32 1.0, %v3840_v18  ;;  %3843 = vpow2.f32 %v3469_v30 }
 0x442   : > { %3845 = vrcp.f32 %v2067_v28  ;;  %v2082_v2 = vand.u32 2147483647, %v2067_v28  ;;  %v2084_v15 = vand.u32 2147483648, %v2067_v28  ;;  %vm2078_vm3 = vweird.f32 %v2067_v28 }
 0x443   : > { %3847 = vrcp.f32 %v2068_v43  ;;  %v2016_v44 = vpop.f32.mrf.mxu2  ;;  %v2099_v46 = vand.u32 2147483648, %v2068_v43  ;;  %v2097_v45 = vand.u32 2147483647, %v2068_v43  ;;  %vm2093_vm2 = vweird.f32 %v2068_v43  ;;  %v2030_v9 = vpop.f32.mrf.mxu3 }
 0x444   : > { %3849 = vpow2.f32 %v3470_v59  ;;  %v2047_v21 = vadd.f32 %v2039_v25, %v2016_v44  ;;  %v2040_v59 = vunpack.c.h.bf16 %v4972_v8  ;;  %vm2083_vm5 = vcmp.eq.f32.partialorder %v2082_v2, 8.507059e+37 }
 0x445   : > { %vm2098_vm7 = vcmp.eq.f32.partialorder %v2097_v45, 8.507059e+37 }
 0x446   : > { %v3842_v26 = vpop.eup %3841  ;;  %v3471_v29 = vmul.f32 -1.442695, %v2047_v21 }
 0x447   : > { %v3844_v35 = vpop.eup %3843  ;;  %v4975_v40 = vadd.f32 1.0, %v3842_v26  ;;  %v2100_v26 = vor.u32 1.1754944e-38, %v2099_v46 }
 0x448   : > { %v3846_v17 = vpop.eup %3845  ;;  %v4977_v3 = vadd.f32 1.0, %v3844_v35  ;;  %3851 = vpow2.f32 %v3471_v29 }
 0x449   : > { %v3848_v13 = vpop.eup %3847  ;;  %v2074_v20 = vmul.f32 %v3846_v17, %v2067_v28  ;;  %3853 = vrcp.f32 %v4975_v40  ;;  %vm2079_vm0 = vweird.f32 %v3846_v17 }
 0x44a   : > { %v3850_v12 = vpop.eup %3849  ;;  %v2089_v16 = vmul.f32 %v3848_v13, %v2068_v43  ;;  %3855 = vtanh.f32 %v2044_v7  ;;  %vm2094_vm1 = vweird.f32 %v3848_v13  ;;  %vm2080_vm4 = vmor %vm2078_vm3, %vm2079_vm0  ;;  %v2085_v7 = vor.u32 1.1754944e-38, %v2084_v15 }
 0x44b   : > { %v2075_v54 = vsub.f32 1.0, %v2074_v20  ;;  %3857 = vrcp.f32 %v4977_v3  ;;  %v4981_v33 = vadd.f32 1.0, %v3850_v12  ;;  %vm2095_vm6 = vmor %vm2093_vm2, %vm2094_vm1  ;;  %vm2123_vm10 = vweird.f32 %v4977_v3 }
 0x44c   : > { %v2090_v0 = vsub.f32 1.0, %v2089_v16  ;;  %v2048_v16 = vadd.f32 %v2040_v59, %v2030_v9  ;;  %v2127_v59 = vand.u32 2147483647, %v4977_v3  ;;  %vm2108_vm1 = vweird.f32 %v4975_v40 }
 0x44d   : > { %v2076_v4 = vmul.f32 %v3846_v17, %v2075_v54  ;;  %3859 = vrcp.f32 %v4981_v33  ;;  %vm2138_vm11 = vweird.f32 %v4981_v33 }
 0x44e   : > { %v3852_v30 = vpop.eup %3851  ;;  %v2091_v18 = vmul.f32 %v3848_v13, %v2090_v0  ;;  %vm2128_vm15 = vcmp.eq.f32.partialorder %v2127_v59, 8.507059e+37 }
 0x44f   : > { %v4985_v25 = vpop.eup %3853  ;;  %v2077_v60 = vadd.f32 %v3846_v17, %v2076_v4  ;;  %v4987_v44 = vadd.f32 1.0, %v3852_v30 }
 0x450   : > { %v3856_v21 = vpop.eup %3855  ;;  %v2092_v29 = vadd.f32 %v3848_v13, %v2091_v18  ;;  %v2104_v8 = vmul.f32 %v4985_v25, %v4975_v40  ;;  %vm2109_vm13 = vweird.f32 %v4985_v25 }
 0x451   : > { %v3858_v35 = vpop.eup %3857  ;;  %v2081_v20 = vsel %vm2080_vm4, %v3846_v17, %v2077_v60  ;;  %3861 = vrcp.f32 %v4987_v44  ;;  %v2129_v17 = vand.u32 2147483648, %v4977_v3  ;;  %v2142_v60 = vand.u32 2147483647, %v4981_v33  ;;  %vm2110_vm2 = vmor %vm2108_vm1, %vm2109_vm13 }
 0x452   : > { %v2086_v28 = vsel %vm2083_vm5, %v2085_v7, %v2081_v20  ;;  %v2096_v43 = vsel %vm2095_vm6, %v3848_v13, %v2092_v29  ;;  %v2119_v12 = vmul.f32 %v3858_v35, %v4977_v3  ;;  %v2105_v30 = vsub.f32 1.0, %v2104_v8 }
 0x453   : > { %v3860_v54 = vpop.eup %3859  ;;  %v2101_v0 = vsel %vm2098_vm7, %v2100_v26, %v2096_v43  ;;  %v2167_v2 = vmul.f32 %v3856_v21, %v2086_v28  ;;  %3863 = vtanh.f32 %v2048_v16  ;;  %v2144_v13 = vand.u32 2147483648, %v4981_v33 }
 0x454   : > { %v2165_v46 = vmul.f32 %v2101_v0, %v4909_v51  ;;  %v2120_v15 = vsub.f32 1.0, %v2119_v12  ;;  %v2134_v4 = vmul.f32 %v3860_v54, %v4981_v33  ;;  %vm2124_vm8 = vweird.f32 %v3858_v35 }
 0x455   : > { %vm2139_vm9 = vweird.f32 %v3860_v54  ;;  %v2106_v26 = vmul.f32 %v4985_v25, %v2105_v30  ;;  %vm2125_vm12 = vmor %vm2123_vm10, %vm2124_vm8  ;;  %v2130_v8 = vor.u32 1.1754944e-38, %v2129_v17  ;;  %v2145_v28 = vor.u32 1.1754944e-38, %v2144_v13 }
 0x456   : > { %v2135_v18 = vsub.f32 1.0, %v2134_v4  ;;  %v2121_v22 = vmul.f32 %v3858_v35, %v2120_v15  ;;  %v5001_v9 = vadd.f32 %v2167_v2, %v2165_v46  ;;  %vm2140_vm14 = vmor %vm2138_vm11, %vm2139_vm9  ;;  %vm2143_vm0 = vcmp.eq.f32.partialorder %v2142_v60, 8.507059e+37 }
 0x457   : > { %v3862_v45 = vpop.eup %3861  ;;  %v2114_v2 = vand.u32 2147483648, %v4975_v40  ;;  %v2159_v13 = vand.u32 2147483648, %v4987_v44  ;;  %vm2153_vm5 = vweird.f32 %v4987_v44 }
 0x458   : > { %v2136_v51 = vmul.f32 %v3860_v54, %v2135_v18  ;;  %v2149_v21 = vmul.f32 %v3862_v45, %v4987_v44  ;;  %v2122_v7 = vadd.f32 %v3858_v35, %v2121_v22  ;;  %3865 = vtanh.f32 %v5001_v9 }
 0x459   : > { %v3864_v12 = vpop.eup %3863  ;;  %v2107_v22 = vadd.f32 %v4985_v25, %v2106_v26  ;;  %vm2154_vm3 = vweird.f32 %v3862_v45  ;;  %v2115_v17 = vor.u32 1.1754944e-38, %v2114_v2 }
 0x45a   : > { %v2150_v29 = vsub.f32 1.0, %v2149_v21  ;;  %v2137_v20 = vadd.f32 %v3860_v54, %v2136_v51  ;;  %v2126_v43 = vsel %vm2125_vm12, %v3858_v35, %v2122_v7  ;;  %v2112_v35 = vand.u32 2147483647, %v4975_v40  ;;  %vm2155_vm6 = vmor %vm2153_vm5, %vm2154_vm3 }
 0x45b   : > { %v2131_v16 = vsel %vm2128_vm15, %v2130_v8, %v2126_v43  ;;  %v2160_v51 = vor.u32 1.1754944e-38, %v2159_v13 }
 0x45c   : > { %v2141_v0 = vsel %vm2140_vm14, %v3860_v54, %v2137_v20  ;;  %v2151_v3 = vmul.f32 %v3862_v45, %v2150_v29  ;;  %v2168_v46 = vmul.f32 %v3864_v12, %v2131_v16  ;;  %v2111_v54 = vsel %vm2110_vm2, %v4985_v25, %v2107_v22 }
 0x45d   : > { %v2146_v33 = vsel %vm2143_vm0, %v2145_v28, %v2141_v0  ;;  %vm2113_vm4 = vcmp.eq.f32.partialorder %v2112_v35, 8.507059e+37 }
 0x45e   : > { %v2166_v15 = vmul.f32 %v2146_v33, %v4924_v55  ;;  %v2152_v30 = vadd.f32 %v3862_v45, %v2151_v3  ;;  %v3866_v18 = vpop.eup %3865  ;;  %v2157_v55 = vand.u32 2147483647, %v4987_v44  ;;  %v2116_v40 = vsel %vm2113_vm4, %v2115_v17, %v2111_v54 }
 0x45f   : > { %v2173_v60 = vmul.f32 %v3866_v18, %v2116_v40 }
 0x460   : > { %v5016_v4 = vadd.f32 %v2168_v46, %v2166_v15  ;;  %v2156_v59 = vsel %vm2155_vm6, %v3862_v45, %v2152_v30  ;;  %vm2158_vm7 = vcmp.eq.f32.partialorder %v2157_v55, 8.507059e+37 }
 0x461   : > { %v2161_v21 = vsel %vm2158_vm7, %v2160_v51, %v2156_v59  ;;  %v2175_v7 = vpack.c.bf16 %v2173_v60, %v2173_v60 }
 0x462   : > { %3867 = vtanh.f32 %v5016_v4 }
 0x463   : > { %v2195_v20 = vunpack.c.l.b16 %v2175_v7 }
 0x468   : > { %v3868_v25 = vpop.eup %3867 }
 0x469   : > { %v2174_v26 = vmul.f32 %v3868_v25, %v2161_v21 }
 0x46b   : > { %v2176_v29 = vpack.c.bf16 %v2174_v26, %v2174_v26  ;;  %v3624_v8 = vpack.c.bf16 %v2174_v26, %v2173_v60 }
 0x46d   : > { %3625 = vst [vmem:[%s2178_s15] sm:$0xff] %v3624_v8   ;;  %v2196_v28 = vunpack.c.l.b16 %v2176_v29  ;;  %s2628_s15 = sshra.s32 %s5179_s14, 3 }
 0x46e   : > { %s3600_s21 = sshll.u32 %s2628_s15, 4  ;;  %s3502_s25 = sshll.u32 %s2628_s15, 2 }
 0x46f   : > { %v2197_v43 = vpack.c.b16 %v2196_v28, %v2195_v20  ;;  %s2632_s23 = scalar_lea.vmem [#allocation2], %s3600_s21  ;;  %s2844_s6 = scalar_lea.vmem %s4669_s7, %s3502_s25 [#allocation9] }
 0x471   : > { %2207 = vmatmul.bf16.vlgmr.msra.gmra.mxu0 %v2197_v43  ;;  %2221 = vmatmul.bf16.vlgmr.msra.gmra.mxu1 %v2197_v43 }
 0x472   : > { %2235 = vmatmul.bf16.vlgmr.msra.gmra.mxu2 %v2197_v43  ;;  %2249 = vmatmul.bf16.vlgmr.msra.gmra.mxu3 %v2197_v43 }
 0x473   : > { %2643 = vmatpush.bf16.msra.mxu0 %v4278_v37  ;;  %2657 = vmatpush.bf16.msra.mxu1 %v4283_v41  ;;  %v5308_v37 = vld [vmem:[#allocation15_spill] sm:$0xff]  ;;  %v2189_v41 = vld [vmem:[%s2188_s24] sm:$0xff] }
 0x474   : > { %2671 = vmatpush.bf16.msra.mxu2 %v4290_v47  ;;  %2685 = vmatpush.bf16.msra.mxu3 %v4293_v48  ;;  %v2255_v47 = vunpack.c.l.bf16 %v2189_v41  ;;  %v2256_v48 = vunpack.c.h.bf16 %v2189_v41 }
 0x477   : > { %2644 = vmatpush.bf16.msra.mxu0 %v4295_v49  ;;  %2658 = vmatpush.bf16.msra.mxu1 %v4300_v52 }
 0x478   : > { %2672 = vmatpush.bf16.msra.mxu2 %v4303_v53  ;;  %2686 = vmatpush.bf16.msra.mxu3 %v4310_v57 }
 0x47b   : > { %2645 = vmatpush.bf16.msra.mxu0 %v4316_v61  ;;  %2659 = vmatpush.bf16.msra.mxu1 %v4318_v62 }
 0x47c   : > { %2673 = vmatpush.bf16.msra.mxu2 %v4323_v1  ;;  %2687 = vmatpush.bf16.msra.mxu3 %v4335_v6  ;;  %v2190_v1 = vld [vmem:[%s2188_s24 + $0x8] sm:$0xff]  ;;  %v2191_v6 = vld [vmem:[%s2188_s24 + $0x10] sm:$0xff] }
 0x47d   : > { %v2258_v45 = vunpack.c.h.bf16 %v2190_v1 }
 0x47f   : > { %2646 = vmatpush.bf16.msra.mxu0 %v4340_v10  ;;  %2660 = vmatpush.bf16.msra.mxu1 %v4342_v11  ;;  %v2257_v10 = vunpack.c.l.bf16 %v2190_v1 }
 0x480   : > { %2674 = vmatpush.bf16.msra.mxu2 %v4347_v14  ;;  %2688 = vmatpush.bf16.msra.mxu3 %v4358_v19  ;;  %v2259_v14 = vunpack.c.l.bf16 %v2191_v6  ;;  %v2260_v19 = vunpack.c.h.bf16 %v2191_v6 }
 0x483   : > { %2647 = vmatpush.bf16.msra.mxu0 %v4363_v23  ;;  %2661 = vmatpush.bf16.msra.mxu1 %v4365_v24 }
 0x484   : > { %2675 = vmatpush.bf16.msra.mxu2 %v4370_v27  ;;  %2689 = vmatpush.bf16.msra.mxu3 %v4381_v32 }
 0x487   : > { %2648 = vmatpush.bf16.msra.mxu0 %v4386_v36  ;;  %2662 = vmatpush.bf16.msra.mxu1 %v4388_v38 }
 0x488   : > { %2676 = vmatpush.bf16.msra.mxu2 %v4393_v42  ;;  %2690 = vmatpush.bf16.msra.mxu3 %v4404_v50 }
 0x48b   : > { %2649 = vmatpush.bf16.msra.mxu0 %v4409_v56  ;;  %2663 = vmatpush.bf16.msra.mxu1 %v4411_v58  ;;  %v5064_v56 = vld [vmem:[%s2188_s24 + $0x18] sm:$0xff]  ;;  %s3504_s24 = sshll.u32 (%p4159_p9), %s4071_s18, 2 }
 0x48c   : > { %2677 = vmatpush.bf16.msra.mxu2 %v4416_v63  ;;  %2691 = vmatpush.bf16.msra.mxu3 %v4427_v5  ;;  %v2262_v26 = vunpack.c.h.bf16 %v5064_v56  ;;  %s2866_s9 = scalar_lea.vmem (%p4159_p9), %s5280_s4, %s3504_s24 }
 0x48f   : > { %2650 = vmatpush.bf16.msra.mxu0 %v5303_v31  ;;  %2664 = vmatpush.bf16.msra.mxu1 %v5304_v34  ;;  %v2261_v34 = vunpack.c.l.bf16 %v5064_v56 }
 0x490   : > { %2678 = vmatpush.bf16.msra.mxu2 %v5305_v39  ;;  %2692 = vmatpush.bf16.msra.mxu3 %v5308_v37 }
 0x4ee   : > { %v2208_v49 = vpop.f32.mrf.mxu0  ;;  %v2222_v52 = vpop.f32.mrf.mxu1 }
 0x4ef   : > { %v2263_v53 = vadd.f32 %v2255_v47, %v2208_v49  ;;  %v2264_v57 = vadd.f32 %v2256_v48, %v2222_v52 }
 0x4f1   : > { %v3476_v61 = vmul.f32 -1.442695, %v2263_v53  ;;  %v3477_v62 = vmul.f32 -1.442695, %v2264_v57 }
 0x4f3   : > { %3869 = vpow2.f32 %v3476_v61 }
 0x4f4   : > { %3871 = vpow2.f32 %v3477_v62 }
 0x4f5   : > { %v2236_v11 = vpop.f32.mrf.mxu2  ;;  %v2250_v39 = vpop.f32.mrf.mxu3 }
 0x4f6   : > { %v2265_v23 = vadd.f32 %v2257_v10, %v2236_v11  ;;  %v2210_v24 = vpop.f32.mrf.mxu0  ;;  %v2224_v27 = vpop.f32.mrf.mxu1  ;;  %v2266_v0 = vadd.f32 %v2258_v45, %v2250_v39 }
 0x4f7   : > { %v2267_v32 = vadd.f32 %v2259_v14, %v2210_v24  ;;  %v2268_v36 = vadd.f32 %v2260_v19, %v2224_v27 }
 0x4f8   : > { %v3478_v38 = vmul.f32 -1.442695, %v2265_v23 }
 0x4f9   : > { %v3870_v42 = vpop.eup %3869  ;;  %v3479_v50 = vmul.f32 -1.442695, %v2267_v32  ;;  %v3480_v5 = vmul.f32 -1.442695, %v2268_v36 }
 0x4fa   : > { %v3872_v58 = vpop.eup %3871  ;;  %v2289_v63 = vadd.f32 1.0, %v3870_v42  ;;  %3873 = vpow2.f32 %v3478_v38 }
 0x4fb   : > { %v2290_v31 = vadd.f32 1.0, %v3872_v58  ;;  %3875 = vpow2.f32 %v3479_v50 }
 0x4fc   : > { %3877 = vrcp.f32 %v2289_v63  ;;  %v2304_v40 = vand.u32 2147483647, %v2289_v63  ;;  %v2306_v59 = vand.u32 2147483648, %v2289_v63  ;;  %vm2300_vm11 = vweird.f32 %v2289_v63 }
 0x4fd   : > { %3879 = vrcp.f32 %v2290_v31  ;;  %v2238_v44 = vpop.f32.mrf.mxu2  ;;  %v2321_v55 = vand.u32 2147483648, %v2290_v31  ;;  %v2319_v51 = vand.u32 2147483647, %v2290_v31  ;;  %vm2315_vm10 = vweird.f32 %v2290_v31  ;;  %v2252_v20 = vpop.f32.mrf.mxu3 }
 0x4fe   : > { %3881 = vpow2.f32 %v3480_v5  ;;  %v2269_v12 = vadd.f32 %v2261_v34, %v2238_v44  ;;  %vm2305_vm13 = vcmp.eq.f32.partialorder %v2304_v40, 8.507059e+37  ;;  %v2307_v37 = vor.u32 1.1754944e-38, %v2306_v59 }
 0x4ff   : > { %v2322_v43 = vor.u32 1.1754944e-38, %v2321_v55  ;;  %vm2320_vm15 = vcmp.eq.f32.partialorder %v2319_v51, 8.507059e+37  ;;  %v2270_v61 = vadd.f32 %v2262_v26, %v2252_v20 }
 0x500   : > { %v3874_v16 = vpop.eup %3873  ;;  %v3481_v22 = vmul.f32 -1.442695, %v2269_v12 }
 0x501   : > { %v3876_v3 = vpop.eup %3875  ;;  %v5067_v33 = vadd.f32 1.0, %v3874_v16 }
 0x502   : > { %v3878_v46 = vpop.eup %3877  ;;  %v5069_v2 = vadd.f32 1.0, %v3876_v3  ;;  %3883 = vpow2.f32 %v3481_v22 }
 0x503   : > { %v3880_v15 = vpop.eup %3879  ;;  %v2296_v35 = vmul.f32 %v3878_v46, %v2289_v63  ;;  %3885 = vrcp.f32 %v5067_v33  ;;  %vm2301_vm8 = vweird.f32 %v3878_v46 }
 0x504   : > { %v3882_v54 = vpop.eup %3881  ;;  %v2311_v30 = vmul.f32 %v3880_v15, %v2290_v31  ;;  %3887 = vtanh.f32 %v2266_v0  ;;  %vm2316_vm9 = vweird.f32 %v3880_v15  ;;  %vm2302_vm12 = vmor %vm2300_vm11, %vm2301_vm8  ;;  %v2351_v27 = vand.u32 2147483648, %v5069_v2 }
 0x505   : > { %v2297_v18 = vsub.f32 1.0, %v2296_v35  ;;  %3889 = vrcp.f32 %v5069_v2  ;;  %v5073_v17 = vadd.f32 1.0, %v3882_v54  ;;  %vm2317_vm14 = vmor %vm2315_vm10, %vm2316_vm9  ;;  %v2349_v38 = vand.u32 2147483647, %v5069_v2 }
 0x506   : > { %v2312_v13 = vsub.f32 1.0, %v2311_v30  ;;  %vm2345_vm2 = vweird.f32 %v5069_v2  ;;  %v2352_v31 = vor.u32 1.1754944e-38, %v2351_v27  ;;  %vm2330_vm9 = vweird.f32 %v5067_v33 }
 0x507   : > { %v2298_v60 = vmul.f32 %v3878_v46, %v2297_v18  ;;  %3891 = vrcp.f32 %v5073_v17  ;;  %v2366_v36 = vand.u32 2147483648, %v5073_v17  ;;  %v2364_v42 = vand.u32 2147483647, %v5073_v17 }
 0x508   : > { %v3884_v25 = vpop.eup %3883  ;;  %v2313_v21 = vmul.f32 %v3880_v15, %v2312_v13  ;;  %vm2360_vm3 = vweird.f32 %v5073_v17  ;;  %vm2350_vm7 = vcmp.eq.f32.partialorder %v2349_v38, 8.507059e+37  ;;  %v2334_v35 = vand.u32 2147483647, %v5067_v33 }
 0x509   : > { %v5077_v7 = vpop.eup %3885  ;;  %v2299_v29 = vadd.f32 %v3878_v46, %v2298_v60  ;;  %v5079_v8 = vadd.f32 1.0, %v3884_v25  ;;  %v2367_v39 = vor.u32 1.1754944e-38, %v2366_v36  ;;  %vm2365_vm8 = vcmp.eq.f32.partialorder %v2364_v42, 8.507059e+37  ;;  %v5124_v42 = vld [vmem:[%s2410_s30 + $0x18] sm:$0xff] }
 0x50a   : > { %v3888_v28 = vpop.eup %3887  ;;  %v2314_v41 = vadd.f32 %v3880_v15, %v2313_v21  ;;  %v2326_v48 = vmul.f32 %v5077_v7, %v5067_v33  ;;  %vm2331_vm5 = vweird.f32 %v5077_v7 }
 0x50b   : > { %v3890_v47 = vpop.eup %3889  ;;  %v2303_v49 = vsel %vm2302_vm12, %v3878_v46, %v2299_v29  ;;  %3893 = vrcp.f32 %v5079_v8  ;;  %vm2332_vm10 = vmor %vm2330_vm9, %vm2331_vm5  ;;  %v2381_v55 = vand.u32 2147483648, %v5079_v8  ;;  %vm2335_vm12 = vcmp.eq.f32.partialorder %v2334_v35, 8.507059e+37 }
 0x50c   : > { %v2308_v52 = vsel %vm2305_vm13, %v2307_v37, %v2303_v49  ;;  %v2318_v53 = vsel %vm2317_vm14, %v3880_v15, %v2314_v41  ;;  %v2341_v57 = vmul.f32 %v3890_v47, %v5069_v2  ;;  %v2327_v19 = vsub.f32 1.0, %v2326_v48 }
 0x50d   : > { %v3892_v62 = vpop.eup %3891  ;;  %v2323_v1 = vsel %vm2320_vm15, %v2322_v43, %v2318_v53  ;;  %v2389_v10 = vmul.f32 %v3888_v28, %v2308_v52  ;;  %3895 = vtanh.f32 %v2270_v61  ;;  %vm2346_vm0 = vweird.f32 %v3890_v47  ;;  %v2411_v43 = vld [vmem:[%s2410_s30] sm:$0xff]  ;;  %v2412_v61 = vld [vmem:[%s2410_s30 + $0x8] sm:$0xff] }
 0x50e   : > { %v2387_v6 = vmul.f32 %v2323_v1, %v5001_v9  ;;  %v2342_v11 = vsub.f32 1.0, %v2341_v57  ;;  %v2356_v14 = vmul.f32 %v3892_v62, %v5073_v17  ;;  %vm2361_vm1 = vweird.f32 %v3892_v62  ;;  %vm2347_vm4 = vmor %vm2345_vm2, %vm2346_vm0 }
 0x50f   : > { %v2328_v58 = vmul.f32 %v5077_v7, %v2327_v19  ;;  %vm2362_vm6 = vmor %vm2360_vm3, %vm2361_vm1  ;;  %v2336_v2 = vand.u32 2147483648, %v5067_v33  ;;  %vm2375_vm13 = vweird.f32 %v5079_v8  ;;  %v2382_v60 = vor.u32 1.1754944e-38, %v2381_v55 }
 0x510   : > { %v2357_v23 = vsub.f32 1.0, %v2356_v14  ;;  %v2343_v24 = vmul.f32 %v3890_v47, %v2342_v11  ;;  %v5093_v50 = vadd.f32 %v2389_v10, %v2387_v6  ;;  %v2477_v37 = vunpack.c.l.bf16 %v2411_v43 }
 0x511   : > { %v3894_v32 = vpop.eup %3893  ;;  %v2329_v0 = vadd.f32 %v5077_v7, %v2328_v58  ;;  %v2337_v13 = vor.u32 1.1754944e-38, %v2336_v2  ;;  %v2478_v41 = vunpack.c.h.bf16 %v2411_v43  ;;  %v2479_v1 = vunpack.c.l.bf16 %v2412_v61 }
 0x512   : > { %v2358_v9 = vmul.f32 %v3892_v62, %v2357_v23  ;;  %v2371_v56 = vmul.f32 %v3894_v32, %v5079_v8  ;;  %v2344_v63 = vadd.f32 %v3890_v47, %v2343_v24  ;;  %3897 = vtanh.f32 %v5093_v50 }
 0x513   : > { %v3896_v45 = vpop.eup %3895  ;;  %v2333_v30 = vsel %vm2332_vm10, %v5077_v7, %v2329_v0  ;;  %vm2376_vm11 = vweird.f32 %v3894_v32 }
 0x514   : > { %v2372_v5 = vsub.f32 1.0, %v2371_v56  ;;  %v2359_v34 = vadd.f32 %v3892_v62, %v2358_v9  ;;  %v2348_v44 = vsel %vm2347_vm4, %v3890_v47, %v2344_v63  ;;  %vm2377_vm14 = vmor %vm2375_vm13, %vm2376_vm11  ;;  %v2338_v33 = vsel %vm2335_vm12, %v2337_v13, %v2333_v30 }
 0x515   : > { %v2353_v12 = vsel %vm2350_vm7, %v2352_v31, %v2348_v44 }
 0x516   : > { %v2363_v16 = vsel %vm2362_vm6, %v3892_v62, %v2359_v34  ;;  %v2373_v22 = vmul.f32 %v3894_v32, %v2372_v5  ;;  %v2390_v46 = vmul.f32 %v3896_v45, %v2353_v12  ;;  %v2413_v62 = vld [vmem:[%s2410_s30 + $0x10] sm:$0xff]  ;;  %v2483_v5 = vunpack.c.l.bf16 %v5124_v42 }
 0x517   : > { %v2368_v3 = vsel %vm2365_vm8, %v2367_v39, %v2363_v16  ;;  %v2481_v10 = vunpack.c.l.bf16 %v2413_v62  ;;  %v2482_v11 = vunpack.c.h.bf16 %v2413_v62  ;;  %v2480_v39 = vunpack.c.h.bf16 %v2412_v61 }
 0x518   : > { %v2388_v15 = vmul.f32 %v2368_v3, %v5016_v4  ;;  %v2374_v18 = vadd.f32 %v3894_v32, %v2373_v22  ;;  %v3898_v17 = vpop.eup %3897  ;;  %v2379_v4 = vand.u32 2147483647, %v5079_v8 }
 0x519   : > { %v2395_v59 = vmul.f32 %v3898_v17, %v2338_v33 }
 0x51a   : > { %v5108_v54 = vadd.f32 %v2390_v46, %v2388_v15  ;;  %v2378_v40 = vsel %vm2377_vm14, %v3894_v32, %v2374_v18  ;;  %vm2380_vm15 = vcmp.eq.f32.partialorder %v2379_v4, 8.507059e+37 }
 0x51b   : > { %v2383_v25 = vsel %vm2380_vm15, %v2382_v60, %v2378_v40  ;;  %v2397_v26 = vpack.c.bf16 %v2395_v59, %v2395_v59 }
 0x51c   : > { %3899 = vtanh.f32 %v5108_v54 }
 0x51d   : > { %v2417_v20 = vunpack.c.l.b16 %v2397_v26 }
 0x522   : > { %v3900_v51 = vpop.eup %3899 }
 0x523   : > { %v2396_v21 = vmul.f32 %v3900_v51, %v2383_v25  ;;  %v2484_v25 = vunpack.c.h.bf16 %v5124_v42 }
 0x525   : > { %v2398_v7 = vpack.c.bf16 %v2396_v21, %v2396_v21  ;;  %v3629_v29 = vpack.c.bf16 %v2396_v21, %v2395_v59 }
 0x527   : > { %3630 = vst [vmem:[%s2400_s10] sm:$0xff] %v3629_v29   ;;  %v2418_v28 = vunpack.c.l.b16 %v2398_v7 }
 0x529   : > { %v2419_v8 = vpack.c.b16 %v2418_v28, %v2417_v20 }
 0x52b   : > { %2429 = vmatmul.bf16.vlgmr.msrb.gmra.mxu0 %v2419_v8  ;;  %2443 = vmatmul.bf16.vlgmr.msrb.gmra.mxu1 %v2419_v8 }
 0x52c   : > { %2457 = vmatmul.bf16.vlgmr.msrb.gmra.mxu2 %v2419_v8  ;;  %2471 = vmatmul.bf16.vlgmr.msrb.gmra.mxu3 %v2419_v8 }
 0x5a8   : > { %v2430_v47 = vpop.f32.mrf.mxu0  ;;  %v2444_v48 = vpop.f32.mrf.mxu1 }
 0x5a9   : > { %v2485_v49 = vadd.f32 %v2477_v37, %v2430_v47  ;;  %v2486_v52 = vadd.f32 %v2478_v41, %v2444_v48 }
 0x5ab   : > { %v3486_v53 = vmul.f32 -1.442695, %v2485_v49  ;;  %v3487_v57 = vmul.f32 -1.442695, %v2486_v52 }
 0x5ad   : > { %3901 = vpow2.f32 %v3486_v53 }
 0x5ae   : > { %3903 = vpow2.f32 %v3487_v57 }
 0x5af   : > { %v2458_v6 = vpop.f32.mrf.mxu2  ;;  %v2472_v31 = vpop.f32.mrf.mxu3 }
 0x5b0   : > { %v2487_v14 = vadd.f32 %v2479_v1, %v2458_v6  ;;  %v2432_v19 = vpop.f32.mrf.mxu0  ;;  %v2446_v23 = vpop.f32.mrf.mxu1  ;;  %v2488_v12 = vadd.f32 %v2480_v39, %v2472_v31 }
 0x5b1   : > { %v2489_v24 = vadd.f32 %v2481_v10, %v2432_v19  ;;  %v2490_v27 = vadd.f32 %v2482_v11, %v2446_v23 }
 0x5b2   : > { %v3488_v32 = vmul.f32 -1.442695, %v2487_v14 }
 0x5b3   : > { %v3902_v36 = vpop.eup %3901  ;;  %v3489_v38 = vmul.f32 -1.442695, %v2489_v24  ;;  %v3490_v58 = vmul.f32 -1.442695, %v2490_v27 }
 0x5b4   : > { %v3904_v9 = vpop.eup %3903  ;;  %v2511_v56 = vadd.f32 1.0, %v3902_v36  ;;  %3905 = vpow2.f32 %v3488_v32 }
 0x5b5   : > { %v2512_v63 = vadd.f32 1.0, %v3904_v9  ;;  %3907 = vpow2.f32 %v3489_v38 }
 0x5b6   : > { %3909 = vrcp.f32 %v2511_v56  ;;  %v2526_v4 = vand.u32 2147483647, %v2511_v56  ;;  %v2528_v33 = vand.u32 2147483648, %v2511_v56  ;;  %vm2522_vm3 = vweird.f32 %v2511_v56 }
 0x5b7   : > { %3911 = vrcp.f32 %v2512_v63  ;;  %v2460_v34 = vpop.f32.mrf.mxu2  ;;  %v2543_v55 = vand.u32 2147483648, %v2512_v63  ;;  %v2541_v59 = vand.u32 2147483647, %v2512_v63  ;;  %vm2537_vm2 = vweird.f32 %v2512_v63  ;;  %v2474_v29 = vpop.f32.mrf.mxu3 }
 0x5b8   : > { %3913 = vpow2.f32 %v3490_v58  ;;  %v2491_v44 = vadd.f32 %v2483_v5, %v2460_v34  ;;  %vm2527_vm5 = vcmp.eq.f32.partialorder %v2526_v4, 8.507059e+37  ;;  %v2529_v8 = vor.u32 1.1754944e-38, %v2528_v33 }
 0x5b9   : > { %v2544_v28 = vor.u32 1.1754944e-38, %v2543_v55  ;;  %vm2542_vm7 = vcmp.eq.f32.partialorder %v2541_v59, 8.507059e+37  ;;  %v2492_v53 = vadd.f32 %v2484_v25, %v2474_v29 }
 0x5ba   : > { %v3906_v45 = vpop.eup %3905  ;;  %v3491_v16 = vmul.f32 -1.442695, %v2491_v44 }
 0x5bb   : > { %v3908_v0 = vpop.eup %3907  ;;  %v5127_v22 = vadd.f32 1.0, %v3906_v45 }
 0x5bc   : > { %v3910_v3 = vpop.eup %3909  ;;  %v5129_v46 = vadd.f32 1.0, %v3908_v0  ;;  %3915 = vpow2.f32 %v3491_v16 }
 0x5bd   : > { %v3912_v2 = vpop.eup %3911  ;;  %v2518_v15 = vmul.f32 %v3910_v3, %v2511_v56  ;;  %3917 = vrcp.f32 %v5127_v22  ;;  %vm2523_vm0 = vweird.f32 %v3910_v3 }
 0x5be   : > { %v3914_v35 = vpop.eup %3913  ;;  %v2533_v30 = vmul.f32 %v3912_v2, %v2512_v63  ;;  %3919 = vtanh.f32 %v2488_v12  ;;  %vm2538_vm1 = vweird.f32 %v3912_v2  ;;  %vm2524_vm4 = vmor %vm2522_vm3, %vm2523_vm0  ;;  %v2573_v23 = vand.u32 2147483648, %v5129_v46 }
 0x5bf   : > { %v2519_v18 = vsub.f32 1.0, %v2518_v15  ;;  %3921 = vrcp.f32 %v5129_v46  ;;  %v5133_v17 = vadd.f32 1.0, %v3914_v35  ;;  %vm2539_vm6 = vmor %vm2537_vm2, %vm2538_vm1  ;;  %v2571_v32 = vand.u32 2147483647, %v5129_v46 }
 0x5c0   : > { %v2534_v13 = vsub.f32 1.0, %v2533_v30  ;;  %vm2567_vm10 = vweird.f32 %v5129_v46  ;;  %v2574_v63 = vor.u32 1.1754944e-38, %v2573_v23  ;;  %vm2552_vm1 = vweird.f32 %v5127_v22 }
 0x5c1   : > { %v2520_v40 = vmul.f32 %v3910_v3, %v2519_v18  ;;  %3923 = vrcp.f32 %v5133_v17  ;;  %v2588_v27 = vand.u32 2147483648, %v5133_v17  ;;  %v2586_v36 = vand.u32 2147483647, %v5133_v17 }
 0x5c2   : > { %v3916_v60 = vpop.eup %3915  ;;  %v2535_v51 = vmul.f32 %v3912_v2, %v2534_v13  ;;  %vm2582_vm11 = vweird.f32 %v5133_v17  ;;  %vm2572_vm15 = vcmp.eq.f32.partialorder %v2571_v32, 8.507059e+37  ;;  %v2556_v15 = vand.u32 2147483647, %v5127_v22 }
 0x5c3   : > { %v5137_v21 = vpop.eup %3917  ;;  %v2521_v26 = vadd.f32 %v3910_v3, %v2520_v40  ;;  %v5139_v7 = vadd.f32 1.0, %v3916_v60  ;;  %v2589_v31 = vor.u32 1.1754944e-38, %v2588_v27  ;;  %vm2587_vm0 = vcmp.eq.f32.partialorder %v2586_v36, 8.507059e+37  ;;  %v2636_v36 = vld [vmem:[%s2632_s23 + $0x18] sm:$0xff] }
 0x5c4   : > { %v3920_v20 = vpop.eup %3919  ;;  %v2536_v43 = vadd.f32 %v3912_v2, %v2535_v51  ;;  %v2548_v41 = vmul.f32 %v5137_v21, %v5127_v22  ;;  %vm2553_vm13 = vweird.f32 %v5137_v21 }
 0x5c5   : > { %v3922_v37 = vpop.eup %3921  ;;  %v2525_v47 = vsel %vm2524_vm4, %v3910_v3, %v2521_v26  ;;  %3925 = vrcp.f32 %v5139_v7  ;;  %vm2554_vm2 = vmor %vm2552_vm1, %vm2553_vm13  ;;  %v2603_v55 = vand.u32 2147483648, %v5139_v7  ;;  %vm2557_vm4 = vcmp.eq.f32.partialorder %v2556_v15, 8.507059e+37 }
 0x5c6   : > { %v2530_v48 = vsel %vm2527_vm5, %v2529_v8, %v2525_v47  ;;  %v2540_v49 = vsel %vm2539_vm6, %v3912_v2, %v2536_v43  ;;  %v2563_v52 = vmul.f32 %v3922_v37, %v5129_v46  ;;  %v2549_v11 = vsub.f32 1.0, %v2548_v41 }
 0x5c7   : > { %v3924_v57 = vpop.eup %3923  ;;  %v2545_v61 = vsel %vm2542_vm7, %v2544_v28, %v2540_v49  ;;  %v2611_v1 = vmul.f32 %v3920_v20, %v2530_v48  ;;  %3927 = vtanh.f32 %v2492_v53  ;;  %vm2568_vm8 = vweird.f32 %v3922_v37  ;;  %v2633_v28 = vld [vmem:[%s2632_s23] sm:$0xff]  ;;  %v2634_v53 = vld [vmem:[%s2632_s23 + $0x8] sm:$0xff] }
 0x5c8   : > { %v2609_v62 = vmul.f32 %v2545_v61, %v5093_v50  ;;  %v2564_v6 = vsub.f32 1.0, %v2563_v52  ;;  %v2578_v10 = vmul.f32 %v3924_v57, %v5133_v17  ;;  %vm2583_vm9 = vweird.f32 %v3924_v57  ;;  %vm2569_vm12 = vmor %vm2567_vm10, %vm2568_vm8 }
 0x5c9   : > { %v2550_v9 = vmul.f32 %v5137_v21, %v2549_v11  ;;  %vm2584_vm14 = vmor %vm2582_vm11, %vm2583_vm9  ;;  %v2558_v46 = vand.u32 2147483648, %v5127_v22  ;;  %vm2597_vm5 = vweird.f32 %v5139_v7  ;;  %v2604_v40 = vor.u32 1.1754944e-38, %v2603_v55 }
 0x5ca   : > { %v2579_v14 = vsub.f32 1.0, %v2578_v10  ;;  %v2565_v19 = vmul.f32 %v3922_v37, %v2564_v6  ;;  %v5153_v38 = vadd.f32 %v2611_v1, %v2609_v62  ;;  %v2699_v8 = vunpack.c.l.bf16 %v2633_v28 }
 0x5cb   : > { %v3926_v24 = vpop.eup %3925  ;;  %v2551_v12 = vadd.f32 %v5137_v21, %v2550_v9  ;;  %v2559_v13 = vor.u32 1.1754944e-38, %v2558_v46  ;;  %v2700_v43 = vunpack.c.h.bf16 %v2633_v28  ;;  %v2701_v61 = vunpack.c.l.bf16 %v2634_v53 }
 0x5cc   : > { %v2580_v50 = vmul.f32 %v3924_v57, %v2579_v14  ;;  %v2593_v42 = vmul.f32 %v3926_v24, %v5139_v7  ;;  %v2566_v56 = vadd.f32 %v3922_v37, %v2565_v19  ;;  %3929 = vtanh.f32 %v5153_v38 }
 0x5cd   : > { %v3928_v39 = vpop.eup %3927  ;;  %v2555_v30 = vsel %vm2554_vm2, %v5137_v21, %v2551_v12  ;;  %vm2598_vm3 = vweird.f32 %v3926_v24  ;;  %v2702_v15 = vunpack.c.h.bf16 %v2634_v53 }
 0x5ce   : > { %v2594_v58 = vsub.f32 1.0, %v2593_v42  ;;  %v2581_v5 = vadd.f32 %v3924_v57, %v2580_v50  ;;  %v2570_v34 = vsel %vm2569_vm12, %v3922_v37, %v2566_v56  ;;  %vm2599_vm6 = vmor %vm2597_vm5, %vm2598_vm3  ;;  %v2560_v22 = vsel %vm2557_vm4, %v2559_v13, %v2555_v30 }
 0x5cf   : > { %v2575_v44 = vsel %vm2572_vm15, %v2574_v63, %v2570_v34 }
 0x5d0   : > { %v2585_v45 = vsel %vm2584_vm14, %v3924_v57, %v2581_v5  ;;  %v2595_v16 = vmul.f32 %v3926_v24, %v2594_v58  ;;  %v2612_v3 = vmul.f32 %v3928_v39, %v2575_v44  ;;  %v2635_v57 = vld [vmem:[%s2632_s23 + $0x10] sm:$0xff]  ;;  %v2705_v58 = vunpack.c.l.bf16 %v2636_v36 }
 0x5d1   : > { %v2590_v0 = vsel %vm2587_vm0, %v2589_v31, %v2585_v45  ;;  %v2703_v1 = vunpack.c.l.bf16 %v2635_v57  ;;  %v2704_v6 = vunpack.c.h.bf16 %v2635_v57 }
 0x5d2   : > { %v2610_v2 = vmul.f32 %v2590_v0, %v5108_v54  ;;  %v2596_v18 = vadd.f32 %v3926_v24, %v2595_v16  ;;  %v3930_v17 = vpop.eup %3929  ;;  %v2601_v54 = vand.u32 2147483647, %v5139_v7 }
 0x5d3   : > { %v2617_v33 = vmul.f32 %v3930_v17, %v2560_v22 }
 0x5d4   : > { %v5168_v35 = vadd.f32 %v2612_v3, %v2610_v2  ;;  %v2600_v4 = vsel %vm2599_vm6, %v3926_v24, %v2596_v18  ;;  %vm2602_vm7 = vcmp.eq.f32.partialorder %v2601_v54, 8.507059e+37  ;;  %v2706_v54 = vunpack.c.h.bf16 %v2636_v36 }
 0x5d5   : > { %v2605_v60 = vsel %vm2602_vm7, %v2604_v40, %v2600_v4  ;;  %v2619_v25 = vpack.c.bf16 %v2617_v33, %v2617_v33 }
 0x5d6   : > { %3931 = vtanh.f32 %v5168_v35 }
 0x5d7   : > { %v2639_v29 = vunpack.c.l.b16 %v2619_v25 }
 0x5dc   : > { %v3932_v59 = vpop.eup %3931 }
 0x5dd   : > { %v2618_v51 = vmul.f32 %v3932_v59, %v2605_v60 }
 0x5df   : > { %v2620_v21 = vpack.c.bf16 %v2618_v51, %v2618_v51  ;;  %v3634_v26 = vpack.c.bf16 %v2618_v51, %v2617_v33 }
 0x5e1   : > { %3635 = vst [vmem:[%s2622_s5] sm:$0xff] %v3634_v26   ;;  %v2640_v20 = vunpack.c.l.b16 %v2620_v21 }
 0x5e3   : > { %v2641_v7 = vpack.c.b16 %v2640_v20, %v2639_v29 }
 0x5e5   : > { %2651 = vmatmul.bf16.vlgmr.msra.gmra.mxu0 %v2641_v7  ;;  %2665 = vmatmul.bf16.vlgmr.msra.gmra.mxu1 %v2641_v7 }
 0x5e6   : > { %2679 = vmatmul.bf16.vlgmr.msra.gmra.mxu2 %v2641_v7  ;;  %2693 = vmatmul.bf16.vlgmr.msra.gmra.mxu3 %v2641_v7 }
 0x662   : > { %v2652_v37 = vpop.f32.mrf.mxu0  ;;  %v2666_v41 = vpop.f32.mrf.mxu1 }
 0x663   : > { %v2707_v47 = vadd.f32 %v2699_v8, %v2652_v37  ;;  %v2708_v48 = vadd.f32 %v2700_v43, %v2666_v41 }
 0x665   : > { %v3496_v49 = vmul.f32 -1.442695, %v2707_v47  ;;  %v3497_v52 = vmul.f32 -1.442695, %v2708_v48 }
 0x667   : > { %3933 = vpow2.f32 %v3496_v49 }
 0x668   : > { %3935 = vpow2.f32 %v3497_v52 }
 0x669   : > { %v2680_v62 = vpop.f32.mrf.mxu2  ;;  %v2694_v5 = vpop.f32.mrf.mxu3 }
 0x66a   : > { %v2709_v10 = vadd.f32 %v2701_v61, %v2680_v62  ;;  %v2654_v11 = vpop.f32.mrf.mxu0  ;;  %v2668_v14 = vpop.f32.mrf.mxu1  ;;  %v2710_v13 = vadd.f32 %v2702_v15, %v2694_v5 }
 0x66b   : > { %v2711_v19 = vadd.f32 %v2703_v1, %v2654_v11  ;;  %v2712_v23 = vadd.f32 %v2704_v6, %v2668_v14 }
 0x66c   : > { %v3498_v24 = vmul.f32 -1.442695, %v2709_v10 }
 0x66d   : > { %v3934_v27 = vpop.eup %3933  ;;  %v3499_v32 = vmul.f32 -1.442695, %v2711_v19  ;;  %v3500_v9 = vmul.f32 -1.442695, %v2712_v23 }
 0x66e   : > { %v3936_v50 = vpop.eup %3935  ;;  %v2733_v42 = vadd.f32 1.0, %v3934_v27  ;;  %3937 = vpow2.f32 %v3498_v24 }
 0x66f   : > { %v2734_v56 = vadd.f32 1.0, %v3936_v50  ;;  %3939 = vpow2.f32 %v3499_v32 }
 0x670   : > { %3941 = vrcp.f32 %v2733_v42  ;;  %vm2744_vm10 = vweird.f32 %v2733_v42  ;;  %v2750_v33 = vand.u32 2147483648, %v2733_v42  ;;  %v2748_v51 = vand.u32 2147483647, %v2733_v42 }
 0x671   : > { %3943 = vrcp.f32 %v2734_v56  ;;  %v2682_v63 = vpop.f32.mrf.mxu2  ;;  %v2696_v40 = vpop.f32.mrf.mxu3  ;;  %v2765_v59 = vand.u32 2147483648, %v2734_v56  ;;  %vm2759_vm11 = vweird.f32 %v2734_v56  ;;  %v2763_v29 = vand.u32 2147483647, %v2734_v56 }
 0x672   : > { %3945 = vpow2.f32 %v3500_v9  ;;  %v2713_v31 = vadd.f32 %v2705_v58, %v2682_v63  ;;  %v2714_v8 = vadd.f32 %v2706_v54, %v2696_v40  ;;  %v2751_v37 = vor.u32 1.1754944e-38, %v2750_v33 }
 0x673   : > { %v2766_v49 = vor.u32 1.1754944e-38, %v2765_v59  ;;  %vm2749_vm14 = vcmp.eq.f32.partialorder %v2748_v51, 8.507059e+37  ;;  %vm2764_vm15 = vcmp.eq.f32.partialorder %v2763_v29, 8.507059e+37 }
 0x674   : > { %v3938_v34 = vpop.eup %3937  ;;  %v3501_v39 = vmul.f32 -1.442695, %v2713_v31 }
 0x675   : > { %v3940_v44 = vpop.eup %3939  ;;  %v5184_v12 = vadd.f32 1.0, %v3938_v34 }
 0x676   : > { %v3942_v45 = vpop.eup %3941  ;;  %v5186_v16 = vadd.f32 1.0, %v3940_v44  ;;  %3947 = vpow2.f32 %v3501_v39 }
 0x677   : > { %v3944_v0 = vpop.eup %3943  ;;  %v2740_v3 = vmul.f32 %v3942_v45, %v2733_v42  ;;  %vm2745_vm8 = vweird.f32 %v3942_v45 }
 0x678   : > { %v3946_v46 = vpop.eup %3945  ;;  %v2755_v2 = vmul.f32 %v3944_v0, %v2734_v56  ;;  %3949 = vrcp.f32 %v5186_v16  ;;  %vm2760_vm9 = vweird.f32 %v3944_v0  ;;  %vm5195_vm12 = vmor %vm2744_vm10, %vm2745_vm8  ;;  %v2793_v11 = vand.u32 2147483647, %v5186_v16 }
 0x679   : > { %v2741_v30 = vsub.f32 1.0, %v2740_v3  ;;  %v5189_v18 = vadd.f32 1.0, %v3946_v46  ;;  %3951 = vrcp.f32 %v5184_v12  ;;  %vm5199_vm13 = vmor %vm2759_vm11, %vm2760_vm9  ;;  %v2795_v14 = vand.u32 2147483648, %v5186_v16 }
 0x67a   : > { %v2756_v17 = vsub.f32 1.0, %v2755_v2  ;;  %vm2789_vm2 = vweird.f32 %v5186_v16  ;;  %vm2794_vm6 = vcmp.eq.f32.partialorder %v2793_v11, 8.507059e+37  ;;  %vm2774_vm10 = vweird.f32 %v5184_v12 }
 0x67b   : > { %v2742_v55 = vmul.f32 %v3942_v45, %v2741_v30  ;;  %3953 = vrcp.f32 %v5189_v18  ;;  %v2810_v24 = vand.u32 2147483648, %v5189_v18  ;;  %v2808_v27 = vand.u32 2147483647, %v5189_v18 }
 0x67c   : > { %v3948_v22 = vpop.eup %3947  ;;  %v2757_v4 = vmul.f32 %v3944_v0, %v2756_v17  ;;  %3955 = vtanh.f32 %v2710_v13  ;;  %vm2804_vm3 = vweird.f32 %v5189_v18  ;;  %v2796_v58 = vor.u32 1.1754944e-38, %v2795_v14 }
 0x67d   : > { %v2743_v60 = vadd.f32 %v3942_v45, %v2742_v55  ;;  %v5193_v25 = vadd.f32 1.0, %v3948_v22  ;;  %v2811_v31 = vor.u32 1.1754944e-38, %v2810_v24  ;;  %vm2809_vm7 = vcmp.eq.f32.partialorder %v2808_v27, 8.507059e+37 }
 0x67e   : > { %v2758_v26 = vadd.f32 %v3944_v0, %v2757_v4  ;;  %v3950_v20 = vpop.eup %3949  ;;  %v2778_v13 = vand.u32 2147483647, %v5184_v12 }
 0x67f   : > { %v2747_v28 = vsel %vm5195_vm12, %v3942_v45, %v2743_v60  ;;  %3957 = vrcp.f32 %v5193_v25  ;;  %v5206_v43 = vpop.eup %3951  ;;  %v2785_v47 = vmul.f32 %v3950_v20, %v5186_v16  ;;  %vm2790_vm0 = vweird.f32 %v3950_v20 }
 0x680   : > { %v2762_v41 = vsel %vm5199_vm13, %v3944_v0, %v2758_v26  ;;  %v2752_v52 = vsel %vm2749_vm14, %v2751_v37, %v2747_v28  ;;  %v2770_v61 = vmul.f32 %v5206_v43, %v5184_v12  ;;  %3959 = vtanh.f32 %v2714_v8  ;;  %vm2791_vm4 = vmor %vm2789_vm2, %vm2790_vm0 }
 0x681   : > { %v3954_v48 = vpop.eup %3953  ;;  %v2786_v53 = vsub.f32 1.0, %v2785_v47  ;;  %v2767_v62 = vsel %vm2764_vm15, %v2766_v49, %v2762_v41  ;;  %vm2775_vm8 = vweird.f32 %v5206_v43  ;;  %v2825_v17 = vand.u32 2147483648, %v5193_v25 }
 0x682   : > { %v2800_v57 = vmul.f32 %v3954_v48, %v5189_v18  ;;  %v3956_v1 = vpop.eup %3955  ;;  %v2831_v32 = vmul.f32 %v2767_v62, %v5153_v38  ;;  %vm2805_vm1 = vweird.f32 %v3954_v48  ;;  %v2771_v42 = vsub.f32 1.0, %v2770_v61  ;;  %vm2776_vm11 = vmor %vm2774_vm10, %vm2775_vm8 }
 0x683   : > { %v2787_v10 = vmul.f32 %v3950_v20, %v2786_v53  ;;  %v2833_v23 = vmul.f32 %v3956_v1, %v2752_v52  ;;  %vm2806_vm5 = vmor %vm2804_vm3, %vm2805_vm1  ;;  %v2780_v18 = vand.u32 2147483648, %v5184_v12  ;;  %vm2819_vm12 = vweird.f32 %v5193_v25 }
 0x684   : > { %v2801_v6 = vsub.f32 1.0, %v2800_v57  ;;  %v2772_v45 = vmul.f32 %v5206_v43, %v2771_v42  ;;  %v2826_v33 = vor.u32 1.1754944e-38, %v2825_v17  ;;  %vm2779_vm14 = vcmp.eq.f32.partialorder %v2778_v13, 8.507059e+37 }
 0x685   : > { %v3958_v19 = vpop.eup %3957  ;;  %v2788_v9 = vadd.f32 %v3950_v20, %v2787_v10  ;;  %v2835_v38 = vadd.f32 %v2833_v23, %v2831_v32  ;;  %v2781_v4 = vor.u32 1.1754944e-38, %v2780_v18 }
 0x686   : > { %v2802_v36 = vmul.f32 %v3954_v48, %v2801_v6  ;;  %v2815_v50 = vmul.f32 %v3958_v19, %v5193_v25  ;;  %v3960_v5 = vpop.eup %3959  ;;  %v2773_v15 = vadd.f32 %v5206_v43, %v2772_v45  ;;  %vm2820_vm9 = vweird.f32 %v3958_v19 }
 0x687   : > { %v2792_v34 = vsel %vm2791_vm4, %v3950_v20, %v2788_v9  ;;  %3961 = vtanh.f32 %v2835_v38  ;;  %vm2821_vm13 = vmor %vm2819_vm12, %vm2820_vm9 }
 0x688   : > { %v2816_v56 = vsub.f32 1.0, %v2815_v50  ;;  %v2803_v63 = vadd.f32 %v3954_v48, %v2802_v36  ;;  %v2797_v39 = vsel %vm2794_vm6, %v2796_v58, %v2792_v34  ;;  %v2777_v55 = vsel %vm2776_vm11, %v5206_v43, %v2773_v15 }
 0x689   : > { %v2834_v16 = vmul.f32 %v3960_v5, %v2797_v39  ;;  %v2782_v59 = vsel %vm2779_vm14, %v2781_v4, %v2777_v55 }
 0x68a   : > { %v2807_v44 = vsel %vm2806_vm5, %v3954_v48, %v2803_v63  ;;  %v2817_v0 = vmul.f32 %v3958_v19, %v2816_v56 }
 0x68b   : > { %v2812_v3 = vsel %vm2809_vm7, %v2811_v31, %v2807_v44 }
 0x68c   : > { %v2832_v46 = vmul.f32 %v2812_v3, %v5168_v35  ;;  %v2818_v30 = vadd.f32 %v3958_v19, %v2817_v0  ;;  %v2823_v35 = vand.u32 2147483647, %v5193_v25 }
 0x68d   : > { %v3962_v22 = vpop.eup %3961 }
 0x68e   : > { %v2836_v2 = vadd.f32 %v2834_v16, %v2832_v46  ;;  %v2822_v54 = vsel %vm2821_vm13, %v3958_v19, %v2818_v30  ;;  %vm2824_vm15 = vcmp.eq.f32.partialorder %v2823_v35, 8.507059e+37  ;;  %v2839_v12 = vmul.f32 %v3962_v22, %v2782_v59 }
 0x68f   : > { %v2827_v60 = vsel %vm2824_vm15, %v2826_v33, %v2822_v54 }
 0x690   : > { %3963 = vtanh.f32 %v2836_v2 }
 0x696   : > { %v3964_v40 = vpop.eup %3963 }
 0x697   : > { %v2840_v51 = vmul.f32 %v3964_v40, %v2827_v60  ;;  %2857 = sbr.rel (!%p4159_p9) target bundleno = 1715 (0x6b3), region = 52 }
 0x699   : > { %v3639_v21 = vpack.c.bf16 %v2840_v51, %v2839_v12 }
 0x69b   : > { %3640 = vst [vmem:[%s2844_s6] sm:$0xff] %v3639_v21  }
 0x6a2   : > { %v2883_v25 = vld [vmem:[%s4669_s7] sm:$0xf]  ;;  %v2885_v26 = vld [vmem:[%s4669_s7 + $0x4] sm:$0xf]  ;;  %v2887_v29 = vld [vmem:[%s4669_s7 + $0x8] sm:$0xf] }
 0x6a3   : > { %2884 = vst [vmem:[%s2866_s9] sm:$0xf] %v2883_v25  ;;  %v2889_v20 = vld [vmem:[%s4669_s7 + $0xc] sm:$0xf]  ;;  %v2891_v7 = vld [vmem:[%s4669_s7 + $0x10] sm:$0xf] }
 0x6a4   : > { %2886 = vst [vmem:[%s2866_s9 + $0x8] sm:$0xf] %v2885_v26  ;;  %v2893_v28 = vld [vmem:[%s4669_s7 + $0x14] sm:$0xf]  ;;  %v2895_v8 = vld [vmem:[%s4669_s7 + $0x18] sm:$0xf] }
 0x6a5   : > { %2888 = vst [vmem:[%s2866_s9 + $0x10] sm:$0xf] %v2887_v29  ;;  %v2897_v43 = vld [vmem:[%s4669_s7 + $0x1c] sm:$0xf]  ;;  %v2899_v37 = vld [vmem:[%s4669_s7 + $0x20] sm:$0xf] }
 0x6a6   : > { %2890 = vst [vmem:[%s2866_s9 + $0x18] sm:$0xf] %v2889_v20  ;;  %v2901_v41 = vld [vmem:[%s4669_s7 + $0x24] sm:$0xf]  ;;  %v2903_v47 = vld [vmem:[%s4669_s7 + $0x28] sm:$0xf] }
 0x6a7   : > { %2892 = vst [vmem:[%s2866_s9 + $0x20] sm:$0xf] %v2891_v7  ;;  %v2905_v48 = vld [vmem:[%s4669_s7 + $0x2c] sm:$0xf]  ;;  %v2907_v49 = vld [vmem:[%s4669_s7 + $0x30] sm:$0xf] }
 0x6a8   : > { %2894 = vst [vmem:[%s2866_s9 + $0x28] sm:$0xf] %v2893_v28  ;;  %v2909_v52 = vld [vmem:[%s4669_s7 + $0x34] sm:$0xf]  ;;  %v2911_v53 = vld [vmem:[%s4669_s7 + $0x38] sm:$0xf] }
 0x6a9   : > { %2896 = vst [vmem:[%s2866_s9 + $0x30] sm:$0xf] %v2895_v8  ;;  %v2913_v57 = vld [vmem:[%s4669_s7 + $0x3c] sm:$0xf] }
 0x6aa   : > { %2898 = vst [vmem:[%s2866_s9 + $0x38] sm:$0xf] %v2897_v43 }
 0x6ab   : > { %2900 = vst [vmem:[%s2866_s9 + $0x40] sm:$0xf] %v2899_v37 }
 0x6ac   : > { %2902 = vst [vmem:[%s2866_s9 + $0x48] sm:$0xf] %v2901_v41 }
 0x6ad   : > { %2904 = vst [vmem:[%s2866_s9 + $0x50] sm:$0xf] %v2903_v47 }
 0x6ae   : > { %2906 = vst [vmem:[%s2866_s9 + $0x58] sm:$0xf] %v2905_v48 }
 0x6af   : > { %2908 = vst [vmem:[%s2866_s9 + $0x60] sm:$0xf] %v2907_v49 }
 0x6b0   : > { %2910 = vst [vmem:[%s2866_s9 + $0x68] sm:$0xf] %v2909_v52 }
 0x6b1   : > { %2912 = vst [vmem:[%s2866_s9 + $0x70] sm:$0xf] %v2911_v53 }
 0x6b2   : > { %2914 = vst [vmem:[%s2866_s9 + $0x78] sm:$0xf] %v2913_v57 }
 0x6b3 PF: > { %s20_s20 = sadd.s32 1, %s4079_s20   ;;  %s5313_s15 = smov %s4063_s16 }
 0x6b4   : > { %p17_p2 = scmp.ge.s32.totalorder %s20_s20, 4   ;;  %s5314_s16 = smov %s4067_s17 }
 0x6b5   : > { %s5315_s17 = smov %s4157_s27  ;;  %s5316_s18 = smov %s4075_s19 }
 0x6b6   : > { %s5317_s19 = smov %s5319_s22  ;;  %19 = sbr.rel (!%p17_p2) target bundleno = 6 (0x6), region = 156 }
 0x6bb   :  { %2980 = vsyncpa [#allocation6], 1 }
 0x6bc   :  { %2982 = vsyncpa [#allocation6 + $0x1], 1 }
 0x6bd   :  { %2983 = vsyncpa [#allocation8], 1 }
 0x6be   :  { %2985 = vsyncpa [#allocation8 + $0x1], 1 }

// kernel: bilstm_forward.4
= control target key start
LH: loop header
LB: loop body
LE: loop exit
PB: predicated region body
PF: predicated region fallthrough
CT: control target
= control target key end

     0   :  { %9 = vsyncpa [#allocation6], 0  ;;  %s6152_s0 = inlined_call_operand.vmem [shape: bf16[128,256], index: 0, kind: input, shape index: {}]   ;;  %s6153_s1 = inlined_call_operand.hbm [shape: bf16[2,256,512], index: 1, kind: input, shape index: {}]   ;;  %s6154_s2 = inlined_call_operand.vmem [shape: f32[2,1,512], index: 2, kind: input, shape index: {}]   ;;  %s6155_s3 = inlined_call_operand.hbm [shape: bf16[2,128,512], index: 3, kind: input, shape index: {}]   ;;  %s6156_s4 = inlined_call_operand.vmem [shape: bf16[128,256], index: 4, kind: output, shape index: {}]  }
   0x1   :  { %11 = vsyncpa [#allocation6 + $0x1], 0 }
   0x2   :  { %12 = vsyncpa [#allocation8], 0 }
   0x3   :  { %14 = vsyncpa [#allocation8 + $0x1], 0  ;;  %s4732_s15 = smov 0   ;;  %s4734_s16 = smov 0  }
   0x4   :  { %s4736_s17 = smov 0   ;;  %s4738_s18 = smov 0  }
   0x5   :  { %s4740_s19 = smov 0   ;;  %s4742_s20 = smov 0  }
   0x6 LB: > { %s3543_s21 = sadd.s32 4294967295, %s4702_s20   ;;  %s32_s22 = sadd.s32 1, %s4698_s19  ;;  %s4702_s20 = sphi %s4742_s20, %s20_s20   ;;  %s4698_s19 = sphi %s4740_s19, %s6189_s19   ;;  %s4694_s18 = sphi %s4738_s18, %s6188_s18   ;;  %s4690_s17 = sphi %s4736_s17, %s6187_s17   ;;  %s4686_s16 = sphi %s4734_s16, %s6186_s16   ;;  %s4682_s15 = sphi %s4732_s15, %s6185_s15  }
   0x7   : > { %p34_p0 = scmp.ge.s32.totalorder %s32_s22, 2  ;;  %s73_s23 = sadd.s32 1, %s4690_s17 }
   0x8   : > { %p80_p1 = scmp.ne.s32.totalorder %s4690_s17, %s4686_s16  ;;  %p81_p2 = scmp.eq.s32.totalorder %s4702_s20, 0 }
   0x9   : > { %s6191_s22 = smov (%p34_p0, %s32_s22), 0  ;;  %p86_p4 = scmp.ne.s32.totalorder %s4686_s16, %s4682_s15 }
   0xa   : > { %p4768_p3 = por %p81_p2, %p80_p1  ;;  %s70_s25 = ssub.s32 %s4698_s19, %s6191_s22 }
   0xb   : > { %p87_p5 = scmp.eq.s32.totalorder %s3543_s21, 0  ;;  %p71_p6 = scmp.eq.s32.totalorder %s70_s25, 0 }
   0xc   : > { %p172_p7 = scmp.eq.s32.totalorder %s3543_s21, 1  ;;  %p4280_p10 = scmp.lt.s32.totalorder %s4702_s20, 2 }
   0xd   : > { %p4775_p8 = por %p87_p5, %p86_p4  ;;  %s4788_s29 = sand.u32 1, %s4690_s17  }
   0xe   : > { %s4780_s27 = scalar_select %p71_p6, %s4690_s17, %s73_s23  }
   0xf   : > { %p4782_p9 = por %p172_p7, %p80_p1  ;;  %s4090_s30 = sshll.u32 %s4698_s19, 9 }
  0x10   : > { %s3548_s5 = sshll.u32 %s4788_s29, 9  ;;  %s225_s8 = scalar_lea.hbm %s6153_s1, %s4090_s30 }
  0x11   : > { %s226_s9 = sshll.u32 %s225_s8, 4  ;;  %s220_s10 = scalar_lea.vmem [#allocation5], %s3548_s5  ;;  %s227_s9 = int_to_ptr.hbm [resolvable:$true] %s226_s9 }
  0x12   : > { %s228_s11 = sshll.u32 %s220_s10, 4  ;;  %p4797_p11 = pnand %p4280_p10, %p4768_p3  ;;  %s229_s11 = int_to_ptr.vmem [resolvable:$true] %s228_s11 }
  0x13   : > { %p3554_p12 = scmp.ge.s32.totalorder %s4702_s20, 1  ;;  %p265_p13 = scmp.lt.s32.totalorder %s4702_s20, 3 }
  0x14   : > { %s217_s13 = scalar_lea.sflag [#allocation6], %s4788_s29  ;;  %s4704_s14 = smov 256  }
  0x15   : > { %s4705_s15 = smov 16   ;;  %p266_p0 = pnand %p3554_p12, %p265_p13 }
  0x16   : > { %4276 = dma.hbm_to_vmem [thread:$0]  (!%p4797_p11), %s227_s9, 8192, %s229_s11, %s217_s13, %s4704_s14, %s4704_s14, %s4705_s15  }
  0x17   : > { %s3551_s21 = sshll.u32 %s4788_s29, 8  ;;  %s4091_s23 = sshll.u32 %s4698_s19, 8 }
  0x18   : > { %s254_s24 = scalar_lea.hbm %s6155_s3, %s4091_s23  ;;  %s249_s6 = scalar_lea.vmem [#allocation7], %s3551_s21 }
  0x19   : > { %s255_s5 = sshll.u32 %s254_s24, 4  ;;  %s257_s7 = sshll.u32 %s249_s6, 4  ;;  %s256_s5 = int_to_ptr.hbm [resolvable:$true] %s255_s5  ;;  %s258_s7 = int_to_ptr.vmem [resolvable:$true] %s257_s7 }
  0x1a   : > { %s246_s8 = scalar_lea.sflag [#allocation8], %s4788_s29  ;;  %269 = sbr.rel (%p266_p0) target bundleno = 1845 (0x735), region = 36 }
  0x1b   : > { %4279 = dma.hbm_to_vmem [thread:$0]  (!%p4797_p11), %s256_s5, 4096, %s258_s7, %s246_s8, %s4704_s14, %s4704_s14, %s4705_s15  }
  0x1f   : > { %s4815_s10 = sand.u32 1, %s4686_s16  }
  0x20   : > { %s3555_s9 = sshll.u32 %s4815_s10, 9  ;;  %s272_s11 = scalar_lea.sflag [#allocation6], %s4815_s10 }
  0x21   : > { %s4819_s13 = scalar_lea.vmem [#allocation5], %s3555_s9 }
  0x22   : > { %4673 = dma.done.wait (%p4775_p8), %s272_s11, 8192  }
  0x23   : > { %4675 = vsyncadd (%p4775_p8), %s272_s11, 4294959104  ;;  %s3556_s29 = sshll.u32 %s4815_s10, 8  ;;  %s282_s12 = scalar_lea.sflag [#allocation8], %s4815_s10 }
  0x24   : > { %s4827_s14 = scalar_lea.vmem [#allocation7], %s3556_s29 }
  0x25   : > { %4677 = dma.done.wait (%p4775_p8), %s282_s12, 4096  }
  0x26   : > { %4679 = vsyncadd (%p4775_p8), %s282_s12, 4294963200  ;;  %v3737_v0 = vld [vmem:[%s4819_s13 + $0xe0] sm:$0xf]  ;;  %v4138_v1 = vld [vmem:[%s4819_s13 + $0xec] sm:$0xf0]  ;;  %p344_p1 = scmp.lt.s32.totalorder %s4694_s18, 1 }
  0x27   : > { %v3865_v2 = vld [vmem:[%s4819_s13 + $0x1e0] sm:$0xf]  ;;  %v3738_v3 = vor.u32 %v4138_v1, %v3737_v0  ;;  %v4170_v4 = vld [vmem:[%s4819_s13 + $0x1ec] sm:$0xf0]  ;;  %v4136_v5 = vld [vmem:[%s4819_s13 + $0xe4] sm:$0xf] }
  0x28   : > { %v3739_v6 = vld [vmem:[%s4819_s13 + $0xf0] sm:$0xf0]  ;;  %v3866_v7 = vor.u32 %v4170_v4, %v3865_v2  ;;  %v4168_v9 = vld [vmem:[%s4819_s13 + $0x1e4] sm:$0xf]  ;;  %v3721_v11 = vld [vmem:[%s4819_s13 + $0xc0] sm:$0xf] }
  0x29   : > { %v3742_v8 = vor.u32 %v4136_v5, %v3739_v6  ;;  %v3867_v10 = vld [vmem:[%s4819_s13 + $0x1f0] sm:$0xf0]  ;;  %851 = vmatpush.bf16.msra.mxu0 %v3738_v3  ;;  %v4134_v13 = vld [vmem:[%s4819_s13 + $0xcc] sm:$0xf0]  ;;  %v3849_v14 = vld [vmem:[%s4819_s13 + $0x1c0] sm:$0xf] }
  0x2a   : > { %v3870_v12 = vor.u32 %v4168_v9, %v3867_v10  ;;  %v4166_v15 = vld [vmem:[%s4819_s13 + $0x1cc] sm:$0xf0]  ;;  %900 = vmatpush.bf16.msra.mxu1 %v3866_v7  ;;  %v3722_v16 = vor.u32 %v4134_v13, %v3721_v11  ;;  %v4132_v18 = vld [vmem:[%s4819_s13 + $0xc4] sm:$0xf]  ;;  %v3723_v19 = vld [vmem:[%s4819_s13 + $0xd0] sm:$0xf0] }
  0x2b   : > { %949 = vmatpush.bf16.msra.mxu2 %v3742_v8  ;;  %v3850_v17 = vor.u32 %v4166_v15, %v3849_v14  ;;  %v4164_v20 = vld [vmem:[%s4819_s13 + $0x1c4] sm:$0xf]  ;;  %v3726_v21 = vor.u32 %v4132_v18, %v3723_v19  ;;  %v3851_v22 = vld [vmem:[%s4819_s13 + $0x1d0] sm:$0xf0]  ;;  %v3705_v23 = vld [vmem:[%s4819_s13 + $0xa0] sm:$0xf] }
  0x2c   : > { %998 = vmatpush.bf16.msra.mxu3 %v3870_v12  ;;  %v4130_v24 = vld [vmem:[%s4819_s13 + $0xac] sm:$0xf0]  ;;  %v3854_v25 = vor.u32 %v4164_v20, %v3851_v22  ;;  %v3833_v26 = vld [vmem:[%s4819_s13 + $0x1a0] sm:$0xf]  ;;  %v4128_v28 = vld [vmem:[%s4819_s13 + $0xa4] sm:$0xf] }
  0x2d   : > { %v4162_v27 = vld [vmem:[%s4819_s13 + $0x1ac] sm:$0xf0]  ;;  %852 = vmatpush.bf16.msra.mxu0 %v3722_v16  ;;  %v3706_v29 = vor.u32 %v4130_v24, %v3705_v23  ;;  %v3707_v30 = vld [vmem:[%s4819_s13 + $0xb0] sm:$0xf0]  ;;  %v4160_v31 = vld [vmem:[%s4819_s13 + $0x1a4] sm:$0xf] }
  0x2e   : > { %v3835_v32 = vld [vmem:[%s4819_s13 + $0x1b0] sm:$0xf0]  ;;  %901 = vmatpush.bf16.msra.mxu1 %v3850_v17  ;;  %v3834_v33 = vor.u32 %v4162_v27, %v3833_v26  ;;  %v3710_v34 = vor.u32 %v4128_v28, %v3707_v30  ;;  %v3689_v35 = vld [vmem:[%s4819_s13 + $0x80] sm:$0xf]  ;;  %v4126_v36 = vld [vmem:[%s4819_s13 + $0x8c] sm:$0xf0] }
  0x2f   : > { %950 = vmatpush.bf16.msra.mxu2 %v3726_v21  ;;  %v3817_v37 = vld [vmem:[%s4819_s13 + $0x180] sm:$0xf]  ;;  %v3838_v38 = vor.u32 %v4160_v31, %v3835_v32  ;;  %v4158_v39 = vld [vmem:[%s4819_s13 + $0x18c] sm:$0xf0]  ;;  %v4124_v40 = vld [vmem:[%s4819_s13 + $0x84] sm:$0xf]  ;;  %v3690_v44 = vor.u32 %v4126_v36, %v3689_v35 }
  0x30   : > { %999 = vmatpush.bf16.msra.mxu3 %v3854_v25  ;;  %v3691_v41 = vld [vmem:[%s4819_s13 + $0x90] sm:$0xf0]  ;;  %v4156_v42 = vld [vmem:[%s4819_s13 + $0x184] sm:$0xf]  ;;  %v3818_v45 = vor.u32 %v4158_v39, %v3817_v37  ;;  %v3673_v47 = vld [vmem:[%s4819_s13 + $0x60] sm:$0xf] }
  0x31   : > { %v3819_v43 = vld [vmem:[%s4819_s13 + $0x190] sm:$0xf0]  ;;  %853 = vmatpush.bf16.msra.mxu0 %v3706_v29  ;;  %v3694_v46 = vor.u32 %v4124_v40, %v3691_v41  ;;  %v4122_v48 = vld [vmem:[%s4819_s13 + $0x6c] sm:$0xf0]  ;;  %v3801_v49 = vld [vmem:[%s4819_s13 + $0x160] sm:$0xf] }
  0x32   : > { %902 = vmatpush.bf16.msra.mxu1 %v3834_v33  ;;  %v3822_v50 = vor.u32 %v4156_v42, %v3819_v43  ;;  %v4154_v51 = vld [vmem:[%s4819_s13 + $0x16c] sm:$0xf0]  ;;  %v4120_v52 = vld [vmem:[%s4819_s13 + $0x64] sm:$0xf]  ;;  %v3675_v53 = vld [vmem:[%s4819_s13 + $0x70] sm:$0xf0]  ;;  %v3674_v56 = vor.u32 %v4122_v48, %v3673_v47 }
  0x33   : > { %951 = vmatpush.bf16.msra.mxu2 %v3710_v34  ;;  %v4152_v54 = vld [vmem:[%s4819_s13 + $0x164] sm:$0xf]  ;;  %v3803_v55 = vld [vmem:[%s4819_s13 + $0x170] sm:$0xf0]  ;;  %v3802_v57 = vor.u32 %v4154_v51, %v3801_v49  ;;  %v3678_v58 = vor.u32 %v4120_v52, %v3675_v53  ;;  %v3657_v59 = vld [vmem:[%s4819_s13 + $0x40] sm:$0xf] }
  0x34   : > { %1000 = vmatpush.bf16.msra.mxu3 %v3838_v38  ;;  %v4118_v60 = vld [vmem:[%s4819_s13 + $0x4c] sm:$0xf0]  ;;  %v3785_v61 = vld [vmem:[%s4819_s13 + $0x140] sm:$0xf]  ;;  %v3806_v62 = vor.u32 %v4152_v54, %v3803_v55  ;;  %v4116_v0 = vld [vmem:[%s4819_s13 + $0x44] sm:$0xf] }
  0x35   : > { %854 = vmatpush.bf16.msra.mxu0 %v3690_v44  ;;  %v4150_v63 = vld [vmem:[%s4819_s13 + $0x14c] sm:$0xf0]  ;;  %v3659_v1 = vld [vmem:[%s4819_s13 + $0x50] sm:$0xf0]  ;;  %v4148_v2 = vld [vmem:[%s4819_s13 + $0x144] sm:$0xf]  ;;  %v3658_v4 = vor.u32 %v4118_v60, %v3657_v59 }
  0x36   : > { %903 = vmatpush.bf16.msra.mxu1 %v3818_v45  ;;  %v3787_v3 = vld [vmem:[%s4819_s13 + $0x150] sm:$0xf0]  ;;  %v3786_v5 = vor.u32 %v4150_v63, %v3785_v61  ;;  %v3662_v6 = vor.u32 %v4116_v0, %v3659_v1  ;;  %v3641_v7 = vld [vmem:[%s4819_s13 + $0x20] sm:$0xf]  ;;  %v4114_v8 = vld [vmem:[%s4819_s13 + $0x2c] sm:$0xf0] }
  0x37   : > { %952 = vmatpush.bf16.msra.mxu2 %v3694_v46  ;;  %v3769_v9 = vld [vmem:[%s4819_s13 + $0x120] sm:$0xf]  ;;  %v3790_v10 = vor.u32 %v4148_v2, %v3787_v3  ;;  %v4146_v11 = vld [vmem:[%s4819_s13 + $0x12c] sm:$0xf0]  ;;  %v4112_v12 = vld [vmem:[%s4819_s13 + $0x24] sm:$0xf]  ;;  %v3642_v16 = vor.u32 %v4114_v8, %v3641_v7 }
  0x38   : > { %1001 = vmatpush.bf16.msra.mxu3 %v3822_v50  ;;  %v3643_v13 = vld [vmem:[%s4819_s13 + $0x30] sm:$0xf0]  ;;  %v4144_v14 = vld [vmem:[%s4819_s13 + $0x124] sm:$0xf]  ;;  %v3625_v17 = vld [vmem:[%s4819_s13] sm:$0xf]  ;;  %v3770_v19 = vor.u32 %v4146_v11, %v3769_v9 }
  0x39   : > { %855 = vmatpush.bf16.msra.mxu0 %v3674_v56  ;;  %v3771_v15 = vld [vmem:[%s4819_s13 + $0x130] sm:$0xf0]  ;;  %v4110_v18 = vld [vmem:[%s4819_s13 + $0xc] sm:$0xf0]  ;;  %v3646_v20 = vor.u32 %v4112_v12, %v3643_v13  ;;  %v3753_v21 = vld [vmem:[%s4819_s13 + $0x100] sm:$0xf] }
  0x3a   : > { %904 = vmatpush.bf16.msra.mxu1 %v3802_v57  ;;  %v4142_v22 = vld [vmem:[%s4819_s13 + $0x10c] sm:$0xf0]  ;;  %v4108_v23 = vld [vmem:[%s4819_s13 + $0x4] sm:$0xf]  ;;  %v3774_v24 = vor.u32 %v4144_v14, %v3771_v15  ;;  %v3627_v25 = vld [vmem:[%s4819_s13 + $0x10] sm:$0xf0]  ;;  %v3626_v31 = vor.u32 %v4110_v18, %v3625_v17 }
  0x3b   : > { %953 = vmatpush.bf16.msra.mxu2 %v3678_v58  ;;  %v4140_v26 = vld [vmem:[%s4819_s13 + $0x104] sm:$0xf]  ;;  %v3755_v27 = vld [vmem:[%s4819_s13 + $0x110] sm:$0xf0]  ;;  %v3561_v28 = vld [vmem:[%s6152_s0] sm:$0xf]  ;;  %v3754_v35 = vor.u32 %v4142_v22, %v3753_v21  ;;  %v3630_v36 = vor.u32 %v4108_v23, %v3627_v25 }
  0x3c   : > { %1002 = vmatpush.bf16.msra.mxu3 %v3806_v62  ;;  %v4137_v29 = vld [vmem:[%s4819_s13 + $0xec] sm:$0xf]  ;;  %v3747_v30 = vld [vmem:[%s4819_s13 + $0xf8] sm:$0xf0]  ;;  %v4093_v32 = vld [vmem:[%s6152_s0 + $0x4] sm:$0xf0]  ;;  %v3758_v39 = vor.u32 %v4140_v26, %v3755_v27 }
  0x3d   : > { %856 = vmatpush.bf16.msra.mxu0 %v3658_v4  ;;  %v4169_v33 = vld [vmem:[%s4819_s13 + $0x1ec] sm:$0xf]  ;;  %v3875_v34 = vld [vmem:[%s4819_s13 + $0x1f8] sm:$0xf0]  ;;  %v4092_v37 = vld [vmem:[%s6152_s0 + $0x4] sm:$0xf]  ;;  %v3750_v40 = vor.u32 %v4137_v29, %v3747_v30  ;;  %v4916_v44 = vor.u32 %v4093_v32, %v3561_v28 }
  0x3e   : > { %905 = vmatpush.bf16.msra.mxu1 %v3786_v5  ;;  %v3563_v38 = vld [vmem:[%s6152_s0 + $0x8] sm:$0xf0]  ;;  %v3745_v41 = vld [vmem:[%s4819_s13 + $0xe8] sm:$0xf]  ;;  %v4139_v42 = vld [vmem:[%s4819_s13 + $0xf4] sm:$0xf0]  ;;  %v3878_v45 = vor.u32 %v4169_v33, %v3875_v34 }
  0x3f   : > { %954 = vmatpush.bf16.msra.mxu2 %v3662_v6  ;;  %v3873_v43 = vld [vmem:[%s4819_s13 + $0x1e8] sm:$0xf]  ;;  %v4171_v46 = vld [vmem:[%s4819_s13 + $0x1f4] sm:$0xf0]  ;;  %v4133_v47 = vld [vmem:[%s4819_s13 + $0xcc] sm:$0xf]  ;;  %v4921_v49 = vor.u32 %v4092_v37, %v3563_v38  ;;  %v3746_v52 = vor.u32 %v4139_v42, %v3745_v41 }
  0x40   : > { %1003 = vmatpush.bf16.msra.mxu3 %v3790_v10  ;;  %v3731_v48 = vld [vmem:[%s4819_s13 + $0xd8] sm:$0xf0]  ;;  %v4165_v50 = vld [vmem:[%s4819_s13 + $0x1cc] sm:$0xf]  ;;  %v3874_v53 = vor.u32 %v4171_v46, %v3873_v43  ;;  %v3729_v55 = vld [vmem:[%s4819_s13 + $0xc8] sm:$0xf] }
  0x41   : > { %857 = vmatpush.bf16.msra.mxu0 %v3642_v16  ;;  %v3859_v51 = vld [vmem:[%s4819_s13 + $0x1d8] sm:$0xf0]  ;;  %v3734_v54 = vor.u32 %v4133_v47, %v3731_v48  ;;  %v4135_v56 = vld [vmem:[%s4819_s13 + $0xd4] sm:$0xf0]  ;;  %v3857_v58 = vld [vmem:[%s4819_s13 + $0x1c8] sm:$0xf] }
  0x42   : > { %906 = vmatpush.bf16.msra.mxu1 %v3770_v19  ;;  %v3862_v57 = vor.u32 %v4165_v50, %v3859_v51  ;;  %v4167_v59 = vld [vmem:[%s4819_s13 + $0x1d4] sm:$0xf0]  ;;  %v3730_v60 = vor.u32 %v4135_v56, %v3729_v55  ;;  %v4129_v61 = vld [vmem:[%s4819_s13 + $0xac] sm:$0xf]  ;;  %v3715_v62 = vld [vmem:[%s4819_s13 + $0xb8] sm:$0xf0] }
  0x43   : > { %955 = vmatpush.bf16.msra.mxu2 %v3646_v20  ;;  %v4161_v63 = vld [vmem:[%s4819_s13 + $0x1ac] sm:$0xf]  ;;  %v3858_v0 = vor.u32 %v4167_v59, %v3857_v58  ;;  %v3718_v1 = vor.u32 %v4129_v61, %v3715_v62  ;;  %v3843_v2 = vld [vmem:[%s4819_s13 + $0x1b8] sm:$0xf0]  ;;  %v3713_v3 = vld [vmem:[%s4819_s13 + $0xa8] sm:$0xf] }
  0x44   : > { %1004 = vmatpush.bf16.msra.mxu3 %v3774_v24  ;;  %v4131_v4 = vld [vmem:[%s4819_s13 + $0xb4] sm:$0xf0]  ;;  %v3846_v5 = vor.u32 %v4161_v63, %v3843_v2  ;;  %v3841_v6 = vld [vmem:[%s4819_s13 + $0x1a8] sm:$0xf]  ;;  %v3569_v10 = vld [vmem:[%s6152_s0 + $0x10] sm:$0xf] }
  0x45   : > { %858 = vmatpush.bf16.msra.mxu0 %v3626_v31  ;;  %v4163_v7 = vld [vmem:[%s4819_s13 + $0x1b4] sm:$0xf0]  ;;  %v3714_v8 = vor.u32 %v4131_v4, %v3713_v3  ;;  %v4094_v12 = vld [vmem:[%s6152_s0 + $0x14] sm:$0xf]  ;;  %v3571_v13 = vld [vmem:[%s6152_s0 + $0x18] sm:$0xf0] }
  0x46   : > { %907 = vmatpush.bf16.msra.mxu1 %v3754_v35  ;;  %v3842_v9 = vor.u32 %v4163_v7, %v3841_v6  ;;  %v4095_v11 = vld [vmem:[%s6152_s0 + $0x14] sm:$0xf0]  ;;  %v4955_v15 = vor.u32 %v4094_v12, %v3571_v13  ;;  %v4125_v16 = vld [vmem:[%s4819_s13 + $0x8c] sm:$0xf]  ;;  %v3699_v17 = vld [vmem:[%s4819_s13 + $0x98] sm:$0xf0] }
  0x47   : > { %956 = vmatpush.bf16.msra.mxu2 %v3630_v36  ;;  %v4953_v14 = vor.u32 %v4095_v11, %v3569_v10  ;;  %v4157_v18 = vld [vmem:[%s4819_s13 + $0x18c] sm:$0xf]  ;;  %v3702_v19 = vor.u32 %v4125_v16, %v3699_v17  ;;  %v3827_v20 = vld [vmem:[%s4819_s13 + $0x198] sm:$0xf0]  ;;  %v3697_v21 = vld [vmem:[%s4819_s13 + $0x88] sm:$0xf] }
  0x48   : > { %1005 = vmatpush.bf16.msra.mxu3 %v3758_v39  ;;  %859 = vmatmul.bf16.vlgmr.msra.gmra.mxu0 %v4916_v44  ;;  %v4127_v22 = vld [vmem:[%s4819_s13 + $0x94] sm:$0xf0]  ;;  %v3830_v23 = vor.u32 %v4157_v18, %v3827_v20  ;;  %v3825_v25 = vld [vmem:[%s4819_s13 + $0x188] sm:$0xf]  ;;  %v3577_v28 = vld [vmem:[%s6152_s0 + $0x20] sm:$0xf] }
  0x49   : > { %908 = vmatmul.bf16.vlgmr.msra.gmra.mxu1 %v4921_v49  ;;  %1047 = vmatpush.bf16.msrb.mxu0 %v3746_v52  ;;  %v3698_v24 = vor.u32 %v4127_v22, %v3697_v21  ;;  %v4159_v26 = vld [vmem:[%s4819_s13 + $0x194] sm:$0xf0]  ;;  %v4097_v29 = vld [vmem:[%s6152_s0 + $0x24] sm:$0xf0]  ;;  %v4096_v30 = vld [vmem:[%s6152_s0 + $0x24] sm:$0xf] }
  0x4a   : > { %957 = vmatmul.bf16.vlgmr.msra.gmra.mxu2 %v4916_v44  ;;  %1096 = vmatpush.bf16.msrb.mxu1 %v3874_v53  ;;  %v3826_v27 = vor.u32 %v4159_v26, %v3825_v25  ;;  %v3579_v31 = vld [vmem:[%s6152_s0 + $0x28] sm:$0xf0]  ;;  %v4981_v32 = vor.u32 %v4097_v29, %v3577_v28  ;;  %v3683_v35 = vld [vmem:[%s4819_s13 + $0x78] sm:$0xf0]  ;;  %v3681_v39 = vld [vmem:[%s4819_s13 + $0x68] sm:$0xf] }
  0x4b   : > { %1145 = vmatpush.bf16.msrb.mxu2 %v3750_v40  ;;  %1006 = vmatmul.bf16.vlgmr.msra.gmra.mxu3 %v4921_v49  ;;  %v4983_v33 = vor.u32 %v4096_v30, %v3579_v31  ;;  %v4121_v34 = vld [vmem:[%s4819_s13 + $0x6c] sm:$0xf]  ;;  %v3811_v38 = vld [vmem:[%s4819_s13 + $0x178] sm:$0xf0]  ;;  %v4123_v40 = vld [vmem:[%s4819_s13 + $0x74] sm:$0xf0] }
  0x4c   : > { %1194 = vmatpush.bf16.msrb.mxu3 %v3878_v45  ;;  %v4153_v36 = vld [vmem:[%s4819_s13 + $0x16c] sm:$0xf]  ;;  %v3686_v37 = vor.u32 %v4121_v34, %v3683_v35  ;;  %v3682_v42 = vor.u32 %v4123_v40, %v3681_v39  ;;  %v3809_v43 = vld [vmem:[%s4819_s13 + $0x168] sm:$0xf]  ;;  %v4155_v45 = vld [vmem:[%s4819_s13 + $0x174] sm:$0xf0] }
  0x4d   : > { %1048 = vmatpush.bf16.msrb.mxu0 %v3730_v60  ;;  %v3814_v41 = vor.u32 %v4153_v36, %v3811_v38  ;;  %v3810_v46 = vor.u32 %v4155_v45, %v3809_v43  ;;  %v3585_v47 = vld [vmem:[%s6152_s0 + $0x30] sm:$0xf]  ;;  %v4099_v48 = vld [vmem:[%s6152_s0 + $0x34] sm:$0xf0]  ;;  %v4098_v50 = vld [vmem:[%s6152_s0 + $0x34] sm:$0xf] }
  0x4e   : > { %1097 = vmatpush.bf16.msrb.mxu1 %v3858_v0  ;;  %v3587_v51 = vld [vmem:[%s6152_s0 + $0x38] sm:$0xf0]  ;;  %v5009_v52 = vor.u32 %v4099_v48, %v3585_v47  ;;  %v4149_v56 = vld [vmem:[%s4819_s13 + $0x14c] sm:$0xf]  ;;  %v3665_v59 = vld [vmem:[%s4819_s13 + $0x48] sm:$0xf] }
  0x4f   : > { %1146 = vmatpush.bf16.msrb.mxu2 %v3734_v54  ;;  %v5011_v53 = vor.u32 %v4098_v50, %v3587_v51  ;;  %v4117_v54 = vld [vmem:[%s4819_s13 + $0x4c] sm:$0xf]  ;;  %v3667_v55 = vld [vmem:[%s4819_s13 + $0x58] sm:$0xf0]  ;;  %v4119_v60 = vld [vmem:[%s4819_s13 + $0x54] sm:$0xf0] }
  0x50   : > { %1195 = vmatpush.bf16.msrb.mxu3 %v3862_v57  ;;  %v3670_v57 = vor.u32 %v4117_v54, %v3667_v55  ;;  %v3795_v58 = vld [vmem:[%s4819_s13 + $0x158] sm:$0xf0]  ;;  %v3666_v62 = vor.u32 %v4119_v60, %v3665_v59  ;;  %v3793_v63 = vld [vmem:[%s4819_s13 + $0x148] sm:$0xf]  ;;  %v4151_v0 = vld [vmem:[%s4819_s13 + $0x154] sm:$0xf0] }
  0x51   : > { %1049 = vmatpush.bf16.msrb.mxu0 %v3714_v8  ;;  %v3798_v61 = vor.u32 %v4149_v56, %v3795_v58  ;;  %v3593_v2 = vld [vmem:[%s6152_s0 + $0x40] sm:$0xf]  ;;  %v4101_v3 = vld [vmem:[%s6152_s0 + $0x44] sm:$0xf0]  ;;  %v4100_v4 = vld [vmem:[%s6152_s0 + $0x44] sm:$0xf] }
  0x52   : > { %1098 = vmatpush.bf16.msrb.mxu1 %v3842_v9  ;;  %v5037_v6 = vor.u32 %v4101_v3, %v3593_v2  ;;  %v4113_v8 = vld [vmem:[%s4819_s13 + $0x2c] sm:$0xf]  ;;  %v3651_v9 = vld [vmem:[%s4819_s13 + $0x38] sm:$0xf0]  ;;  %v3649_v13 = vld [vmem:[%s4819_s13 + $0x28] sm:$0xf] }
  0x53   : > { %1147 = vmatpush.bf16.msrb.mxu2 %v3718_v1  ;;  %v3794_v1 = vor.u32 %v4151_v0, %v3793_v63  ;;  %v4145_v10 = vld [vmem:[%s4819_s13 + $0x12c] sm:$0xf]  ;;  %v3654_v11 = vor.u32 %v4113_v8, %v3651_v9  ;;  %v3779_v12 = vld [vmem:[%s4819_s13 + $0x138] sm:$0xf0]  ;;  %v4115_v16 = vld [vmem:[%s4819_s13 + $0x34] sm:$0xf0] }
  0x54   : > { %1196 = vmatpush.bf16.msrb.mxu3 %v3846_v5  ;;  %v3595_v5 = vld [vmem:[%s6152_s0 + $0x48] sm:$0xf0]  ;;  %v3782_v17 = vor.u32 %v4145_v10, %v3779_v12  ;;  %v3650_v18 = vor.u32 %v4115_v16, %v3649_v13  ;;  %v4147_v20 = vld [vmem:[%s4819_s13 + $0x134] sm:$0xf0]  ;;  %v3601_v22 = vld [vmem:[%s6152_s0 + $0x50] sm:$0xf] }
  0x55   : > { %1050 = vmatpush.bf16.msrb.mxu0 %v3698_v24  ;;  %v5039_v7 = vor.u32 %v4100_v4, %v3595_v5  ;;  %v4102_v24 = vld [vmem:[%s6152_s0 + $0x54] sm:$0xf]  ;;  %v3603_v25 = vld [vmem:[%s6152_s0 + $0x58] sm:$0xf0]  ;;  %v4109_v28 = vld [vmem:[%s4819_s13 + $0xc] sm:$0xf] }
  0x56   : > { %1099 = vmatpush.bf16.msrb.mxu1 %v3826_v27  ;;  %v5067_v27 = vor.u32 %v4102_v24, %v3603_v25  ;;  %v3635_v29 = vld [vmem:[%s4819_s13 + $0x18] sm:$0xf0]  ;;  %v4141_v30 = vld [vmem:[%s4819_s13 + $0x10c] sm:$0xf]  ;;  %v3633_v35 = vld [vmem:[%s4819_s13 + $0x8] sm:$0xf] }
  0x57   : > { %1148 = vmatpush.bf16.msrb.mxu2 %v3702_v19  ;;  %v3777_v19 = vld [vmem:[%s4819_s13 + $0x128] sm:$0xf]  ;;  %v3638_v31 = vor.u32 %v4109_v28, %v3635_v29  ;;  %v3763_v34 = vld [vmem:[%s4819_s13 + $0x118] sm:$0xf0]  ;;  %v4111_v36 = vld [vmem:[%s4819_s13 + $0x14] sm:$0xf0] }
  0x58   : > { %864 = vmatmul.bf16.gmra.mxu0 %v4953_v14  ;;  %1197 = vmatpush.bf16.msrb.mxu3 %v3830_v23  ;;  %v3778_v21 = vor.u32 %v4147_v20, %v3777_v19  ;;  %v4103_v23 = vld [vmem:[%s6152_s0 + $0x54] sm:$0xf0]  ;;  %v3634_v38 = vor.u32 %v4111_v36, %v3633_v35  ;;  %v3761_v39 = vld [vmem:[%s4819_s13 + $0x108] sm:$0xf]  ;;  %v4104_v45 = vld [vmem:[%s6152_s0 + $0x64] sm:$0xf] }
  0x59   : > { %913 = vmatmul.bf16.gmra.mxu1 %v4955_v15  ;;  %1051 = vmatpush.bf16.msrb.mxu0 %v3682_v42  ;;  %v5065_v26 = vor.u32 %v4103_v23, %v3601_v22  ;;  %v4143_v40 = vld [vmem:[%s4819_s13 + $0x114] sm:$0xf0]  ;;  %v3609_v42 = vld [vmem:[%s6152_s0 + $0x60] sm:$0xf]  ;;  %v4105_v43 = vld [vmem:[%s6152_s0 + $0x64] sm:$0xf0] }
  0x5a   : > { %962 = vmatmul.bf16.gmra.mxu2 %v4953_v14  ;;  %1100 = vmatpush.bf16.msrb.mxu1 %v3810_v46  ;;  %v3611_v46 = vld [vmem:[%s6152_s0 + $0x68] sm:$0xf0]  ;;  %v5093_v47 = vor.u32 %v4105_v43, %v3609_v42  ;;  %v3617_v50 = vld [vmem:[%s6152_s0 + $0x70] sm:$0xf]  ;;  %v4107_v51 = vld [vmem:[%s6152_s0 + $0x74] sm:$0xf0] }
  0x5b   : > { %1011 = vmatmul.bf16.gmra.mxu3 %v4955_v15  ;;  %1149 = vmatpush.bf16.msrb.mxu2 %v3686_v37  ;;  %v3766_v37 = vor.u32 %v4141_v30, %v3763_v34  ;;  %v5095_v48 = vor.u32 %v4104_v45, %v3611_v46  ;;  %v4106_v54 = vld [vmem:[%s6152_s0 + $0x74] sm:$0xf]  ;;  %v3619_v55 = vld [vmem:[%s6152_s0 + $0x78] sm:$0xf0]  ;;  %v3995_v56 = vld [vmem:[%s4827_s14 + $0xe0] sm:$0xf]  ;;  %v5116_v59 = vor.u32 %v4107_v51, %v3617_v50 }
  0x5c   : > { %1198 = vmatpush.bf16.msrb.mxu3 %v3814_v41  ;;  %v3762_v41 = vor.u32 %v4143_v40, %v3761_v39  ;;  %v4200_v58 = vld [vmem:[%s4827_s14 + $0xe4] sm:$0xf]  ;;  %s345_s23 = scalar_select %p344_p1, %s4694_s18, 1  ;;  %v4003_v0 = vld [vmem:[%s4827_s14 + $0xe8] sm:$0xf] }
  0x5d   : > { %1052 = vmatpush.bf16.msrb.mxu0 %v3666_v62  ;;  %v5122_v62 = vor.u32 %v4106_v54, %v3619_v55  ;;  %v4201_v4 = vld [vmem:[%s4827_s14 + $0xec] sm:$0xf]  ;;  %v4005_v5 = vld [vmem:[%s4827_s14 + $0xf8] sm:$0xf0]  ;;  %v3979_v8 = vld [vmem:[%s4827_s14 + $0xc0] sm:$0xf] }
  0x5e   : > { %1101 = vmatpush.bf16.msrb.mxu1 %v3794_v1  ;;  %v4203_v1 = vld [vmem:[%s4827_s14 + $0xf4] sm:$0xf0]  ;;  %s3558_s25 = sshll.u32 %s345_s23, 2  ;;  %v5146_v9 = vor.u32 %v4201_v4, %v4005_v5  ;;  %v4198_v10 = vld [vmem:[%s4827_s14 + $0xcc] sm:$0xf0]  ;;  %s3557_s8 = sshll.u32 %s4815_s10, 6 }
  0x5f   : > { %1150 = vmatpush.bf16.msrb.mxu2 %v3670_v57  ;;  %v4202_v57 = vld [vmem:[%s4827_s14 + $0xec] sm:$0xf0]  ;;  %v5135_v2 = vor.u32 %v4203_v1, %v4003_v0  ;;  %s347_s5 = scalar_lea.vmem %s6154_s2, %s3558_s25  ;;  %v3981_v12 = vld [vmem:[%s4827_s14 + $0xd0] sm:$0xf0]  ;;  %v5151_v16 = vor.u32 %v4198_v10, %v3979_v8  ;;  %v3987_v22 = vld [vmem:[%s4827_s14 + $0xc8] sm:$0xf] }
  0x60   : > { %1199 = vmatpush.bf16.msrb.mxu3 %v3798_v61  ;;  %v5119_v60 = vor.u32 %v4202_v57, %v3995_v56  ;;  %v3997_v61 = vld [vmem:[%s4827_s14 + $0xf0] sm:$0xf0]  ;;  %v5141_v3 = vld [vmem:[%s347_s5] sm:$0xf]  ;;  %v4199_v23 = vld [vmem:[%s4827_s14 + $0xd4] sm:$0xf0] }
  0x61   : > { %1053 = vmatpush.bf16.msrb.mxu0 %v3650_v18  ;;  %v5124_v63 = vor.u32 %v4200_v58, %v3997_v61  ;;  %v5157_v19 = vperm.slane %v5141_v3, 0  ;;  %v5165_v20 = vperm.slane %v5141_v3, 1  ;;  %v5171_v25 = vor.u32 %v4199_v23, %v3987_v22  ;;  %v4197_v36 = vld [vmem:[%s4827_s14 + $0xcc] sm:$0xf]  ;;  %v3963_v40 = vld [vmem:[%s4827_s14 + $0xa0] sm:$0xf] }
  0x62   : > { %1102 = vmatpush.bf16.msrb.mxu1 %v3778_v21  ;;  %v4192_v42 = vld [vmem:[%s4827_s14 + $0xa4] sm:$0xf]  ;;  %v3965_v51 = vld [vmem:[%s4827_s14 + $0xb0] sm:$0xf0]  ;;  %v3971_v0 = vld [vmem:[%s4827_s14 + $0xa8] sm:$0xf] }
  0x63   : > { %1151 = vmatpush.bf16.msrb.mxu2 %v3654_v11  ;;  %v4196_v11 = vld [vmem:[%s4827_s14 + $0xc4] sm:$0xf]  ;;  %v5188_v55 = vor.u32 %v4192_v42, %v3965_v51  ;;  %v4195_v1 = vld [vmem:[%s4827_s14 + $0xb4] sm:$0xf0]  ;;  %v3973_v22 = vld [vmem:[%s4827_s14 + $0xb8] sm:$0xf0] }
  0x64   : > { %1200 = vmatpush.bf16.msrb.mxu3 %v3782_v17  ;;  %v5153_v17 = vor.u32 %v4196_v11, %v3981_v12  ;;  %v5199_v5 = vor.u32 %v4195_v1, %v3971_v0  ;;  %v4189_v1 = vld [vmem:[%s4827_s14 + $0x8c] sm:$0xf]  ;;  %s5531_s11 = scalar_lea.vmem [#allocation9], %s3557_s8  ;;  %s4264_s10 = smul.u32 80, %s4694_s18 }
  0x65   : > { %1054 = vmatpush.bf16.msrb.mxu0 %v3634_v38  ;;  %s4265_s30 = smul.u32 48, %s4694_s18  ;;  %s4211_s8 = sshll.u32 %s4694_s18, 4 }
  0x66   : > { %1103 = vmatpush.bf16.msrb.mxu1 %v3762_v41  ;;  %v4194_v41 = vld [vmem:[%s4827_s14 + $0xac] sm:$0xf0]  ;;  %s5567_s12 = sadd.s32 16, %s4264_s10 }
  0x67   : > { %1152 = vmatpush.bf16.msrb.mxu2 %v3638_v31  ;;  %v5184_v50 = vor.u32 %v4194_v41, %v3963_v40  ;;  %s1721_s26 = sshra.s32 %s5567_s12, 3  ;;  %s5659_s24 = sadd.s32 32, %s4265_s30 }
  0x68   : > { %869 = vmatmul.bf16.gmra.mxu0 %v4981_v32  ;;  %1201 = vmatpush.bf16.msrb.mxu3 %v3766_v37  ;;  %v3989_v37 = vld [vmem:[%s4827_s14 + $0xd8] sm:$0xf0]  ;;  %s4207_s15 = sshll.u32 %s1721_s26, 4  ;;  %s4025_s23 = sshll.u32 %s1721_s26, 2 }
  0x69   : > { %918 = vmatmul.bf16.gmra.mxu1 %v4983_v33  ;;  %1514 = vmatpush.bf16.msra.mxu0 %v5119_v60  ;;  %v5178_v39 = vor.u32 %v4197_v36, %v3989_v37  ;;  %s1725_s21 = scalar_lea.vmem [#allocation2], %s4207_s15  ;;  %s1937_s25 = scalar_lea.vmem %s5531_s11, %s4025_s23 [#allocation9] }
  0x6a   : > { %967 = vmatmul.bf16.gmra.mxu2 %v4981_v32  ;;  %1528 = vmatpush.bf16.msra.mxu1 %v5124_v63  ;;  %s1943_s5 = sshra.s32 %s5659_s24, 3 }
  0x6b   : > { %1016 = vmatmul.bf16.gmra.mxu3 %v4983_v33  ;;  %1542 = vmatpush.bf16.msra.mxu2 %v5135_v2 }
  0x6c   : > { %1556 = vmatpush.bf16.msra.mxu3 %v5146_v9 }
  0x6d   : > { %1515 = vmatpush.bf16.msra.mxu0 %v5151_v16 }
  0x6e   : > { %1529 = vmatpush.bf16.msra.mxu1 %v5153_v17 }
  0x6f   : > { %1543 = vmatpush.bf16.msra.mxu2 %v5171_v25 }
  0x70   : > { %1557 = vmatpush.bf16.msra.mxu3 %v5178_v39 }
  0x71   : > { %1516 = vmatpush.bf16.msra.mxu0 %v5184_v50 }
  0x72   : > { %1530 = vmatpush.bf16.msra.mxu1 %v5188_v55 }
  0x73   : > { %1544 = vmatpush.bf16.msra.mxu2 %v5199_v5 }
  0x78   : > { %874 = vmatmul.bf16.gmra.mxu0 %v5009_v52 }
  0x79   : > { %923 = vmatmul.bf16.gmra.mxu1 %v5011_v53 }
  0x7a   : > { %972 = vmatmul.bf16.gmra.mxu2 %v5009_v52 }
  0x7b   : > { %1021 = vmatmul.bf16.gmra.mxu3 %v5011_v53 }
  0x88   : > { %879 = vmatmul.bf16.gmra.mxu0 %v5037_v6 }
  0x89   : > { %928 = vmatmul.bf16.gmra.mxu1 %v5039_v7 }
  0x8a   : > { %977 = vmatmul.bf16.gmra.mxu2 %v5037_v6 }
  0x8b   : > { %1026 = vmatmul.bf16.gmra.mxu3 %v5039_v7 }
  0x98   : > { %884 = vmatmul.bf16.gmra.mxu0 %v5065_v26 }
  0x99   : > { %933 = vmatmul.bf16.gmra.mxu1 %v5067_v27 }
  0x9a   : > { %982 = vmatmul.bf16.gmra.mxu2 %v5065_v26 }
  0x9b   : > { %1031 = vmatmul.bf16.gmra.mxu3 %v5067_v27 }
  0xa8   : > { %889 = vmatmul.bf16.gmra.mxu0 %v5093_v47 }
  0xa9   : > { %938 = vmatmul.bf16.gmra.mxu1 %v5095_v48 }
  0xaa   : > { %987 = vmatmul.bf16.gmra.mxu2 %v5093_v47 }
  0xab   : > { %1036 = vmatmul.bf16.gmra.mxu3 %v5095_v48 }
  0xb8   : > { %894 = vmatmul.bf16.gmra.mxu0 %v5116_v59 }
  0xb9   : > { %943 = vmatmul.bf16.gmra.mxu1 %v5122_v62 }
  0xba   : > { %992 = vmatmul.bf16.gmra.mxu2 %v5116_v59 }
  0xbb   : > { %1041 = vmatmul.bf16.gmra.mxu3 %v5122_v62 }
  0xc5   : > { %v860_v13 = vpop.f32.mrf.mxu0 }
  0xc6   : > { %v909_v18 = vpop.f32.mrf.mxu1  ;;  %v861_v21 = vadd.f32 %v860_v13, %v5157_v19 }
  0xc8   : > { %1055 = vmatmul.bf16.vlgmr.msrb.gmra.mxu0 %v4916_v44 }
  0xc9   : > { %1104 = vmatmul.bf16.vlgmr.msrb.gmra.mxu1 %v4921_v49 }
  0xca   : > { %1153 = vmatmul.bf16.vlgmr.msrb.gmra.mxu2 %v4916_v44 }
  0xcb   : > { %1202 = vmatmul.bf16.vlgmr.msrb.gmra.mxu3 %v4921_v49  ;;  %v910_v49 = vadd.f32 %v909_v18, %v861_v21  ;;  %v4193_v21 = vld [vmem:[%s4827_s14 + $0xac] sm:$0xf] }
  0xcd   : > { %v958_v24 = vpop.f32.mrf.mxu2  ;;  %v862_v29 = vpop.f32.mrf.mxu0 }
  0xce   : > { %v959_v28 = vadd.f32 %v958_v24, %v5165_v20  ;;  %v1007_v44 = vpop.f32.mrf.mxu3  ;;  %v911_v30 = vpop.f32.mrf.mxu1  ;;  %v863_v35 = vadd.f32 %v862_v29, %v5157_v19  ;;  %v5206_v24 = vor.u32 %v4193_v21, %v3973_v22  ;;  %v4188_v29 = vld [vmem:[%s4827_s14 + $0x84] sm:$0xf]  ;;  %v3933_v22 = vld [vmem:[%s4827_s14 + $0x70] sm:$0xf0] }
  0xd0   : > { %v1008_v31 = vadd.f32 %v1007_v44, %v959_v28  ;;  %v912_v56 = vadd.f32 %v911_v30, %v863_v35  ;;  %v3947_v28 = vld [vmem:[%s4827_s14 + $0x80] sm:$0xf]  ;;  %v4190_v44 = vld [vmem:[%s4827_s14 + $0x8c] sm:$0xf0]  ;;  %v3949_v35 = vld [vmem:[%s4827_s14 + $0x90] sm:$0xf0]  ;;  %1558 = vmatpush.bf16.msra.mxu3 %v5206_v24 }
  0xd1   : > { %v5216_v37 = vor.u32 %v4188_v29, %v3949_v35  ;;  %v4187_v35 = vld [vmem:[%s4827_s14 + $0x74] sm:$0xf0] }
  0xd2   : > { %v1243_v34 = vpack.c.bf16 %v1008_v31, %v910_v49 }
  0xd3   : > { %1531 = vmatpush.bf16.msra.mxu1 %v5216_v37 }
  0xd4   : > { %1275 = vst [vmem:[#allocation2] sm:$0xff] %v1243_v34  ;;  %v5212_v34 = vor.u32 %v4190_v44, %v3947_v28 }
  0xd5   : > { %v960_v38 = vpop.f32.mrf.mxu2  ;;  %v865_v46 = vpop.f32.mrf.mxu0 }
  0xd6   : > { %v961_v43 = vadd.f32 %v960_v38, %v5165_v20  ;;  %v1009_v45 = vpop.f32.mrf.mxu3  ;;  %v914_v54 = vpop.f32.mrf.mxu1  ;;  %v866_v61 = vadd.f32 %v865_v46, %v5157_v19  ;;  %1517 = vmatpush.bf16.msra.mxu0 %v5212_v34 }
  0xd8   : > { %v1010_v57 = vadd.f32 %v1009_v45, %v961_v43  ;;  %1060 = vmatmul.bf16.gmra.mxu0 %v4953_v14  ;;  %v3955_v43 = vld [vmem:[%s4827_s14 + $0x88] sm:$0xf]  ;;  %v4191_v45 = vld [vmem:[%s4827_s14 + $0x94] sm:$0xf0] }
  0xd9   : > { %1109 = vmatmul.bf16.gmra.mxu1 %v4955_v15  ;;  %v5227_v51 = vor.u32 %v4191_v45, %v3955_v43 }
  0xda   : > { %v1245_v58 = vpack.c.bf16 %v1010_v57, %v912_v56  ;;  %1158 = vmatmul.bf16.gmra.mxu2 %v4953_v14 }
  0xdb   : > { %1207 = vmatmul.bf16.gmra.mxu3 %v4955_v15  ;;  %v915_v15 = vadd.f32 %v914_v54, %v866_v61  ;;  %1545 = vmatpush.bf16.msra.mxu2 %v5227_v51 }
  0xdc   : > { %1277 = vst [vmem:[#allocation2 + $0x10] sm:$0xff] %v1245_v58 }
  0xdd   : > { %v963_v4 = vpop.f32.mrf.mxu2  ;;  %v867_v11 = vpop.f32.mrf.mxu0 }
  0xde   : > { %v964_v8 = vadd.f32 %v963_v4, %v5165_v20  ;;  %v1012_v10 = vpop.f32.mrf.mxu3  ;;  %v916_v14 = vpop.f32.mrf.mxu1  ;;  %v868_v18 = vadd.f32 %v867_v11, %v5157_v19  ;;  %v3957_v4 = vld [vmem:[%s4827_s14 + $0x98] sm:$0xf0]  ;;  %v3931_v11 = vld [vmem:[%s4827_s14 + $0x60] sm:$0xf] }
  0xe0   : > { %v1013_v12 = vadd.f32 %v1012_v10, %v964_v8  ;;  %v917_v38 = vadd.f32 %v916_v14, %v868_v18  ;;  %v5234_v10 = vor.u32 %v4189_v1, %v3957_v4  ;;  %v4186_v14 = vld [vmem:[%s4827_s14 + $0x6c] sm:$0xf0] }
  0xe1   : > { %v5240_v21 = vor.u32 %v4186_v14, %v3931_v11  ;;  %v3917_v11 = vld [vmem:[%s4827_s14 + $0x50] sm:$0xf0] }
  0xe2   : > { %v1247_v13 = vpack.c.bf16 %v1013_v12, %v915_v15  ;;  %v4184_v15 = vld [vmem:[%s4827_s14 + $0x64] sm:$0xf]  ;;  %1559 = vmatpush.bf16.msra.mxu3 %v5234_v10 }
  0xe3   : > { %v5244_v28 = vor.u32 %v4184_v15, %v3933_v22  ;;  %1518 = vmatpush.bf16.msra.mxu0 %v5240_v21 }
  0xe4   : > { %1279 = vst [vmem:[#allocation2 + $0x20] sm:$0xff] %v1247_v13 }
  0xe5   : > { %v965_v23 = vpop.f32.mrf.mxu2  ;;  %v870_v31 = vpop.f32.mrf.mxu0  ;;  %1532 = vmatpush.bf16.msra.mxu1 %v5244_v28 }
  0xe6   : > { %v966_v30 = vadd.f32 %v965_v23, %v5165_v20  ;;  %v1014_v49 = vpop.f32.mrf.mxu3  ;;  %v919_v36 = vpop.f32.mrf.mxu1  ;;  %v871_v42 = vadd.f32 %v870_v31, %v5157_v19  ;;  %v3939_v31 = vld [vmem:[%s4827_s14 + $0x68] sm:$0xf] }
  0xe8   : > { %v1015_v40 = vadd.f32 %v1014_v49, %v966_v30  ;;  %1065 = vmatmul.bf16.gmra.mxu0 %v4981_v32 }
  0xe9   : > { %1114 = vmatmul.bf16.gmra.mxu1 %v4983_v33 }
  0xea   : > { %v1249_v41 = vpack.c.bf16 %v1015_v40, %v917_v38  ;;  %1163 = vmatmul.bf16.gmra.mxu2 %v4981_v32  ;;  %v5255_v38 = vor.u32 %v4187_v35, %v3939_v31 }
  0xeb   : > { %1212 = vmatmul.bf16.gmra.mxu3 %v4983_v33  ;;  %v920_v33 = vadd.f32 %v919_v36, %v871_v42 }
  0xec   : > { %1281 = vst [vmem:[#allocation2 + $0x30] sm:$0xff] %v1249_v41  ;;  %1546 = vmatpush.bf16.msra.mxu2 %v5255_v38 }
  0xed   : > { %v968_v46 = vpop.f32.mrf.mxu2  ;;  %v872_v57 = vpop.f32.mrf.mxu0 }
  0xee   : > { %v969_v54 = vadd.f32 %v968_v46, %v5165_v20  ;;  %v1017_v56 = vpop.f32.mrf.mxu3  ;;  %v921_v32 = vpop.f32.mrf.mxu1  ;;  %v873_v0 = vadd.f32 %v872_v57, %v5157_v19 }
  0xf0   : > { %v1018_v58 = vadd.f32 %v1017_v56, %v969_v54  ;;  %v922_v44 = vadd.f32 %v921_v32, %v873_v0  ;;  %v4185_v54 = vld [vmem:[%s4827_s14 + $0x6c] sm:$0xf]  ;;  %v3941_v56 = vld [vmem:[%s4827_s14 + $0x78] sm:$0xf0] }
  0xf1   : > { %v5262_v32 = vor.u32 %v4185_v54, %v3941_v56  ;;  %v4176_v54 = vld [vmem:[%s4827_s14 + $0x24] sm:$0xf] }
  0xf2   : > { %v1251_v61 = vpack.c.bf16 %v1018_v58, %v920_v33  ;;  %v3915_v33 = vld [vmem:[%s4827_s14 + $0x40] sm:$0xf]  ;;  %v4182_v58 = vld [vmem:[%s4827_s14 + $0x4c] sm:$0xf0] }
  0xf3   : > { %1560 = vmatpush.bf16.msra.mxu3 %v5262_v32 }
  0xf4   : > { %1283 = vst [vmem:[#allocation2 + $0x40] sm:$0xff] %v1251_v61  ;;  %v4180_v61 = vld [vmem:[%s4827_s14 + $0x44] sm:$0xf] }
  0xf5   : > { %v970_v8 = vpop.f32.mrf.mxu2  ;;  %v875_v18 = vpop.f32.mrf.mxu0  ;;  %v5272_v15 = vor.u32 %v4180_v61, %v3917_v11  ;;  %v3901_v61 = vld [vmem:[%s4827_s14 + $0x30] sm:$0xf0] }
  0xf6   : > { %v971_v12 = vadd.f32 %v970_v8, %v5165_v20  ;;  %v1019_v13 = vpop.f32.mrf.mxu3  ;;  %v924_v23 = vpop.f32.mrf.mxu1  ;;  %v876_v49 = vadd.f32 %v875_v18, %v5157_v19  ;;  %v5268_v8 = vor.u32 %v4182_v58, %v3915_v33 }
  0xf7   : > { %1533 = vmatpush.bf16.msra.mxu1 %v5272_v15 }
  0xf8   : > { %v1020_v29 = vadd.f32 %v1019_v13, %v971_v12  ;;  %1070 = vmatmul.bf16.gmra.mxu0 %v5009_v52 }
  0xf9   : > { %1119 = vmatmul.bf16.gmra.mxu1 %v5011_v53  ;;  %1519 = vmatpush.bf16.msra.mxu0 %v5268_v8 }
  0xfa   : > { %v1253_v30 = vpack.c.bf16 %v1020_v29, %v922_v44  ;;  %1168 = vmatmul.bf16.gmra.mxu2 %v5009_v52  ;;  %v4183_v44 = vld [vmem:[%s4827_s14 + $0x54] sm:$0xf0] }
  0xfb   : > { %1217 = vmatmul.bf16.gmra.mxu3 %v5011_v53  ;;  %v925_v53 = vadd.f32 %v924_v23, %v876_v49  ;;  %v3923_v23 = vld [vmem:[%s4827_s14 + $0x48] sm:$0xf] }
  0xfc   : > { %1285 = vst [vmem:[#allocation2 + $0x50] sm:$0xff] %v1253_v30  ;;  %v5283_v30 = vor.u32 %v4183_v44, %v3923_v23 }
  0xfd   : > { %v973_v36 = vpop.f32.mrf.mxu2  ;;  %v877_v42 = vpop.f32.mrf.mxu0 }
  0xfe   : > { %v974_v40 = vadd.f32 %v973_v36, %v5165_v20  ;;  %v1022_v41 = vpop.f32.mrf.mxu3  ;;  %v926_v52 = vpop.f32.mrf.mxu1  ;;  %v878_v46 = vadd.f32 %v877_v42, %v5157_v19  ;;  %1547 = vmatpush.bf16.msra.mxu2 %v5283_v30  ;;  %v4181_v42 = vld [vmem:[%s4827_s14 + $0x4c] sm:$0xf] }
 0x100   : > { %v1023_v43 = vadd.f32 %v1022_v41, %v974_v40  ;;  %v927_v12 = vadd.f32 %v926_v52, %v878_v46  ;;  %v3925_v52 = vld [vmem:[%s4827_s14 + $0x58] sm:$0xf0]  ;;  %v4178_v46 = vld [vmem:[%s4827_s14 + $0x2c] sm:$0xf0] }
 0x102   : > { %v1255_v45 = vpack.c.bf16 %v1023_v43, %v925_v53  ;;  %v5290_v43 = vor.u32 %v4181_v42, %v3925_v52  ;;  %v4174_v42 = vld [vmem:[%s4827_s14 + $0xc] sm:$0xf0] }
 0x104   : > { %1287 = vst [vmem:[#allocation2 + $0x60] sm:$0xff] %v1255_v45  ;;  %v3899_v45 = vld [vmem:[%s4827_s14 + $0x20] sm:$0xf]  ;;  %1561 = vmatpush.bf16.msra.mxu3 %v5290_v43 }
 0x105   : > { %v975_v57 = vpop.f32.mrf.mxu2  ;;  %v880_v4 = vpop.f32.mrf.mxu0  ;;  %v5296_v58 = vor.u32 %v4178_v46, %v3899_v45  ;;  %v4172_v45 = vld [vmem:[%s4827_s14 + $0x4] sm:$0xf]  ;;  %v3885_v46 = vld [vmem:[%s4827_s14 + $0x10] sm:$0xf0] }
 0x106   : > { %v976_v0 = vadd.f32 %v975_v57, %v5165_v20  ;;  %v1024_v1 = vpop.f32.mrf.mxu3  ;;  %v929_v14 = vpop.f32.mrf.mxu1  ;;  %v881_v22 = vadd.f32 %v880_v4, %v5157_v19 }
 0x107   : > { %1520 = vmatpush.bf16.msra.mxu0 %v5296_v58 }
 0x108   : > { %v1025_v13 = vadd.f32 %v1024_v1, %v976_v0  ;;  %1075 = vmatmul.bf16.gmra.mxu0 %v5037_v6  ;;  %v5300_v1 = vor.u32 %v4176_v54, %v3901_v61  ;;  %v3891_v54 = vld [vmem:[%s4827_s14 + $0x8] sm:$0xf]  ;;  %v5329_v61 = vor.u32 %v4172_v45, %v3885_v46 }
 0x109   : > { %1124 = vmatmul.bf16.gmra.mxu1 %v5039_v7 }
 0x10a   : > { %v1257_v18 = vpack.c.bf16 %v1025_v13, %v927_v12  ;;  %1173 = vmatmul.bf16.gmra.mxu2 %v5037_v6  ;;  %1534 = vmatpush.bf16.msra.mxu1 %v5300_v1  ;;  %v3907_v13 = vld [vmem:[%s4827_s14 + $0x28] sm:$0xf]  ;;  %6167 = vst [vmem:[#allocation12_spill] sm:$0xff] %v5329_v61 }
 0x10b   : > { %1222 = vmatmul.bf16.gmra.mxu3 %v5039_v7  ;;  %v930_v7 = vadd.f32 %v929_v14, %v881_v22 }
 0x10c   : > { %1289 = vst [vmem:[#allocation2 + $0x70] sm:$0xff] %v1257_v18  ;;  %v4179_v18 = vld [vmem:[%s4827_s14 + $0x34] sm:$0xf0] }
 0x10d   : > { %v978_v29 = vpop.f32.mrf.mxu2  ;;  %v882_v35 = vpop.f32.mrf.mxu0  ;;  %v5311_v23 = vor.u32 %v4179_v18, %v3907_v13 }
 0x10e   : > { %v979_v49 = vadd.f32 %v978_v29, %v5165_v20  ;;  %v1027_v31 = vpop.f32.mrf.mxu3  ;;  %v931_v6 = vpop.f32.mrf.mxu1  ;;  %v883_v41 = vadd.f32 %v882_v35, %v5157_v19  ;;  %v4177_v35 = vld [vmem:[%s4827_s14 + $0x2c] sm:$0xf]  ;;  %1535 = vmatpush.bf16.msra.mxu1 %v5329_v61 }
 0x10f   : > { %1548 = vmatpush.bf16.msra.mxu2 %v5311_v23 }
 0x110   : > { %v1028_v36 = vadd.f32 %v1027_v31, %v979_v49  ;;  %v932_v4 = vadd.f32 %v931_v6, %v883_v41  ;;  %v3909_v6 = vld [vmem:[%s4827_s14 + $0x38] sm:$0xf0]  ;;  %v3883_v41 = vld [vmem:[%s4827_s14] sm:$0xf] }
 0x112   : > { %v1259_v40 = vpack.c.bf16 %v1028_v36, %v930_v7  ;;  %v5317_v36 = vor.u32 %v4177_v35, %v3909_v6  ;;  %1750 = vmatpush.bf16.msrb.mxu1 %v5124_v63 }
 0x114   : > { %1291 = vst [vmem:[#allocation2 + $0x80] sm:$0xff] %v1259_v40  ;;  %1562 = vmatpush.bf16.msra.mxu3 %v5317_v36 }
 0x115   : > { %v980_v53 = vpop.f32.mrf.mxu2  ;;  %v885_v33 = vpop.f32.mrf.mxu0 }
 0x116   : > { %v981_v56 = vadd.f32 %v980_v53, %v5165_v20  ;;  %v1029_v57 = vpop.f32.mrf.mxu3  ;;  %v934_v0 = vpop.f32.mrf.mxu1  ;;  %v886_v12 = vadd.f32 %v885_v33, %v5157_v19  ;;  %v5323_v53 = vor.u32 %v4174_v42, %v3883_v41  ;;  %1751 = vmatpush.bf16.msrb.mxu1 %v5153_v17 }
 0x118   : > { %v1030_v11 = vadd.f32 %v1029_v57, %v981_v56  ;;  %1080 = vmatmul.bf16.gmra.mxu0 %v5065_v26 }
 0x119   : > { %1129 = vmatmul.bf16.gmra.mxu1 %v5067_v27  ;;  %1521 = vmatpush.bf16.msra.mxu0 %v5323_v53 }
 0x11a   : > { %v1261_v14 = vpack.c.bf16 %v1030_v11, %v932_v4  ;;  %1178 = vmatmul.bf16.gmra.mxu2 %v5065_v26  ;;  %v935_v26 = vadd.f32 %v934_v0, %v886_v12  ;;  %v4175_v0 = vld [vmem:[%s4827_s14 + $0x14] sm:$0xf0]  ;;  %v4173_v4 = vld [vmem:[%s4827_s14 + $0xc] sm:$0xf]  ;;  %v3893_v11 = vld [vmem:[%s4827_s14 + $0x18] sm:$0xf0]  ;;  %1752 = vmatpush.bf16.msrb.mxu1 %v5188_v55 }
 0x11b   : > { %1227 = vmatmul.bf16.gmra.mxu3 %v5067_v27  ;;  %v5335_v12 = vor.u32 %v4175_v0, %v3891_v54  ;;  %s1343_s14 = smul.u32 112, %s4694_s18 }
 0x11c   : > { %1293 = vst [vmem:[#allocation2 + $0x90] sm:$0xff] %v1261_v14 }
 0x11d   : > { %v983_v22 = vpop.f32.mrf.mxu2  ;;  %v887_v49 = vpop.f32.mrf.mxu0  ;;  %6168 = vst [vmem:[#allocation13_spill] sm:$0xff] %v5335_v12  ;;  %1736 = vmatpush.bf16.msrb.mxu0 %v5119_v60  ;;  %1549 = vmatpush.bf16.msra.mxu2 %v5335_v12  ;;  %s5461_s6 = sshra.s32 %s1343_s14, 3  ;;  %s4210_s14 = sshll.u32 %s1943_s5, 4 }
 0x11e   : > { %v984_v44 = vadd.f32 %v983_v22, %v5165_v20  ;;  %v1032_v29 = vpop.f32.mrf.mxu3  ;;  %v936_v31 = vpop.f32.mrf.mxu1  ;;  %v888_v40 = vadd.f32 %v887_v49, %v5157_v19  ;;  %v5338_v22 = vor.u32 %v4173_v4, %v3893_v11  ;;  %1753 = vmatpush.bf16.msrb.mxu1 %v5216_v37  ;;  %s4204_s13 = sshll.u32 %s5461_s6, 4  ;;  %s4015_s9 = sshll.u32 %s5461_s6, 2 }
 0x11f   : > { %s1348_s7 = scalar_lea.vmem [#allocation2], %s4204_s13  ;;  %s1715_s29 = scalar_lea.vmem %s5531_s11, %s4015_s9 [#allocation9] }
 0x120   : > { %v1033_v27 = vadd.f32 %v1032_v29, %v984_v44  ;;  %v937_v13 = vadd.f32 %v936_v31, %v888_v40  ;;  %6169 = vst [vmem:[#allocation14_spill] sm:$0xff] %v5338_v22  ;;  %1563 = vmatpush.bf16.msra.mxu3 %v5338_v22  ;;  %s1947_s6 = scalar_lea.vmem [#allocation2], %s4210_s14  ;;  %s4035_s13 = sshll.u32 %s1943_s5, 2 }
 0x121   : > { %1764 = vmatpush.bf16.msrb.mxu2 %v5135_v2  ;;  %1737 = vmatpush.bf16.msrb.mxu0 %v5151_v16  ;;  %s5751_s9 = sadd.s32 48, %s4211_s8 }
 0x122   : > { %v1263_v7 = vpack.c.bf16 %v1033_v27, %v935_v26  ;;  %1754 = vmatpush.bf16.msrb.mxu1 %v5244_v28 }
 0x124   : > { %1295 = vst [vmem:[#allocation2 + $0xa0] sm:$0xff] %v1263_v7  ;;  %1778 = vmatpush.bf16.msrb.mxu3 %v5146_v9 }
 0x125   : > { %v985_v52 = vpop.f32.mrf.mxu2  ;;  %v890_v33 = vpop.f32.mrf.mxu0  ;;  %1765 = vmatpush.bf16.msrb.mxu2 %v5171_v25  ;;  %1738 = vmatpush.bf16.msrb.mxu0 %v5184_v50 }
 0x126   : > { %v986_v56 = vadd.f32 %v985_v52, %v5165_v20  ;;  %v1034_v57 = vpop.f32.mrf.mxu3  ;;  %v939_v14 = vpop.f32.mrf.mxu1  ;;  %v891_v29 = vadd.f32 %v890_v33, %v5157_v19  ;;  %1755 = vmatpush.bf16.msrb.mxu1 %v5272_v15 }
 0x128   : > { %v1035_v18 = vadd.f32 %v1034_v57, %v986_v56  ;;  %1085 = vmatmul.bf16.gmra.mxu0 %v5093_v47  ;;  %1779 = vmatpush.bf16.msrb.mxu3 %v5178_v39 }
 0x129   : > { %1134 = vmatmul.bf16.gmra.mxu1 %v5095_v48  ;;  %1766 = vmatpush.bf16.msrb.mxu2 %v5199_v5 }
 0x12a   : > { %v1265_v44 = vpack.c.bf16 %v1035_v18, %v937_v13  ;;  %1183 = vmatmul.bf16.gmra.mxu2 %v5093_v47  ;;  %1739 = vmatpush.bf16.msrb.mxu0 %v5212_v34 }
 0x12b   : > { %1232 = vmatmul.bf16.gmra.mxu3 %v5095_v48  ;;  %v940_v48 = vadd.f32 %v939_v14, %v891_v29  ;;  %1756 = vmatpush.bf16.msrb.mxu1 %v5300_v1 }
 0x12c   : > { %1297 = vst [vmem:[#allocation2 + $0xb0] sm:$0xff] %v1265_v44  ;;  %1780 = vmatpush.bf16.msrb.mxu3 %v5206_v24 }
 0x12d   : > { %v988_v49 = vpop.f32.mrf.mxu2  ;;  %v892_v47 = vpop.f32.mrf.mxu0  ;;  %1767 = vmatpush.bf16.msrb.mxu2 %v5227_v51 }
 0x12e   : > { %v989_v31 = vadd.f32 %v988_v49, %v5165_v20  ;;  %v1037_v26 = vpop.f32.mrf.mxu3  ;;  %v941_v27 = vpop.f32.mrf.mxu1  ;;  %v893_v7 = vadd.f32 %v892_v47, %v5157_v19  ;;  %1740 = vmatpush.bf16.msrb.mxu0 %v5240_v21 }
 0x12f   : > { %1757 = vmatpush.bf16.msrb.mxu1 %v5329_v61 }
 0x130   : > { %v1038_v35 = vadd.f32 %v1037_v26, %v989_v31  ;;  %v942_v46 = vadd.f32 %v941_v27, %v893_v7  ;;  %1781 = vmatpush.bf16.msrb.mxu3 %v5234_v10 }
 0x131   : > { %1768 = vmatpush.bf16.msrb.mxu2 %v5255_v38 }
 0x132   : > { %v1267_v6 = vpack.c.bf16 %v1038_v35, %v940_v48  ;;  %1741 = vmatpush.bf16.msrb.mxu0 %v5268_v8  ;;  %v5388_v48 = vperm.slane %v5141_v3, 2 }
 0x134   : > { %1299 = vst [vmem:[#allocation2 + $0xc0] sm:$0xff] %v1267_v6  ;;  %1782 = vmatpush.bf16.msrb.mxu3 %v5262_v32 }
 0x135   : > { %v990_v40 = vpop.f32.mrf.mxu2  ;;  %v895_v52 = vpop.f32.mrf.mxu0  ;;  %1769 = vmatpush.bf16.msrb.mxu2 %v5283_v30 }
 0x136   : > { %v991_v41 = vadd.f32 %v990_v40, %v5165_v20  ;;  %v1039_v42 = vpop.f32.mrf.mxu3  ;;  %v944_v45 = vpop.f32.mrf.mxu1  ;;  %v896_v57 = vadd.f32 %v895_v52, %v5157_v19  ;;  %1742 = vmatpush.bf16.msrb.mxu0 %v5296_v58 }
 0x138   : > { %v1040_v54 = vadd.f32 %v1039_v42, %v991_v41  ;;  %1090 = vmatmul.bf16.gmra.mxu0 %v5116_v59  ;;  %1783 = vmatpush.bf16.msrb.mxu3 %v5290_v43 }
 0x139   : > { %1139 = vmatmul.bf16.gmra.mxu1 %v5122_v62  ;;  %1770 = vmatpush.bf16.msrb.mxu2 %v5311_v23 }
 0x13a   : > { %v1269_v56 = vpack.c.bf16 %v1040_v54, %v942_v46  ;;  %1188 = vmatmul.bf16.gmra.mxu2 %v5116_v59  ;;  %v945_v59 = vadd.f32 %v944_v45, %v896_v57  ;;  %1743 = vmatpush.bf16.msrb.mxu0 %v5323_v53 }
 0x13b   : > { %1237 = vmatmul.bf16.gmra.mxu3 %v5122_v62 }
 0x13c   : > { %1301 = vst [vmem:[#allocation2 + $0xd0] sm:$0xff] %v1269_v56  ;;  %1784 = vmatpush.bf16.msrb.mxu3 %v5317_v36 }
 0x13d   : > { %v993_v33 = vpop.f32.mrf.mxu2  ;;  %v897_v11 = vpop.f32.mrf.mxu0  ;;  %1771 = vmatpush.bf16.msrb.mxu2 %v5335_v12 }
 0x13e   : > { %v994_v0 = vadd.f32 %v993_v33, %v5165_v20  ;;  %v1042_v4 = vpop.f32.mrf.mxu3  ;;  %v946_v14 = vpop.f32.mrf.mxu1  ;;  %v898_v18 = vadd.f32 %v897_v11, %v5157_v19  ;;  %v4706_v19 = vmov 0.0|0.0  }
 0x140   : > { %v1043_v62 = vadd.f32 %v1042_v4, %v994_v0  ;;  %v947_v47 = vadd.f32 %v946_v14, %v898_v18  ;;  %1785 = vmatpush.bf16.msrb.mxu3 %v5338_v22 }
 0x142   : > { %v1271_v13 = vpack.c.bf16 %v1043_v62, %v945_v59 }
 0x144   : > { %1303 = vst [vmem:[#allocation2 + $0xe0] sm:$0xff] %v1271_v13 }
 0x145   : > { %v995_v44 = vpop.f32.mrf.mxu2  ;;  %v1056_v31 = vpop.f32.mrf.mxu0 }
 0x146   : > { %v996_v29 = vadd.f32 %v995_v44, %v5165_v20  ;;  %v1044_v49 = vpop.f32.mrf.mxu3  ;;  %v1105_v26 = vpop.f32.mrf.mxu1  ;;  %v5394_v20 = vperm.slane %v5141_v3, 3  ;;  %v1057_v6 = vadd.f32 %v1056_v31, %v5388_v48 }
 0x148   : > { %v1045_v27 = vadd.f32 %v1044_v49, %v996_v29  ;;  %1522 = vmatmul.bf16.vlgmr.msra.gmra.mxu0 %v4706_v19  ;;  %v1106_v3 = vadd.f32 %v1105_v26, %v1057_v6 }
 0x149   : > { %1536 = vmatmul.bf16.vlgmr.msra.gmra.mxu1 %v4706_v19  ;;  %1958 = vmatpush.bf16.msra.mxu0 %v5119_v60 }
 0x14a   : > { %v1273_v35 = vpack.c.bf16 %v1045_v27, %v947_v47  ;;  %1550 = vmatmul.bf16.vlgmr.msra.gmra.mxu2 %v4706_v19  ;;  %1972 = vmatpush.bf16.msra.mxu1 %v5124_v63 }
 0x14b   : > { %1564 = vmatmul.bf16.vlgmr.msra.gmra.mxu3 %v4706_v19  ;;  %1986 = vmatpush.bf16.msra.mxu2 %v5135_v2 }
 0x14c   : > { %1305 = vst [vmem:[#allocation2 + $0xf0] sm:$0xff] %v1273_v35  ;;  %2000 = vmatpush.bf16.msra.mxu3 %v5146_v9 }
 0x14d   : > { %v1154_v7 = vpop.f32.mrf.mxu2  ;;  %v1058_v42 = vpop.f32.mrf.mxu0  ;;  %1959 = vmatpush.bf16.msra.mxu0 %v5151_v16 }
 0x14e   : > { %v1155_v40 = vadd.f32 %v1154_v7, %v5394_v20  ;;  %v1203_v41 = vpop.f32.mrf.mxu3  ;;  %v1107_v52 = vpop.f32.mrf.mxu1  ;;  %1973 = vmatpush.bf16.msra.mxu1 %v5153_v17  ;;  %v1059_v54 = vadd.f32 %v1058_v42, %v5388_v48 }
 0x14f   : > { %1987 = vmatpush.bf16.msra.mxu2 %v5171_v25 }
 0x150   : > { %v1204_v45 = vadd.f32 %v1203_v41, %v1155_v40  ;;  %2001 = vmatpush.bf16.msra.mxu3 %v5178_v39  ;;  %v1108_v11 = vadd.f32 %v1107_v52, %v1059_v54 }
 0x151   : > { %1960 = vmatpush.bf16.msra.mxu0 %v5184_v50 }
 0x152   : > { %v1244_v46 = vpack.c.bf16 %v1204_v45, %v1106_v3  ;;  %1974 = vmatpush.bf16.msra.mxu1 %v5188_v55 }
 0x153   : > { %1988 = vmatpush.bf16.msra.mxu2 %v5199_v5 }
 0x154   : > { %1276 = vst [vmem:[#allocation2 + $0x8] sm:$0xff] %v1244_v46  ;;  %2002 = vmatpush.bf16.msra.mxu3 %v5206_v24 }
 0x155   : > { %v1156_v56 = vpop.f32.mrf.mxu2  ;;  %v1061_v0 = vpop.f32.mrf.mxu0  ;;  %1961 = vmatpush.bf16.msra.mxu0 %v5212_v34 }
 0x156   : > { %v1157_v57 = vadd.f32 %v1156_v56, %v5394_v20  ;;  %v1205_v33 = vpop.f32.mrf.mxu3  ;;  %v1110_v4 = vpop.f32.mrf.mxu1  ;;  %1975 = vmatpush.bf16.msra.mxu1 %v5216_v37  ;;  %v1062_v62 = vadd.f32 %v1061_v0, %v5388_v48 }
 0x157   : > { %1989 = vmatpush.bf16.msra.mxu2 %v5227_v51 }
 0x158   : > { %v1206_v14 = vadd.f32 %v1205_v33, %v1157_v57  ;;  %2003 = vmatpush.bf16.msra.mxu3 %v5234_v10  ;;  %v1111_v31 = vadd.f32 %v1110_v4, %v1062_v62 }
 0x159   : > { %1962 = vmatpush.bf16.msra.mxu0 %v5240_v21 }
 0x15a   : > { %v1246_v59 = vpack.c.bf16 %v1206_v14, %v1108_v11  ;;  %1976 = vmatpush.bf16.msra.mxu1 %v5244_v28 }
 0x15b   : > { %1990 = vmatpush.bf16.msra.mxu2 %v5255_v38 }
 0x15c   : > { %1278 = vst [vmem:[#allocation2 + $0x18] sm:$0xff] %v1246_v59  ;;  %2004 = vmatpush.bf16.msra.mxu3 %v5262_v32 }
 0x15d   : > { %v1159_v13 = vpop.f32.mrf.mxu2  ;;  %v1063_v29 = vpop.f32.mrf.mxu0  ;;  %1963 = vmatpush.bf16.msra.mxu0 %v5268_v8 }
 0x15e   : > { %v1160_v18 = vadd.f32 %v1159_v13, %v5394_v20  ;;  %v1208_v44 = vpop.f32.mrf.mxu3  ;;  %v1112_v49 = vpop.f32.mrf.mxu1  ;;  %1977 = vmatpush.bf16.msra.mxu1 %v5272_v15  ;;  %v1064_v27 = vadd.f32 %v1063_v29, %v5388_v48 }
 0x15f   : > { %1991 = vmatpush.bf16.msra.mxu2 %v5283_v30 }
 0x160   : > { %v1209_v26 = vadd.f32 %v1208_v44, %v1160_v18  ;;  %2005 = vmatpush.bf16.msra.mxu3 %v5290_v43  ;;  %v1113_v41 = vadd.f32 %v1112_v49, %v1064_v27 }
 0x161   : > { %1964 = vmatpush.bf16.msra.mxu0 %v5296_v58 }
 0x162   : > { %v1248_v47 = vpack.c.bf16 %v1209_v26, %v1111_v31  ;;  %1978 = vmatpush.bf16.msra.mxu1 %v5300_v1 }
 0x163   : > { %1992 = vmatpush.bf16.msra.mxu2 %v5311_v23 }
 0x164   : > { %1280 = vst [vmem:[#allocation2 + $0x28] sm:$0xff] %v1248_v47  ;;  %2006 = vmatpush.bf16.msra.mxu3 %v5317_v36 }
 0x165   : > { %v1161_v19 = vpop.f32.mrf.mxu2  ;;  %v1066_v7 = vpop.f32.mrf.mxu0  ;;  %1965 = vmatpush.bf16.msra.mxu0 %v5323_v53 }
 0x166   : > { %v1162_v35 = vadd.f32 %v1161_v19, %v5394_v20  ;;  %v1210_v6 = vpop.f32.mrf.mxu3  ;;  %v1115_v40 = vpop.f32.mrf.mxu1  ;;  %1979 = vmatpush.bf16.msra.mxu1 %v5329_v61  ;;  %v1067_v3 = vadd.f32 %v1066_v7, %v5388_v48 }
 0x167   : > { %1993 = vmatpush.bf16.msra.mxu2 %v5335_v12 }
 0x168   : > { %v1211_v42 = vadd.f32 %v1210_v6, %v1162_v35  ;;  %2007 = vmatpush.bf16.msra.mxu3 %v5338_v22  ;;  %v1116_v33 = vadd.f32 %v1115_v40, %v1067_v3 }
 0x16a   : > { %v1250_v52 = vpack.c.bf16 %v1211_v42, %v1113_v41 }
 0x16c   : > { %1282 = vst [vmem:[#allocation2 + $0x38] sm:$0xff] %v1250_v52 }
 0x16d   : > { %v1164_v45 = vpop.f32.mrf.mxu2  ;;  %v1068_v56 = vpop.f32.mrf.mxu0 }
 0x16e   : > { %v1165_v46 = vadd.f32 %v1164_v45, %v5394_v20  ;;  %v1213_v54 = vpop.f32.mrf.mxu3  ;;  %v1117_v57 = vpop.f32.mrf.mxu1  ;;  %v1069_v11 = vadd.f32 %v1068_v56, %v5388_v48 }
 0x170   : > { %v1214_v0 = vadd.f32 %v1213_v54, %v1165_v46  ;;  %v1118_v44 = vadd.f32 %v1117_v57, %v1069_v11 }
 0x172   : > { %v1252_v4 = vpack.c.bf16 %v1214_v0, %v1116_v33 }
 0x174   : > { %1284 = vst [vmem:[#allocation2 + $0x48] sm:$0xff] %v1252_v4 }
 0x175   : > { %v1166_v14 = vpop.f32.mrf.mxu2  ;;  %v1071_v13 = vpop.f32.mrf.mxu0 }
 0x176   : > { %v1167_v59 = vadd.f32 %v1166_v14, %v5394_v20  ;;  %v1215_v62 = vpop.f32.mrf.mxu3  ;;  %v1120_v18 = vpop.f32.mrf.mxu1  ;;  %v1072_v31 = vadd.f32 %v1071_v13, %v5388_v48 }
 0x178   : > { %v1216_v29 = vadd.f32 %v1215_v62, %v1167_v59  ;;  %v1121_v6 = vadd.f32 %v1120_v18, %v1072_v31 }
 0x17a   : > { %v1254_v49 = vpack.c.bf16 %v1216_v29, %v1118_v44 }
 0x17c   : > { %1286 = vst [vmem:[#allocation2 + $0x58] sm:$0xff] %v1254_v49 }
 0x17d   : > { %v1169_v26 = vpop.f32.mrf.mxu2  ;;  %v1073_v19 = vpop.f32.mrf.mxu0 }
 0x17e   : > { %v1170_v47 = vadd.f32 %v1169_v26, %v5394_v20  ;;  %v1218_v27 = vpop.f32.mrf.mxu3  ;;  %v1122_v35 = vpop.f32.mrf.mxu1  ;;  %v1074_v41 = vadd.f32 %v1073_v19, %v5388_v48 }
 0x180   : > { %v1219_v7 = vadd.f32 %v1218_v27, %v1170_v47  ;;  %v1123_v54 = vadd.f32 %v1122_v35, %v1074_v41 }
 0x182   : > { %v1256_v40 = vpack.c.bf16 %v1219_v7, %v1121_v6 }
 0x184   : > { %1288 = vst [vmem:[#allocation2 + $0x68] sm:$0xff] %v1256_v40 }
 0x185   : > { %v1171_v42 = vpop.f32.mrf.mxu2  ;;  %v1076_v45 = vpop.f32.mrf.mxu0 }
 0x186   : > { %v1172_v52 = vadd.f32 %v1171_v42, %v5394_v20  ;;  %v1220_v3 = vpop.f32.mrf.mxu3  ;;  %v1125_v46 = vpop.f32.mrf.mxu1  ;;  %v1077_v33 = vadd.f32 %v1076_v45, %v5388_v48 }
 0x188   : > { %v1221_v56 = vadd.f32 %v1220_v3, %v1172_v52  ;;  %v1126_v62 = vadd.f32 %v1125_v46, %v1077_v33 }
 0x18a   : > { %v1258_v57 = vpack.c.bf16 %v1221_v56, %v1123_v54 }
 0x18c   : > { %1290 = vst [vmem:[#allocation2 + $0x78] sm:$0xff] %v1258_v57 }
 0x18d   : > { %v1174_v0 = vpop.f32.mrf.mxu2  ;;  %v1078_v14 = vpop.f32.mrf.mxu0 }
 0x18e   : > { %v1175_v4 = vadd.f32 %v1174_v0, %v5394_v20  ;;  %v1223_v11 = vpop.f32.mrf.mxu3  ;;  %v1127_v59 = vpop.f32.mrf.mxu1  ;;  %v1079_v44 = vadd.f32 %v1078_v14, %v5388_v48 }
 0x190   : > { %v1224_v13 = vadd.f32 %v1223_v11, %v1175_v4  ;;  %v1128_v27 = vadd.f32 %v1127_v59, %v1079_v44 }
 0x192   : > { %v1260_v18 = vpack.c.bf16 %v1224_v13, %v1126_v62 }
 0x194   : > { %1292 = vst [vmem:[#allocation2 + $0x88] sm:$0xff] %v1260_v18 }
 0x195   : > { %v1176_v29 = vpop.f32.mrf.mxu2  ;;  %v1081_v26 = vpop.f32.mrf.mxu0 }
 0x196   : > { %v1177_v49 = vadd.f32 %v1176_v29, %v5394_v20  ;;  %v1225_v31 = vpop.f32.mrf.mxu3  ;;  %v1130_v47 = vpop.f32.mrf.mxu1  ;;  %v1082_v6 = vadd.f32 %v1081_v26, %v5388_v48 }
 0x198   : > { %v1226_v19 = vadd.f32 %v1225_v31, %v1177_v49  ;;  %v1131_v3 = vadd.f32 %v1130_v47, %v1082_v6 }
 0x19a   : > { %v1262_v35 = vpack.c.bf16 %v1226_v19, %v1128_v27 }
 0x19c   : > { %1294 = vst [vmem:[#allocation2 + $0x98] sm:$0xff] %v1262_v35 }
 0x19d   : > { %v1179_v7 = vpop.f32.mrf.mxu2  ;;  %v1083_v42 = vpop.f32.mrf.mxu0 }
 0x19e   : > { %v1180_v40 = vadd.f32 %v1179_v7, %v5394_v20  ;;  %v1228_v41 = vpop.f32.mrf.mxu3  ;;  %v1132_v52 = vpop.f32.mrf.mxu1  ;;  %v1084_v54 = vadd.f32 %v1083_v42, %v5388_v48 }
 0x1a0   : > { %v1229_v45 = vadd.f32 %v1228_v41, %v1180_v40  ;;  %v1133_v11 = vadd.f32 %v1132_v52, %v1084_v54 }
 0x1a2   : > { %v1264_v46 = vpack.c.bf16 %v1229_v45, %v1131_v3 }
 0x1a4   : > { %1296 = vst [vmem:[#allocation2 + $0xa8] sm:$0xff] %v1264_v46 }
 0x1a5   : > { %v1181_v56 = vpop.f32.mrf.mxu2  ;;  %v1086_v0 = vpop.f32.mrf.mxu0 }
 0x1a6   : > { %v1182_v57 = vadd.f32 %v1181_v56, %v5394_v20  ;;  %v1230_v33 = vpop.f32.mrf.mxu3  ;;  %v1135_v4 = vpop.f32.mrf.mxu1  ;;  %v1087_v62 = vadd.f32 %v1086_v0, %v5388_v48 }
 0x1a8   : > { %v1231_v14 = vadd.f32 %v1230_v33, %v1182_v57  ;;  %v1136_v31 = vadd.f32 %v1135_v4, %v1087_v62 }
 0x1aa   : > { %v1266_v59 = vpack.c.bf16 %v1231_v14, %v1133_v11 }
 0x1ac   : > { %1298 = vst [vmem:[#allocation2 + $0xb8] sm:$0xff] %v1266_v59 }
 0x1ad   : > { %v1184_v13 = vpop.f32.mrf.mxu2  ;;  %v1088_v29 = vpop.f32.mrf.mxu0 }
 0x1ae   : > { %v1185_v18 = vadd.f32 %v1184_v13, %v5394_v20  ;;  %v1233_v44 = vpop.f32.mrf.mxu3  ;;  %v1137_v49 = vpop.f32.mrf.mxu1  ;;  %v1089_v27 = vadd.f32 %v1088_v29, %v5388_v48 }
 0x1b0   : > { %v1234_v26 = vadd.f32 %v1233_v44, %v1185_v18  ;;  %v1138_v40 = vadd.f32 %v1137_v49, %v1089_v27 }
 0x1b2   : > { %v1268_v47 = vpack.c.bf16 %v1234_v26, %v1136_v31 }
 0x1b4   : > { %1300 = vst [vmem:[#allocation2 + $0xc8] sm:$0xff] %v1268_v47 }
 0x1b5   : > { %v1186_v19 = vpop.f32.mrf.mxu2  ;;  %v1091_v7 = vpop.f32.mrf.mxu0 }
 0x1b6   : > { %v1187_v35 = vadd.f32 %v1186_v19, %v5394_v20  ;;  %v1235_v6 = vpop.f32.mrf.mxu3  ;;  %v1140_v42 = vpop.f32.mrf.mxu1  ;;  %v1092_v3 = vadd.f32 %v1091_v7, %v5388_v48 }
 0x1b8   : > { %v1236_v41 = vadd.f32 %v1235_v6, %v1187_v35  ;;  %v1141_v56 = vadd.f32 %v1140_v42, %v1092_v3 }
 0x1ba   : > { %v1270_v52 = vpack.c.bf16 %v1236_v41, %v1138_v40 }
 0x1bc   : > { %1302 = vst [vmem:[#allocation2 + $0xd8] sm:$0xff] %v1270_v52 }
 0x1bd   : > { %v1189_v45 = vpop.f32.mrf.mxu2  ;;  %v1093_v33 = vpop.f32.mrf.mxu0 }
 0x1be   : > { %v1190_v46 = vadd.f32 %v1189_v45, %v5394_v20  ;;  %v1238_v54 = vpop.f32.mrf.mxu3  ;;  %v1142_v4 = vpop.f32.mrf.mxu1  ;;  %v1094_v11 = vadd.f32 %v1093_v33, %v5388_v48 }
 0x1c0   : > { %v1239_v57 = vadd.f32 %v1238_v54, %v1190_v46  ;;  %v1143_v13 = vadd.f32 %v1142_v4, %v1094_v11 }
 0x1c2   : > { %v1272_v0 = vpack.c.bf16 %v1239_v57, %v1141_v56 }
 0x1c4   : > { %1304 = vst [vmem:[#allocation2 + $0xe8] sm:$0xff] %v1272_v0 }
 0x1c5   : > { %v1191_v14 = vpop.f32.mrf.mxu2  ;;  %v1523_v29 = vpop.f32.mrf.mxu0 }
 0x1c6   : > { %v1192_v59 = vadd.f32 %v1191_v14, %v5394_v20  ;;  %v1240_v62 = vpop.f32.mrf.mxu3  ;;  %v1537_v49 = vpop.f32.mrf.mxu1 }
 0x1c8   : > { %v1241_v18 = vadd.f32 %v1240_v62, %v1192_v59 }
 0x1ca   : > { %v1274_v44 = vpack.c.bf16 %v1241_v18, %v1143_v13 }
 0x1cc   : > { %1306 = vst [vmem:[#allocation2 + $0xf8] sm:$0xff] %v1274_v44 }
 0x1cd   : > { %v1551_v31 = vpop.f32.mrf.mxu2  ;;  %v1525_v45 = vpop.f32.mrf.mxu0 }
 0x1ce   : > { %v1539_v46 = vpop.f32.mrf.mxu1  ;;  %v1565_v62 = vpop.f32.mrf.mxu3 }
 0x1d3   : > { %v1349_v26 = vld [vmem:[%s1348_s7] sm:$0xff]  ;;  %v1350_v47 = vld [vmem:[%s1348_s7 + $0x8] sm:$0xff]  ;;  %v1351_v48 = vld [vmem:[%s1348_s7 + $0x10] sm:$0xff] }
 0x1d4   : > { %v1570_v27 = vunpack.c.l.bf16 %v1349_v26  ;;  %v1571_v19 = vunpack.c.h.bf16 %v1349_v26  ;;  %v1572_v20 = vunpack.c.l.bf16 %v1350_v47  ;;  %v1352_v35 = vld [vmem:[%s1348_s7 + $0x18] sm:$0xff]  ;;  %v1574_v6 = vunpack.c.l.bf16 %v1351_v48  ;;  %s2159_s7 = scalar_lea.vmem %s5531_s11, %s4035_s13 [#allocation9] }
 0x1d5   : > { %v1575_v7 = vunpack.c.h.bf16 %v1351_v48  ;;  %v1553_v40 = vpop.f32.mrf.mxu2  ;;  %v1576_v41 = vunpack.c.l.bf16 %v1352_v35 }
 0x1d6   : > { %v1578_v42 = vadd.f32 %v1570_v27, %v1523_v29  ;;  %v1579_v52 = vadd.f32 %v1571_v19, %v1537_v49  ;;  %v1580_v3 = vadd.f32 %v1572_v20, %v1551_v31  ;;  %v1582_v54 = vadd.f32 %v1574_v6, %v1525_v45  ;;  %v1567_v6 = vpop.f32.mrf.mxu3 }
 0x1d7   : > { %v1583_v56 = vadd.f32 %v1575_v7, %v1539_v46  ;;  %v1584_v57 = vadd.f32 %v1576_v41, %v1553_v40  ;;  %v1573_v27 = vunpack.c.h.bf16 %v1350_v47  ;;  %v1577_v20 = vunpack.c.h.bf16 %v1352_v35 }
 0x1d8   : > { %v4009_v33 = vmul.f32 -1.442695, %v1578_v42  ;;  %v4010_v0 = vmul.f32 -1.442695, %v1579_v52  ;;  %v4011_v4 = vmul.f32 -1.442695, %v1580_v3 }
 0x1d9   : > { %v4012_v11 = vmul.f32 -1.442695, %v1582_v54  ;;  %v4013_v14 = vmul.f32 -1.442695, %v1583_v56  ;;  %v4014_v59 = vmul.f32 -1.442695, %v1584_v57  ;;  %v1581_v41 = vadd.f32 %v1573_v27, %v1565_v62 }
 0x1da   : > { %4332 = vpow2.f32 %v4009_v33  ;;  %v1585_v3 = vadd.f32 %v1577_v20, %v1567_v6 }
 0x1db   : > { %4334 = vpow2.f32 %v4010_v0 }
 0x1dc   : > { %4336 = vpow2.f32 %v4011_v4 }
 0x1dd   : > { %4338 = vpow2.f32 %v4012_v11 }
 0x1de   : > { %4340 = vpow2.f32 %v4013_v14 }
 0x1df   : > { %4342 = vpow2.f32 %v4014_v59 }
 0x1e0   : > { %v4333_v13 = vpop.eup %4332 }
 0x1e1   : > { %v4335_v18 = vpop.eup %4334  ;;  %v1604_v44 = vadd.f32 1.0, %v4333_v13 }
 0x1e2   : > { %v4337_v29 = vpop.eup %4336  ;;  %v1605_v49 = vadd.f32 1.0, %v4335_v18 }
 0x1e3   : > { %v4339_v31 = vpop.eup %4338  ;;  %4344 = vrcp.f32 %v1604_v44  ;;  %v5464_v26 = vadd.f32 1.0, %v4337_v29  ;;  %v1619_v56 = vand.u32 2147483647, %v1604_v44  ;;  %v1621_v57 = vand.u32 2147483648, %v1604_v44 }
 0x1e4   : > { %v4341_v48 = vpop.eup %4340  ;;  %4346 = vrcp.f32 %v1605_v49  ;;  %v5467_v7 = vadd.f32 1.0, %v4339_v31  ;;  %v1636_v54 = vand.u32 2147483648, %v1605_v49  ;;  %v1634_v4 = vand.u32 2147483647, %v1605_v49 }
 0x1e5   : > { %v4343_v19 = vpop.eup %4342  ;;  %4348 = vrcp.f32 %v5464_v26  ;;  %v5469_v40 = vadd.f32 1.0, %v4341_v48  ;;  %vm1615_vm0 = vweird.f32 %v1604_v44  ;;  %vm1630_vm1 = vweird.f32 %v1605_v49 }
 0x1e6   : > { %v5471_v42 = vadd.f32 1.0, %v4343_v19  ;;  %4350 = vrcp.f32 %v5467_v7  ;;  %v1637_v14 = vor.u32 1.1754944e-38, %v1636_v54  ;;  %vm5480_vm3 = vcmp.eq.f32.partialorder %v1619_v56, 8.507059e+37 }
 0x1e7   : > { %4352 = vrcp.f32 %v5469_v40  ;;  %v1622_v29 = vor.u32 1.1754944e-38, %v1621_v57  ;;  %vm5484_vm5 = vcmp.eq.f32.partialorder %v1634_v4, 8.507059e+37  ;;  %v1664_v54 = vand.u32 2147483647, %v5467_v7 }
 0x1e8   : > { %4354 = vrcp.f32 %v5471_v42  ;;  %vm1645_vm7 = vweird.f32 %v5464_v26  ;;  %v1651_v61 = vand.u32 2147483648, %v5464_v26  ;;  %vm1675_vm11 = vweird.f32 %v5469_v40 }
 0x1e9   : > { %v4345_v52 = vpop.eup %4344  ;;  %4356 = vtanh.f32 %v1581_v41  ;;  %vm1660_vm12 = vweird.f32 %v5467_v7  ;;  %vm1665_vm15 = vcmp.eq.f32.partialorder %v1664_v54, 8.507059e+37 }
 0x1ea   : > { %v4347_v45 = vpop.eup %4346  ;;  %v1611_v46 = vmul.f32 %v4345_v52, %v1604_v44  ;;  %4358 = vtanh.f32 %v1585_v3  ;;  %vm1616_vm2 = vweird.f32 %v4345_v52  ;;  %v1666_v44 = vand.u32 2147483648, %v5467_v7 }
 0x1eb   : > { %v5475_v47 = vpop.eup %4348  ;;  %v1626_v35 = vmul.f32 %v4347_v45, %v1605_v49  ;;  %vm1631_vm4 = vweird.f32 %v4347_v45  ;;  %vm1617_vm6 = vmor %vm1615_vm0, %vm1616_vm2 }
 0x1ec   : > { %v1612_v33 = vsub.f32 1.0, %v1611_v46  ;;  %v1641_v0 = vmul.f32 %v5475_v47, %v5464_v26  ;;  %v4351_v62 = vpop.eup %4350  ;;  %v1681_v46 = vand.u32 2147483648, %v5469_v40  ;;  %vm1632_vm8 = vmor %vm1630_vm1, %vm1631_vm4  ;;  %vm1646_vm14 = vweird.f32 %v5475_v47 }
 0x1ed   : > { %v1627_v11 = vsub.f32 1.0, %v1626_v35  ;;  %v4353_v31 = vpop.eup %4352  ;;  %v1656_v20 = vmul.f32 %v4351_v62, %v5467_v7  ;;  %vm1661_vm9 = vweird.f32 %v4351_v62  ;;  %v1649_v7 = vand.u32 2147483647, %v5464_v26  ;;  %vm1647_vm2 = vmor %vm1645_vm7, %vm1646_vm14 }
 0x1ee   : > { %v1613_v59 = vmul.f32 %v4345_v52, %v1612_v33  ;;  %v1642_v48 = vsub.f32 1.0, %v1641_v0  ;;  %v5489_v6 = vpop.eup %4354  ;;  %v1671_v3 = vmul.f32 %v4353_v31, %v5469_v40  ;;  %vm1676_vm10 = vweird.f32 %v4353_v31  ;;  %vm1662_vm13 = vmor %vm1660_vm12, %vm1661_vm9 }
 0x1ef   : > { %v1628_v13 = vmul.f32 %v4347_v45, %v1627_v11  ;;  %v4357_v35 = vpop.eup %4356  ;;  %v1657_v57 = vsub.f32 1.0, %v1656_v20  ;;  %v1686_v33 = vmul.f32 %v5489_v6, %v5471_v42  ;;  %vm1677_vm0 = vmor %vm1675_vm11, %vm1676_vm10  ;;  %vm1691_vm4 = vweird.f32 %v5489_v6 }
 0x1f0   : > { %v1614_v27 = vadd.f32 %v4345_v52, %v1613_v59  ;;  %v4359_v0 = vpop.eup %4358  ;;  %v1672_v59 = vsub.f32 1.0, %v1671_v3  ;;  %v1643_v22 = vmul.f32 %v5475_v47, %v1642_v48 }
 0x1f1   : > { %v1629_v41 = vadd.f32 %v4347_v45, %v1628_v13  ;;  %v1679_v13 = vand.u32 2147483647, %v5469_v40  ;;  %v1658_v12 = vmul.f32 %v4351_v62, %v1657_v57  ;;  %v1687_v18 = vsub.f32 1.0, %v1686_v33 }
 0x1f2   : > { %v1618_v56 = vsel %vm1617_vm6, %v4345_v52, %v1614_v27  ;;  %v1673_v20 = vmul.f32 %v4353_v31, %v1672_v59  ;;  %v1652_v57 = vor.u32 1.1754944e-38, %v1651_v61 }
 0x1f3   : > { %v1623_v4 = vsel %vm5480_vm3, %v1622_v29, %v1618_v56  ;;  %v1633_v11 = vsel %vm1632_vm8, %v4347_v45, %v1629_v41  ;;  %v1682_v29 = vor.u32 1.1754944e-38, %v1681_v46  ;;  %v1659_v48 = vadd.f32 %v4351_v62, %v1658_v12 }
 0x1f4   : > { %v1638_v49 = vsel %vm5484_vm5, %v1637_v14, %v1633_v11  ;;  %v1704_v52 = vmul.f32 %v4357_v35, %v1623_v4  ;;  %v1674_v19 = vadd.f32 %v4353_v31, %v1673_v20  ;;  %v1644_v14 = vadd.f32 %v5475_v47, %v1643_v22 }
 0x1f5   : > { %v1702_v27 = vmul.f32 0.0, %v1638_v49  ;;  %v1667_v41 = vor.u32 1.1754944e-38, %v1666_v44  ;;  %v1663_v3 = vsel %vm1662_vm13, %v4351_v62, %v1659_v48  ;;  %vm1680_vm1 = vcmp.eq.f32.partialorder %v1679_v13, 8.507059e+37  ;;  %v6176_v48 = vld [vmem:[#allocation14_spill] sm:$0xff] }
 0x1f6   : > { %v1678_v40 = vsel %vm1677_vm0, %v4353_v31, %v1674_v19  ;;  %v1688_v35 = vmul.f32 %v5489_v6, %v1687_v18  ;;  %v1648_v54 = vsel %vm1647_vm2, %v5475_v47, %v1644_v14  ;;  %vm1650_vm3 = vcmp.eq.f32.partialorder %v1649_v7, 8.507059e+37  ;;  %v1726_v19 = vld [vmem:[%s1725_s21] sm:$0xff] }
 0x1f7   : > { %v5510_v45 = vadd.f32 %v1704_v52, %v1702_v27  ;;  %v1668_v46 = vsel %vm1665_vm15, %v1667_v41, %v1663_v3  ;;  %v1683_v12 = vsel %vm1680_vm1, %v1682_v29, %v1678_v40  ;;  %v1696_v44 = vand.u32 2147483648, %v5471_v42  ;;  %v6175_v29 = vld [vmem:[#allocation13_spill] sm:$0xff] }
 0x1f8   : > { %v1703_v22 = vmul.f32 0.0, %v1683_v12  ;;  %v1705_v56 = vmul.f32 %v4359_v0, %v1668_v46  ;;  %v1689_v62 = vadd.f32 %v5489_v6, %v1688_v35  ;;  %v1653_v26 = vsel %vm1650_vm3, %v1652_v57, %v1648_v54 }
 0x1f9   : > { %4360 = vtanh.f32 %v5510_v45  ;;  %vm1690_vm5 = vweird.f32 %v5471_v42  ;;  %v1694_v0 = vand.u32 2147483647, %v5471_v42  ;;  %v1697_v4 = vor.u32 1.1754944e-38, %v1696_v44 }
 0x1fa   : > { %v5520_v33 = vadd.f32 %v1705_v56, %v1703_v22  ;;  %vm1692_vm6 = vmor %vm1690_vm5, %vm1691_vm4  ;;  %v1792_v14 = vunpack.c.l.bf16 %v1726_v19  ;;  %v1793_v41 = vunpack.c.h.bf16 %v1726_v19  ;;  %v1727_v22 = vld [vmem:[%s1725_s21 + $0x8] sm:$0xff]  ;;  %v1728_v56 = vld [vmem:[%s1725_s21 + $0x10] sm:$0xff] }
 0x1fb   : > { %v1693_v61 = vsel %vm1692_vm6, %v5489_v6, %v1689_v62  ;;  %vm1695_vm7 = vcmp.eq.f32.partialorder %v1694_v0, 8.507059e+37  ;;  %v6174_v6 = vld [vmem:[#allocation12_spill] sm:$0xff]  ;;  %v1794_v54 = vunpack.c.l.bf16 %v1727_v22  ;;  %v1796_v62 = vunpack.c.l.bf16 %v1728_v56 }
 0x1fc   : > { %4362 = vtanh.f32 %v5520_v33  ;;  %v1698_v13 = vsel %vm1695_vm7, %v1697_v4, %v1693_v61 }
 0x1ff   : > { %v4361_v31 = vpop.eup %4360 }
 0x200   : > { %v1710_v47 = vmul.f32 %v4361_v31, %v1653_v26  ;;  %v1797_v31 = vunpack.c.h.bf16 %v1728_v56 }
 0x202   : > { %v1712_v11 = vpack.c.bf16 %v1710_v47, %v1710_v47  ;;  %v4363_v59 = vpop.eup %4362 }
 0x203   : > { %v1711_v49 = vmul.f32 %v4363_v59, %v1698_v13  ;;  %v5572_v13 = vld [vmem:[%s1725_s21 + $0x18] sm:$0xff]  ;;  %s2383_s21 = ssub.s32 4, %s4694_s18 }
 0x204   : > { %v1732_v20 = vunpack.c.l.b16 %v1712_v11  ;;  %s5843_s23 = sshll.u32 %s2383_s21, 4 }
 0x205   : > { %v1713_v52 = vpack.c.bf16 %v1711_v49, %v1711_v49  ;;  %v4227_v27 = vpack.c.bf16 %v1711_v49, %v1710_v47 }
 0x207   : > { %4228 = vst [vmem:[%s1715_s29] sm:$0xff] %v4227_v27   ;;  %v1733_v42 = vunpack.c.l.b16 %v1713_v52  ;;  %s2164_s29 = sshra.s32 %s5751_s9, 3 }
 0x208   : > { %s4213_s10 = sshll.u32 %s2164_s29, 4  ;;  %s4045_s26 = sshll.u32 %s2164_s29, 2 }
 0x209   : > { %v1734_v18 = vpack.c.b16 %v1733_v42, %v1732_v20  ;;  %v1798_v42 = vunpack.c.l.bf16 %v5572_v13  ;;  %s2168_s12 = scalar_lea.vmem [#allocation2], %s4213_s10  ;;  %s2380_s15 = scalar_lea.vmem %s5531_s11, %s4045_s26 [#allocation9] }
 0x20b   : > { %1744 = vmatmul.bf16.vlgmr.msrb.gmra.mxu0 %v1734_v18  ;;  %1758 = vmatmul.bf16.vlgmr.msrb.gmra.mxu1 %v1734_v18 }
 0x20c   : > { %1772 = vmatmul.bf16.vlgmr.msrb.gmra.mxu2 %v1734_v18  ;;  %1786 = vmatmul.bf16.vlgmr.msrb.gmra.mxu3 %v1734_v18 }
 0x20d   : > { %2179 = vmatpush.bf16.msrb.mxu0 %v5119_v60  ;;  %2193 = vmatpush.bf16.msrb.mxu1 %v5124_v63 }
 0x20e   : > { %2207 = vmatpush.bf16.msrb.mxu2 %v5135_v2  ;;  %2221 = vmatpush.bf16.msrb.mxu3 %v5146_v9 }
 0x211   : > { %2180 = vmatpush.bf16.msrb.mxu0 %v5151_v16  ;;  %2194 = vmatpush.bf16.msrb.mxu1 %v5153_v17 }
 0x212   : > { %2208 = vmatpush.bf16.msrb.mxu2 %v5171_v25  ;;  %2222 = vmatpush.bf16.msrb.mxu3 %v5178_v39 }
 0x215   : > { %2181 = vmatpush.bf16.msrb.mxu0 %v5184_v50  ;;  %2195 = vmatpush.bf16.msrb.mxu1 %v5188_v55 }
 0x216   : > { %2209 = vmatpush.bf16.msrb.mxu2 %v5199_v5  ;;  %2223 = vmatpush.bf16.msrb.mxu3 %v5206_v24 }
 0x219   : > { %2182 = vmatpush.bf16.msrb.mxu0 %v5212_v34  ;;  %2196 = vmatpush.bf16.msrb.mxu1 %v5216_v37 }
 0x21a   : > { %2210 = vmatpush.bf16.msrb.mxu2 %v5227_v51  ;;  %2224 = vmatpush.bf16.msrb.mxu3 %v5234_v10 }
 0x21d   : > { %2183 = vmatpush.bf16.msrb.mxu0 %v5240_v21  ;;  %2197 = vmatpush.bf16.msrb.mxu1 %v5244_v28 }
 0x21e   : > { %2211 = vmatpush.bf16.msrb.mxu2 %v5255_v38  ;;  %2225 = vmatpush.bf16.msrb.mxu3 %v5262_v32 }
 0x221   : > { %2184 = vmatpush.bf16.msrb.mxu0 %v5268_v8  ;;  %2198 = vmatpush.bf16.msrb.mxu1 %v5272_v15 }
 0x222   : > { %2212 = vmatpush.bf16.msrb.mxu2 %v5283_v30  ;;  %2226 = vmatpush.bf16.msrb.mxu3 %v5290_v43 }
 0x225   : > { %2185 = vmatpush.bf16.msrb.mxu0 %v5296_v58  ;;  %2199 = vmatpush.bf16.msrb.mxu1 %v5300_v1 }
 0x226   : > { %2213 = vmatpush.bf16.msrb.mxu2 %v5311_v23  ;;  %2227 = vmatpush.bf16.msrb.mxu3 %v5317_v36 }
 0x229   : > { %2186 = vmatpush.bf16.msrb.mxu0 %v5323_v53  ;;  %2200 = vmatpush.bf16.msrb.mxu1 %v6174_v6 }
 0x22a   : > { %2214 = vmatpush.bf16.msrb.mxu2 %v6175_v29  ;;  %2228 = vmatpush.bf16.msrb.mxu3 %v6176_v48 }
 0x288   : > { %v1745_v3 = vpop.f32.mrf.mxu0  ;;  %v1759_v40 = vpop.f32.mrf.mxu1 }
 0x289   : > { %v1800_v7 = vadd.f32 %v1792_v14, %v1745_v3  ;;  %v1801_v35 = vadd.f32 %v1793_v41, %v1759_v40  ;;  %v1795_v14 = vunpack.c.h.bf16 %v1727_v22 }
 0x28b   : > { %v4019_v46 = vmul.f32 -1.442695, %v1800_v7  ;;  %v4020_v12 = vmul.f32 -1.442695, %v1801_v35 }
 0x28d   : > { %4364 = vpow2.f32 %v4019_v46 }
 0x28e   : > { %4366 = vpow2.f32 %v4020_v12 }
 0x28f   : > { %v1773_v57 = vpop.f32.mrf.mxu2  ;;  %v1787_v18 = vpop.f32.mrf.mxu3 }
 0x290   : > { %v1802_v44 = vadd.f32 %v1794_v54, %v1773_v57  ;;  %v1747_v26 = vpop.f32.mrf.mxu0  ;;  %v1761_v0 = vpop.f32.mrf.mxu1  ;;  %v1803_v40 = vadd.f32 %v1795_v14, %v1787_v18 }
 0x291   : > { %v1804_v47 = vadd.f32 %v1796_v62, %v1747_v26  ;;  %v1805_v61 = vadd.f32 %v1797_v31, %v1761_v0 }
 0x292   : > { %v4021_v4 = vmul.f32 -1.442695, %v1802_v44 }
 0x293   : > { %v4365_v11 = vpop.eup %4364  ;;  %v4022_v59 = vmul.f32 -1.442695, %v1804_v47  ;;  %v4023_v27 = vmul.f32 -1.442695, %v1805_v61 }
 0x294   : > { %v4367_v49 = vpop.eup %4366  ;;  %v1826_v52 = vadd.f32 1.0, %v4365_v11  ;;  %4368 = vpow2.f32 %v4021_v4 }
 0x295   : > { %v1827_v20 = vadd.f32 1.0, %v4367_v49  ;;  %4370 = vpow2.f32 %v4022_v59 }
 0x296   : > { %4372 = vrcp.f32 %v1826_v52  ;;  %v1841_v47 = vand.u32 2147483647, %v1826_v52  ;;  %v1843_v61 = vand.u32 2147483648, %v1826_v52  ;;  %vm1837_vm11 = vweird.f32 %v1826_v52 }
 0x297   : > { %4374 = vrcp.f32 %v1827_v20  ;;  %v1775_v19 = vpop.f32.mrf.mxu2  ;;  %v1858_v0 = vand.u32 2147483648, %v1827_v20  ;;  %v1856_v11 = vand.u32 2147483647, %v1827_v20  ;;  %vm1852_vm10 = vweird.f32 %v1827_v20  ;;  %v1789_v14 = vpop.f32.mrf.mxu3 }
 0x298   : > { %4376 = vpow2.f32 %v4023_v27  ;;  %v1806_v41 = vadd.f32 %v1798_v42, %v1775_v19  ;;  %v1799_v27 = vunpack.c.h.bf16 %v5572_v13  ;;  %vm1842_vm13 = vcmp.eq.f32.partialorder %v1841_v47, 8.507059e+37 }
 0x299   : > { %vm1857_vm15 = vcmp.eq.f32.partialorder %v1856_v11, 8.507059e+37 }
 0x29a   : > { %v4369_v3 = vpop.eup %4368  ;;  %v4024_v7 = vmul.f32 -1.442695, %v1806_v41 }
 0x29b   : > { %v4371_v35 = vpop.eup %4370  ;;  %v5575_v46 = vadd.f32 1.0, %v4369_v3  ;;  %v1859_v3 = vor.u32 1.1754944e-38, %v1858_v0 }
 0x29c   : > { %v4373_v12 = vpop.eup %4372  ;;  %v5577_v56 = vadd.f32 1.0, %v4371_v35  ;;  %4378 = vpow2.f32 %v4024_v7 }
 0x29d   : > { %v4375_v54 = vpop.eup %4374  ;;  %v1833_v57 = vmul.f32 %v4373_v12, %v1826_v52  ;;  %4380 = vrcp.f32 %v5575_v46  ;;  %vm1838_vm8 = vweird.f32 %v4373_v12 }
 0x29e   : > { %v4377_v62 = vpop.eup %4376  ;;  %v1848_v31 = vmul.f32 %v4375_v54, %v1827_v20  ;;  %4382 = vtanh.f32 %v1803_v40  ;;  %vm1853_vm9 = vweird.f32 %v4375_v54  ;;  %vm1839_vm12 = vmor %vm1837_vm11, %vm1838_vm8  ;;  %v1844_v40 = vor.u32 1.1754944e-38, %v1843_v61 }
 0x29f   : > { %v1834_v22 = vsub.f32 1.0, %v1833_v57  ;;  %4384 = vrcp.f32 %v5577_v56  ;;  %v5581_v44 = vadd.f32 1.0, %v4377_v62  ;;  %vm1854_vm14 = vmor %vm1852_vm10, %vm1853_vm9  ;;  %vm1882_vm2 = vweird.f32 %v5577_v56 }
 0x2a0   : > { %v1849_v26 = vsub.f32 1.0, %v1848_v31  ;;  %v1807_v31 = vadd.f32 %v1799_v27, %v1789_v14  ;;  %v1886_v27 = vand.u32 2147483647, %v5577_v56  ;;  %vm1867_vm9 = vweird.f32 %v5575_v46 }
 0x2a1   : > { %v1835_v4 = vmul.f32 %v4373_v12, %v1834_v22  ;;  %4386 = vrcp.f32 %v5581_v44  ;;  %vm1897_vm3 = vweird.f32 %v5581_v44 }
 0x2a2   : > { %v4379_v59 = vpop.eup %4378  ;;  %v1850_v49 = vmul.f32 %v4375_v54, %v1849_v26  ;;  %vm1887_vm7 = vcmp.eq.f32.partialorder %v1886_v27, 8.507059e+37 }
 0x2a3   : > { %v5585_v42 = vpop.eup %4380  ;;  %v1836_v18 = vadd.f32 %v4373_v12, %v1835_v4  ;;  %v5587_v19 = vadd.f32 1.0, %v4379_v59 }
 0x2a4   : > { %v4383_v41 = vpop.eup %4382  ;;  %v1851_v7 = vadd.f32 %v4375_v54, %v1850_v49  ;;  %v1863_v13 = vmul.f32 %v5585_v42, %v5575_v46  ;;  %vm1868_vm5 = vweird.f32 %v5585_v42 }
 0x2a5   : > { %v4385_v35 = vpop.eup %4384  ;;  %v1840_v57 = vsel %vm1839_vm12, %v4373_v12, %v1836_v18  ;;  %4388 = vrcp.f32 %v5587_v19  ;;  %v1888_v12 = vand.u32 2147483648, %v5577_v56  ;;  %v1901_v18 = vand.u32 2147483647, %v5581_v44  ;;  %vm1869_vm10 = vmor %vm1867_vm9, %vm1868_vm5 }
 0x2a6   : > { %v1845_v52 = vsel %vm1842_vm13, %v1844_v40, %v1840_v57  ;;  %v1855_v20 = vsel %vm1854_vm14, %v4375_v54, %v1851_v7  ;;  %v1878_v62 = vmul.f32 %v4385_v35, %v5577_v56  ;;  %v1864_v59 = vsub.f32 1.0, %v1863_v13 }
 0x2a7   : > { %v4387_v22 = vpop.eup %4386  ;;  %v1860_v26 = vsel %vm1857_vm15, %v1859_v3, %v1855_v20  ;;  %v1926_v47 = vmul.f32 %v4383_v41, %v1845_v52  ;;  %4390 = vtanh.f32 %v1807_v31  ;;  %v1903_v54 = vand.u32 2147483648, %v5581_v44 }
 0x2a8   : > { %v1924_v0 = vmul.f32 %v1860_v26, %v5510_v45  ;;  %v1879_v61 = vsub.f32 1.0, %v1878_v62  ;;  %v1893_v4 = vmul.f32 %v4387_v22, %v5581_v44  ;;  %vm1883_vm0 = vweird.f32 %v4385_v35 }
 0x2a9   : > { %vm1898_vm1 = vweird.f32 %v4387_v22  ;;  %v1865_v3 = vmul.f32 %v5585_v42, %v1864_v59  ;;  %vm1884_vm4 = vmor %vm1882_vm2, %vm1883_vm0  ;;  %v1889_v13 = vor.u32 1.1754944e-38, %v1888_v12  ;;  %v1904_v52 = vor.u32 1.1754944e-38, %v1903_v54 }
 0x2aa   : > { %v1894_v49 = vsub.f32 1.0, %v1893_v4  ;;  %v1880_v48 = vmul.f32 %v4385_v35, %v1879_v61  ;;  %v5601_v14 = vadd.f32 %v1926_v47, %v1924_v0  ;;  %vm1899_vm6 = vmor %vm1897_vm3, %vm1898_vm1  ;;  %vm1902_vm8 = vcmp.eq.f32.partialorder %v1901_v18, 8.507059e+37 }
 0x2ab   : > { %v4389_v11 = vpop.eup %4388  ;;  %v1873_v47 = vand.u32 2147483648, %v5575_v46  ;;  %v1918_v54 = vand.u32 2147483648, %v5587_v19  ;;  %vm1912_vm13 = vweird.f32 %v5587_v19 }
 0x2ac   : > { %v1895_v45 = vmul.f32 %v4387_v22, %v1894_v49  ;;  %v1908_v41 = vmul.f32 %v4389_v11, %v5587_v19  ;;  %v1881_v40 = vadd.f32 %v4385_v35, %v1880_v48  ;;  %4392 = vtanh.f32 %v5601_v14 }
 0x2ad   : > { %v4391_v62 = vpop.eup %4390  ;;  %v1866_v48 = vadd.f32 %v5585_v42, %v1865_v3  ;;  %vm1913_vm11 = vweird.f32 %v4389_v11  ;;  %v1874_v12 = vor.u32 1.1754944e-38, %v1873_v47 }
 0x2ae   : > { %v1909_v7 = vsub.f32 1.0, %v1908_v41  ;;  %v1896_v57 = vadd.f32 %v4387_v22, %v1895_v45  ;;  %v1885_v20 = vsel %vm1884_vm4, %v4385_v35, %v1881_v40  ;;  %v1871_v35 = vand.u32 2147483647, %v5575_v46  ;;  %vm1914_vm14 = vmor %vm1912_vm13, %vm1913_vm11 }
 0x2af   : > { %v1890_v31 = vsel %vm1887_vm7, %v1889_v13, %v1885_v20 }
 0x2b0   : > { %v1900_v26 = vsel %vm1899_vm6, %v4387_v22, %v1896_v57  ;;  %v1910_v56 = vmul.f32 %v4389_v11, %v1909_v7  ;;  %v1927_v0 = vmul.f32 %v4391_v62, %v1890_v31  ;;  %v1870_v22 = vsel %vm1869_vm10, %v5585_v42, %v1866_v48 }
 0x2b1   : > { %v1905_v44 = vsel %vm1902_vm8, %v1904_v52, %v1900_v26  ;;  %vm1872_vm12 = vcmp.eq.f32.partialorder %v1871_v35, 8.507059e+37  ;;  %v1919_v42 = vor.u32 1.1754944e-38, %v1918_v54  ;;  %v1950_v35 = vld [vmem:[%s1947_s6 + $0x10] sm:$0xff] }
 0x2b2   : > { %v1925_v61 = vmul.f32 %v1905_v44, %v5520_v33  ;;  %v1911_v59 = vadd.f32 %v4389_v11, %v1910_v56  ;;  %v4393_v49 = vpop.eup %4392  ;;  %v1916_v33 = vand.u32 2147483647, %v5587_v19  ;;  %v1875_v46 = vsel %vm1872_vm12, %v1874_v12, %v1870_v22  ;;  %v6177_v19 = vld [vmem:[#allocation14_spill] sm:$0xff] }
 0x2b3   : > { %v1932_v18 = vmul.f32 %v4393_v49, %v1875_v46  ;;  %v2018_v49 = vunpack.c.l.bf16 %v1950_v35  ;;  %v2019_v12 = vunpack.c.h.bf16 %v1950_v35 }
 0x2b4   : > { %v5616_v4 = vadd.f32 %v1927_v0, %v1925_v61  ;;  %v1915_v27 = vsel %vm1914_vm14, %v4389_v11, %v1911_v59  ;;  %vm1917_vm15 = vcmp.eq.f32.partialorder %v1916_v33, 8.507059e+37  ;;  %v1948_v11 = vld [vmem:[%s1947_s6] sm:$0xff]  ;;  %v1949_v61 = vld [vmem:[%s1947_s6 + $0x8] sm:$0xff] }
 0x2b5   : > { %v1920_v41 = vsel %vm1917_vm15, %v1919_v42, %v1915_v27  ;;  %v1934_v40 = vpack.c.bf16 %v1932_v18, %v1932_v18  ;;  %v2014_v62 = vunpack.c.l.bf16 %v1948_v11  ;;  %v2015_v31 = vunpack.c.h.bf16 %v1948_v11 }
 0x2b6   : > { %4394 = vtanh.f32 %v5616_v4  ;;  %v2016_v22 = vunpack.c.l.bf16 %v1949_v61 }
 0x2b7   : > { %v1954_v57 = vunpack.c.l.b16 %v1934_v40 }
 0x2bc   : > { %v4395_v45 = vpop.eup %4394 }
 0x2bd   : > { %v1933_v3 = vmul.f32 %v4395_v45, %v1920_v41 }
 0x2bf   : > { %v1935_v7 = vpack.c.bf16 %v1933_v3, %v1933_v3  ;;  %v4232_v13 = vpack.c.bf16 %v1933_v3, %v1932_v18  ;;  %v5664_v3 = vld [vmem:[%s1947_s6 + $0x18] sm:$0xff]  ;;  %s4266_s6 = smul.u32 4294967248, %s4694_s18 }
 0x2c1   : > { %4233 = vst [vmem:[%s1937_s25] sm:$0xff] %v4232_v13   ;;  %v1955_v52 = vunpack.c.l.b16 %v1935_v7  ;;  %s2385_s25 = sshra.s32 %s5843_s23, 3  ;;  %s5935_s13 = sadd.s32 80, %s4266_s6 }
 0x2c2   : > { %s4214_s30 = sshll.u32 %s2385_s25, 4  ;;  %s4055_s5 = sshll.u32 %s2385_s25, 2 }
 0x2c3   : > { %v1956_v20 = vpack.c.b16 %v1955_v52, %v1954_v57  ;;  %v2020_v52 = vunpack.c.l.bf16 %v5664_v3  ;;  %s2389_s24 = scalar_lea.vmem [#allocation2], %s4214_s30  ;;  %s2601_s14 = scalar_lea.vmem %s5531_s11, %s4055_s5 [#allocation9] }
 0x2c5   : > { %1966 = vmatmul.bf16.vlgmr.msra.gmra.mxu0 %v1956_v20  ;;  %1980 = vmatmul.bf16.vlgmr.msra.gmra.mxu1 %v1956_v20 }
 0x2c6   : > { %1994 = vmatmul.bf16.vlgmr.msra.gmra.mxu2 %v1956_v20  ;;  %2008 = vmatmul.bf16.vlgmr.msra.gmra.mxu3 %v1956_v20 }
 0x2c7   : > { %2400 = vmatpush.bf16.msra.mxu0 %v5119_v60  ;;  %2414 = vmatpush.bf16.msra.mxu1 %v5124_v63 }
 0x2c8   : > { %2428 = vmatpush.bf16.msra.mxu2 %v5135_v2  ;;  %2442 = vmatpush.bf16.msra.mxu3 %v5146_v9 }
 0x2cb   : > { %2401 = vmatpush.bf16.msra.mxu0 %v5151_v16  ;;  %2415 = vmatpush.bf16.msra.mxu1 %v5153_v17 }
 0x2cc   : > { %2429 = vmatpush.bf16.msra.mxu2 %v5171_v25  ;;  %2443 = vmatpush.bf16.msra.mxu3 %v5178_v39 }
 0x2cf   : > { %2402 = vmatpush.bf16.msra.mxu0 %v5184_v50  ;;  %2416 = vmatpush.bf16.msra.mxu1 %v5188_v55 }
 0x2d0   : > { %2430 = vmatpush.bf16.msra.mxu2 %v5199_v5  ;;  %2444 = vmatpush.bf16.msra.mxu3 %v5206_v24 }
 0x2d3   : > { %2403 = vmatpush.bf16.msra.mxu0 %v5212_v34  ;;  %2417 = vmatpush.bf16.msra.mxu1 %v5216_v37 }
 0x2d4   : > { %2431 = vmatpush.bf16.msra.mxu2 %v5227_v51  ;;  %2445 = vmatpush.bf16.msra.mxu3 %v5234_v10 }
 0x2d7   : > { %2404 = vmatpush.bf16.msra.mxu0 %v5240_v21  ;;  %2418 = vmatpush.bf16.msra.mxu1 %v5244_v28 }
 0x2d8   : > { %2432 = vmatpush.bf16.msra.mxu2 %v5255_v38  ;;  %2446 = vmatpush.bf16.msra.mxu3 %v5262_v32 }
 0x2db   : > { %2405 = vmatpush.bf16.msra.mxu0 %v5268_v8  ;;  %2419 = vmatpush.bf16.msra.mxu1 %v5272_v15 }
 0x2dc   : > { %2433 = vmatpush.bf16.msra.mxu2 %v5283_v30  ;;  %2447 = vmatpush.bf16.msra.mxu3 %v5290_v43 }
 0x2df   : > { %2406 = vmatpush.bf16.msra.mxu0 %v5296_v58  ;;  %2420 = vmatpush.bf16.msra.mxu1 %v5300_v1 }
 0x2e0   : > { %2434 = vmatpush.bf16.msra.mxu2 %v5311_v23  ;;  %2448 = vmatpush.bf16.msra.mxu3 %v5317_v36 }
 0x2e3   : > { %2407 = vmatpush.bf16.msra.mxu0 %v5323_v53  ;;  %2421 = vmatpush.bf16.msra.mxu1 %v6174_v6 }
 0x2e4   : > { %2435 = vmatpush.bf16.msra.mxu2 %v6175_v29  ;;  %2449 = vmatpush.bf16.msra.mxu3 %v6177_v19 }
 0x342   : > { %v1967_v26 = vpop.f32.mrf.mxu0  ;;  %v1981_v48 = vpop.f32.mrf.mxu1 }
 0x343   : > { %v2022_v56 = vadd.f32 %v2014_v62, %v1967_v26  ;;  %v2023_v44 = vadd.f32 %v2015_v31, %v1981_v48  ;;  %v2017_v62 = vunpack.c.h.bf16 %v1949_v61 }
 0x345   : > { %v4029_v0 = vmul.f32 -1.442695, %v2022_v56  ;;  %v4030_v47 = vmul.f32 -1.442695, %v2023_v44 }
 0x347   : > { %4396 = vpow2.f32 %v4029_v0 }
 0x348   : > { %4398 = vpow2.f32 %v4030_v47 }
 0x349   : > { %v1995_v59 = vpop.f32.mrf.mxu2  ;;  %v2009_v20 = vpop.f32.mrf.mxu3 }
 0x34a   : > { %v2024_v54 = vadd.f32 %v2016_v22, %v1995_v59  ;;  %v1969_v33 = vpop.f32.mrf.mxu0  ;;  %v1983_v46 = vpop.f32.mrf.mxu1  ;;  %v2025_v48 = vadd.f32 %v2017_v62, %v2009_v20 }
 0x34b   : > { %v2026_v27 = vadd.f32 %v2018_v49, %v1969_v33  ;;  %v2027_v18 = vadd.f32 %v2019_v12, %v1983_v46 }
 0x34c   : > { %v4031_v42 = vmul.f32 -1.442695, %v2024_v54 }
 0x34d   : > { %v4397_v45 = vpop.eup %4396  ;;  %v4032_v41 = vmul.f32 -1.442695, %v2026_v27  ;;  %v4033_v13 = vmul.f32 -1.442695, %v2027_v18 }
 0x34e   : > { %v4399_v40 = vpop.eup %4398  ;;  %v2048_v7 = vadd.f32 1.0, %v4397_v45  ;;  %4400 = vpow2.f32 %v4031_v42 }
 0x34f   : > { %v2049_v57 = vadd.f32 1.0, %v4399_v40  ;;  %4402 = vpow2.f32 %v4032_v41 }
 0x350   : > { %4404 = vrcp.f32 %v2048_v7  ;;  %v2063_v27 = vand.u32 2147483647, %v2048_v7  ;;  %v2065_v18 = vand.u32 2147483648, %v2048_v7  ;;  %vm2059_vm3 = vweird.f32 %v2048_v7 }
 0x351   : > { %4406 = vrcp.f32 %v2049_v57  ;;  %v1997_v11 = vpop.f32.mrf.mxu2  ;;  %v2080_v46 = vand.u32 2147483648, %v2049_v57  ;;  %v2078_v45 = vand.u32 2147483647, %v2049_v57  ;;  %vm2074_vm2 = vweird.f32 %v2049_v57  ;;  %v2011_v62 = vpop.f32.mrf.mxu3 }
 0x352   : > { %4408 = vpow2.f32 %v4033_v13  ;;  %v2028_v31 = vadd.f32 %v2020_v52, %v1997_v11  ;;  %v2021_v13 = vunpack.c.h.bf16 %v5664_v3  ;;  %vm2064_vm5 = vcmp.eq.f32.partialorder %v2063_v27, 8.507059e+37 }
 0x353   : > { %vm2079_vm7 = vcmp.eq.f32.partialorder %v2078_v45, 8.507059e+37 }
 0x354   : > { %v4401_v26 = vpop.eup %4400  ;;  %v4034_v56 = vmul.f32 -1.442695, %v2028_v31 }
 0x355   : > { %v4403_v44 = vpop.eup %4402  ;;  %v5667_v0 = vadd.f32 1.0, %v4401_v26  ;;  %v2081_v26 = vor.u32 1.1754944e-38, %v2080_v46 }
 0x356   : > { %v4405_v47 = vpop.eup %4404  ;;  %v5669_v35 = vadd.f32 1.0, %v4403_v44  ;;  %4410 = vpow2.f32 %v4034_v56 }
 0x357   : > { %v4407_v22 = vpop.eup %4406  ;;  %v2055_v59 = vmul.f32 %v4405_v47, %v2048_v7  ;;  %4412 = vrcp.f32 %v5667_v0  ;;  %vm2060_vm0 = vweird.f32 %v4405_v47 }
 0x358   : > { %v4409_v49 = vpop.eup %4408  ;;  %v2070_v12 = vmul.f32 %v4407_v22, %v2049_v57  ;;  %4414 = vtanh.f32 %v2025_v48  ;;  %vm2075_vm1 = vweird.f32 %v4407_v22  ;;  %vm2061_vm4 = vmor %vm2059_vm3, %vm2060_vm0  ;;  %v2066_v48 = vor.u32 1.1754944e-38, %v2065_v18 }
 0x359   : > { %v2056_v61 = vsub.f32 1.0, %v2055_v59  ;;  %4416 = vrcp.f32 %v5669_v35  ;;  %v5673_v54 = vadd.f32 1.0, %v4409_v49  ;;  %vm2076_vm6 = vmor %vm2074_vm2, %vm2075_vm1  ;;  %vm2104_vm10 = vweird.f32 %v5669_v35 }
 0x35a   : > { %v2071_v33 = vsub.f32 1.0, %v2070_v12  ;;  %v2029_v12 = vadd.f32 %v2021_v13, %v2011_v62  ;;  %v2108_v13 = vand.u32 2147483647, %v5669_v35  ;;  %vm2089_vm1 = vweird.f32 %v5667_v0 }
 0x35b   : > { %v2057_v42 = vmul.f32 %v4405_v47, %v2056_v61  ;;  %4418 = vrcp.f32 %v5673_v54  ;;  %vm2119_vm11 = vweird.f32 %v5673_v54 }
 0x35c   : > { %v4411_v41 = vpop.eup %4410  ;;  %v2072_v40 = vmul.f32 %v4407_v22, %v2071_v33  ;;  %vm2109_vm15 = vcmp.eq.f32.partialorder %v2108_v13, 8.507059e+37 }
 0x35d   : > { %v5677_v52 = vpop.eup %4412  ;;  %v2058_v20 = vadd.f32 %v4405_v47, %v2057_v42  ;;  %v5679_v11 = vadd.f32 1.0, %v4411_v41 }
 0x35e   : > { %v4415_v31 = vpop.eup %4414  ;;  %v2073_v56 = vadd.f32 %v4407_v22, %v2072_v40  ;;  %v2085_v3 = vmul.f32 %v5677_v52, %v5667_v0  ;;  %vm2090_vm13 = vweird.f32 %v5677_v52 }
 0x35f   : > { %v4417_v44 = vpop.eup %4416  ;;  %v2062_v59 = vsel %vm2061_vm4, %v4405_v47, %v2058_v20  ;;  %4420 = vrcp.f32 %v5679_v11  ;;  %v2110_v47 = vand.u32 2147483648, %v5669_v35  ;;  %v2123_v20 = vand.u32 2147483647, %v5673_v54  ;;  %vm2091_vm2 = vmor %vm2089_vm1, %vm2090_vm13 }
 0x360   : > { %v2067_v7 = vsel %vm2064_vm5, %v2066_v48, %v2062_v59  ;;  %v2077_v57 = vsel %vm2076_vm6, %v4407_v22, %v2073_v56  ;;  %v2100_v49 = vmul.f32 %v4417_v44, %v5669_v35  ;;  %v2086_v41 = vsub.f32 1.0, %v2085_v3 }
 0x361   : > { %v4419_v61 = vpop.eup %4418  ;;  %v2082_v33 = vsel %vm2079_vm7, %v2081_v26, %v2077_v57  ;;  %v2148_v27 = vmul.f32 %v4415_v31, %v2067_v7  ;;  %4422 = vtanh.f32 %v2029_v12  ;;  %v2125_v22 = vand.u32 2147483648, %v5673_v54 }
 0x362   : > { %v2146_v46 = vmul.f32 %v2082_v33, %v5601_v14  ;;  %v2101_v18 = vsub.f32 1.0, %v2100_v49  ;;  %v2115_v42 = vmul.f32 %v4419_v61, %v5673_v54  ;;  %vm2105_vm8 = vweird.f32 %v4417_v44 }
 0x363   : > { %vm2120_vm9 = vweird.f32 %v4419_v61  ;;  %v2087_v26 = vmul.f32 %v5677_v52, %v2086_v41  ;;  %vm2106_vm12 = vmor %vm2104_vm10, %vm2105_vm8  ;;  %v2111_v3 = vor.u32 1.1754944e-38, %v2110_v47  ;;  %v2126_v7 = vor.u32 1.1754944e-38, %v2125_v22 }
 0x364   : > { %v2116_v40 = vsub.f32 1.0, %v2115_v42  ;;  %v2102_v19 = vmul.f32 %v4417_v44, %v2101_v18  ;;  %v5693_v62 = vadd.f32 %v2148_v27, %v2146_v46  ;;  %vm2121_vm14 = vmor %vm2119_vm11, %vm2120_vm9  ;;  %vm2124_vm0 = vcmp.eq.f32.partialorder %v2123_v20, 8.507059e+37 }
 0x365   : > { %v4421_v45 = vpop.eup %4420  ;;  %v2095_v27 = vand.u32 2147483648, %v5667_v0  ;;  %v2140_v22 = vand.u32 2147483648, %v5679_v11  ;;  %vm2134_vm5 = vweird.f32 %v5679_v11 }
 0x366   : > { %v2117_v14 = vmul.f32 %v4419_v61, %v2116_v40  ;;  %v2130_v31 = vmul.f32 %v4421_v45, %v5679_v11  ;;  %v2103_v48 = vadd.f32 %v4417_v44, %v2102_v19  ;;  %4424 = vtanh.f32 %v5693_v62 }
 0x367   : > { %v4423_v49 = vpop.eup %4422  ;;  %v2088_v19 = vadd.f32 %v5677_v52, %v2087_v26  ;;  %vm2135_vm3 = vweird.f32 %v4421_v45  ;;  %v2096_v47 = vor.u32 1.1754944e-38, %v2095_v27 }
 0x368   : > { %v2131_v56 = vsub.f32 1.0, %v2130_v31  ;;  %v2118_v59 = vadd.f32 %v4419_v61, %v2117_v14  ;;  %v2107_v57 = vsel %vm2106_vm12, %v4417_v44, %v2103_v48  ;;  %v2093_v44 = vand.u32 2147483647, %v5667_v0  ;;  %vm2136_vm6 = vmor %vm2134_vm5, %vm2135_vm3 }
 0x369   : > { %v2112_v12 = vsel %vm2109_vm15, %v2111_v3, %v2107_v57 }
 0x36a   : > { %v2122_v33 = vsel %vm2121_vm14, %v4419_v61, %v2118_v59  ;;  %v2132_v35 = vmul.f32 %v4421_v45, %v2131_v56  ;;  %v2149_v46 = vmul.f32 %v4423_v49, %v2112_v12  ;;  %v2092_v61 = vsel %vm2091_vm2, %v5677_v52, %v2088_v19 }
 0x36b   : > { %v2127_v54 = vsel %vm2124_vm0, %v2126_v7, %v2122_v33  ;;  %vm2094_vm4 = vcmp.eq.f32.partialorder %v2093_v44, 8.507059e+37  ;;  %v2141_v52 = vor.u32 1.1754944e-38, %v2140_v22  ;;  %v2171_v44 = vld [vmem:[%s2168_s12 + $0x10] sm:$0xff] }
 0x36c   : > { %v2147_v18 = vmul.f32 %v2127_v54, %v5616_v4  ;;  %v2133_v41 = vadd.f32 %v4421_v45, %v2132_v35  ;;  %v4425_v40 = vpop.eup %4424  ;;  %v2138_v4 = vand.u32 2147483647, %v5679_v11  ;;  %v2097_v0 = vsel %vm2094_vm4, %v2096_v47, %v2092_v61  ;;  %v6178_v11 = vld [vmem:[#allocation14_spill] sm:$0xff] }
 0x36d   : > { %v2154_v20 = vmul.f32 %v4425_v40, %v2097_v0  ;;  %v2239_v40 = vunpack.c.l.bf16 %v2171_v44  ;;  %v2240_v47 = vunpack.c.h.bf16 %v2171_v44 }
 0x36e   : > { %v5708_v42 = vadd.f32 %v2149_v46, %v2147_v18  ;;  %v2137_v13 = vsel %vm2136_vm6, %v4421_v45, %v2133_v41  ;;  %vm2139_vm7 = vcmp.eq.f32.partialorder %v2138_v4, 8.507059e+37  ;;  %v2169_v45 = vld [vmem:[%s2168_s12] sm:$0xff]  ;;  %v2170_v18 = vld [vmem:[%s2168_s12 + $0x8] sm:$0xff] }
 0x36f   : > { %v2142_v31 = vsel %vm2139_vm7, %v2141_v52, %v2137_v13  ;;  %v2156_v48 = vpack.c.bf16 %v2154_v20, %v2154_v20  ;;  %v2235_v49 = vunpack.c.l.bf16 %v2169_v45  ;;  %v2236_v12 = vunpack.c.h.bf16 %v2169_v45 }
 0x370   : > { %4426 = vtanh.f32 %v5708_v42  ;;  %v2237_v61 = vunpack.c.l.bf16 %v2170_v18 }
 0x371   : > { %v2175_v59 = vunpack.c.l.b16 %v2156_v48 }
 0x376   : > { %v4427_v14 = vpop.eup %4426 }
 0x377   : > { %v2155_v26 = vmul.f32 %v4427_v14, %v2142_v31 }
 0x379   : > { %v2157_v56 = vpack.c.bf16 %v2155_v26, %v2155_v26  ;;  %v4237_v3 = vpack.c.bf16 %v2155_v26, %v2154_v20  ;;  %v5756_v26 = vld [vmem:[%s2168_s12 + $0x18] sm:$0xff]  ;;  %s4267_s12 = smul.u32 4294967216, %s4694_s18 }
 0x37b   : > { %4238 = vst [vmem:[%s2159_s7] sm:$0xff] %v4237_v3   ;;  %v2176_v7 = vunpack.c.l.b16 %v2157_v56  ;;  %s2607_s7 = sshra.s32 %s5935_s13, 3  ;;  %s5995_s26 = sadd.s32 96, %s4267_s12 }
 0x37c   : > { %s4217_s8 = sshll.u32 %s2607_s7, 4  ;;  %s4065_s29 = sshll.u32 %s2607_s7, 2 }
 0x37d   : > { %v2177_v57 = vpack.c.b16 %v2176_v7, %v2175_v59  ;;  %v2241_v7 = vunpack.c.l.bf16 %v5756_v26  ;;  %s2611_s9 = scalar_lea.vmem [#allocation2], %s4217_s8  ;;  %s2823_s10 = scalar_lea.vmem %s5531_s11, %s4065_s29 [#allocation9] }
 0x37f   : > { %2187 = vmatmul.bf16.vlgmr.msrb.gmra.mxu0 %v2177_v57  ;;  %2201 = vmatmul.bf16.vlgmr.msrb.gmra.mxu1 %v2177_v57 }
 0x380   : > { %2215 = vmatmul.bf16.vlgmr.msrb.gmra.mxu2 %v2177_v57  ;;  %2229 = vmatmul.bf16.vlgmr.msrb.gmra.mxu3 %v2177_v57 }
 0x381   : > { %2622 = vmatpush.bf16.msrb.mxu0 %v5119_v60  ;;  %2636 = vmatpush.bf16.msrb.mxu1 %v5124_v63 }
 0x382   : > { %2650 = vmatpush.bf16.msrb.mxu2 %v5135_v2  ;;  %2664 = vmatpush.bf16.msrb.mxu3 %v5146_v9 }
 0x385   : > { %2623 = vmatpush.bf16.msrb.mxu0 %v5151_v16  ;;  %2637 = vmatpush.bf16.msrb.mxu1 %v5153_v17 }
 0x386   : > { %2651 = vmatpush.bf16.msrb.mxu2 %v5171_v25  ;;  %2665 = vmatpush.bf16.msrb.mxu3 %v5178_v39 }
 0x389   : > { %2624 = vmatpush.bf16.msrb.mxu0 %v5184_v50  ;;  %2638 = vmatpush.bf16.msrb.mxu1 %v5188_v55 }
 0x38a   : > { %2652 = vmatpush.bf16.msrb.mxu2 %v5199_v5  ;;  %2666 = vmatpush.bf16.msrb.mxu3 %v5206_v24 }
 0x38d   : > { %2625 = vmatpush.bf16.msrb.mxu0 %v5212_v34  ;;  %2639 = vmatpush.bf16.msrb.mxu1 %v5216_v37 }
 0x38e   : > { %2653 = vmatpush.bf16.msrb.mxu2 %v5227_v51  ;;  %2667 = vmatpush.bf16.msrb.mxu3 %v5234_v10 }
 0x391   : > { %2626 = vmatpush.bf16.msrb.mxu0 %v5240_v21  ;;  %2640 = vmatpush.bf16.msrb.mxu1 %v5244_v28 }
 0x392   : > { %2654 = vmatpush.bf16.msrb.mxu2 %v5255_v38  ;;  %2668 = vmatpush.bf16.msrb.mxu3 %v5262_v32 }
 0x395   : > { %2627 = vmatpush.bf16.msrb.mxu0 %v5268_v8  ;;  %2641 = vmatpush.bf16.msrb.mxu1 %v5272_v15 }
 0x396   : > { %2655 = vmatpush.bf16.msrb.mxu2 %v5283_v30  ;;  %2669 = vmatpush.bf16.msrb.mxu3 %v5290_v43 }
 0x399   : > { %2628 = vmatpush.bf16.msrb.mxu0 %v5296_v58  ;;  %2642 = vmatpush.bf16.msrb.mxu1 %v5300_v1 }
 0x39a   : > { %2656 = vmatpush.bf16.msrb.mxu2 %v5311_v23  ;;  %2670 = vmatpush.bf16.msrb.mxu3 %v5317_v36 }
 0x39d   : > { %2629 = vmatpush.bf16.msrb.mxu0 %v5323_v53  ;;  %2643 = vmatpush.bf16.msrb.mxu1 %v6174_v6 }
 0x39e   : > { %2657 = vmatpush.bf16.msrb.mxu2 %v6175_v29  ;;  %2671 = vmatpush.bf16.msrb.mxu3 %v6178_v11 }
 0x3fc   : > { %v2188_v33 = vpop.f32.mrf.mxu0  ;;  %v2202_v19 = vpop.f32.mrf.mxu1 }
 0x3fd   : > { %v2243_v35 = vadd.f32 %v2235_v49, %v2188_v33  ;;  %v2244_v54 = vadd.f32 %v2236_v12, %v2202_v19  ;;  %v2238_v49 = vunpack.c.h.bf16 %v2170_v18 }
 0x3ff   : > { %v4039_v46 = vmul.f32 -1.442695, %v2243_v35  ;;  %v4040_v27 = vmul.f32 -1.442695, %v2244_v54 }
 0x401   : > { %4428 = vpow2.f32 %v4039_v46 }
 0x402   : > { %4430 = vpow2.f32 %v4040_v27 }
 0x403   : > { %v2216_v41 = vpop.f32.mrf.mxu2  ;;  %v2230_v57 = vpop.f32.mrf.mxu3 }
 0x404   : > { %v2245_v22 = vadd.f32 %v2237_v61, %v2216_v41  ;;  %v2190_v4 = vpop.f32.mrf.mxu0  ;;  %v2204_v0 = vpop.f32.mrf.mxu1  ;;  %v2246_v19 = vadd.f32 %v2238_v49, %v2230_v57 }
 0x405   : > { %v2247_v13 = vadd.f32 %v2239_v40, %v2190_v4  ;;  %v2248_v20 = vadd.f32 %v2240_v47, %v2204_v0 }
 0x406   : > { %v4041_v52 = vmul.f32 -1.442695, %v2245_v22 }
 0x407   : > { %v4429_v14 = vpop.eup %4428  ;;  %v4042_v31 = vmul.f32 -1.442695, %v2247_v13  ;;  %v4043_v3 = vmul.f32 -1.442695, %v2248_v20 }
 0x408   : > { %v4431_v48 = vpop.eup %4430  ;;  %v2269_v56 = vadd.f32 1.0, %v4429_v14  ;;  %4432 = vpow2.f32 %v4041_v52 }
 0x409   : > { %v2270_v59 = vadd.f32 1.0, %v4431_v48  ;;  %4434 = vpow2.f32 %v4042_v31 }
 0x40a   : > { %4436 = vrcp.f32 %v2269_v56  ;;  %v2284_v13 = vand.u32 2147483647, %v2269_v56  ;;  %v2286_v20 = vand.u32 2147483648, %v2269_v56  ;;  %vm2280_vm11 = vweird.f32 %v2269_v56 }
 0x40b   : > { %4438 = vrcp.f32 %v2270_v59  ;;  %v2218_v45 = vpop.f32.mrf.mxu2  ;;  %v2301_v0 = vand.u32 2147483648, %v2270_v59  ;;  %v2299_v14 = vand.u32 2147483647, %v2270_v59  ;;  %vm2295_vm10 = vweird.f32 %v2270_v59  ;;  %v2232_v49 = vpop.f32.mrf.mxu3 }
 0x40c   : > { %4440 = vpow2.f32 %v4043_v3  ;;  %v2249_v12 = vadd.f32 %v2241_v7, %v2218_v45  ;;  %v2242_v3 = vunpack.c.h.bf16 %v5756_v26  ;;  %vm2285_vm13 = vcmp.eq.f32.partialorder %v2284_v13, 8.507059e+37 }
 0x40d   : > { %vm2300_vm15 = vcmp.eq.f32.partialorder %v2299_v14, 8.507059e+37 }
 0x40e   : > { %v4433_v33 = vpop.eup %4432  ;;  %v4044_v35 = vmul.f32 -1.442695, %v2249_v12 }
 0x40f   : > { %v4435_v54 = vpop.eup %4434  ;;  %v5759_v46 = vadd.f32 1.0, %v4433_v33  ;;  %v2302_v33 = vor.u32 1.1754944e-38, %v2301_v0 }
 0x410   : > { %v4437_v27 = vpop.eup %4436  ;;  %v5761_v44 = vadd.f32 1.0, %v4435_v54  ;;  %4442 = vpow2.f32 %v4044_v35 }
 0x411   : > { %v4439_v61 = vpop.eup %4438  ;;  %v2276_v41 = vmul.f32 %v4437_v27, %v2269_v56  ;;  %4444 = vrcp.f32 %v5759_v46  ;;  %vm2281_vm8 = vweird.f32 %v4437_v27 }
 0x412   : > { %v4441_v40 = vpop.eup %4440  ;;  %v2291_v47 = vmul.f32 %v4439_v61, %v2270_v59  ;;  %4446 = vtanh.f32 %v2246_v19  ;;  %vm2296_vm9 = vweird.f32 %v4439_v61  ;;  %vm2282_vm12 = vmor %vm2280_vm11, %vm2281_vm8  ;;  %v2287_v19 = vor.u32 1.1754944e-38, %v2286_v20 }
 0x413   : > { %v2277_v18 = vsub.f32 1.0, %v2276_v41  ;;  %4448 = vrcp.f32 %v5761_v44  ;;  %v5765_v22 = vadd.f32 1.0, %v4441_v40  ;;  %vm2297_vm14 = vmor %vm2295_vm10, %vm2296_vm9  ;;  %vm2325_vm2 = vweird.f32 %v5761_v44 }
 0x414   : > { %v2292_v4 = vsub.f32 1.0, %v2291_v47  ;;  %v2250_v47 = vadd.f32 %v2242_v3, %v2232_v49  ;;  %v2329_v3 = vand.u32 2147483647, %v5761_v44  ;;  %vm2310_vm9 = vweird.f32 %v5759_v46 }
 0x415   : > { %v2278_v52 = vmul.f32 %v4437_v27, %v2277_v18  ;;  %4450 = vrcp.f32 %v5765_v22  ;;  %vm2340_vm3 = vweird.f32 %v5765_v22 }
 0x416   : > { %v4443_v31 = vpop.eup %4442  ;;  %v2293_v48 = vmul.f32 %v4439_v61, %v2292_v4  ;;  %vm2330_vm7 = vcmp.eq.f32.partialorder %v2329_v3, 8.507059e+37 }
 0x417   : > { %v5769_v7 = vpop.eup %4444  ;;  %v2279_v57 = vadd.f32 %v4437_v27, %v2278_v52  ;;  %v5771_v45 = vadd.f32 1.0, %v4443_v31 }
 0x418   : > { %v4447_v12 = vpop.eup %4446  ;;  %v2294_v35 = vadd.f32 %v4439_v61, %v2293_v48  ;;  %v2306_v26 = vmul.f32 %v5769_v7, %v5759_v46  ;;  %vm2311_vm5 = vweird.f32 %v5769_v7 }
 0x419   : > { %v4449_v54 = vpop.eup %4448  ;;  %v2283_v41 = vsel %vm2282_vm12, %v4437_v27, %v2279_v57  ;;  %4452 = vrcp.f32 %v5771_v45  ;;  %v2331_v27 = vand.u32 2147483648, %v5761_v44  ;;  %v2344_v57 = vand.u32 2147483647, %v5765_v22  ;;  %vm2312_vm10 = vmor %vm2310_vm9, %vm2311_vm5 }
 0x41a   : > { %v2288_v56 = vsel %vm2285_vm13, %v2287_v19, %v2283_v41  ;;  %v2298_v59 = vsel %vm2297_vm14, %v4439_v61, %v2294_v35  ;;  %v2321_v40 = vmul.f32 %v4449_v54, %v5761_v44  ;;  %v2307_v31 = vsub.f32 1.0, %v2306_v26 }
 0x41b   : > { %v4451_v18 = vpop.eup %4450  ;;  %v2303_v4 = vsel %vm2300_vm15, %v2302_v33, %v2298_v59  ;;  %v2369_v13 = vmul.f32 %v4447_v12, %v2288_v56  ;;  %4454 = vtanh.f32 %v2250_v47  ;;  %v2346_v61 = vand.u32 2147483648, %v5765_v22 }
 0x41c   : > { %v2367_v0 = vmul.f32 %v2303_v4, %v5693_v62  ;;  %v2322_v20 = vsub.f32 1.0, %v2321_v40  ;;  %v2336_v52 = vmul.f32 %v4451_v18, %v5765_v22  ;;  %vm2326_vm0 = vweird.f32 %v4449_v54 }
 0x41d   : > { %vm2341_vm1 = vweird.f32 %v4451_v18  ;;  %v2308_v33 = vmul.f32 %v5769_v7, %v2307_v31  ;;  %vm2327_vm4 = vmor %vm2325_vm2, %vm2326_vm0  ;;  %v2332_v26 = vor.u32 1.1754944e-38, %v2331_v27  ;;  %v2347_v56 = vor.u32 1.1754944e-38, %v2346_v61 }
 0x41e   : > { %v2337_v48 = vsub.f32 1.0, %v2336_v52  ;;  %v2323_v11 = vmul.f32 %v4449_v54, %v2322_v20  ;;  %v5785_v49 = vadd.f32 %v2369_v13, %v2367_v0  ;;  %vm2342_vm6 = vmor %vm2340_vm3, %vm2341_vm1  ;;  %vm2345_vm8 = vcmp.eq.f32.partialorder %v2344_v57, 8.507059e+37 }
 0x41f   : > { %v4453_v14 = vpop.eup %4452  ;;  %v2316_v13 = vand.u32 2147483648, %v5759_v46  ;;  %v2361_v61 = vand.u32 2147483648, %v5771_v45  ;;  %vm2355_vm13 = vweird.f32 %v5771_v45 }
 0x420   : > { %v2338_v62 = vmul.f32 %v4451_v18, %v2337_v48  ;;  %v2351_v12 = vmul.f32 %v4453_v14, %v5771_v45  ;;  %v2324_v19 = vadd.f32 %v4449_v54, %v2323_v11  ;;  %4456 = vtanh.f32 %v5785_v49 }
 0x421   : > { %v4455_v40 = vpop.eup %4454  ;;  %v2309_v11 = vadd.f32 %v5769_v7, %v2308_v33  ;;  %vm2356_vm11 = vweird.f32 %v4453_v14  ;;  %v2317_v27 = vor.u32 1.1754944e-38, %v2316_v13 }
 0x422   : > { %v2352_v35 = vsub.f32 1.0, %v2351_v12  ;;  %v2339_v41 = vadd.f32 %v4451_v18, %v2338_v62  ;;  %v2328_v59 = vsel %vm2327_vm4, %v4449_v54, %v2324_v19  ;;  %v2314_v54 = vand.u32 2147483647, %v5759_v46  ;;  %vm2357_vm14 = vmor %vm2355_vm13, %vm2356_vm11 }
 0x423   : > { %v2333_v47 = vsel %vm2330_vm7, %v2332_v26, %v2328_v59 }
 0x424   : > { %v2343_v4 = vsel %vm2342_vm6, %v4451_v18, %v2339_v41  ;;  %v2353_v44 = vmul.f32 %v4453_v14, %v2352_v35  ;;  %v2370_v0 = vmul.f32 %v4455_v40, %v2333_v47  ;;  %v2313_v18 = vsel %vm2312_vm10, %v5769_v7, %v2309_v11 }
 0x425   : > { %v2348_v22 = vsel %vm2345_vm8, %v2347_v56, %v2343_v4  ;;  %vm2315_vm12 = vcmp.eq.f32.partialorder %v2314_v54, 8.507059e+37  ;;  %v2362_v7 = vor.u32 1.1754944e-38, %v2361_v61  ;;  %v2392_v54 = vld [vmem:[%s2389_s24 + $0x10] sm:$0xff] }
 0x426   : > { %v2368_v20 = vmul.f32 %v2348_v22, %v5708_v42  ;;  %v2354_v31 = vadd.f32 %v4453_v14, %v2353_v44  ;;  %v4457_v48 = vpop.eup %4456  ;;  %v2359_v42 = vand.u32 2147483647, %v5771_v45  ;;  %v2318_v46 = vsel %vm2315_vm12, %v2317_v27, %v2313_v18  ;;  %v6179_v45 = vld [vmem:[#allocation14_spill] sm:$0xff] }
 0x427   : > { %v2375_v57 = vmul.f32 %v4457_v48, %v2318_v46  ;;  %v2460_v48 = vunpack.c.l.bf16 %v2392_v54  ;;  %v2461_v27 = vunpack.c.h.bf16 %v2392_v54 }
 0x428   : > { %v5800_v52 = vadd.f32 %v2370_v0, %v2368_v20  ;;  %v2358_v3 = vsel %vm2357_vm14, %v4453_v14, %v2354_v31  ;;  %vm2360_vm15 = vcmp.eq.f32.partialorder %v2359_v42, 8.507059e+37  ;;  %v2390_v14 = vld [vmem:[%s2389_s24] sm:$0xff]  ;;  %v2391_v20 = vld [vmem:[%s2389_s24 + $0x8] sm:$0xff] }
 0x429   : > { %v2363_v12 = vsel %vm2360_vm15, %v2362_v7, %v2358_v3  ;;  %v2377_v19 = vpack.c.bf16 %v2375_v57, %v2375_v57  ;;  %v2456_v40 = vunpack.c.l.bf16 %v2390_v14  ;;  %v2457_v47 = vunpack.c.h.bf16 %v2390_v14 }
 0x42a   : > { %4458 = vtanh.f32 %v5800_v52  ;;  %v2458_v18 = vunpack.c.l.bf16 %v2391_v20 }
 0x42b   : > { %v2396_v41 = vunpack.c.l.b16 %v2377_v19 }
 0x430   : > { %v4459_v62 = vpop.eup %4458 }
 0x431   : > { %v2376_v33 = vmul.f32 %v4459_v62, %v2363_v12 }
 0x433   : > { %v2378_v35 = vpack.c.bf16 %v2376_v33, %v2376_v33  ;;  %v4242_v26 = vpack.c.bf16 %v2376_v33, %v2375_v57  ;;  %v5848_v33 = vld [vmem:[%s2389_s24 + $0x18] sm:$0xff]  ;;  %s4268_s24 = smul.u32 4294967184, %s4694_s18 }
 0x435   : > { %4243 = vst [vmem:[%s2380_s15] sm:$0xff] %v4242_v26   ;;  %v2397_v56 = vunpack.c.l.b16 %v2378_v35  ;;  %s2829_s15 = sshra.s32 %s5995_s26, 3  ;;  %s6055_s5 = sadd.s32 112, %s4268_s24 }
 0x436   : > { %s4220_s21 = sshll.u32 %s2829_s15, 4  ;;  %s4075_s25 = sshll.u32 %s2829_s15, 2 }
 0x437   : > { %v2398_v59 = vpack.c.b16 %v2397_v56, %v2396_v41  ;;  %v2462_v56 = vunpack.c.l.bf16 %v5848_v33  ;;  %s2833_s23 = scalar_lea.vmem [#allocation2], %s4220_s21  ;;  %s3045_s30 = scalar_lea.vmem %s5531_s11, %s4075_s25 [#allocation9] }
 0x439   : > { %2408 = vmatmul.bf16.vlgmr.msra.gmra.mxu0 %v2398_v59  ;;  %2422 = vmatmul.bf16.vlgmr.msra.gmra.mxu1 %v2398_v59 }
 0x43a   : > { %2436 = vmatmul.bf16.vlgmr.msra.gmra.mxu2 %v2398_v59  ;;  %2450 = vmatmul.bf16.vlgmr.msra.gmra.mxu3 %v2398_v59 }
 0x43b   : > { %2844 = vmatpush.bf16.msra.mxu0 %v5119_v60  ;;  %2858 = vmatpush.bf16.msra.mxu1 %v5124_v63 }
 0x43c   : > { %2872 = vmatpush.bf16.msra.mxu2 %v5135_v2  ;;  %2886 = vmatpush.bf16.msra.mxu3 %v5146_v9 }
 0x43f   : > { %2845 = vmatpush.bf16.msra.mxu0 %v5151_v16  ;;  %2859 = vmatpush.bf16.msra.mxu1 %v5153_v17 }
 0x440   : > { %2873 = vmatpush.bf16.msra.mxu2 %v5171_v25  ;;  %2887 = vmatpush.bf16.msra.mxu3 %v5178_v39 }
 0x443   : > { %2846 = vmatpush.bf16.msra.mxu0 %v5184_v50  ;;  %2860 = vmatpush.bf16.msra.mxu1 %v5188_v55 }
 0x444   : > { %2874 = vmatpush.bf16.msra.mxu2 %v5199_v5  ;;  %2888 = vmatpush.bf16.msra.mxu3 %v5206_v24 }
 0x447   : > { %2847 = vmatpush.bf16.msra.mxu0 %v5212_v34  ;;  %2861 = vmatpush.bf16.msra.mxu1 %v5216_v37 }
 0x448   : > { %2875 = vmatpush.bf16.msra.mxu2 %v5227_v51  ;;  %2889 = vmatpush.bf16.msra.mxu3 %v5234_v10 }
 0x44b   : > { %2848 = vmatpush.bf16.msra.mxu0 %v5240_v21  ;;  %2862 = vmatpush.bf16.msra.mxu1 %v5244_v28 }
 0x44c   : > { %2876 = vmatpush.bf16.msra.mxu2 %v5255_v38  ;;  %2890 = vmatpush.bf16.msra.mxu3 %v5262_v32 }
 0x44f   : > { %2849 = vmatpush.bf16.msra.mxu0 %v5268_v8  ;;  %2863 = vmatpush.bf16.msra.mxu1 %v5272_v15 }
 0x450   : > { %2877 = vmatpush.bf16.msra.mxu2 %v5283_v30  ;;  %2891 = vmatpush.bf16.msra.mxu3 %v5290_v43 }
 0x453   : > { %2850 = vmatpush.bf16.msra.mxu0 %v5296_v58  ;;  %2864 = vmatpush.bf16.msra.mxu1 %v5300_v1 }
 0x454   : > { %2878 = vmatpush.bf16.msra.mxu2 %v5311_v23  ;;  %2892 = vmatpush.bf16.msra.mxu3 %v5317_v36 }
 0x457   : > { %2851 = vmatpush.bf16.msra.mxu0 %v5323_v53  ;;  %2865 = vmatpush.bf16.msra.mxu1 %v6174_v6 }
 0x458   : > { %2879 = vmatpush.bf16.msra.mxu2 %v6175_v29  ;;  %2893 = vmatpush.bf16.msra.mxu3 %v6179_v45 }
 0x4b6   : > { %v2409_v4 = vpop.f32.mrf.mxu0  ;;  %v2423_v11 = vpop.f32.mrf.mxu1 }
 0x4b7   : > { %v2464_v44 = vadd.f32 %v2456_v40, %v2409_v4  ;;  %v2465_v22 = vadd.f32 %v2457_v47, %v2423_v11  ;;  %v2459_v40 = vunpack.c.h.bf16 %v2391_v20 }
 0x4b9   : > { %v4049_v0 = vmul.f32 -1.442695, %v2464_v44  ;;  %v4050_v13 = vmul.f32 -1.442695, %v2465_v22 }
 0x4bb   : > { %4460 = vpow2.f32 %v4049_v0 }
 0x4bc   : > { %4462 = vpow2.f32 %v4050_v13 }
 0x4bd   : > { %v2437_v31 = vpop.f32.mrf.mxu2  ;;  %v2451_v59 = vpop.f32.mrf.mxu3 }
 0x4be   : > { %v2466_v61 = vadd.f32 %v2458_v18, %v2437_v31  ;;  %v2411_v42 = vpop.f32.mrf.mxu0  ;;  %v2425_v46 = vpop.f32.mrf.mxu1  ;;  %v2467_v11 = vadd.f32 %v2459_v40, %v2451_v59 }
 0x4bf   : > { %v2468_v3 = vadd.f32 %v2460_v48, %v2411_v42  ;;  %v2469_v57 = vadd.f32 %v2461_v27, %v2425_v46 }
 0x4c0   : > { %v4051_v7 = vmul.f32 -1.442695, %v2466_v61 }
 0x4c1   : > { %v4461_v62 = vpop.eup %4460  ;;  %v4052_v12 = vmul.f32 -1.442695, %v2468_v3  ;;  %v4053_v26 = vmul.f32 -1.442695, %v2469_v57 }
 0x4c2   : > { %v4463_v19 = vpop.eup %4462  ;;  %v2490_v35 = vadd.f32 1.0, %v4461_v62  ;;  %4464 = vpow2.f32 %v4051_v7 }
 0x4c3   : > { %v2491_v41 = vadd.f32 1.0, %v4463_v19  ;;  %4466 = vpow2.f32 %v4052_v12 }
 0x4c4   : > { %4468 = vrcp.f32 %v2490_v35  ;;  %v2505_v3 = vand.u32 2147483647, %v2490_v35  ;;  %v2507_v57 = vand.u32 2147483648, %v2490_v35  ;;  %vm2501_vm3 = vweird.f32 %v2490_v35 }
 0x4c5   : > { %4470 = vrcp.f32 %v2491_v41  ;;  %v2439_v14 = vpop.f32.mrf.mxu2  ;;  %v2522_v46 = vand.u32 2147483648, %v2491_v41  ;;  %v2520_v62 = vand.u32 2147483647, %v2491_v41  ;;  %vm2516_vm2 = vweird.f32 %v2491_v41  ;;  %v2453_v40 = vpop.f32.mrf.mxu3 }
 0x4c6   : > { %4472 = vpow2.f32 %v4053_v26  ;;  %v2470_v47 = vadd.f32 %v2462_v56, %v2439_v14  ;;  %v2463_v26 = vunpack.c.h.bf16 %v5848_v33  ;;  %vm2506_vm5 = vcmp.eq.f32.partialorder %v2505_v3, 8.507059e+37 }
 0x4c7   : > { %vm2521_vm7 = vcmp.eq.f32.partialorder %v2520_v62, 8.507059e+37 }
 0x4c8   : > { %v4465_v4 = vpop.eup %4464  ;;  %v4054_v44 = vmul.f32 -1.442695, %v2470_v47 }
 0x4c9   : > { %v4467_v22 = vpop.eup %4466  ;;  %v5851_v0 = vadd.f32 1.0, %v4465_v4  ;;  %v2523_v4 = vor.u32 1.1754944e-38, %v2522_v46 }
 0x4ca   : > { %v4469_v13 = vpop.eup %4468  ;;  %v5853_v54 = vadd.f32 1.0, %v4467_v22  ;;  %4474 = vpow2.f32 %v4054_v44 }
 0x4cb   : > { %v4471_v18 = vpop.eup %4470  ;;  %v2497_v31 = vmul.f32 %v4469_v13, %v2490_v35  ;;  %4476 = vrcp.f32 %v5851_v0  ;;  %vm2502_vm0 = vweird.f32 %v4469_v13 }
 0x4cc   : > { %v4473_v48 = vpop.eup %4472  ;;  %v2512_v27 = vmul.f32 %v4471_v18, %v2491_v41  ;;  %4478 = vtanh.f32 %v2467_v11  ;;  %vm2517_vm1 = vweird.f32 %v4471_v18  ;;  %vm2503_vm4 = vmor %vm2501_vm3, %vm2502_vm0  ;;  %v2508_v11 = vor.u32 1.1754944e-38, %v2507_v57 }
 0x4cd   : > { %v2498_v20 = vsub.f32 1.0, %v2497_v31  ;;  %4480 = vrcp.f32 %v5853_v54  ;;  %v5857_v61 = vadd.f32 1.0, %v4473_v48  ;;  %vm2518_vm6 = vmor %vm2516_vm2, %vm2517_vm1  ;;  %vm2546_vm10 = vweird.f32 %v5853_v54 }
 0x4ce   : > { %v2513_v42 = vsub.f32 1.0, %v2512_v27  ;;  %v2471_v27 = vadd.f32 %v2463_v26, %v2453_v40  ;;  %v2550_v26 = vand.u32 2147483647, %v5853_v54  ;;  %vm2531_vm1 = vweird.f32 %v5851_v0 }
 0x4cf   : > { %v2499_v7 = vmul.f32 %v4469_v13, %v2498_v20  ;;  %4482 = vrcp.f32 %v5857_v61  ;;  %vm2561_vm11 = vweird.f32 %v5857_v61 }
 0x4d0   : > { %v4475_v12 = vpop.eup %4474  ;;  %v2514_v19 = vmul.f32 %v4471_v18, %v2513_v42  ;;  %vm2551_vm15 = vcmp.eq.f32.partialorder %v2550_v26, 8.507059e+37 }
 0x4d1   : > { %v5861_v56 = vpop.eup %4476  ;;  %v2500_v59 = vadd.f32 %v4469_v13, %v2499_v7  ;;  %v5863_v14 = vadd.f32 1.0, %v4475_v12 }
 0x4d2   : > { %v4479_v47 = vpop.eup %4478  ;;  %v2515_v44 = vadd.f32 %v4471_v18, %v2514_v19  ;;  %v2527_v33 = vmul.f32 %v5861_v56, %v5851_v0  ;;  %vm2532_vm13 = vweird.f32 %v5861_v56 }
 0x4d3   : > { %v4481_v22 = vpop.eup %4480  ;;  %v2504_v31 = vsel %vm2503_vm4, %v4469_v13, %v2500_v59  ;;  %4484 = vrcp.f32 %v5863_v14  ;;  %v2552_v13 = vand.u32 2147483648, %v5853_v54  ;;  %v2565_v59 = vand.u32 2147483647, %v5857_v61  ;;  %vm2533_vm2 = vmor %vm2531_vm1, %vm2532_vm13 }
 0x4d4   : > { %v2509_v35 = vsel %vm2506_vm5, %v2508_v11, %v2504_v31  ;;  %v2519_v41 = vsel %vm2518_vm6, %v4471_v18, %v2515_v44  ;;  %v2542_v48 = vmul.f32 %v4481_v22, %v5853_v54  ;;  %v2528_v12 = vsub.f32 1.0, %v2527_v33 }
 0x4d5   : > { %v4483_v20 = vpop.eup %4482  ;;  %v2524_v42 = vsel %vm2521_vm7, %v2523_v4, %v2519_v41  ;;  %v2590_v3 = vmul.f32 %v4479_v47, %v2509_v35  ;;  %4486 = vtanh.f32 %v2471_v27  ;;  %v2567_v18 = vand.u32 2147483648, %v5857_v61 }
 0x4d6   : > { %v2588_v46 = vmul.f32 %v2524_v42, %v5785_v49  ;;  %v2543_v57 = vsub.f32 1.0, %v2542_v48  ;;  %v2557_v7 = vmul.f32 %v4483_v20, %v5857_v61  ;;  %vm2547_vm8 = vweird.f32 %v4481_v22 }
 0x4d7   : > { %vm2562_vm9 = vweird.f32 %v4483_v20  ;;  %v2529_v4 = vmul.f32 %v5861_v56, %v2528_v12  ;;  %vm2548_vm12 = vmor %vm2546_vm10, %vm2547_vm8  ;;  %v2553_v33 = vor.u32 1.1754944e-38, %v2552_v13  ;;  %v2568_v35 = vor.u32 1.1754944e-38, %v2567_v18 }
 0x4d8   : > { %v2558_v19 = vsub.f32 1.0, %v2557_v7  ;;  %v2544_v45 = vmul.f32 %v4481_v22, %v2543_v57  ;;  %v5877_v40 = vadd.f32 %v2590_v3, %v2588_v46  ;;  %vm2563_vm14 = vmor %vm2561_vm11, %vm2562_vm9  ;;  %vm2566_vm0 = vcmp.eq.f32.partialorder %v2565_v59, 8.507059e+37 }
 0x4d9   : > { %v4485_v62 = vpop.eup %4484  ;;  %v2537_v3 = vand.u32 2147483648, %v5851_v0  ;;  %v2582_v18 = vand.u32 2147483648, %v5863_v14  ;;  %vm2576_vm5 = vweird.f32 %v5863_v14 }
 0x4da   : > { %v2559_v49 = vmul.f32 %v4483_v20, %v2558_v19  ;;  %v2572_v47 = vmul.f32 %v4485_v62, %v5863_v14  ;;  %v2545_v11 = vadd.f32 %v4481_v22, %v2544_v45  ;;  %4488 = vtanh.f32 %v5877_v40 }
 0x4db   : > { %v4487_v48 = vpop.eup %4486  ;;  %v2530_v45 = vadd.f32 %v5861_v56, %v2529_v4  ;;  %vm2577_vm3 = vweird.f32 %v4485_v62  ;;  %v2538_v13 = vor.u32 1.1754944e-38, %v2537_v3 }
 0x4dc   : > { %v2573_v44 = vsub.f32 1.0, %v2572_v47  ;;  %v2560_v31 = vadd.f32 %v4483_v20, %v2559_v49  ;;  %v2549_v41 = vsel %vm2548_vm12, %v4481_v22, %v2545_v11  ;;  %v2535_v22 = vand.u32 2147483647, %v5851_v0  ;;  %vm2578_vm6 = vmor %vm2576_vm5, %vm2577_vm3 }
 0x4dd   : > { %v2554_v27 = vsel %vm2551_vm15, %v2553_v33, %v2549_v41 }
 0x4de   : > { %v2564_v42 = vsel %vm2563_vm14, %v4483_v20, %v2560_v31  ;;  %v2574_v54 = vmul.f32 %v4485_v62, %v2573_v44  ;;  %v2591_v46 = vmul.f32 %v4487_v48, %v2554_v27  ;;  %v2534_v20 = vsel %vm2533_vm2, %v5861_v56, %v2530_v45 }
 0x4df   : > { %v2569_v61 = vsel %vm2566_vm0, %v2568_v35, %v2564_v42  ;;  %vm2536_vm4 = vcmp.eq.f32.partialorder %v2535_v22, 8.507059e+37  ;;  %v2583_v56 = vor.u32 1.1754944e-38, %v2582_v18 }
 0x4e0   : > { %v2589_v57 = vmul.f32 %v2569_v61, %v5800_v52  ;;  %v2575_v12 = vadd.f32 %v4485_v62, %v2574_v54  ;;  %v4489_v19 = vpop.eup %4488  ;;  %v2580_v52 = vand.u32 2147483647, %v5863_v14  ;;  %v2539_v0 = vsel %vm2536_vm4, %v2538_v13, %v2534_v20 }
 0x4e1   : > { %v2596_v59 = vmul.f32 %v4489_v19, %v2539_v0 }
 0x4e2   : > { %v5892_v7 = vadd.f32 %v2591_v46, %v2589_v57  ;;  %v2579_v26 = vsel %vm2578_vm6, %v4485_v62, %v2575_v12  ;;  %vm2581_vm7 = vcmp.eq.f32.partialorder %v2580_v52, 8.507059e+37 }
 0x4e3   : > { %v2584_v47 = vsel %vm2581_vm7, %v2583_v56, %v2579_v26  ;;  %v2598_v11 = vpack.c.bf16 %v2596_v59, %v2596_v59 }
 0x4e4   : > { %4490 = vtanh.f32 %v5892_v7 }
 0x4e5   : > { %v2618_v31 = vunpack.c.l.b16 %v2598_v11 }
 0x4ea   : > { %v4491_v49 = vpop.eup %4490 }
 0x4eb   : > { %v2597_v4 = vmul.f32 %v4491_v49, %v2584_v47 }
 0x4ed   : > { %v2599_v44 = vpack.c.bf16 %v2597_v4, %v2597_v4  ;;  %v4247_v33 = vpack.c.bf16 %v2597_v4, %v2596_v59 }
 0x4ef   : > { %4248 = vst [vmem:[%s2601_s14] sm:$0xff] %v4247_v33   ;;  %v2619_v35 = vunpack.c.l.b16 %v2599_v44  ;;  %s3051_s14 = sshra.s32 %s6055_s5, 3 }
 0x4f0   : > { %s4223_s6 = sshll.u32 %s3051_s14, 4  ;;  %s4085_s7 = sshll.u32 %s3051_s14, 2 }
 0x4f1   : > { %v2620_v41 = vpack.c.b16 %v2619_v35, %v2618_v31  ;;  %s3055_s13 = scalar_lea.vmem [#allocation2], %s4223_s6  ;;  %s3267_s8 = scalar_lea.vmem %s5531_s11, %s4085_s7 [#allocation9] }
 0x4f3   : > { %2630 = vmatmul.bf16.vlgmr.msrb.gmra.mxu0 %v2620_v41  ;;  %2644 = vmatmul.bf16.vlgmr.msrb.gmra.mxu1 %v2620_v41 }
 0x4f4   : > { %2658 = vmatmul.bf16.vlgmr.msrb.gmra.mxu2 %v2620_v41  ;;  %2672 = vmatmul.bf16.vlgmr.msrb.gmra.mxu3 %v2620_v41 }
 0x4f5   : > { %3066 = vmatpush.bf16.msrb.mxu0 %v5119_v60  ;;  %3080 = vmatpush.bf16.msrb.mxu1 %v5124_v63  ;;  %v6180_v60 = vld [vmem:[#allocation14_spill] sm:$0xff]  ;;  %v2612_v63 = vld [vmem:[%s2611_s9] sm:$0xff] }
 0x4f6   : > { %3094 = vmatpush.bf16.msrb.mxu2 %v5135_v2  ;;  %3108 = vmatpush.bf16.msrb.mxu3 %v5146_v9  ;;  %v2678_v2 = vunpack.c.l.bf16 %v2612_v63  ;;  %v2679_v9 = vunpack.c.h.bf16 %v2612_v63 }
 0x4f9   : > { %3067 = vmatpush.bf16.msrb.mxu0 %v5151_v16  ;;  %3081 = vmatpush.bf16.msrb.mxu1 %v5153_v17 }
 0x4fa   : > { %3095 = vmatpush.bf16.msrb.mxu2 %v5171_v25  ;;  %3109 = vmatpush.bf16.msrb.mxu3 %v5178_v39 }
 0x4fd   : > { %3068 = vmatpush.bf16.msrb.mxu0 %v5184_v50  ;;  %3082 = vmatpush.bf16.msrb.mxu1 %v5188_v55 }
 0x4fe   : > { %3096 = vmatpush.bf16.msrb.mxu2 %v5199_v5  ;;  %3110 = vmatpush.bf16.msrb.mxu3 %v5206_v24  ;;  %v2613_v5 = vld [vmem:[%s2611_s9 + $0x8] sm:$0xff]  ;;  %v2614_v24 = vld [vmem:[%s2611_s9 + $0x10] sm:$0xff] }
 0x4ff   : > { %v2681_v62 = vunpack.c.h.bf16 %v2613_v5 }
 0x501   : > { %3069 = vmatpush.bf16.msrb.mxu0 %v5212_v34  ;;  %3083 = vmatpush.bf16.msrb.mxu1 %v5216_v37  ;;  %v2680_v34 = vunpack.c.l.bf16 %v2613_v5 }
 0x502   : > { %3097 = vmatpush.bf16.msrb.mxu2 %v5227_v51  ;;  %3111 = vmatpush.bf16.msrb.mxu3 %v5234_v10  ;;  %v2682_v51 = vunpack.c.l.bf16 %v2614_v24  ;;  %v2683_v10 = vunpack.c.h.bf16 %v2614_v24 }
 0x505   : > { %3070 = vmatpush.bf16.msrb.mxu0 %v5240_v21  ;;  %3084 = vmatpush.bf16.msrb.mxu1 %v5244_v28 }
 0x506   : > { %3098 = vmatpush.bf16.msrb.mxu2 %v5255_v38  ;;  %3112 = vmatpush.bf16.msrb.mxu3 %v5262_v32 }
 0x509   : > { %3071 = vmatpush.bf16.msrb.mxu0 %v5268_v8  ;;  %3085 = vmatpush.bf16.msrb.mxu1 %v5272_v15 }
 0x50a   : > { %3099 = vmatpush.bf16.msrb.mxu2 %v5283_v30  ;;  %3113 = vmatpush.bf16.msrb.mxu3 %v5290_v43 }
 0x50d   : > { %3072 = vmatpush.bf16.msrb.mxu0 %v5296_v58  ;;  %3086 = vmatpush.bf16.msrb.mxu1 %v5300_v1  ;;  %v5940_v58 = vld [vmem:[%s2611_s9 + $0x18] sm:$0xff]  ;;  %s4087_s9 = sshll.u32 (%p4782_p9), %s4694_s18, 2 }
 0x50e   : > { %3100 = vmatpush.bf16.msrb.mxu2 %v5311_v23  ;;  %3114 = vmatpush.bf16.msrb.mxu3 %v5317_v36  ;;  %v2685_v4 = vunpack.c.h.bf16 %v5940_v58  ;;  %s3289_s12 = scalar_lea.vmem (%p4782_p9), %s6156_s4, %s4087_s9 }
 0x511   : > { %3073 = vmatpush.bf16.msrb.mxu0 %v5323_v53  ;;  %3087 = vmatpush.bf16.msrb.mxu1 %v6174_v6  ;;  %v2684_v6 = vunpack.c.l.bf16 %v5940_v58 }
 0x512   : > { %3101 = vmatpush.bf16.msrb.mxu2 %v6175_v29  ;;  %3115 = vmatpush.bf16.msrb.mxu3 %v6180_v60 }
 0x570   : > { %v2631_v16 = vpop.f32.mrf.mxu0  ;;  %v2645_v17 = vpop.f32.mrf.mxu1 }
 0x571   : > { %v2686_v25 = vadd.f32 %v2678_v2, %v2631_v16  ;;  %v2687_v39 = vadd.f32 %v2679_v9, %v2645_v17 }
 0x573   : > { %v4059_v50 = vmul.f32 -1.442695, %v2686_v25  ;;  %v4060_v55 = vmul.f32 -1.442695, %v2687_v39 }
 0x575   : > { %4492 = vpow2.f32 %v4059_v50 }
 0x576   : > { %4494 = vpow2.f32 %v4060_v55 }
 0x577   : > { %v2659_v37 = vpop.f32.mrf.mxu2  ;;  %v2673_v29 = vpop.f32.mrf.mxu3 }
 0x578   : > { %v2688_v21 = vadd.f32 %v2680_v34, %v2659_v37  ;;  %v2633_v28 = vpop.f32.mrf.mxu0  ;;  %v2647_v38 = vpop.f32.mrf.mxu1  ;;  %v2689_v42 = vadd.f32 %v2681_v62, %v2673_v29 }
 0x579   : > { %v2690_v32 = vadd.f32 %v2682_v51, %v2633_v28  ;;  %v2691_v8 = vadd.f32 %v2683_v10, %v2647_v38 }
 0x57a   : > { %v4061_v15 = vmul.f32 -1.442695, %v2688_v21 }
 0x57b   : > { %v4493_v30 = vpop.eup %4492  ;;  %v4062_v43 = vmul.f32 -1.442695, %v2690_v32  ;;  %v4063_v36 = vmul.f32 -1.442695, %v2691_v8 }
 0x57c   : > { %v4495_v1 = vpop.eup %4494  ;;  %v2712_v23 = vadd.f32 1.0, %v4493_v30  ;;  %4496 = vpow2.f32 %v4061_v15 }
 0x57d   : > { %v2713_v53 = vadd.f32 1.0, %v4495_v1  ;;  %4498 = vpow2.f32 %v4062_v43 }
 0x57e   : > { %4500 = vrcp.f32 %v2712_v23  ;;  %v2727_v0 = vand.u32 2147483647, %v2712_v23  ;;  %v2729_v26 = vand.u32 2147483648, %v2712_v23  ;;  %vm2723_vm11 = vweird.f32 %v2712_v23 }
 0x57f   : > { %4502 = vrcp.f32 %v2713_v53  ;;  %v2661_v14 = vpop.f32.mrf.mxu2  ;;  %v2744_v52 = vand.u32 2147483648, %v2713_v53  ;;  %v2742_v56 = vand.u32 2147483647, %v2713_v53  ;;  %vm2738_vm10 = vweird.f32 %v2713_v53  ;;  %v2675_v31 = vpop.f32.mrf.mxu3 }
 0x580   : > { %4504 = vpow2.f32 %v4063_v36  ;;  %v2692_v48 = vadd.f32 %v2684_v6, %v2661_v14  ;;  %vm2728_vm13 = vcmp.eq.f32.partialorder %v2727_v0, 8.507059e+37  ;;  %v2730_v60 = vor.u32 1.1754944e-38, %v2729_v26 }
 0x581   : > { %v2745_v41 = vor.u32 1.1754944e-38, %v2744_v52  ;;  %vm2743_vm15 = vcmp.eq.f32.partialorder %v2742_v56, 8.507059e+37  ;;  %v2693_v50 = vadd.f32 %v2685_v4, %v2675_v31 }
 0x582   : > { %v4497_v27 = vpop.eup %4496  ;;  %v4064_v45 = vmul.f32 -1.442695, %v2692_v48 }
 0x583   : > { %v4499_v54 = vpop.eup %4498  ;;  %v5943_v61 = vadd.f32 1.0, %v4497_v27 }
 0x584   : > { %v4501_v46 = vpop.eup %4500  ;;  %v5945_v3 = vadd.f32 1.0, %v4499_v54  ;;  %4506 = vpow2.f32 %v4064_v45 }
 0x585   : > { %v4503_v57 = vpop.eup %4502  ;;  %v2719_v22 = vmul.f32 %v4501_v46, %v2712_v23  ;;  %4508 = vrcp.f32 %v5943_v61  ;;  %vm2724_vm8 = vweird.f32 %v4501_v46 }
 0x586   : > { %v4505_v20 = vpop.eup %4504  ;;  %v2734_v12 = vmul.f32 %v4503_v57, %v2713_v53  ;;  %4510 = vtanh.f32 %v2689_v42  ;;  %vm2739_vm9 = vweird.f32 %v4503_v57  ;;  %vm2725_vm12 = vmor %vm2723_vm11, %vm2724_vm8  ;;  %v2774_v38 = vand.u32 2147483648, %v5945_v3 }
 0x587   : > { %v2720_v19 = vsub.f32 1.0, %v2719_v22  ;;  %4512 = vrcp.f32 %v5945_v3  ;;  %v5949_v13 = vadd.f32 1.0, %v4505_v20  ;;  %vm2740_vm14 = vmor %vm2738_vm10, %vm2739_vm9  ;;  %v2772_v15 = vand.u32 2147483647, %v5945_v3 }
 0x588   : > { %v2735_v18 = vsub.f32 1.0, %v2734_v12  ;;  %vm2768_vm2 = vweird.f32 %v5945_v3  ;;  %v2775_v53 = vor.u32 1.1754944e-38, %v2774_v38  ;;  %vm2753_vm9 = vweird.f32 %v5943_v61 }
 0x589   : > { %v2721_v59 = vmul.f32 %v4501_v46, %v2720_v19  ;;  %4514 = vrcp.f32 %v5949_v13  ;;  %v2789_v8 = vand.u32 2147483648, %v5949_v13  ;;  %v2787_v30 = vand.u32 2147483647, %v5949_v13 }
 0x58a   : > { %v4507_v49 = vpop.eup %4506  ;;  %v2736_v47 = vmul.f32 %v4503_v57, %v2735_v18  ;;  %vm2783_vm3 = vweird.f32 %v5949_v13  ;;  %vm2773_vm7 = vcmp.eq.f32.partialorder %v2772_v15, 8.507059e+37  ;;  %v2757_v22 = vand.u32 2147483647, %v5943_v61 }
 0x58b   : > { %v5953_v11 = vpop.eup %4508  ;;  %v2722_v44 = vadd.f32 %v4501_v46, %v2721_v59  ;;  %v5955_v33 = vadd.f32 1.0, %v4507_v49  ;;  %v2790_v29 = vor.u32 1.1754944e-38, %v2789_v8  ;;  %vm2788_vm8 = vcmp.eq.f32.partialorder %v2787_v30, 8.507059e+37  ;;  %v6000_v30 = vld [vmem:[%s2833_s23 + $0x18] sm:$0xff] }
 0x58c   : > { %v4511_v35 = vpop.eup %4510  ;;  %v2737_v63 = vadd.f32 %v4503_v57, %v2736_v47  ;;  %v2749_v9 = vmul.f32 %v5953_v11, %v5943_v61  ;;  %vm2754_vm5 = vweird.f32 %v5953_v11 }
 0x58d   : > { %v4513_v2 = vpop.eup %4512  ;;  %v2726_v16 = vsel %vm2725_vm12, %v4501_v46, %v2722_v44  ;;  %4516 = vrcp.f32 %v5955_v33  ;;  %vm2755_vm10 = vmor %vm2753_vm9, %vm2754_vm5  ;;  %v2804_v52 = vand.u32 2147483648, %v5955_v33  ;;  %vm2758_vm12 = vcmp.eq.f32.partialorder %v2757_v22, 8.507059e+37 }
 0x58e   : > { %v2731_v17 = vsel %vm2728_vm13, %v2730_v60, %v2726_v16  ;;  %v2741_v25 = vsel %vm2740_vm14, %v4503_v57, %v2737_v63  ;;  %v2764_v39 = vmul.f32 %v4513_v2, %v5945_v3  ;;  %v2750_v10 = vsub.f32 1.0, %v2749_v9 }
 0x58f   : > { %v4515_v55 = vpop.eup %4514  ;;  %v2746_v5 = vsel %vm2743_vm15, %v2745_v41, %v2741_v25  ;;  %v2812_v34 = vmul.f32 %v4511_v35, %v2731_v17  ;;  %4518 = vtanh.f32 %v2693_v50  ;;  %vm2769_vm0 = vweird.f32 %v4513_v2  ;;  %v2834_v41 = vld [vmem:[%s2833_s23] sm:$0xff]  ;;  %v2835_v50 = vld [vmem:[%s2833_s23 + $0x8] sm:$0xff] }
 0x590   : > { %v2810_v24 = vmul.f32 %v2746_v5, %v5877_v40  ;;  %v2765_v37 = vsub.f32 1.0, %v2764_v39  ;;  %v2779_v51 = vmul.f32 %v4515_v55, %v5949_v13  ;;  %vm2784_vm1 = vweird.f32 %v4515_v55  ;;  %vm2770_vm4 = vmor %vm2768_vm2, %vm2769_vm0 }
 0x591   : > { %v2751_v1 = vmul.f32 %v5953_v11, %v2750_v10  ;;  %vm2785_vm6 = vmor %vm2783_vm3, %vm2784_vm1  ;;  %v2759_v3 = vand.u32 2147483648, %v5943_v61  ;;  %vm2798_vm13 = vweird.f32 %v5955_v33  ;;  %v2805_v59 = vor.u32 1.1754944e-38, %v2804_v52 }
 0x592   : > { %v2780_v21 = vsub.f32 1.0, %v2779_v51  ;;  %v2766_v28 = vmul.f32 %v4513_v2, %v2765_v37  ;;  %v5969_v43 = vadd.f32 %v2812_v34, %v2810_v24  ;;  %v2900_v60 = vunpack.c.l.bf16 %v2834_v41 }
 0x593   : > { %v4517_v32 = vpop.eup %4516  ;;  %v2752_v42 = vadd.f32 %v5953_v11, %v2751_v1  ;;  %v2760_v18 = vor.u32 1.1754944e-38, %v2759_v3  ;;  %v2901_v63 = vunpack.c.h.bf16 %v2834_v41  ;;  %v2902_v5 = vunpack.c.l.bf16 %v2835_v50 }
 0x594   : > { %v2781_v40 = vmul.f32 %v4515_v55, %v2780_v21  ;;  %v2794_v58 = vmul.f32 %v4517_v32, %v5955_v33  ;;  %v2767_v23 = vadd.f32 %v4513_v2, %v2766_v28  ;;  %4520 = vtanh.f32 %v5969_v43 }
 0x595   : > { %v4519_v62 = vpop.eup %4518  ;;  %v2756_v12 = vsel %vm2755_vm10, %v5953_v11, %v2752_v42  ;;  %vm2799_vm11 = vweird.f32 %v4517_v32 }
 0x596   : > { %v2795_v36 = vsub.f32 1.0, %v2794_v58  ;;  %v2782_v6 = vadd.f32 %v4515_v55, %v2781_v40  ;;  %v2771_v14 = vsel %vm2770_vm4, %v4513_v2, %v2767_v23  ;;  %vm2800_vm14 = vmor %vm2798_vm13, %vm2799_vm11  ;;  %v2761_v61 = vsel %vm2758_vm12, %v2760_v18, %v2756_v12 }
 0x597   : > { %v2776_v48 = vsel %vm2773_vm7, %v2775_v53, %v2771_v14 }
 0x598   : > { %v2786_v27 = vsel %vm2785_vm6, %v4515_v55, %v2782_v6  ;;  %v2796_v45 = vmul.f32 %v4517_v32, %v2795_v36  ;;  %v2813_v46 = vmul.f32 %v4519_v62, %v2776_v48  ;;  %v2836_v55 = vld [vmem:[%s2833_s23 + $0x10] sm:$0xff]  ;;  %v2906_v36 = vunpack.c.l.bf16 %v6000_v30 }
 0x599   : > { %v2791_v54 = vsel %vm2788_vm8, %v2790_v29, %v2786_v27  ;;  %v2904_v34 = vunpack.c.l.bf16 %v2836_v55  ;;  %v2905_v37 = vunpack.c.h.bf16 %v2836_v55  ;;  %v2903_v29 = vunpack.c.h.bf16 %v2835_v50 }
 0x59a   : > { %v2811_v57 = vmul.f32 %v2791_v54, %v5892_v7  ;;  %v2797_v19 = vadd.f32 %v4517_v32, %v2796_v45  ;;  %v4521_v13 = vpop.eup %4520  ;;  %v2802_v7 = vand.u32 2147483647, %v5955_v33 }
 0x59b   : > { %v2818_v26 = vmul.f32 %v4521_v13, %v2761_v61 }
 0x59c   : > { %v5984_v20 = vadd.f32 %v2813_v46, %v2811_v57  ;;  %v2801_v0 = vsel %vm2800_vm14, %v4517_v32, %v2797_v19  ;;  %vm2803_vm15 = vcmp.eq.f32.partialorder %v2802_v7, 8.507059e+37 }
 0x59d   : > { %v2806_v49 = vsel %vm2803_vm15, %v2805_v59, %v2801_v0  ;;  %v2820_v4 = vpack.c.bf16 %v2818_v26, %v2818_v26 }
 0x59e   : > { %4522 = vtanh.f32 %v5984_v20 }
 0x59f   : > { %v2840_v31 = vunpack.c.l.b16 %v2820_v4 }
 0x5a4   : > { %v4523_v56 = vpop.eup %4522 }
 0x5a5   : > { %v2819_v47 = vmul.f32 %v4523_v56, %v2806_v49  ;;  %v2907_v49 = vunpack.c.h.bf16 %v6000_v30 }
 0x5a7   : > { %v2821_v11 = vpack.c.bf16 %v2819_v47, %v2819_v47  ;;  %v4252_v44 = vpack.c.bf16 %v2819_v47, %v2818_v26 }
 0x5a9   : > { %4253 = vst [vmem:[%s2823_s10] sm:$0xff] %v4252_v44   ;;  %v2841_v35 = vunpack.c.l.b16 %v2821_v11 }
 0x5ab   : > { %v2842_v33 = vpack.c.b16 %v2841_v35, %v2840_v31 }
 0x5ad   : > { %2852 = vmatmul.bf16.vlgmr.msra.gmra.mxu0 %v2842_v33  ;;  %2866 = vmatmul.bf16.vlgmr.msra.gmra.mxu1 %v2842_v33 }
 0x5ae   : > { %2880 = vmatmul.bf16.vlgmr.msra.gmra.mxu2 %v2842_v33  ;;  %2894 = vmatmul.bf16.vlgmr.msra.gmra.mxu3 %v2842_v33 }
 0x62a   : > { %v2853_v2 = vpop.f32.mrf.mxu0  ;;  %v2867_v9 = vpop.f32.mrf.mxu1 }
 0x62b   : > { %v2908_v16 = vadd.f32 %v2900_v60, %v2853_v2  ;;  %v2909_v17 = vadd.f32 %v2901_v63, %v2867_v9 }
 0x62d   : > { %v4069_v25 = vmul.f32 -1.442695, %v2908_v16  ;;  %v4070_v39 = vmul.f32 -1.442695, %v2909_v17 }
 0x62f   : > { %4524 = vpow2.f32 %v4069_v25 }
 0x630   : > { %4526 = vpow2.f32 %v4070_v39 }
 0x631   : > { %v2881_v24 = vpop.f32.mrf.mxu2  ;;  %v2895_v53 = vpop.f32.mrf.mxu3 }
 0x632   : > { %v2910_v51 = vadd.f32 %v2902_v5, %v2881_v24  ;;  %v2855_v10 = vpop.f32.mrf.mxu0  ;;  %v2869_v21 = vpop.f32.mrf.mxu1  ;;  %v2911_v48 = vadd.f32 %v2903_v29, %v2895_v53 }
 0x633   : > { %v2912_v28 = vadd.f32 %v2904_v34, %v2855_v10  ;;  %v2913_v38 = vadd.f32 %v2905_v37, %v2869_v21 }
 0x634   : > { %v4071_v32 = vmul.f32 -1.442695, %v2910_v51 }
 0x635   : > { %v4525_v8 = vpop.eup %4524  ;;  %v4072_v15 = vmul.f32 -1.442695, %v2912_v28  ;;  %v4073_v1 = vmul.f32 -1.442695, %v2913_v38 }
 0x636   : > { %v4527_v40 = vpop.eup %4526  ;;  %v2934_v58 = vadd.f32 1.0, %v4525_v8  ;;  %4528 = vpow2.f32 %v4071_v32 }
 0x637   : > { %v2935_v23 = vadd.f32 1.0, %v4527_v40  ;;  %4530 = vpow2.f32 %v4072_v15 }
 0x638   : > { %4532 = vrcp.f32 %v2934_v58  ;;  %v2949_v7 = vand.u32 2147483647, %v2934_v58  ;;  %v2951_v61 = vand.u32 2147483648, %v2934_v58  ;;  %vm2945_vm3 = vweird.f32 %v2934_v58 }
 0x639   : > { %4534 = vrcp.f32 %v2935_v23  ;;  %v2883_v6 = vpop.f32.mrf.mxu2  ;;  %v2966_v52 = vand.u32 2147483648, %v2935_v23  ;;  %v2964_v26 = vand.u32 2147483647, %v2935_v23  ;;  %vm2960_vm2 = vweird.f32 %v2935_v23  ;;  %v2897_v44 = vpop.f32.mrf.mxu3 }
 0x63a   : > { %4536 = vpow2.f32 %v4073_v1  ;;  %v2914_v14 = vadd.f32 %v2906_v36, %v2883_v6  ;;  %vm2950_vm5 = vcmp.eq.f32.partialorder %v2949_v7, 8.507059e+37  ;;  %v2952_v33 = vor.u32 1.1754944e-38, %v2951_v61 }
 0x63b   : > { %v2967_v35 = vor.u32 1.1754944e-38, %v2966_v52  ;;  %vm2965_vm7 = vcmp.eq.f32.partialorder %v2964_v26, 8.507059e+37  ;;  %v2915_v25 = vadd.f32 %v2907_v49, %v2897_v44 }
 0x63c   : > { %v4529_v62 = vpop.eup %4528  ;;  %v4074_v27 = vmul.f32 -1.442695, %v2914_v14 }
 0x63d   : > { %v4531_v42 = vpop.eup %4530  ;;  %v6003_v45 = vadd.f32 1.0, %v4529_v62 }
 0x63e   : > { %v4533_v54 = vpop.eup %4532  ;;  %v6005_v46 = vadd.f32 1.0, %v4531_v42  ;;  %4538 = vpow2.f32 %v4074_v27 }
 0x63f   : > { %v4535_v3 = vpop.eup %4534  ;;  %v2941_v57 = vmul.f32 %v4533_v54, %v2934_v58  ;;  %4540 = vrcp.f32 %v6003_v45  ;;  %vm2946_vm0 = vweird.f32 %v4533_v54 }
 0x640   : > { %v4537_v22 = vpop.eup %4536  ;;  %v2956_v12 = vmul.f32 %v4535_v3, %v2935_v23  ;;  %4542 = vtanh.f32 %v2911_v48  ;;  %vm2961_vm1 = vweird.f32 %v4535_v3  ;;  %vm2947_vm4 = vmor %vm2945_vm3, %vm2946_vm0  ;;  %v2996_v21 = vand.u32 2147483648, %v6005_v46 }
 0x641   : > { %v2942_v19 = vsub.f32 1.0, %v2941_v57  ;;  %4544 = vrcp.f32 %v6005_v46  ;;  %v6009_v13 = vadd.f32 1.0, %v4537_v22  ;;  %vm2962_vm6 = vmor %vm2960_vm2, %vm2961_vm1  ;;  %v2994_v32 = vand.u32 2147483647, %v6005_v46 }
 0x642   : > { %v2957_v18 = vsub.f32 1.0, %v2956_v12  ;;  %vm2990_vm10 = vweird.f32 %v6005_v46  ;;  %v2997_v23 = vor.u32 1.1754944e-38, %v2996_v21  ;;  %vm2975_vm1 = vweird.f32 %v6003_v45 }
 0x643   : > { %v2943_v0 = vmul.f32 %v4533_v54, %v2942_v19  ;;  %4546 = vrcp.f32 %v6009_v13  ;;  %v3011_v38 = vand.u32 2147483648, %v6009_v13  ;;  %v3009_v8 = vand.u32 2147483647, %v6009_v13 }
 0x644   : > { %v4539_v59 = vpop.eup %4538  ;;  %v2958_v56 = vmul.f32 %v4535_v3, %v2957_v18  ;;  %vm3005_vm11 = vweird.f32 %v6009_v13  ;;  %vm2995_vm15 = vcmp.eq.f32.partialorder %v2994_v32, 8.507059e+37  ;;  %v2979_v57 = vand.u32 2147483647, %v6003_v45 }
 0x645   : > { %v6013_v47 = vpop.eup %4540  ;;  %v2944_v4 = vadd.f32 %v4533_v54, %v2943_v0  ;;  %v6015_v11 = vadd.f32 1.0, %v4539_v59  ;;  %v3012_v53 = vor.u32 1.1754944e-38, %v3011_v38  ;;  %vm3010_vm0 = vcmp.eq.f32.partialorder %v3009_v8, 8.507059e+37  ;;  %v3059_v8 = vld [vmem:[%s3055_s13 + $0x18] sm:$0xff] }
 0x646   : > { %v4543_v31 = vpop.eup %4542  ;;  %v2959_v41 = vadd.f32 %v4535_v3, %v2958_v56  ;;  %v2971_v63 = vmul.f32 %v6013_v47, %v6003_v45  ;;  %vm2976_vm13 = vweird.f32 %v6013_v47 }
 0x647   : > { %v4545_v60 = vpop.eup %4544  ;;  %v2948_v2 = vsel %vm2947_vm4, %v4533_v54, %v2944_v4  ;;  %4548 = vrcp.f32 %v6015_v11  ;;  %vm2977_vm2 = vmor %vm2975_vm1, %vm2976_vm13  ;;  %v3026_v52 = vand.u32 2147483648, %v6015_v11  ;;  %vm2980_vm4 = vcmp.eq.f32.partialorder %v2979_v57, 8.507059e+37 }
 0x648   : > { %v2953_v9 = vsel %vm2950_vm5, %v2952_v33, %v2948_v2  ;;  %v2963_v16 = vsel %vm2962_vm6, %v4535_v3, %v2959_v41  ;;  %v2986_v17 = vmul.f32 %v4545_v60, %v6005_v46  ;;  %v2972_v37 = vsub.f32 1.0, %v2971_v63 }
 0x649   : > { %v4547_v39 = vpop.eup %4546  ;;  %v2968_v50 = vsel %vm2965_vm7, %v2967_v35, %v2963_v16  ;;  %v3034_v5 = vmul.f32 %v4543_v31, %v2953_v9  ;;  %4550 = vtanh.f32 %v2915_v25  ;;  %vm2991_vm8 = vweird.f32 %v4545_v60  ;;  %v3056_v35 = vld [vmem:[%s3055_s13] sm:$0xff]  ;;  %v3057_v25 = vld [vmem:[%s3055_s13 + $0x8] sm:$0xff] }
 0x64a   : > { %v3032_v55 = vmul.f32 %v2968_v50, %v5969_v43  ;;  %v2987_v24 = vsub.f32 1.0, %v2986_v17  ;;  %v3001_v34 = vmul.f32 %v4547_v39, %v6009_v13  ;;  %vm3006_vm9 = vweird.f32 %v4547_v39  ;;  %vm2992_vm12 = vmor %vm2990_vm10, %vm2991_vm8 }
 0x64b   : > { %v2973_v40 = vmul.f32 %v6013_v47, %v2972_v37  ;;  %vm3007_vm14 = vmor %vm3005_vm11, %vm3006_vm9  ;;  %v2981_v46 = vand.u32 2147483648, %v6003_v45  ;;  %vm3020_vm5 = vweird.f32 %v6015_v11  ;;  %v3027_v0 = vor.u32 1.1754944e-38, %v3026_v52 }
 0x64c   : > { %v3002_v51 = vsub.f32 1.0, %v3001_v34  ;;  %v2988_v10 = vmul.f32 %v4545_v60, %v2987_v24  ;;  %v6029_v15 = vadd.f32 %v3034_v5, %v3032_v55  ;;  %v3122_v33 = vunpack.c.l.bf16 %v3056_v35 }
 0x64d   : > { %v4549_v28 = vpop.eup %4548  ;;  %v2974_v48 = vadd.f32 %v6013_v47, %v2973_v40  ;;  %v2982_v18 = vor.u32 1.1754944e-38, %v2981_v46  ;;  %v3123_v41 = vunpack.c.h.bf16 %v3056_v35  ;;  %v3124_v50 = vunpack.c.l.bf16 %v3057_v25 }
 0x64e   : > { %v3003_v43 = vmul.f32 %v4547_v39, %v3002_v51  ;;  %v3016_v30 = vmul.f32 %v4549_v28, %v6015_v11  ;;  %v2989_v58 = vadd.f32 %v4545_v60, %v2988_v10  ;;  %4552 = vtanh.f32 %v6029_v15 }
 0x64f   : > { %v4551_v29 = vpop.eup %4550  ;;  %v2978_v12 = vsel %vm2977_vm2, %v6013_v47, %v2974_v48  ;;  %vm3021_vm3 = vweird.f32 %v4549_v28  ;;  %v3125_v57 = vunpack.c.h.bf16 %v3057_v25 }
 0x650   : > { %v3017_v1 = vsub.f32 1.0, %v3016_v30  ;;  %v3004_v36 = vadd.f32 %v4547_v39, %v3003_v43  ;;  %v2993_v6 = vsel %vm2992_vm12, %v4545_v60, %v2989_v58  ;;  %vm3022_vm6 = vmor %vm3020_vm5, %vm3021_vm3  ;;  %v2983_v45 = vsel %vm2980_vm4, %v2982_v18, %v2978_v12 }
 0x651   : > { %v2998_v14 = vsel %vm2995_vm15, %v2997_v23, %v2993_v6 }
 0x652   : > { %v3008_v62 = vsel %vm3007_vm14, %v4547_v39, %v3004_v36  ;;  %v3018_v27 = vmul.f32 %v4549_v28, %v3017_v1  ;;  %v3035_v54 = vmul.f32 %v4551_v29, %v2998_v14  ;;  %v3058_v39 = vld [vmem:[%s3055_s13 + $0x10] sm:$0xff]  ;;  %v3128_v1 = vunpack.c.l.bf16 %v3059_v8 }
 0x653   : > { %v3013_v42 = vsel %vm3010_vm0, %v3012_v53, %v3008_v62  ;;  %v3126_v5 = vunpack.c.l.bf16 %v3058_v39  ;;  %v3127_v24 = vunpack.c.h.bf16 %v3058_v39 }
 0x654   : > { %v3033_v3 = vmul.f32 %v3013_v42, %v5984_v20  ;;  %v3019_v19 = vadd.f32 %v4549_v28, %v3018_v27  ;;  %v4553_v13 = vpop.eup %4552  ;;  %v3024_v20 = vand.u32 2147483647, %v6015_v11 }
 0x655   : > { %v3040_v61 = vmul.f32 %v4553_v13, %v2983_v45 }
 0x656   : > { %v6044_v22 = vadd.f32 %v3035_v54, %v3033_v3  ;;  %v3023_v7 = vsel %vm3022_vm6, %v4549_v28, %v3019_v19  ;;  %vm3025_vm7 = vcmp.eq.f32.partialorder %v3024_v20, 8.507059e+37  ;;  %v3129_v20 = vunpack.c.h.bf16 %v3059_v8 }
 0x657   : > { %v3028_v59 = vsel %vm3025_vm7, %v3027_v0, %v3023_v7  ;;  %v3042_v49 = vpack.c.bf16 %v3040_v61, %v3040_v61 }
 0x658   : > { %4554 = vtanh.f32 %v6044_v22 }
 0x659   : > { %v3062_v44 = vunpack.c.l.b16 %v3042_v49 }
 0x65e   : > { %v4555_v26 = vpop.eup %4554 }
 0x65f   : > { %v3041_v56 = vmul.f32 %v4555_v26, %v3028_v59 }
 0x661   : > { %v3043_v47 = vpack.c.bf16 %v3041_v56, %v3041_v56  ;;  %v4257_v4 = vpack.c.bf16 %v3041_v56, %v3040_v61 }
 0x663   : > { %4258 = vst [vmem:[%s3045_s30] sm:$0xff] %v4257_v4   ;;  %v3063_v31 = vunpack.c.l.b16 %v3043_v47 }
 0x665   : > { %v3064_v11 = vpack.c.b16 %v3063_v31, %v3062_v44 }
 0x667   : > { %3074 = vmatmul.bf16.vlgmr.msrb.gmra.mxu0 %v3064_v11  ;;  %3088 = vmatmul.bf16.vlgmr.msrb.gmra.mxu1 %v3064_v11 }
 0x668   : > { %3102 = vmatmul.bf16.vlgmr.msrb.gmra.mxu2 %v3064_v11  ;;  %3116 = vmatmul.bf16.vlgmr.msrb.gmra.mxu3 %v3064_v11 }
 0x6e4   : > { %v3075_v60 = vpop.f32.mrf.mxu0  ;;  %v3089_v63 = vpop.f32.mrf.mxu1 }
 0x6e5   : > { %v3130_v2 = vadd.f32 %v3122_v33, %v3075_v60  ;;  %v3131_v9 = vadd.f32 %v3123_v41, %v3089_v63 }
 0x6e7   : > { %v4079_v16 = vmul.f32 -1.442695, %v3130_v2  ;;  %v4080_v17 = vmul.f32 -1.442695, %v3131_v9 }
 0x6e9   : > { %4556 = vpow2.f32 %v4079_v16 }
 0x6ea   : > { %4558 = vpow2.f32 %v4080_v17 }
 0x6eb   : > { %v3103_v55 = vpop.f32.mrf.mxu2  ;;  %v3117_v36 = vpop.f32.mrf.mxu3 }
 0x6ec   : > { %v3132_v34 = vadd.f32 %v3124_v50, %v3103_v55  ;;  %v3077_v37 = vpop.f32.mrf.mxu0  ;;  %v3091_v51 = vpop.f32.mrf.mxu1  ;;  %v3133_v18 = vadd.f32 %v3125_v57, %v3117_v36 }
 0x6ed   : > { %v3134_v10 = vadd.f32 %v3126_v5, %v3077_v37  ;;  %v3135_v21 = vadd.f32 %v3127_v24, %v3091_v51 }
 0x6ee   : > { %v4081_v28 = vmul.f32 -1.442695, %v3132_v34 }
 0x6ef   : > { %v4557_v38 = vpop.eup %4556  ;;  %v4082_v32 = vmul.f32 -1.442695, %v3134_v10  ;;  %v4083_v40 = vmul.f32 -1.442695, %v3135_v21 }
 0x6f0   : > { %v4559_v43 = vpop.eup %4558  ;;  %v3156_v30 = vadd.f32 1.0, %v4557_v38  ;;  %4560 = vpow2.f32 %v4081_v28 }
 0x6f1   : > { %v3157_v58 = vadd.f32 1.0, %v4559_v43  ;;  %4562 = vpow2.f32 %v4082_v32 }
 0x6f2   : > { %4564 = vrcp.f32 %v3156_v30  ;;  %vm3167_vm10 = vweird.f32 %v3156_v30  ;;  %v3173_v61 = vand.u32 2147483648, %v3156_v30  ;;  %v3171_v56 = vand.u32 2147483647, %v3156_v30 }
 0x6f3   : > { %4566 = vrcp.f32 %v3157_v58  ;;  %v3105_v23 = vpop.f32.mrf.mxu2  ;;  %v3119_v0 = vpop.f32.mrf.mxu3  ;;  %v3188_v26 = vand.u32 2147483648, %v3157_v58  ;;  %vm3182_vm11 = vweird.f32 %v3157_v58  ;;  %v3186_v44 = vand.u32 2147483647, %v3157_v58 }
 0x6f4   : > { %4568 = vpow2.f32 %v4083_v40  ;;  %v3136_v53 = vadd.f32 %v3128_v1, %v3105_v23  ;;  %v3137_v33 = vadd.f32 %v3129_v20, %v3119_v0  ;;  %v3174_v60 = vor.u32 1.1754944e-38, %v3173_v61 }
 0x6f5   : > { %v3189_v16 = vor.u32 1.1754944e-38, %v3188_v26  ;;  %vm3172_vm14 = vcmp.eq.f32.partialorder %v3171_v56, 8.507059e+37  ;;  %vm3187_vm15 = vcmp.eq.f32.partialorder %v3186_v44, 8.507059e+37 }
 0x6f6   : > { %v4561_v6 = vpop.eup %4560  ;;  %v4084_v29 = vmul.f32 -1.442695, %v3136_v53 }
 0x6f7   : > { %v4563_v14 = vpop.eup %4562  ;;  %v6060_v48 = vadd.f32 1.0, %v4561_v6 }
 0x6f8   : > { %v4565_v62 = vpop.eup %4564  ;;  %v6062_v27 = vadd.f32 1.0, %v4563_v14  ;;  %4570 = vpow2.f32 %v4084_v29 }
 0x6f9   : > { %v4567_v42 = vpop.eup %4566  ;;  %v3163_v54 = vmul.f32 %v4565_v62, %v3156_v30  ;;  %vm3168_vm8 = vweird.f32 %v4565_v62 }
 0x6fa   : > { %v4569_v46 = vpop.eup %4568  ;;  %v3178_v3 = vmul.f32 %v4567_v42, %v3157_v58  ;;  %4572 = vrcp.f32 %v6062_v27  ;;  %vm3183_vm9 = vweird.f32 %v4567_v42  ;;  %vm6071_vm12 = vmor %vm3167_vm10, %vm3168_vm8  ;;  %v3216_v37 = vand.u32 2147483647, %v6062_v27 }
 0x6fb   : > { %v3164_v12 = vsub.f32 1.0, %v3163_v54  ;;  %v6065_v19 = vadd.f32 1.0, %v4569_v46  ;;  %4574 = vrcp.f32 %v6060_v48  ;;  %vm6075_vm13 = vmor %vm3182_vm11, %vm3183_vm9  ;;  %v3218_v51 = vand.u32 2147483648, %v6062_v27 }
 0x6fc   : > { %v3179_v13 = vsub.f32 1.0, %v3178_v3  ;;  %vm3212_vm2 = vweird.f32 %v6062_v27  ;;  %vm3217_vm6 = vcmp.eq.f32.partialorder %v3216_v37, 8.507059e+37  ;;  %vm3197_vm10 = vweird.f32 %v6060_v48 }
 0x6fd   : > { %v3165_v52 = vmul.f32 %v4565_v62, %v3164_v12  ;;  %4576 = vrcp.f32 %v6065_v19  ;;  %v3233_v28 = vand.u32 2147483648, %v6065_v19  ;;  %v3231_v38 = vand.u32 2147483647, %v6065_v19 }
 0x6fe   : > { %v4571_v45 = vpop.eup %4570  ;;  %v3180_v7 = vmul.f32 %v4567_v42, %v3179_v13  ;;  %4578 = vtanh.f32 %v3133_v18  ;;  %vm3227_vm3 = vweird.f32 %v6065_v19  ;;  %v3219_v1 = vor.u32 1.1754944e-38, %v3218_v51 }
 0x6ff   : > { %v3166_v59 = vadd.f32 %v4565_v62, %v3165_v52  ;;  %v6069_v49 = vadd.f32 1.0, %v4571_v45  ;;  %v3234_v53 = vor.u32 1.1754944e-38, %v3233_v28  ;;  %vm3232_vm7 = vcmp.eq.f32.partialorder %v3231_v38, 8.507059e+37 }
 0x700   : > { %v3181_v4 = vadd.f32 %v4567_v42, %v3180_v7  ;;  %v4573_v31 = vpop.eup %4572  ;;  %v3201_v18 = vand.u32 2147483647, %v6060_v48 }
 0x701   : > { %v3170_v35 = vsel %vm6071_vm12, %v4565_v62, %v3166_v59  ;;  %4580 = vrcp.f32 %v6069_v49  ;;  %v6082_v41 = vpop.eup %4574  ;;  %v3208_v2 = vmul.f32 %v4573_v31, %v6062_v27  ;;  %vm3213_vm0 = vweird.f32 %v4573_v31 }
 0x702   : > { %v3185_v63 = vsel %vm6075_vm13, %v4567_v42, %v3181_v4  ;;  %v3175_v17 = vsel %vm3172_vm14, %v3174_v60, %v3170_v35  ;;  %v3193_v50 = vmul.f32 %v6082_v41, %v6060_v48  ;;  %4582 = vtanh.f32 %v3137_v33  ;;  %vm3214_vm4 = vmor %vm3212_vm2, %vm3213_vm0 }
 0x703   : > { %v4577_v9 = vpop.eup %4576  ;;  %v3209_v25 = vsub.f32 1.0, %v3208_v2  ;;  %v3190_v55 = vsel %vm3187_vm15, %v3189_v16, %v3185_v63  ;;  %vm3198_vm8 = vweird.f32 %v6082_v41  ;;  %v3248_v13 = vand.u32 2147483648, %v6069_v49 }
 0x704   : > { %v3223_v39 = vmul.f32 %v4577_v9, %v6065_v19  ;;  %v4579_v5 = vpop.eup %4578  ;;  %v3254_v32 = vmul.f32 %v3190_v55, %v6029_v15  ;;  %vm3228_vm1 = vweird.f32 %v4577_v9  ;;  %v3194_v30 = vsub.f32 1.0, %v3193_v50  ;;  %vm3199_vm11 = vmor %vm3197_vm10, %vm3198_vm8 }
 0x705   : > { %v3210_v34 = vmul.f32 %v4573_v31, %v3209_v25  ;;  %v3256_v21 = vmul.f32 %v4579_v5, %v3175_v17  ;;  %vm3229_vm5 = vmor %vm3227_vm3, %vm3228_vm1  ;;  %v3203_v19 = vand.u32 2147483648, %v6060_v48  ;;  %vm3242_vm12 = vweird.f32 %v6069_v49 }
 0x706   : > { %v3224_v24 = vsub.f32 1.0, %v3223_v39  ;;  %v3195_v62 = vmul.f32 %v6082_v41, %v3194_v30  ;;  %v3249_v61 = vor.u32 1.1754944e-38, %v3248_v13  ;;  %vm3202_vm14 = vcmp.eq.f32.partialorder %v3201_v18, 8.507059e+37 }
 0x707   : > { %v4581_v10 = vpop.eup %4580  ;;  %v3211_v40 = vadd.f32 %v4573_v31, %v3210_v34  ;;  %v3258_v15 = vadd.f32 %v3256_v21, %v3254_v32  ;;  %v3204_v7 = vor.u32 1.1754944e-38, %v3203_v19 }
 0x708   : > { %v3225_v8 = vmul.f32 %v4577_v9, %v3224_v24  ;;  %v3238_v43 = vmul.f32 %v4581_v10, %v6069_v49  ;;  %v4583_v36 = vpop.eup %4582  ;;  %v3196_v57 = vadd.f32 %v6082_v41, %v3195_v62  ;;  %vm3243_vm9 = vweird.f32 %v4581_v10 }
 0x709   : > { %v3215_v6 = vsel %vm3214_vm4, %v4573_v31, %v3211_v40  ;;  %4584 = vtanh.f32 %v3258_v15  ;;  %vm3244_vm13 = vmor %vm3242_vm12, %vm3243_vm9 }
 0x70a   : > { %v3239_v58 = vsub.f32 1.0, %v3238_v43  ;;  %v3226_v23 = vadd.f32 %v4577_v9, %v3225_v8  ;;  %v3220_v29 = vsel %vm3217_vm6, %v3219_v1, %v3215_v6  ;;  %v3200_v52 = vsel %vm3199_vm11, %v6082_v41, %v3196_v57 }
 0x70b   : > { %v3257_v27 = vmul.f32 %v4583_v36, %v3220_v29  ;;  %v3205_v26 = vsel %vm3202_vm14, %v3204_v7, %v3200_v52 }
 0x70c   : > { %v3230_v14 = vsel %vm3229_vm5, %v4577_v9, %v3226_v23  ;;  %v3240_v42 = vmul.f32 %v4581_v10, %v3239_v58 }
 0x70d   : > { %v3235_v54 = vsel %vm3232_vm7, %v3234_v53, %v3230_v14 }
 0x70e   : > { %v3255_v46 = vmul.f32 %v3235_v54, %v6044_v22  ;;  %v3241_v12 = vadd.f32 %v4581_v10, %v3240_v42  ;;  %v3246_v22 = vand.u32 2147483647, %v6069_v49 }
 0x70f   : > { %v4585_v45 = vpop.eup %4584 }
 0x710   : > { %v3259_v3 = vadd.f32 %v3257_v27, %v3255_v46  ;;  %v3245_v20 = vsel %vm3244_vm13, %v4581_v10, %v3241_v12  ;;  %vm3247_vm15 = vcmp.eq.f32.partialorder %v3246_v22, 8.507059e+37  ;;  %v3262_v48 = vmul.f32 %v4585_v45, %v3205_v26 }
 0x711   : > { %v3250_v59 = vsel %vm3247_vm15, %v3249_v61, %v3245_v20 }
 0x712   : > { %4586 = vtanh.f32 %v3259_v3 }
 0x718   : > { %v4587_v0 = vpop.eup %4586 }
 0x719   : > { %v3263_v56 = vmul.f32 %v4587_v0, %v3250_v59  ;;  %3280 = sbr.rel (!%p4782_p9) target bundleno = 1845 (0x735), region = 52 }
 0x71b   : > { %v4262_v47 = vpack.c.bf16 %v3263_v56, %v3262_v48 }
 0x71d   : > { %4263 = vst [vmem:[%s3267_s8] sm:$0xff] %v4262_v47  }
 0x724   : > { %v3306_v49 = vld [vmem:[%s5531_s11] sm:$0xf]  ;;  %v3308_v4 = vld [vmem:[%s5531_s11 + $0x4] sm:$0xf]  ;;  %v3310_v44 = vld [vmem:[%s5531_s11 + $0x8] sm:$0xf] }
 0x725   : > { %3307 = vst [vmem:[%s3289_s12] sm:$0xf] %v3306_v49  ;;  %v3312_v31 = vld [vmem:[%s5531_s11 + $0xc] sm:$0xf]  ;;  %v3314_v11 = vld [vmem:[%s5531_s11 + $0x10] sm:$0xf] }
 0x726   : > { %3309 = vst [vmem:[%s3289_s12 + $0x8] sm:$0xf] %v3308_v4  ;;  %v3316_v35 = vld [vmem:[%s5531_s11 + $0x14] sm:$0xf]  ;;  %v3318_v33 = vld [vmem:[%s5531_s11 + $0x18] sm:$0xf] }
 0x727   : > { %3311 = vst [vmem:[%s3289_s12 + $0x10] sm:$0xf] %v3310_v44  ;;  %v3320_v41 = vld [vmem:[%s5531_s11 + $0x1c] sm:$0xf]  ;;  %v3322_v60 = vld [vmem:[%s5531_s11 + $0x20] sm:$0xf] }
 0x728   : > { %3313 = vst [vmem:[%s3289_s12 + $0x18] sm:$0xf] %v3312_v31  ;;  %v3324_v63 = vld [vmem:[%s5531_s11 + $0x24] sm:$0xf]  ;;  %v3326_v2 = vld [vmem:[%s5531_s11 + $0x28] sm:$0xf] }
 0x729   : > { %3315 = vst [vmem:[%s3289_s12 + $0x20] sm:$0xf] %v3314_v11  ;;  %v3328_v9 = vld [vmem:[%s5531_s11 + $0x2c] sm:$0xf]  ;;  %v3330_v16 = vld [vmem:[%s5531_s11 + $0x30] sm:$0xf] }
 0x72a   : > { %3317 = vst [vmem:[%s3289_s12 + $0x28] sm:$0xf] %v3316_v35  ;;  %v3332_v17 = vld [vmem:[%s5531_s11 + $0x34] sm:$0xf]  ;;  %v3334_v25 = vld [vmem:[%s5531_s11 + $0x38] sm:$0xf] }
 0x72b   : > { %3319 = vst [vmem:[%s3289_s12 + $0x30] sm:$0xf] %v3318_v33  ;;  %v3336_v39 = vld [vmem:[%s5531_s11 + $0x3c] sm:$0xf] }
 0x72c   : > { %3321 = vst [vmem:[%s3289_s12 + $0x38] sm:$0xf] %v3320_v41 }
 0x72d   : > { %3323 = vst [vmem:[%s3289_s12 + $0x40] sm:$0xf] %v3322_v60 }
 0x72e   : > { %3325 = vst [vmem:[%s3289_s12 + $0x48] sm:$0xf] %v3324_v63 }
 0x72f   : > { %3327 = vst [vmem:[%s3289_s12 + $0x50] sm:$0xf] %v3326_v2 }
 0x730   : > { %3329 = vst [vmem:[%s3289_s12 + $0x58] sm:$0xf] %v3328_v9 }
 0x731   : > { %3331 = vst [vmem:[%s3289_s12 + $0x60] sm:$0xf] %v3330_v16 }
 0x732   : > { %3333 = vst [vmem:[%s3289_s12 + $0x68] sm:$0xf] %v3332_v17 }
 0x733   : > { %3335 = vst [vmem:[%s3289_s12 + $0x70] sm:$0xf] %v3334_v25 }
 0x734   : > { %3337 = vst [vmem:[%s3289_s12 + $0x78] sm:$0xf] %v3336_v39 }
 0x735 PF: > { %s20_s20 = sadd.s32 1, %s4702_s20   ;;  %s6185_s15 = smov %s4686_s16 }
 0x736   : > { %p17_p2 = scmp.ge.s32.totalorder %s20_s20, 4   ;;  %s6186_s16 = smov %s4690_s17 }
 0x737   : > { %s6187_s17 = smov %s4780_s27  ;;  %s6188_s18 = smov %s4698_s19 }
 0x738   : > { %s6189_s19 = smov %s6191_s22  ;;  %19 = sbr.rel (!%p17_p2) target bundleno = 6 (0x6), region = 156 }
 0x73d   :  { %3403 = vsyncpa [#allocation6], 1 }
 0x73e   :  { %3405 = vsyncpa [#allocation6 + $0x1], 1 }
 0x73f   :  { %3406 = vsyncpa [#allocation8], 1 }
 0x740   :  { %3408 = vsyncpa [#allocation8 + $0x1], 1 }

</bundles_post_ra>
